<compile_context>
chip_gen: v7x
topology: tpu7x:2x2x1
jax: 0.10.0
libtpu: 0.0.40
codegen_flags: <defaults>
</compile_context>

<pallas_src>
import functools

import jax
import jax.numpy as jnp
from jax import lax
from jax.experimental import pallas as pl
from jax.experimental.pallas import tpu as pltpu

_MXU_DTYPE = jnp.float32  # switch to jnp.bfloat16 on v6e/v7x for large shapes


def _round_up(x, m):
    return ((x + m - 1) // m) * m


def _sigmoid(x):
    # 1/(1+exp(-x)) == 0.5*tanh(0.5*x)+0.5 : one EUP op instead of exp + divide.
    return 0.5 * jnp.tanh(0.5 * x) + 0.5


# ---------------------------------------------------------------------------
# In-kernel helpers (shared by the uni- and bi-directional chunk kernels)
# ---------------------------------------------------------------------------
def _proj_chunk(x_ref, wih_t_ref, bias_ref, gx_scr, Tc, H):
    """gates_x for a whole time chunk: (Tc*B, In) @ (In, 4H) + bias -> VMEM scratch."""
    _, B, In = x_ref.shape
    x2 = x_ref[...].reshape(Tc * B, In)           # B padded to 8 -> layout-trivial
    gx = jnp.dot(x2.astype(_MXU_DTYPE), wih_t_ref[...].astype(_MXU_DTYPE),
                 preferred_element_type=jnp.float32) + bias_ref[...]
    gx_scr[...] = gx.reshape(Tc, B, 4 * H)


def _lstm_step(j, t, gx_scr, whh_t_ref, lens, h_scr, c_scr, out_ref, H):
    """One masked LSTM cell update at chunk-local step j / global time t."""
    gates = gx_scr[j] + jnp.dot(h_scr[...].astype(_MXU_DTYPE),
                                whh_t_ref[...].astype(_MXU_DTYPE),
                                preferred_element_type=jnp.float32)      # (B, 4H)
    i_g = _sigmoid(gates[:, 0 * H:1 * H])
    f_g = _sigmoid(gates[:, 1 * H:2 * H])
    g_g = jnp.tanh(gates[:, 2 * H:3 * H])
    o_g = _sigmoid(gates[:, 3 * H:4 * H])
    c_new = f_g * c_scr[...] + i_g * g_g
    h_new = o_g * jnp.tanh(c_new)
    valid = lens > t                              # (B,1) bool, broadcasts over H
    c_scr[...] = jnp.where(valid, c_new, c_scr[...])
    h_scr[...] = jnp.where(valid, h_new, h_scr[...])
    out_ref[j] = jnp.where(valid, h_new, 0.0)


# ---------------------------------------------------------------------------
# Fused bidirectional, time-chunked LSTM kernel (one layer)
# ---------------------------------------------------------------------------
def _bidir_chunk_kernel(Tc, H, Nc,
                        lens_ref, xf_ref, xb_ref,
                        wih_f_ref, wih_b_ref, whh_f_ref, whh_b_ref,
                        bias_f_ref, bias_b_ref,
                        of_ref, ob_ref,
                        h_f, c_f, h_b, c_b, gx_f, gx_b):
    ci = pl.program_id(0)

    @pl.when(ci == 0)
    def _():
        for r in (h_f, c_f, h_b, c_b):
            r[...] = jnp.zeros_like(r)

    # Chunk input projections on the MXU — gates_x stays in VMEM, never in HBM.
    _proj_chunk(xf_ref, wih_f_ref, bias_f_ref, gx_f, Tc, H)
    _proj_chunk(xb_ref, wih_b_ref, bias_b_ref, gx_b, Tc, H)

    lens = lens_ref[...]
    t0_f = ci * Tc                  # first global time of the forward chunk
    t0_b = (Nc - 1 - ci) * Tc       # first global time of the backward chunk

    def body(j, carry):
        # Forward direction walks its chunk front-to-back ...
        _lstm_step(j, t0_f + j, gx_f, whh_f_ref, lens, h_f, c_f, of_ref, H)
        # ... backward direction walks its (time-reversed) chunk back-to-front.
        jj = Tc - 1 - j
        _lstm_step(jj, t0_b + jj, gx_b, whh_b_ref, lens, h_b, c_b, ob_ref, H)
        return carry

    lax.fori_loop(0, Tc, body, 0, unroll=True)


def _unidir_chunk_kernel(Tc, H,
                         lens_ref, x_ref, wih_ref, whh_ref, bias_ref,
                         o_ref, h_s, c_s, gx_s):
    ci = pl.program_id(0)

    @pl.when(ci == 0)
    def _():
        h_s[...] = jnp.zeros_like(h_s)
        c_s[...] = jnp.zeros_like(c_s)

    _proj_chunk(x_ref, wih_ref, bias_ref, gx_s, Tc, H)
    lens = lens_ref[...]
    t0 = ci * Tc

    def body(j, carry):
        _lstm_step(j, t0 + j, gx_s, whh_ref, lens, h_s, c_s, o_ref, H)
        return carry

    lax.fori_loop(0, Tc, body, 0, unroll=True)


# ---------------------------------------------------------------------------
# Per-layer wrappers
# ---------------------------------------------------------------------------
def _bidir_layer(x, lens2, dir_params, H, Tc):
    """x: (Tp, Bp, In) f32; returns (out_fwd, out_bwd), each (Tp, Bp, H) f32."""
    Tp, Bp, In = x.shape
    Nc = Tp // Tc
    g4 = 4 * H
    w_ih_f, w_hh_f, b_ih_f, b_hh_f = dir_params[0]
    w_ih_b, w_hh_b, b_ih_b, b_hh_b = dir_params[1]

    kernel = functools.partial(_bidir_chunk_kernel, Tc, H, Nc)
    return pl.pallas_call(
        kernel,
        out_shape=(jax.ShapeDtypeStruct((Tp, Bp, H), jnp.float32),
                   jax.ShapeDtypeStruct((Tp, Bp, H), jnp.float32)),
        grid_spec=pltpu.PrefetchScalarGridSpec(
            num_scalar_prefetch=0,
            grid=(Nc,),
            in_specs=[
                pl.BlockSpec((Bp, 1), lambda c: (0, 0)),                   # lengths
                pl.BlockSpec((Tc, Bp, In), lambda c: (c, 0, 0)),           # x, fwd chunk
                pl.BlockSpec((Tc, Bp, In), lambda c: (Nc - 1 - c, 0, 0)),  # x, bwd chunk
                pl.BlockSpec((In, g4), lambda c: (0, 0)),                  # W_ih_f^T
                pl.BlockSpec((In, g4), lambda c: (0, 0)),                  # W_ih_b^T
                pl.BlockSpec((H, g4), lambda c: (0, 0)),                   # W_hh_f^T
                pl.BlockSpec((H, g4), lambda c: (0, 0)),                   # W_hh_b^T
                pl.BlockSpec((1, g4), lambda c: (0, 0)),                   # bias_f
                pl.BlockSpec((1, g4), lambda c: (0, 0)),                   # bias_b
            ],
            out_specs=[
                pl.BlockSpec((Tc, Bp, H), lambda c: (c, 0, 0)),            # fwd out
                pl.BlockSpec((Tc, Bp, H), lambda c: (Nc - 1 - c, 0, 0)),   # bwd out
            ],
            scratch_shapes=[pltpu.VMEM((Bp, H), jnp.float32)] * 4          # h_f,c_f,h_b,c_b
                          + [pltpu.VMEM((Tc, Bp, g4), jnp.float32)] * 2,   # gx_f, gx_b
        ),
        compiler_params=pltpu.CompilerParams(
            dimension_semantics=("arbitrary",)),       # serial recurrence over chunks
    )(lens2, x, x,
      jnp.transpose(w_ih_f), jnp.transpose(w_ih_b),
      jnp.transpose(w_hh_f), jnp.transpose(w_hh_b),
      (b_ih_f + b_hh_f).reshape(1, g4), (b_ih_b + b_hh_b).reshape(1, g4))


def _unidir_layer(x, lens2, dir_params, H, Tc):
    Tp, Bp, In = x.shape
    Nc = Tp // Tc
    g4 = 4 * H
    w_ih, w_hh, b_ih, b_hh = dir_params

    kernel = functools.partial(_unidir_chunk_kernel, Tc, H)
    return pl.pallas_call(
        kernel,
        out_shape=jax.ShapeDtypeStruct((Tp, Bp, H), jnp.float32),
        grid_spec=pltpu.PrefetchScalarGridSpec(
            num_scalar_prefetch=0,
            grid=(Nc,),
            in_specs=[
                pl.BlockSpec((Bp, 1), lambda c: (0, 0)),
                pl.BlockSpec((Tc, Bp, In), lambda c: (c, 0, 0)),
                pl.BlockSpec((In, g4), lambda c: (0, 0)),
                pl.BlockSpec((H, g4), lambda c: (0, 0)),
                pl.BlockSpec((1, g4), lambda c: (0, 0)),
            ],
            out_specs=pl.BlockSpec((Tc, Bp, H), lambda c: (c, 0, 0)),
            scratch_shapes=[pltpu.VMEM((Bp, H), jnp.float32)] * 2
                          + [pltpu.VMEM((Tc, Bp, g4), jnp.float32)],
        ),
        compiler_params=pltpu.CompilerParams(
            dimension_semantics=("arbitrary",)),
    )(lens2, x, jnp.transpose(w_ih), jnp.transpose(w_hh),
      (b_ih + b_hh).reshape(1, g4))


# ---------------------------------------------------------------------------
# Module forward: RNN(text, text_len)
# ---------------------------------------------------------------------------
@jax.jit
def rnn_forward(text, text_len, params):
    """text: (B, T, input_dim) f32; text_len: (B,) int;
    params[l][d] = (w_ih (4H,in), w_hh (4H,H), b_ih (4H,), b_hh (4H,))."""
    B, T, _ = text.shape
    num_layers = len(params)
    num_dir = len(params[0])
    H = params[0][0][1].shape[1]                       # w_hh: (4H, H)

    Bp = _round_up(B, 8)                               # f32 sublane count
    Tc = min(16, T)                                    # time steps per grid chunk
    Tp = _round_up(T, Tc)

    x = jnp.transpose(text.astype(jnp.float32), (1, 0, 2))   # time-major (T, B, In)
    x = jnp.pad(x, ((0, Tp - T), (0, Bp - B), (0, 0)))
    lens2 = jnp.pad(text_len.astype(jnp.int32), (0, Bp - B)).reshape(Bp, 1)

    layer_in = x
    for l in range(num_layers):
        if num_dir == 2:
            o_f, o_b = _bidir_layer(layer_in, lens2, params[l], H, Tc)
            layer_in = jnp.concatenate([o_f, o_b], axis=-1)   # (Tp, Bp, 2H)
        else:
            layer_in = _unidir_layer(layer_in, lens2, params[l][0], H, Tc)

    out = layer_in[:T, :B]                              # drop time / batch padding
    return jnp.transpose(out, (1, 0, 2))                # (B, T, H*num_dir)


# ---------------------------------------------------------------------------
# Pure-JAX reference (mirrors packed-sequence LSTM semantics)
# ---------------------------------------------------------------------------
def _ref_lstm_dir(x, lens, w_ih, w_hh, b_ih, b_hh, reverse):
    B, T, _ = x.shape
    H = w_hh.shape[1]
    h = jnp.zeros((B, H), jnp.float32)
    c = jnp.zeros((B, H), jnp.float32)
    outs = [None] * T
    order = range(T - 1, -1, -1) if reverse else range(T)
    for tt in order:
        gates = x[:, tt, :] @ w_ih.T + h @ w_hh.T + b_ih + b_hh
        i_g = jax.nn.sigmoid(gates[:, 0 * H:1 * H])
        f_g = jax.nn.sigmoid(gates[:, 1 * H:2 * H])
        g_g = jnp.tanh(gates[:, 2 * H:3 * H])
        o_g = jax.nn.sigmoid(gates[:, 3 * H:4 * H])
        c_new = f_g * c + i_g * g_g
        h_new = o_g * jnp.tanh(c_new)
        valid = (lens > tt)[:, None]
        c = jnp.where(valid, c_new, c)
        h = jnp.where(valid, h_new, h)
        outs[tt] = jnp.where(valid, h_new, 0.0)
    return jnp.stack(outs, axis=1)


def _ref_rnn_forward(text, text_len, params):
    layer_in = text.astype(jnp.float32)
    for dirs in params:
        outs = [_ref_lstm_dir(layer_in, text_len, *dirs[d], reverse=(d == 1))
                for d in range(len(dirs))]
        layer_in = jnp.concatenate(outs, axis=-1) if len(dirs) == 2 else outs[0]
    return layer_in


def _init_params(key, input_dim, hidden_dim, num_layers, bidirectional):
    num_dir = 2 if bidirectional else 1
    scale = 1.0 / (hidden_dim ** 0.5)
    params = []
    for l in range(num_layers):
        in_dim = input_dim if l == 0 else hidden_dim * num_dir
        dirs = []
        for _ in range(num_dir):
            key, k1, k2, k3, k4 = jax.random.split(key, 5)
            dirs.append((
                jax.random.uniform(k1, (4 * hidden_dim, in_dim), jnp.float32, -scale, scale),
                jax.random.uniform(k2, (4 * hidden_dim, hidden_dim), jnp.float32, -scale, scale),
                jax.random.uniform(k3, (4 * hidden_dim,), jnp.float32, -scale, scale),
                jax.random.uniform(k4, (4 * hidden_dim,), jnp.float32, -scale, scale),
            ))
        params.append(dirs)
    return params


if __name__ == "__main__":
    # Small config consistent with the module:
    #   LSTM(input_dim=32, hidden_dim=32, num_layers=2, bidirectional=True, dropout=0)
    #   text: (batch=3, seq=8, input_dim), lengths [8, 5, 0] (masking + zero-length row)
    input_dim, hidden_dim, num_layers, bidirectional = 32, 32, 2, True
    batch, seq = 3, 8

    key = jax.random.PRNGKey(0)
    k_p, k_x = jax.random.split(key)
    params = _init_params(k_p, input_dim, hidden_dim, num_layers, bidirectional)
    text = 0.5 * jax.random.normal(k_x, (batch, seq, input_dim), dtype=jnp.float32)
    text_len = jnp.array([8, 5, 0], dtype=jnp.int32)

    out = rnn_forward(text, text_len, params)
    out = jax.block_until_ready(out)

    ref = _ref_rnn_forward(text, text_len, params)
    num_dir = 2 if bidirectional else 1
    assert out.shape == (batch, seq, hidden_dim * num_dir), out.shape
    assert out.dtype == jnp.float32
    # Padded / zero-length rows must be exactly zero (pad_packed_sequence + _unsort_tensor).
    assert jnp.all(out[1, 5:] == 0.0) and jnp.all(out[2] == 0.0)
    assert jnp.allclose(out, ref, atol=2e-4, rtol=2e-4), "mismatch vs reference LSTM"

    print("KERNEL_OK")
</pallas_src>

<mosaic_0001>
module attributes {stable_mosaic.version = 11 : i64} {
  func.func @_bidir_chunk_kernel(%arg0: i32, %arg1: memref<8x1xi32, #tpu.memory_space<vmem>>, %arg2: memref<8x8x32xf32, #tpu.memory_space<vmem>>, %arg3: memref<8x8x32xf32, #tpu.memory_space<vmem>>, %arg4: memref<32x128xf32, #tpu.memory_space<vmem>>, %arg5: memref<32x128xf32, #tpu.memory_space<vmem>>, %arg6: memref<32x128xf32, #tpu.memory_space<vmem>>, %arg7: memref<32x128xf32, #tpu.memory_space<vmem>>, %arg8: memref<1x128xf32, #tpu.memory_space<vmem>>, %arg9: memref<1x128xf32, #tpu.memory_space<vmem>>, %arg10: memref<8x8x32xf32, #tpu.memory_space<vmem>>, %arg11: memref<8x8x32xf32, #tpu.memory_space<vmem>>, %arg12: memref<8x32xf32, #tpu.memory_space<vmem>>, %arg13: memref<8x32xf32, #tpu.memory_space<vmem>>, %arg14: memref<8x32xf32, #tpu.memory_space<vmem>>, %arg15: memref<8x32xf32, #tpu.memory_space<vmem>>, %arg16: memref<8x8x128xf32, #tpu.memory_space<vmem>>, %arg17: memref<8x8x128xf32, #tpu.memory_space<vmem>>) attributes {dimension_semantics = [#tpu.dimension_semantics<arbitrary>], iteration_bounds = array<i64: 1>, scalar_prefetch = 0 : i64, scratch_operands = 6 : i64, tpu.core_type = #tpu.core_type<tc>, window_params = [{pipeline_mode = #tpu.pipeline_mode<synchronous>, transform_indices = @transform_0, window_bounds = array<i64: 8, 1>}, {transform_indices = @transform_1, window_bounds = array<i64: 8, 8, 32>}, {transform_indices = @transform_2, window_bounds = array<i64: 8, 8, 32>}, {pipeline_mode = #tpu.pipeline_mode<synchronous>, transform_indices = @transform_3, window_bounds = array<i64: 32, 128>}, {pipeline_mode = #tpu.pipeline_mode<synchronous>, transform_indices = @transform_4, window_bounds = array<i64: 32, 128>}, {pipeline_mode = #tpu.pipeline_mode<synchronous>, transform_indices = @transform_5, window_bounds = array<i64: 32, 128>}, {pipeline_mode = #tpu.pipeline_mode<synchronous>, transform_indices = @transform_6, window_bounds = array<i64: 32, 128>}, {pipeline_mode = #tpu.pipeline_mode<synchronous>, transform_indices = @transform_7, window_bounds = array<i64: 1, 128>}, {pipeline_mode = #tpu.pipeline_mode<synchronous>, transform_indices = @transform_8, window_bounds = array<i64: 1, 128>}, {transform_indices = @transform_9, window_bounds = array<i64: 8, 8, 32>}, {transform_indices = @transform_10, window_bounds = array<i64: 8, 8, 32>}]} {
    %c0_i32 = arith.constant 0 : i32
    %0 = arith.cmpi eq, %arg0, %c0_i32 : i32
    %1 = arith.extui %0 : i1 to i32
    %c0_i32_0 = arith.constant 0 : i32
    %2 = arith.cmpi ne, %1, %c0_i32_0 : i32
    scf.if %2 {
      %cst_499 = arith.constant 0.000000e+00 : f32
      %993 = vector.broadcast %cst_499 : f32 to vector<8x32xf32>
      %c0_500 = arith.constant 0 : index
      %c0_501 = arith.constant 0 : index
      %994 = vector.load %arg12[%c0_500, %c0_501] : memref<8x32xf32, #tpu.memory_space<vmem>>, vector<8x32xf32>
      tpu.vector_store %arg12[%c0_500, %c0_501], %993 {strides = array<i32>} : memref<8x32xf32, #tpu.memory_space<vmem>>, vector<8x32xf32>,
      %cst_502 = arith.constant 0.000000e+00 : f32
      %995 = vector.broadcast %cst_502 : f32 to vector<8x32xf32>
      %c0_503 = arith.constant 0 : index
      %c0_504 = arith.constant 0 : index
      %996 = vector.load %arg13[%c0_503, %c0_504] : memref<8x32xf32, #tpu.memory_space<vmem>>, vector<8x32xf32>
      tpu.vector_store %arg13[%c0_503, %c0_504], %995 {strides = array<i32>} : memref<8x32xf32, #tpu.memory_space<vmem>>, vector<8x32xf32>,
      %cst_505 = arith.constant 0.000000e+00 : f32
      %997 = vector.broadcast %cst_505 : f32 to vector<8x32xf32>
      %c0_506 = arith.constant 0 : index
      %c0_507 = arith.constant 0 : index
      %998 = vector.load %arg14[%c0_506, %c0_507] : memref<8x32xf32, #tpu.memory_space<vmem>>, vector<8x32xf32>
      tpu.vector_store %arg14[%c0_506, %c0_507], %997 {strides = array<i32>} : memref<8x32xf32, #tpu.memory_space<vmem>>, vector<8x32xf32>,
      %cst_508 = arith.constant 0.000000e+00 : f32
      %999 = vector.broadcast %cst_508 : f32 to vector<8x32xf32>
      %c0_509 = arith.constant 0 : index
      %c0_510 = arith.constant 0 : index
      %1000 = vector.load %arg15[%c0_509, %c0_510] : memref<8x32xf32, #tpu.memory_space<vmem>>, vector<8x32xf32>
      tpu.vector_store %arg15[%c0_509, %c0_510], %999 {strides = array<i32>} : memref<8x32xf32, #tpu.memory_space<vmem>>, vector<8x32xf32>,
    } else {
    }
    %c0 = arith.constant 0 : index
    %c0_1 = arith.constant 0 : index
    %c0_2 = arith.constant 0 : index
    %3 = vector.load %arg2[%c0, %c0_1, %c0_2] : memref<8x8x32xf32, #tpu.memory_space<vmem>>, vector<8x8x32xf32>
    %4 = vector.shape_cast %3 : vector<8x8x32xf32> to vector<64x32xf32>
    %c0_3 = arith.constant 0 : index
    %c0_4 = arith.constant 0 : index
    %5 = vector.load %arg4[%c0_3, %c0_4] : memref<32x128xf32, #tpu.memory_space<vmem>>, vector<32x128xf32>
    %cst = arith.constant dense<0.000000e+00> : vector<64x128xf32>
    %6 = tpu.matmul %4, %5, %cst {dimension_numbers = #tpu.dot_dimension_numbers<[1], [0], [0], [1], [0, 0, 1, 1], [], []>} : vector<64x32xf32>, vector<32x128xf32>, vector<64x128xf32> -> vector<64x128xf32>
    %c0_5 = arith.constant 0 : index
    %c0_6 = arith.constant 0 : index
    %7 = vector.load %arg8[%c0_5, %c0_6] : memref<1x128xf32, #tpu.memory_space<vmem>>, vector<1x128xf32>
    %8 = vector.broadcast %7 : vector<1x128xf32> to vector<64x128xf32>
    %9 = arith.addf %6, %8 : vector<64x128xf32>
    %10 = vector.shape_cast %9 : vector<64x128xf32> to vector<8x8x128xf32>
    %c0_7 = arith.constant 0 : index
    %c0_8 = arith.constant 0 : index
    %c0_9 = arith.constant 0 : index
    %11 = vector.load %arg16[%c0_7, %c0_8, %c0_9] : memref<8x8x128xf32, #tpu.memory_space<vmem>>, vector<8x8x128xf32>
    tpu.vector_store %arg16[%c0_7, %c0_8, %c0_9], %10 {strides = array<i32>} : memref<8x8x128xf32, #tpu.memory_space<vmem>>, vector<8x8x128xf32>,
    %c0_10 = arith.constant 0 : index
    %c0_11 = arith.constant 0 : index
    %c0_12 = arith.constant 0 : index
    %12 = vector.load %arg3[%c0_10, %c0_11, %c0_12] : memref<8x8x32xf32, #tpu.memory_space<vmem>>, vector<8x8x32xf32>
    %13 = vector.shape_cast %12 : vector<8x8x32xf32> to vector<64x32xf32>
    %c0_13 = arith.constant 0 : index
    %c0_14 = arith.constant 0 : index
    %14 = vector.load %arg5[%c0_13, %c0_14] : memref<32x128xf32, #tpu.memory_space<vmem>>, vector<32x128xf32>
    %cst_15 = arith.constant dense<0.000000e+00> : vector<64x128xf32>
    %15 = tpu.matmul %13, %14, %cst_15 {dimension_numbers = #tpu.dot_dimension_numbers<[1], [0], [0], [1], [0, 0, 1, 1], [], []>} : vector<64x32xf32>, vector<32x128xf32>, vector<64x128xf32> -> vector<64x128xf32>
    %c0_16 = arith.constant 0 : index
    %c0_17 = arith.constant 0 : index
    %16 = vector.load %arg9[%c0_16, %c0_17] : memref<1x128xf32, #tpu.memory_space<vmem>>, vector<1x128xf32>
    %17 = vector.broadcast %16 : vector<1x128xf32> to vector<64x128xf32>
    %18 = arith.addf %15, %17 : vector<64x128xf32>
    %19 = vector.shape_cast %18 : vector<64x128xf32> to vector<8x8x128xf32>
    %c0_18 = arith.constant 0 : index
    %c0_19 = arith.constant 0 : index
    %c0_20 = arith.constant 0 : index
    %20 = vector.load %arg17[%c0_18, %c0_19, %c0_20] : memref<8x8x128xf32, #tpu.memory_space<vmem>>, vector<8x8x128xf32>
    tpu.vector_store %arg17[%c0_18, %c0_19, %c0_20], %19 {strides = array<i32>} : memref<8x8x128xf32, #tpu.memory_space<vmem>>, vector<8x8x128xf32>,
    %c0_21 = arith.constant 0 : index
    %c0_22 = arith.constant 0 : index
    %21 = vector.load %arg1[%c0_21, %c0_22] : memref<8x1xi32, #tpu.memory_space<vmem>>, vector<8x1xi32>
    %c8_i32 = arith.constant 8 : i32
    %22 = arith.muli %arg0, %c8_i32 : i32
    %c0_i32_23 = arith.constant 0 : i32
    %23 = arith.subi %c0_i32_23, %arg0 : i32
    %c8_i32_24 = arith.constant 8 : i32
    %24 = arith.muli %23, %c8_i32_24 : i32
    %c0_i32_25 = arith.constant 0 : i32
    %25 = arith.addi %22, %c0_i32_25 : i32
    %26 = arith.index_cast %c0_i32_25 : i32 to index
    %c0_26 = arith.constant 0 : index
    %c0_27 = arith.constant 0 : index
    %27 = vector.load %arg16[%26, %c0_26, %c0_27] : memref<8x8x128xf32, #tpu.memory_space<vmem>>, vector<1x8x128xf32>
    %28 = vector.shape_cast %27 : vector<1x8x128xf32> to vector<8x128xf32>
    %c0_28 = arith.constant 0 : index
    %c0_29 = arith.constant 0 : index
    %29 = vector.load %arg12[%c0_28, %c0_29] : memref<8x32xf32, #tpu.memory_space<vmem>>, vector<8x32xf32>
    %c0_30 = arith.constant 0 : index
    %c0_31 = arith.constant 0 : index
    %30 = vector.load %arg6[%c0_30, %c0_31] : memref<32x128xf32, #tpu.memory_space<vmem>>, vector<32x128xf32>
    %cst_32 = arith.constant dense<0.000000e+00> : vector<8x128xf32>
    %31 = tpu.matmul %29, %30, %cst_32 {dimension_numbers = #tpu.dot_dimension_numbers<[1], [0], [0], [1], [0, 0, 1, 1], [], []>} : vector<8x32xf32>, vector<32x128xf32>, vector<8x128xf32> -> vector<8x128xf32>
    %32 = arith.addf %28, %31 : vector<8x128xf32>
    %33 = vector.extract_strided_slice %32 {offsets = [0, 0], sizes = [8, 32], strides = [1, 1]} : vector<8x128xf32> to vector<8x32xf32>
    %cst_33 = arith.constant 5.000000e-01 : f32
    %34 = vector.broadcast %cst_33 : f32 to vector<8x32xf32>
    %35 = arith.mulf %34, %33 : vector<8x32xf32>
    %36 = math.tanh %35 : vector<8x32xf32>
    %cst_34 = arith.constant 5.000000e-01 : f32
    %37 = vector.broadcast %cst_34 : f32 to vector<8x32xf32>
    %38 = arith.mulf %37, %36 : vector<8x32xf32>
    %cst_35 = arith.constant 5.000000e-01 : f32
    %39 = vector.broadcast %cst_35 : f32 to vector<8x32xf32>
    %40 = arith.addf %38, %39 : vector<8x32xf32>
    %41 = vector.extract_strided_slice %32 {offsets = [0, 32], sizes = [8, 32], strides = [1, 1]} : vector<8x128xf32> to vector<8x32xf32>
    %cst_36 = arith.constant 5.000000e-01 : f32
    %42 = vector.broadcast %cst_36 : f32 to vector<8x32xf32>
    %43 = arith.mulf %42, %41 : vector<8x32xf32>
    %44 = math.tanh %43 : vector<8x32xf32>
    %cst_37 = arith.constant 5.000000e-01 : f32
    %45 = vector.broadcast %cst_37 : f32 to vector<8x32xf32>
    %46 = arith.mulf %45, %44 : vector<8x32xf32>
    %cst_38 = arith.constant 5.000000e-01 : f32
    %47 = vector.broadcast %cst_38 : f32 to vector<8x32xf32>
    %48 = arith.addf %46, %47 : vector<8x32xf32>
    %49 = vector.extract_strided_slice %32 {offsets = [0, 64], sizes = [8, 32], strides = [1, 1]} : vector<8x128xf32> to vector<8x32xf32>
    %50 = math.tanh %49 : vector<8x32xf32>
    %51 = vector.extract_strided_slice %32 {offsets = [0, 96], sizes = [8, 32], strides = [1, 1]} : vector<8x128xf32> to vector<8x32xf32>
    %cst_39 = arith.constant 5.000000e-01 : f32
    %52 = vector.broadcast %cst_39 : f32 to vector<8x32xf32>
    %53 = arith.mulf %52, %51 : vector<8x32xf32>
    %54 = math.tanh %53 : vector<8x32xf32>
    %cst_40 = arith.constant 5.000000e-01 : f32
    %55 = vector.broadcast %cst_40 : f32 to vector<8x32xf32>
    %56 = arith.mulf %55, %54 : vector<8x32xf32>
    %cst_41 = arith.constant 5.000000e-01 : f32
    %57 = vector.broadcast %cst_41 : f32 to vector<8x32xf32>
    %58 = arith.addf %56, %57 : vector<8x32xf32>
    %c0_42 = arith.constant 0 : index
    %c0_43 = arith.constant 0 : index
    %59 = vector.load %arg13[%c0_42, %c0_43] : memref<8x32xf32, #tpu.memory_space<vmem>>, vector<8x32xf32>
    %60 = arith.mulf %48, %59 : vector<8x32xf32>
    %61 = arith.mulf %40, %50 : vector<8x32xf32>
    %62 = arith.addf %60, %61 : vector<8x32xf32>
    %63 = math.tanh %62 : vector<8x32xf32>
    %64 = arith.mulf %58, %63 : vector<8x32xf32>
    %65 = vector.broadcast %25 : i32 to vector<8x1xi32>
    %66 = arith.cmpi sgt, %21, %65 : vector<8x1xi32>
    %c0_44 = arith.constant 0 : index
    %c0_45 = arith.constant 0 : index
    %67 = vector.load %arg13[%c0_44, %c0_45] : memref<8x32xf32, #tpu.memory_space<vmem>>, vector<8x32xf32>
    %68 = vector.shape_cast %66 : vector<8x1xi1> to vector<8x1xi1>
    %69 = vector.broadcast %68 : vector<8x1xi1> to vector<8x32xi1>
    %70 = arith.select %69, %62, %67 : vector<8x32xi1>, vector<8x32xf32>
    %c0_46 = arith.constant 0 : index
    %c0_47 = arith.constant 0 : index
    %71 = vector.load %arg13[%c0_46, %c0_47] : memref<8x32xf32, #tpu.memory_space<vmem>>, vector<8x32xf32>
    tpu.vector_store %arg13[%c0_46, %c0_47], %70 {strides = array<i32>} : memref<8x32xf32, #tpu.memory_space<vmem>>, vector<8x32xf32>,
    %c0_48 = arith.constant 0 : index
    %c0_49 = arith.constant 0 : index
    %72 = vector.load %arg12[%c0_48, %c0_49] : memref<8x32xf32, #tpu.memory_space<vmem>>, vector<8x32xf32>
    %73 = vector.shape_cast %66 : vector<8x1xi1> to vector<8x1xi1>
    %74 = vector.broadcast %73 : vector<8x1xi1> to vector<8x32xi1>
    %75 = arith.select %74, %64, %72 : vector<8x32xi1>, vector<8x32xf32>
    %c0_50 = arith.constant 0 : index
    %c0_51 = arith.constant 0 : index
    %76 = vector.load %arg12[%c0_50, %c0_51] : memref<8x32xf32, #tpu.memory_space<vmem>>, vector<8x32xf32>
    tpu.vector_store %arg12[%c0_50, %c0_51], %75 {strides = array<i32>} : memref<8x32xf32, #tpu.memory_space<vmem>>, vector<8x32xf32>,
    %cst_52 = arith.constant 0.000000e+00 : f32
    %77 = vector.shape_cast %66 : vector<8x1xi1> to vector<8x1xi1>
    %78 = vector.broadcast %77 : vector<8x1xi1> to vector<8x32xi1>
    %79 = vector.broadcast %cst_52 : f32 to vector<8x32xf32>
    %80 = arith.select %78, %64, %79 : vector<8x32xi1>, vector<8x32xf32>
    %81 = arith.index_cast %c0_i32_25 : i32 to index
    %c0_53 = arith.constant 0 : index
    %c0_54 = arith.constant 0 : index
    %82 = vector.load %arg10[%81, %c0_53, %c0_54] : memref<8x8x32xf32, #tpu.memory_space<vmem>>, vector<1x8x32xf32>
    %83 = vector.shape_cast %82 : vector<1x8x32xf32> to vector<8x32xf32>
    %84 = vector.shape_cast %80 : vector<8x32xf32> to vector<1x8x32xf32>
    tpu.vector_store %arg10[%81, %c0_53, %c0_54], %84 {strides = array<i32>} : memref<8x8x32xf32, #tpu.memory_space<vmem>>, vector<1x8x32xf32>,
    %c7_i32 = arith.constant 7 : i32
    %85 = arith.subi %c7_i32, %c0_i32_25 : i32
    %86 = arith.addi %24, %85 : i32
    %87 = arith.index_cast %85 : i32 to index
    %c0_55 = arith.constant 0 : index
    %c0_56 = arith.constant 0 : index
    %88 = vector.load %arg17[%87, %c0_55, %c0_56] : memref<8x8x128xf32, #tpu.memory_space<vmem>>, vector<1x8x128xf32>
    %89 = vector.shape_cast %88 : vector<1x8x128xf32> to vector<8x128xf32>
    %c0_57 = arith.constant 0 : index
    %c0_58 = arith.constant 0 : index
    %90 = vector.load %arg14[%c0_57, %c0_58] : memref<8x32xf32, #tpu.memory_space<vmem>>, vector<8x32xf32>
    %c0_59 = arith.constant 0 : index
    %c0_60 = arith.constant 0 : index
    %91 = vector.load %arg7[%c0_59, %c0_60] : memref<32x128xf32, #tpu.memory_space<vmem>>, vector<32x128xf32>
    %cst_61 = arith.constant dense<0.000000e+00> : vector<8x128xf32>
    %92 = tpu.matmul %90, %91, %cst_61 {dimension_numbers = #tpu.dot_dimension_numbers<[1], [0], [0], [1], [0, 0, 1, 1], [], []>} : vector<8x32xf32>, vector<32x128xf32>, vector<8x128xf32> -> vector<8x128xf32>
    %93 = arith.addf %89, %92 : vector<8x128xf32>
    %94 = vector.extract_strided_slice %93 {offsets = [0, 0], sizes = [8, 32], strides = [1, 1]} : vector<8x128xf32> to vector<8x32xf32>
    %cst_62 = arith.constant 5.000000e-01 : f32
    %95 = vector.broadcast %cst_62 : f32 to vector<8x32xf32>
    %96 = arith.mulf %95, %94 : vector<8x32xf32>
    %97 = math.tanh %96 : vector<8x32xf32>
    %cst_63 = arith.constant 5.000000e-01 : f32
    %98 = vector.broadcast %cst_63 : f32 to vector<8x32xf32>
    %99 = arith.mulf %98, %97 : vector<8x32xf32>
    %cst_64 = arith.constant 5.000000e-01 : f32
    %100 = vector.broadcast %cst_64 : f32 to vector<8x32xf32>
    %101 = arith.addf %99, %100 : vector<8x32xf32>
    %102 = vector.extract_strided_slice %93 {offsets = [0, 32], sizes = [8, 32], strides = [1, 1]} : vector<8x128xf32> to vector<8x32xf32>
    %cst_65 = arith.constant 5.000000e-01 : f32
    %103 = vector.broadcast %cst_65 : f32 to vector<8x32xf32>
    %104 = arith.mulf %103, %102 : vector<8x32xf32>
    %105 = math.tanh %104 : vector<8x32xf32>
    %cst_66 = arith.constant 5.000000e-01 : f32
    %106 = vector.broadcast %cst_66 : f32 to vector<8x32xf32>
    %107 = arith.mulf %106, %105 : vector<8x32xf32>
    %cst_67 = arith.constant 5.000000e-01 : f32
    %108 = vector.broadcast %cst_67 : f32 to vector<8x32xf32>
    %109 = arith.addf %107, %108 : vector<8x32xf32>
    %110 = vector.extract_strided_slice %93 {offsets = [0, 64], sizes = [8, 32], strides = [1, 1]} : vector<8x128xf32> to vector<8x32xf32>
    %111 = math.tanh %110 : vector<8x32xf32>
    %112 = vector.extract_strided_slice %93 {offsets = [0, 96], sizes = [8, 32], strides = [1, 1]} : vector<8x128xf32> to vector<8x32xf32>
    %cst_68 = arith.constant 5.000000e-01 : f32
    %113 = vector.broadcast %cst_68 : f32 to vector<8x32xf32>
    %114 = arith.mulf %113, %112 : vector<8x32xf32>
    %115 = math.tanh %114 : vector<8x32xf32>
    %cst_69 = arith.constant 5.000000e-01 : f32
    %116 = vector.broadcast %cst_69 : f32 to vector<8x32xf32>
    %117 = arith.mulf %116, %115 : vector<8x32xf32>
    %cst_70 = arith.constant 5.000000e-01 : f32
    %118 = vector.broadcast %cst_70 : f32 to vector<8x32xf32>
    %119 = arith.addf %117, %118 : vector<8x32xf32>
    %c0_71 = arith.constant 0 : index
    %c0_72 = arith.constant 0 : index
    %120 = vector.load %arg15[%c0_71, %c0_72] : memref<8x32xf32, #tpu.memory_space<vmem>>, vector<8x32xf32>
    %121 = arith.mulf %109, %120 : vector<8x32xf32>
    %122 = arith.mulf %101, %111 : vector<8x32xf32>
    %123 = arith.addf %121, %122 : vector<8x32xf32>
    %124 = math.tanh %123 : vector<8x32xf32>
    %125 = arith.mulf %119, %124 : vector<8x32xf32>
    %126 = vector.broadcast %86 : i32 to vector<8x1xi32>
    %127 = arith.cmpi sgt, %21, %126 : vector<8x1xi32>
    %c0_73 = arith.constant 0 : index
    %c0_74 = arith.constant 0 : index
    %128 = vector.load %arg15[%c0_73, %c0_74] : memref<8x32xf32, #tpu.memory_space<vmem>>, vector<8x32xf32>
    %129 = vector.shape_cast %127 : vector<8x1xi1> to vector<8x1xi1>
    %130 = vector.broadcast %129 : vector<8x1xi1> to vector<8x32xi1>
    %131 = arith.select %130, %123, %128 : vector<8x32xi1>, vector<8x32xf32>
    %c0_75 = arith.constant 0 : index
    %c0_76 = arith.constant 0 : index
    %132 = vector.load %arg15[%c0_75, %c0_76] : memref<8x32xf32, #tpu.memory_space<vmem>>, vector<8x32xf32>
    tpu.vector_store %arg15[%c0_75, %c0_76], %131 {strides = array<i32>} : memref<8x32xf32, #tpu.memory_space<vmem>>, vector<8x32xf32>,
    %c0_77 = arith.constant 0 : index
    %c0_78 = arith.constant 0 : index
    %133 = vector.load %arg14[%c0_77, %c0_78] : memref<8x32xf32, #tpu.memory_space<vmem>>, vector<8x32xf32>
    %134 = vector.shape_cast %127 : vector<8x1xi1> to vector<8x1xi1>
    %135 = vector.broadcast %134 : vector<8x1xi1> to vector<8x32xi1>
    %136 = arith.select %135, %125, %133 : vector<8x32xi1>, vector<8x32xf32>
    %c0_79 = arith.constant 0 : index
    %c0_80 = arith.constant 0 : index
    %137 = vector.load %arg14[%c0_79, %c0_80] : memref<8x32xf32, #tpu.memory_space<vmem>>, vector<8x32xf32>
    tpu.vector_store %arg14[%c0_79, %c0_80], %136 {strides = array<i32>} : memref<8x32xf32, #tpu.memory_space<vmem>>, vector<8x32xf32>,
    %cst_81 = arith.constant 0.000000e+00 : f32
    %138 = vector.shape_cast %127 : vector<8x1xi1> to vector<8x1xi1>
    %139 = vector.broadcast %138 : vector<8x1xi1> to vector<8x32xi1>
    %140 = vector.broadcast %cst_81 : f32 to vector<8x32xf32>
    %141 = arith.select %139, %125, %140 : vector<8x32xi1>, vector<8x32xf32>
    %142 = arith.index_cast %85 : i32 to index
    %c0_82 = arith.constant 0 : index
    %c0_83 = arith.constant 0 : index
    %143 = vector.load %arg11[%142, %c0_82, %c0_83] : memref<8x8x32xf32, #tpu.memory_space<vmem>>, vector<1x8x32xf32>
    %144 = vector.shape_cast %143 : vector<1x8x32xf32> to vector<8x32xf32>
    %145 = vector.shape_cast %141 : vector<8x32xf32> to vector<1x8x32xf32>
    tpu.vector_store %arg11[%142, %c0_82, %c0_83], %145 {strides = array<i32>} : memref<8x8x32xf32, #tpu.memory_space<vmem>>, vector<1x8x32xf32>,
    %c1_i32 = arith.constant 1 : i32
    %146 = arith.addi %22, %c1_i32 : i32
    %147 = arith.index_cast %c1_i32 : i32 to index
    %c0_84 = arith.constant 0 : index
    %c0_85 = arith.constant 0 : index
    %148 = vector.load %arg16[%147, %c0_84, %c0_85] : memref<8x8x128xf32, #tpu.memory_space<vmem>>, vector<1x8x128xf32>
    %149 = vector.shape_cast %148 : vector<1x8x128xf32> to vector<8x128xf32>
    %c0_86 = arith.constant 0 : index
    %c0_87 = arith.constant 0 : index
    %150 = vector.load %arg12[%c0_86, %c0_87] : memref<8x32xf32, #tpu.memory_space<vmem>>, vector<8x32xf32>
    %c0_88 = arith.constant 0 : index
    %c0_89 = arith.constant 0 : index
    %151 = vector.load %arg6[%c0_88, %c0_89] : memref<32x128xf32, #tpu.memory_space<vmem>>, vector<32x128xf32>
    %cst_90 = arith.constant dense<0.000000e+00> : vector<8x128xf32>
    %152 = tpu.matmul %150, %151, %cst_90 {dimension_numbers = #tpu.dot_dimension_numbers<[1], [0], [0], [1], [0, 0, 1, 1], [], []>} : vector<8x32xf32>, vector<32x128xf32>, vector<8x128xf32> -> vector<8x128xf32>
    %153 = arith.addf %149, %152 : vector<8x128xf32>
    %154 = vector.extract_strided_slice %153 {offsets = [0, 0], sizes = [8, 32], strides = [1, 1]} : vector<8x128xf32> to vector<8x32xf32>
    %cst_91 = arith.constant 5.000000e-01 : f32
    %155 = vector.broadcast %cst_91 : f32 to vector<8x32xf32>
    %156 = arith.mulf %155, %154 : vector<8x32xf32>
    %157 = math.tanh %156 : vector<8x32xf32>
    %cst_92 = arith.constant 5.000000e-01 : f32
    %158 = vector.broadcast %cst_92 : f32 to vector<8x32xf32>
    %159 = arith.mulf %158, %157 : vector<8x32xf32>
    %cst_93 = arith.constant 5.000000e-01 : f32
    %160 = vector.broadcast %cst_93 : f32 to vector<8x32xf32>
    %161 = arith.addf %159, %160 : vector<8x32xf32>
    %162 = vector.extract_strided_slice %153 {offsets = [0, 32], sizes = [8, 32], strides = [1, 1]} : vector<8x128xf32> to vector<8x32xf32>
    %cst_94 = arith.constant 5.000000e-01 : f32
    %163 = vector.broadcast %cst_94 : f32 to vector<8x32xf32>
    %164 = arith.mulf %163, %162 : vector<8x32xf32>
    %165 = math.tanh %164 : vector<8x32xf32>
    %cst_95 = arith.constant 5.000000e-01 : f32
    %166 = vector.broadcast %cst_95 : f32 to vector<8x32xf32>
    %167 = arith.mulf %166, %165 : vector<8x32xf32>
    %cst_96 = arith.constant 5.000000e-01 : f32
    %168 = vector.broadcast %cst_96 : f32 to vector<8x32xf32>
    %169 = arith.addf %167, %168 : vector<8x32xf32>
    %170 = vector.extract_strided_slice %153 {offsets = [0, 64], sizes = [8, 32], strides = [1, 1]} : vector<8x128xf32> to vector<8x32xf32>
    %171 = math.tanh %170 : vector<8x32xf32>
    %172 = vector.extract_strided_slice %153 {offsets = [0, 96], sizes = [8, 32], strides = [1, 1]} : vector<8x128xf32> to vector<8x32xf32>
    %cst_97 = arith.constant 5.000000e-01 : f32
    %173 = vector.broadcast %cst_97 : f32 to vector<8x32xf32>
    %174 = arith.mulf %173, %172 : vector<8x32xf32>
    %175 = math.tanh %174 : vector<8x32xf32>
    %cst_98 = arith.constant 5.000000e-01 : f32
    %176 = vector.broadcast %cst_98 : f32 to vector<8x32xf32>
    %177 = arith.mulf %176, %175 : vector<8x32xf32>
    %cst_99 = arith.constant 5.000000e-01 : f32
    %178 = vector.broadcast %cst_99 : f32 to vector<8x32xf32>
    %179 = arith.addf %177, %178 : vector<8x32xf32>
    %c0_100 = arith.constant 0 : index
    %c0_101 = arith.constant 0 : index
    %180 = vector.load %arg13[%c0_100, %c0_101] : memref<8x32xf32, #tpu.memory_space<vmem>>, vector<8x32xf32>
    %181 = arith.mulf %169, %180 : vector<8x32xf32>
    %182 = arith.mulf %161, %171 : vector<8x32xf32>
    %183 = arith.addf %181, %182 : vector<8x32xf32>
    %184 = math.tanh %183 : vector<8x32xf32>
    %185 = arith.mulf %179, %184 : vector<8x32xf32>
    %186 = vector.broadcast %146 : i32 to vector<8x1xi32>
    %187 = arith.cmpi sgt, %21, %186 : vector<8x1xi32>
    %c0_102 = arith.constant 0 : index
    %c0_103 = arith.constant 0 : index
    %188 = vector.load %arg13[%c0_102, %c0_103] : memref<8x32xf32, #tpu.memory_space<vmem>>, vector<8x32xf32>
    %189 = vector.shape_cast %187 : vector<8x1xi1> to vector<8x1xi1>
    %190 = vector.broadcast %189 : vector<8x1xi1> to vector<8x32xi1>
    %191 = arith.select %190, %183, %188 : vector<8x32xi1>, vector<8x32xf32>
    %c0_104 = arith.constant 0 : index
    %c0_105 = arith.constant 0 : index
    %192 = vector.load %arg13[%c0_104, %c0_105] : memref<8x32xf32, #tpu.memory_space<vmem>>, vector<8x32xf32>
    tpu.vector_store %arg13[%c0_104, %c0_105], %191 {strides = array<i32>} : memref<8x32xf32, #tpu.memory_space<vmem>>, vector<8x32xf32>,
    %c0_106 = arith.constant 0 : index
    %c0_107 = arith.constant 0 : index
    %193 = vector.load %arg12[%c0_106, %c0_107] : memref<8x32xf32, #tpu.memory_space<vmem>>, vector<8x32xf32>
    %194 = vector.shape_cast %187 : vector<8x1xi1> to vector<8x1xi1>
    %195 = vector.broadcast %194 : vector<8x1xi1> to vector<8x32xi1>
    %196 = arith.select %195, %185, %193 : vector<8x32xi1>, vector<8x32xf32>
    %c0_108 = arith.constant 0 : index
    %c0_109 = arith.constant 0 : index
    %197 = vector.load %arg12[%c0_108, %c0_109] : memref<8x32xf32, #tpu.memory_space<vmem>>, vector<8x32xf32>
    tpu.vector_store %arg12[%c0_108, %c0_109], %196 {strides = array<i32>} : memref<8x32xf32, #tpu.memory_space<vmem>>, vector<8x32xf32>,
    %cst_110 = arith.constant 0.000000e+00 : f32
    %198 = vector.shape_cast %187 : vector<8x1xi1> to vector<8x1xi1>
    %199 = vector.broadcast %198 : vector<8x1xi1> to vector<8x32xi1>
    %200 = vector.broadcast %cst_110 : f32 to vector<8x32xf32>
    %201 = arith.select %199, %185, %200 : vector<8x32xi1>, vector<8x32xf32>
    %202 = arith.index_cast %c1_i32 : i32 to index
    %c0_111 = arith.constant 0 : index
    %c0_112 = arith.constant 0 : index
    %203 = vector.load %arg10[%202, %c0_111, %c0_112] : memref<8x8x32xf32, #tpu.memory_space<vmem>>, vector<1x8x32xf32>
    %204 = vector.shape_cast %203 : vector<1x8x32xf32> to vector<8x32xf32>
    %205 = vector.shape_cast %201 : vector<8x32xf32> to vector<1x8x32xf32>
    tpu.vector_store %arg10[%202, %c0_111, %c0_112], %205 {strides = array<i32>} : memref<8x8x32xf32, #tpu.memory_space<vmem>>, vector<1x8x32xf32>,
    %c7_i32_113 = arith.constant 7 : i32
    %206 = arith.subi %c7_i32_113, %c1_i32 : i32
    %207 = arith.addi %24, %206 : i32
    %208 = arith.index_cast %206 : i32 to index
    %c0_114 = arith.constant 0 : index
    %c0_115 = arith.constant 0 : index
    %209 = vector.load %arg17[%208, %c0_114, %c0_115] : memref<8x8x128xf32, #tpu.memory_space<vmem>>, vector<1x8x128xf32>
    %210 = vector.shape_cast %209 : vector<1x8x128xf32> to vector<8x128xf32>
    %c0_116 = arith.constant 0 : index
    %c0_117 = arith.constant 0 : index
    %211 = vector.load %arg14[%c0_116, %c0_117] : memref<8x32xf32, #tpu.memory_space<vmem>>, vector<8x32xf32>
    %c0_118 = arith.constant 0 : index
    %c0_119 = arith.constant 0 : index
    %212 = vector.load %arg7[%c0_118, %c0_119] : memref<32x128xf32, #tpu.memory_space<vmem>>, vector<32x128xf32>
    %cst_120 = arith.constant dense<0.000000e+00> : vector<8x128xf32>
    %213 = tpu.matmul %211, %212, %cst_120 {dimension_numbers = #tpu.dot_dimension_numbers<[1], [0], [0], [1], [0, 0, 1, 1], [], []>} : vector<8x32xf32>, vector<32x128xf32>, vector<8x128xf32> -> vector<8x128xf32>
    %214 = arith.addf %210, %213 : vector<8x128xf32>
    %215 = vector.extract_strided_slice %214 {offsets = [0, 0], sizes = [8, 32], strides = [1, 1]} : vector<8x128xf32> to vector<8x32xf32>
    %cst_121 = arith.constant 5.000000e-01 : f32
    %216 = vector.broadcast %cst_121 : f32 to vector<8x32xf32>
    %217 = arith.mulf %216, %215 : vector<8x32xf32>
    %218 = math.tanh %217 : vector<8x32xf32>
    %cst_122 = arith.constant 5.000000e-01 : f32
    %219 = vector.broadcast %cst_122 : f32 to vector<8x32xf32>
    %220 = arith.mulf %219, %218 : vector<8x32xf32>
    %cst_123 = arith.constant 5.000000e-01 : f32
    %221 = vector.broadcast %cst_123 : f32 to vector<8x32xf32>
    %222 = arith.addf %220, %221 : vector<8x32xf32>
    %223 = vector.extract_strided_slice %214 {offsets = [0, 32], sizes = [8, 32], strides = [1, 1]} : vector<8x128xf32> to vector<8x32xf32>
    %cst_124 = arith.constant 5.000000e-01 : f32
    %224 = vector.broadcast %cst_124 : f32 to vector<8x32xf32>
    %225 = arith.mulf %224, %223 : vector<8x32xf32>
    %226 = math.tanh %225 : vector<8x32xf32>
    %cst_125 = arith.constant 5.000000e-01 : f32
    %227 = vector.broadcast %cst_125 : f32 to vector<8x32xf32>
    %228 = arith.mulf %227, %226 : vector<8x32xf32>
    %cst_126 = arith.constant 5.000000e-01 : f32
    %229 = vector.broadcast %cst_126 : f32 to vector<8x32xf32>
    %230 = arith.addf %228, %229 : vector<8x32xf32>
    %231 = vector.extract_strided_slice %214 {offsets = [0, 64], sizes = [8, 32], strides = [1, 1]} : vector<8x128xf32> to vector<8x32xf32>
    %232 = math.tanh %231 : vector<8x32xf32>
    %233 = vector.extract_strided_slice %214 {offsets = [0, 96], sizes = [8, 32], strides = [1, 1]} : vector<8x128xf32> to vector<8x32xf32>
    %cst_127 = arith.constant 5.000000e-01 : f32
    %234 = vector.broadcast %cst_127 : f32 to vector<8x32xf32>
    %235 = arith.mulf %234, %233 : vector<8x32xf32>
    %236 = math.tanh %235 : vector<8x32xf32>
    %cst_128 = arith.constant 5.000000e-01 : f32
    %237 = vector.broadcast %cst_128 : f32 to vector<8x32xf32>
    %238 = arith.mulf %237, %236 : vector<8x32xf32>
    %cst_129 = arith.constant 5.000000e-01 : f32
    %239 = vector.broadcast %cst_129 : f32 to vector<8x32xf32>
    %240 = arith.addf %238, %239 : vector<8x32xf32>
    %c0_130 = arith.constant 0 : index
    %c0_131 = arith.constant 0 : index
    %241 = vector.load %arg15[%c0_130, %c0_131] : memref<8x32xf32, #tpu.memory_space<vmem>>, vector<8x32xf32>
    %242 = arith.mulf %230, %241 : vector<8x32xf32>
    %243 = arith.mulf %222, %232 : vector<8x32xf32>
    %244 = arith.addf %242, %243 : vector<8x32xf32>
    %245 = math.tanh %244 : vector<8x32xf32>
    %246 = arith.mulf %240, %245 : vector<8x32xf32>
    %247 = vector.broadcast %207 : i32 to vector<8x1xi32>
    %248 = arith.cmpi sgt, %21, %247 : vector<8x1xi32>
    %c0_132 = arith.constant 0 : index
    %c0_133 = arith.constant 0 : index
    %249 = vector.load %arg15[%c0_132, %c0_133] : memref<8x32xf32, #tpu.memory_space<vmem>>, vector<8x32xf32>
    %250 = vector.shape_cast %248 : vector<8x1xi1> to vector<8x1xi1>
    %251 = vector.broadcast %250 : vector<8x1xi1> to vector<8x32xi1>
    %252 = arith.select %251, %244, %249 : vector<8x32xi1>, vector<8x32xf32>
    %c0_134 = arith.constant 0 : index
    %c0_135 = arith.constant 0 : index
    %253 = vector.load %arg15[%c0_134, %c0_135] : memref<8x32xf32, #tpu.memory_space<vmem>>, vector<8x32xf32>
    tpu.vector_store %arg15[%c0_134, %c0_135], %252 {strides = array<i32>} : memref<8x32xf32, #tpu.memory_space<vmem>>, vector<8x32xf32>,
    %c0_136 = arith.constant 0 : index
    %c0_137 = arith.constant 0 : index
    %254 = vector.load %arg14[%c0_136, %c0_137] : memref<8x32xf32, #tpu.memory_space<vmem>>, vector<8x32xf32>
    %255 = vector.shape_cast %248 : vector<8x1xi1> to vector<8x1xi1>
    %256 = vector.broadcast %255 : vector<8x1xi1> to vector<8x32xi1>
    %257 = arith.select %256, %246, %254 : vector<8x32xi1>, vector<8x32xf32>
    %c0_138 = arith.constant 0 : index
    %c0_139 = arith.constant 0 : index
    %258 = vector.load %arg14[%c0_138, %c0_139] : memref<8x32xf32, #tpu.memory_space<vmem>>, vector<8x32xf32>
    tpu.vector_store %arg14[%c0_138, %c0_139], %257 {strides = array<i32>} : memref<8x32xf32, #tpu.memory_space<vmem>>, vector<8x32xf32>,
    %cst_140 = arith.constant 0.000000e+00 : f32
    %259 = vector.shape_cast %248 : vector<8x1xi1> to vector<8x1xi1>
    %260 = vector.broadcast %259 : vector<8x1xi1> to vector<8x32xi1>
    %261 = vector.broadcast %cst_140 : f32 to vector<8x32xf32>
    %262 = arith.select %260, %246, %261 : vector<8x32xi1>, vector<8x32xf32>
    %263 = arith.index_cast %206 : i32 to index
    %c0_141 = arith.constant 0 : index
    %c0_142 = arith.constant 0 : index
    %264 = vector.load %arg11[%263, %c0_141, %c0_142] : memref<8x8x32xf32, #tpu.memory_space<vmem>>, vector<1x8x32xf32>
    %265 = vector.shape_cast %264 : vector<1x8x32xf32> to vector<8x32xf32>
    %266 = vector.shape_cast %262 : vector<8x32xf32> to vector<1x8x32xf32>
    tpu.vector_store %arg11[%263, %c0_141, %c0_142], %266 {strides = array<i32>} : memref<8x8x32xf32, #tpu.memory_space<vmem>>, vector<1x8x32xf32>,
    %c2_i32 = arith.constant 2 : i32
    %267 = arith.addi %22, %c2_i32 : i32
    %268 = arith.index_cast %c2_i32 : i32 to index
    %c0_143 = arith.constant 0 : index
    %c0_144 = arith.constant 0 : index
    %269 = vector.load %arg16[%268, %c0_143, %c0_144] : memref<8x8x128xf32, #tpu.memory_space<vmem>>, vector<1x8x128xf32>
    %270 = vector.shape_cast %269 : vector<1x8x128xf32> to vector<8x128xf32>
    %c0_145 = arith.constant 0 : index
    %c0_146 = arith.constant 0 : index
    %271 = vector.load %arg12[%c0_145, %c0_146] : memref<8x32xf32, #tpu.memory_space<vmem>>, vector<8x32xf32>
    %c0_147 = arith.constant 0 : index
    %c0_148 = arith.constant 0 : index
    %272 = vector.load %arg6[%c0_147, %c0_148] : memref<32x128xf32, #tpu.memory_space<vmem>>, vector<32x128xf32>
    %cst_149 = arith.constant dense<0.000000e+00> : vector<8x128xf32>
    %273 = tpu.matmul %271, %272, %cst_149 {dimension_numbers = #tpu.dot_dimension_numbers<[1], [0], [0], [1], [0, 0, 1, 1], [], []>} : vector<8x32xf32>, vector<32x128xf32>, vector<8x128xf32> -> vector<8x128xf32>
    %274 = arith.addf %270, %273 : vector<8x128xf32>
    %275 = vector.extract_strided_slice %274 {offsets = [0, 0], sizes = [8, 32], strides = [1, 1]} : vector<8x128xf32> to vector<8x32xf32>
    %cst_150 = arith.constant 5.000000e-01 : f32
    %276 = vector.broadcast %cst_150 : f32 to vector<8x32xf32>
    %277 = arith.mulf %276, %275 : vector<8x32xf32>
    %278 = math.tanh %277 : vector<8x32xf32>
    %cst_151 = arith.constant 5.000000e-01 : f32
    %279 = vector.broadcast %cst_151 : f32 to vector<8x32xf32>
    %280 = arith.mulf %279, %278 : vector<8x32xf32>
    %cst_152 = arith.constant 5.000000e-01 : f32
    %281 = vector.broadcast %cst_152 : f32 to vector<8x32xf32>
    %282 = arith.addf %280, %281 : vector<8x32xf32>
    %283 = vector.extract_strided_slice %274 {offsets = [0, 32], sizes = [8, 32], strides = [1, 1]} : vector<8x128xf32> to vector<8x32xf32>
    %cst_153 = arith.constant 5.000000e-01 : f32
    %284 = vector.broadcast %cst_153 : f32 to vector<8x32xf32>
    %285 = arith.mulf %284, %283 : vector<8x32xf32>
    %286 = math.tanh %285 : vector<8x32xf32>
    %cst_154 = arith.constant 5.000000e-01 : f32
    %287 = vector.broadcast %cst_154 : f32 to vector<8x32xf32>
    %288 = arith.mulf %287, %286 : vector<8x32xf32>
    %cst_155 = arith.constant 5.000000e-01 : f32
    %289 = vector.broadcast %cst_155 : f32 to vector<8x32xf32>
    %290 = arith.addf %288, %289 : vector<8x32xf32>
    %291 = vector.extract_strided_slice %274 {offsets = [0, 64], sizes = [8, 32], strides = [1, 1]} : vector<8x128xf32> to vector<8x32xf32>
    %292 = math.tanh %291 : vector<8x32xf32>
    %293 = vector.extract_strided_slice %274 {offsets = [0, 96], sizes = [8, 32], strides = [1, 1]} : vector<8x128xf32> to vector<8x32xf32>
    %cst_156 = arith.constant 5.000000e-01 : f32
    %294 = vector.broadcast %cst_156 : f32 to vector<8x32xf32>
    %295 = arith.mulf %294, %293 : vector<8x32xf32>
    %296 = math.tanh %295 : vector<8x32xf32>
    %cst_157 = arith.constant 5.000000e-01 : f32
    %297 = vector.broadcast %cst_157 : f32 to vector<8x32xf32>
    %298 = arith.mulf %297, %296 : vector<8x32xf32>
    %cst_158 = arith.constant 5.000000e-01 : f32
    %299 = vector.broadcast %cst_158 : f32 to vector<8x32xf32>
    %300 = arith.addf %298, %299 : vector<8x32xf32>
    %c0_159 = arith.constant 0 : index
    %c0_160 = arith.constant 0 : index
    %301 = vector.load %arg13[%c0_159, %c0_160] : memref<8x32xf32, #tpu.memory_space<vmem>>, vector<8x32xf32>
    %302 = arith.mulf %290, %301 : vector<8x32xf32>
    %303 = arith.mulf %282, %292 : vector<8x32xf32>
    %304 = arith.addf %302, %303 : vector<8x32xf32>
    %305 = math.tanh %304 : vector<8x32xf32>
    %306 = arith.mulf %300, %305 : vector<8x32xf32>
    %307 = vector.broadcast %267 : i32 to vector<8x1xi32>
    %308 = arith.cmpi sgt, %21, %307 : vector<8x1xi32>
    %c0_161 = arith.constant 0 : index
    %c0_162 = arith.constant 0 : index
    %309 = vector.load %arg13[%c0_161, %c0_162] : memref<8x32xf32, #tpu.memory_space<vmem>>, vector<8x32xf32>
    %310 = vector.shape_cast %308 : vector<8x1xi1> to vector<8x1xi1>
    %311 = vector.broadcast %310 : vector<8x1xi1> to vector<8x32xi1>
    %312 = arith.select %311, %304, %309 : vector<8x32xi1>, vector<8x32xf32>
    %c0_163 = arith.constant 0 : index
    %c0_164 = arith.constant 0 : index
    %313 = vector.load %arg13[%c0_163, %c0_164] : memref<8x32xf32, #tpu.memory_space<vmem>>, vector<8x32xf32>
    tpu.vector_store %arg13[%c0_163, %c0_164], %312 {strides = array<i32>} : memref<8x32xf32, #tpu.memory_space<vmem>>, vector<8x32xf32>,
    %c0_165 = arith.constant 0 : index
    %c0_166 = arith.constant 0 : index
    %314 = vector.load %arg12[%c0_165, %c0_166] : memref<8x32xf32, #tpu.memory_space<vmem>>, vector<8x32xf32>
    %315 = vector.shape_cast %308 : vector<8x1xi1> to vector<8x1xi1>
    %316 = vector.broadcast %315 : vector<8x1xi1> to vector<8x32xi1>
    %317 = arith.select %316, %306, %314 : vector<8x32xi1>, vector<8x32xf32>
    %c0_167 = arith.constant 0 : index
    %c0_168 = arith.constant 0 : index
    %318 = vector.load %arg12[%c0_167, %c0_168] : memref<8x32xf32, #tpu.memory_space<vmem>>, vector<8x32xf32>
    tpu.vector_store %arg12[%c0_167, %c0_168], %317 {strides = array<i32>} : memref<8x32xf32, #tpu.memory_space<vmem>>, vector<8x32xf32>,
    %cst_169 = arith.constant 0.000000e+00 : f32
    %319 = vector.shape_cast %308 : vector<8x1xi1> to vector<8x1xi1>
    %320 = vector.broadcast %319 : vector<8x1xi1> to vector<8x32xi1>
    %321 = vector.broadcast %cst_169 : f32 to vector<8x32xf32>
    %322 = arith.select %320, %306, %321 : vector<8x32xi1>, vector<8x32xf32>
    %323 = arith.index_cast %c2_i32 : i32 to index
    %c0_170 = arith.constant 0 : index
    %c0_171 = arith.constant 0 : index
    %324 = vector.load %arg10[%323, %c0_170, %c0_171] : memref<8x8x32xf32, #tpu.memory_space<vmem>>, vector<1x8x32xf32>
    %325 = vector.shape_cast %324 : vector<1x8x32xf32> to vector<8x32xf32>
    %326 = vector.shape_cast %322 : vector<8x32xf32> to vector<1x8x32xf32>
    tpu.vector_store %arg10[%323, %c0_170, %c0_171], %326 {strides = array<i32>} : memref<8x8x32xf32, #tpu.memory_space<vmem>>, vector<1x8x32xf32>,
    %c7_i32_172 = arith.constant 7 : i32
    %327 = arith.subi %c7_i32_172, %c2_i32 : i32
    %328 = arith.addi %24, %327 : i32
    %329 = arith.index_cast %327 : i32 to index
    %c0_173 = arith.constant 0 : index
    %c0_174 = arith.constant 0 : index
    %330 = vector.load %arg17[%329, %c0_173, %c0_174] : memref<8x8x128xf32, #tpu.memory_space<vmem>>, vector<1x8x128xf32>
    %331 = vector.shape_cast %330 : vector<1x8x128xf32> to vector<8x128xf32>
    %c0_175 = arith.constant 0 : index
    %c0_176 = arith.constant 0 : index
    %332 = vector.load %arg14[%c0_175, %c0_176] : memref<8x32xf32, #tpu.memory_space<vmem>>, vector<8x32xf32>
    %c0_177 = arith.constant 0 : index
    %c0_178 = arith.constant 0 : index
    %333 = vector.load %arg7[%c0_177, %c0_178] : memref<32x128xf32, #tpu.memory_space<vmem>>, vector<32x128xf32>
    %cst_179 = arith.constant dense<0.000000e+00> : vector<8x128xf32>
    %334 = tpu.matmul %332, %333, %cst_179 {dimension_numbers = #tpu.dot_dimension_numbers<[1], [0], [0], [1], [0, 0, 1, 1], [], []>} : vector<8x32xf32>, vector<32x128xf32>, vector<8x128xf32> -> vector<8x128xf32>
    %335 = arith.addf %331, %334 : vector<8x128xf32>
    %336 = vector.extract_strided_slice %335 {offsets = [0, 0], sizes = [8, 32], strides = [1, 1]} : vector<8x128xf32> to vector<8x32xf32>
    %cst_180 = arith.constant 5.000000e-01 : f32
    %337 = vector.broadcast %cst_180 : f32 to vector<8x32xf32>
    %338 = arith.mulf %337, %336 : vector<8x32xf32>
    %339 = math.tanh %338 : vector<8x32xf32>
    %cst_181 = arith.constant 5.000000e-01 : f32
    %340 = vector.broadcast %cst_181 : f32 to vector<8x32xf32>
    %341 = arith.mulf %340, %339 : vector<8x32xf32>
    %cst_182 = arith.constant 5.000000e-01 : f32
    %342 = vector.broadcast %cst_182 : f32 to vector<8x32xf32>
    %343 = arith.addf %341, %342 : vector<8x32xf32>
    %344 = vector.extract_strided_slice %335 {offsets = [0, 32], sizes = [8, 32], strides = [1, 1]} : vector<8x128xf32> to vector<8x32xf32>
    %cst_183 = arith.constant 5.000000e-01 : f32
    %345 = vector.broadcast %cst_183 : f32 to vector<8x32xf32>
    %346 = arith.mulf %345, %344 : vector<8x32xf32>
    %347 = math.tanh %346 : vector<8x32xf32>
    %cst_184 = arith.constant 5.000000e-01 : f32
    %348 = vector.broadcast %cst_184 : f32 to vector<8x32xf32>
    %349 = arith.mulf %348, %347 : vector<8x32xf32>
    %cst_185 = arith.constant 5.000000e-01 : f32
    %350 = vector.broadcast %cst_185 : f32 to vector<8x32xf32>
    %351 = arith.addf %349, %350 : vector<8x32xf32>
    %352 = vector.extract_strided_slice %335 {offsets = [0, 64], sizes = [8, 32], strides = [1, 1]} : vector<8x128xf32> to vector<8x32xf32>
    %353 = math.tanh %352 : vector<8x32xf32>
    %354 = vector.extract_strided_slice %335 {offsets = [0, 96], sizes = [8, 32], strides = [1, 1]} : vector<8x128xf32> to vector<8x32xf32>
    %cst_186 = arith.constant 5.000000e-01 : f32
    %355 = vector.broadcast %cst_186 : f32 to vector<8x32xf32>
    %356 = arith.mulf %355, %354 : vector<8x32xf32>
    %357 = math.tanh %356 : vector<8x32xf32>
    %cst_187 = arith.constant 5.000000e-01 : f32
    %358 = vector.broadcast %cst_187 : f32 to vector<8x32xf32>
    %359 = arith.mulf %358, %357 : vector<8x32xf32>
    %cst_188 = arith.constant 5.000000e-01 : f32
    %360 = vector.broadcast %cst_188 : f32 to vector<8x32xf32>
    %361 = arith.addf %359, %360 : vector<8x32xf32>
    %c0_189 = arith.constant 0 : index
    %c0_190 = arith.constant 0 : index
    %362 = vector.load %arg15[%c0_189, %c0_190] : memref<8x32xf32, #tpu.memory_space<vmem>>, vector<8x32xf32>
    %363 = arith.mulf %351, %362 : vector<8x32xf32>
    %364 = arith.mulf %343, %353 : vector<8x32xf32>
    %365 = arith.addf %363, %364 : vector<8x32xf32>
    %366 = math.tanh %365 : vector<8x32xf32>
    %367 = arith.mulf %361, %366 : vector<8x32xf32>
    %368 = vector.broadcast %328 : i32 to vector<8x1xi32>
    %369 = arith.cmpi sgt, %21, %368 : vector<8x1xi32>
    %c0_191 = arith.constant 0 : index
    %c0_192 = arith.constant 0 : index
    %370 = vector.load %arg15[%c0_191, %c0_192] : memref<8x32xf32, #tpu.memory_space<vmem>>, vector<8x32xf32>
    %371 = vector.shape_cast %369 : vector<8x1xi1> to vector<8x1xi1>
    %372 = vector.broadcast %371 : vector<8x1xi1> to vector<8x32xi1>
    %373 = arith.select %372, %365, %370 : vector<8x32xi1>, vector<8x32xf32>
    %c0_193 = arith.constant 0 : index
    %c0_194 = arith.constant 0 : index
    %374 = vector.load %arg15[%c0_193, %c0_194] : memref<8x32xf32, #tpu.memory_space<vmem>>, vector<8x32xf32>
    tpu.vector_store %arg15[%c0_193, %c0_194], %373 {strides = array<i32>} : memref<8x32xf32, #tpu.memory_space<vmem>>, vector<8x32xf32>,
    %c0_195 = arith.constant 0 : index
    %c0_196 = arith.constant 0 : index
    %375 = vector.load %arg14[%c0_195, %c0_196] : memref<8x32xf32, #tpu.memory_space<vmem>>, vector<8x32xf32>
    %376 = vector.shape_cast %369 : vector<8x1xi1> to vector<8x1xi1>
    %377 = vector.broadcast %376 : vector<8x1xi1> to vector<8x32xi1>
    %378 = arith.select %377, %367, %375 : vector<8x32xi1>, vector<8x32xf32>
    %c0_197 = arith.constant 0 : index
    %c0_198 = arith.constant 0 : index
    %379 = vector.load %arg14[%c0_197, %c0_198] : memref<8x32xf32, #tpu.memory_space<vmem>>, vector<8x32xf32>
    tpu.vector_store %arg14[%c0_197, %c0_198], %378 {strides = array<i32>} : memref<8x32xf32, #tpu.memory_space<vmem>>, vector<8x32xf32>,
    %cst_199 = arith.constant 0.000000e+00 : f32
    %380 = vector.shape_cast %369 : vector<8x1xi1> to vector<8x1xi1>
    %381 = vector.broadcast %380 : vector<8x1xi1> to vector<8x32xi1>
    %382 = vector.broadcast %cst_199 : f32 to vector<8x32xf32>
    %383 = arith.select %381, %367, %382 : vector<8x32xi1>, vector<8x32xf32>
    %384 = arith.index_cast %327 : i32 to index
    %c0_200 = arith.constant 0 : index
    %c0_201 = arith.constant 0 : index
    %385 = vector.load %arg11[%384, %c0_200, %c0_201] : memref<8x8x32xf32, #tpu.memory_space<vmem>>, vector<1x8x32xf32>
    %386 = vector.shape_cast %385 : vector<1x8x32xf32> to vector<8x32xf32>
    %387 = vector.shape_cast %383 : vector<8x32xf32> to vector<1x8x32xf32>
    tpu.vector_store %arg11[%384, %c0_200, %c0_201], %387 {strides = array<i32>} : memref<8x8x32xf32, #tpu.memory_space<vmem>>, vector<1x8x32xf32>,
    %c3_i32 = arith.constant 3 : i32
    %388 = arith.addi %22, %c3_i32 : i32
    %389 = arith.index_cast %c3_i32 : i32 to index
    %c0_202 = arith.constant 0 : index
    %c0_203 = arith.constant 0 : index
    %390 = vector.load %arg16[%389, %c0_202, %c0_203] : memref<8x8x128xf32, #tpu.memory_space<vmem>>, vector<1x8x128xf32>
    %391 = vector.shape_cast %390 : vector<1x8x128xf32> to vector<8x128xf32>
    %c0_204 = arith.constant 0 : index
    %c0_205 = arith.constant 0 : index
    %392 = vector.load %arg12[%c0_204, %c0_205] : memref<8x32xf32, #tpu.memory_space<vmem>>, vector<8x32xf32>
    %c0_206 = arith.constant 0 : index
    %c0_207 = arith.constant 0 : index
    %393 = vector.load %arg6[%c0_206, %c0_207] : memref<32x128xf32, #tpu.memory_space<vmem>>, vector<32x128xf32>
    %cst_208 = arith.constant dense<0.000000e+00> : vector<8x128xf32>
    %394 = tpu.matmul %392, %393, %cst_208 {dimension_numbers = #tpu.dot_dimension_numbers<[1], [0], [0], [1], [0, 0, 1, 1], [], []>} : vector<8x32xf32>, vector<32x128xf32>, vector<8x128xf32> -> vector<8x128xf32>
    %395 = arith.addf %391, %394 : vector<8x128xf32>
    %396 = vector.extract_strided_slice %395 {offsets = [0, 0], sizes = [8, 32], strides = [1, 1]} : vector<8x128xf32> to vector<8x32xf32>
    %cst_209 = arith.constant 5.000000e-01 : f32
    %397 = vector.broadcast %cst_209 : f32 to vector<8x32xf32>
    %398 = arith.mulf %397, %396 : vector<8x32xf32>
    %399 = math.tanh %398 : vector<8x32xf32>
    %cst_210 = arith.constant 5.000000e-01 : f32
    %400 = vector.broadcast %cst_210 : f32 to vector<8x32xf32>
    %401 = arith.mulf %400, %399 : vector<8x32xf32>
    %cst_211 = arith.constant 5.000000e-01 : f32
    %402 = vector.broadcast %cst_211 : f32 to vector<8x32xf32>
    %403 = arith.addf %401, %402 : vector<8x32xf32>
    %404 = vector.extract_strided_slice %395 {offsets = [0, 32], sizes = [8, 32], strides = [1, 1]} : vector<8x128xf32> to vector<8x32xf32>
    %cst_212 = arith.constant 5.000000e-01 : f32
    %405 = vector.broadcast %cst_212 : f32 to vector<8x32xf32>
    %406 = arith.mulf %405, %404 : vector<8x32xf32>
    %407 = math.tanh %406 : vector<8x32xf32>
    %cst_213 = arith.constant 5.000000e-01 : f32
    %408 = vector.broadcast %cst_213 : f32 to vector<8x32xf32>
    %409 = arith.mulf %408, %407 : vector<8x32xf32>
    %cst_214 = arith.constant 5.000000e-01 : f32
    %410 = vector.broadcast %cst_214 : f32 to vector<8x32xf32>
    %411 = arith.addf %409, %410 : vector<8x32xf32>
    %412 = vector.extract_strided_slice %395 {offsets = [0, 64], sizes = [8, 32], strides = [1, 1]} : vector<8x128xf32> to vector<8x32xf32>
    %413 = math.tanh %412 : vector<8x32xf32>
    %414 = vector.extract_strided_slice %395 {offsets = [0, 96], sizes = [8, 32], strides = [1, 1]} : vector<8x128xf32> to vector<8x32xf32>
    %cst_215 = arith.constant 5.000000e-01 : f32
    %415 = vector.broadcast %cst_215 : f32 to vector<8x32xf32>
    %416 = arith.mulf %415, %414 : vector<8x32xf32>
    %417 = math.tanh %416 : vector<8x32xf32>
    %cst_216 = arith.constant 5.000000e-01 : f32
    %418 = vector.broadcast %cst_216 : f32 to vector<8x32xf32>
    %419 = arith.mulf %418, %417 : vector<8x32xf32>
    %cst_217 = arith.constant 5.000000e-01 : f32
    %420 = vector.broadcast %cst_217 : f32 to vector<8x32xf32>
    %421 = arith.addf %419, %420 : vector<8x32xf32>
    %c0_218 = arith.constant 0 : index
    %c0_219 = arith.constant 0 : index
    %422 = vector.load %arg13[%c0_218, %c0_219] : memref<8x32xf32, #tpu.memory_space<vmem>>, vector<8x32xf32>
    %423 = arith.mulf %411, %422 : vector<8x32xf32>
    %424 = arith.mulf %403, %413 : vector<8x32xf32>
    %425 = arith.addf %423, %424 : vector<8x32xf32>
    %426 = math.tanh %425 : vector<8x32xf32>
    %427 = arith.mulf %421, %426 : vector<8x32xf32>
    %428 = vector.broadcast %388 : i32 to vector<8x1xi32>
    %429 = arith.cmpi sgt, %21, %428 : vector<8x1xi32>
    %c0_220 = arith.constant 0 : index
    %c0_221 = arith.constant 0 : index
    %430 = vector.load %arg13[%c0_220, %c0_221] : memref<8x32xf32, #tpu.memory_space<vmem>>, vector<8x32xf32>
    %431 = vector.shape_cast %429 : vector<8x1xi1> to vector<8x1xi1>
    %432 = vector.broadcast %431 : vector<8x1xi1> to vector<8x32xi1>
    %433 = arith.select %432, %425, %430 : vector<8x32xi1>, vector<8x32xf32>
    %c0_222 = arith.constant 0 : index
    %c0_223 = arith.constant 0 : index
    %434 = vector.load %arg13[%c0_222, %c0_223] : memref<8x32xf32, #tpu.memory_space<vmem>>, vector<8x32xf32>
    tpu.vector_store %arg13[%c0_222, %c0_223], %433 {strides = array<i32>} : memref<8x32xf32, #tpu.memory_space<vmem>>, vector<8x32xf32>,
    %c0_224 = arith.constant 0 : index
    %c0_225 = arith.constant 0 : index
    %435 = vector.load %arg12[%c0_224, %c0_225] : memref<8x32xf32, #tpu.memory_space<vmem>>, vector<8x32xf32>
    %436 = vector.shape_cast %429 : vector<8x1xi1> to vector<8x1xi1>
    %437 = vector.broadcast %436 : vector<8x1xi1> to vector<8x32xi1>
    %438 = arith.select %437, %427, %435 : vector<8x32xi1>, vector<8x32xf32>
    %c0_226 = arith.constant 0 : index
    %c0_227 = arith.constant 0 : index
    %439 = vector.load %arg12[%c0_226, %c0_227] : memref<8x32xf32, #tpu.memory_space<vmem>>, vector<8x32xf32>
    tpu.vector_store %arg12[%c0_226, %c0_227], %438 {strides = array<i32>} : memref<8x32xf32, #tpu.memory_space<vmem>>, vector<8x32xf32>,
    %cst_228 = arith.constant 0.000000e+00 : f32
    %440 = vector.shape_cast %429 : vector<8x1xi1> to vector<8x1xi1>
    %441 = vector.broadcast %440 : vector<8x1xi1> to vector<8x32xi1>
    %442 = vector.broadcast %cst_228 : f32 to vector<8x32xf32>
    %443 = arith.select %441, %427, %442 : vector<8x32xi1>, vector<8x32xf32>
    %444 = arith.index_cast %c3_i32 : i32 to index
    %c0_229 = arith.constant 0 : index
    %c0_230 = arith.constant 0 : index
    %445 = vector.load %arg10[%444, %c0_229, %c0_230] : memref<8x8x32xf32, #tpu.memory_space<vmem>>, vector<1x8x32xf32>
    %446 = vector.shape_cast %445 : vector<1x8x32xf32> to vector<8x32xf32>
    %447 = vector.shape_cast %443 : vector<8x32xf32> to vector<1x8x32xf32>
    tpu.vector_store %arg10[%444, %c0_229, %c0_230], %447 {strides = array<i32>} : memref<8x8x32xf32, #tpu.memory_space<vmem>>, vector<1x8x32xf32>,
    %c7_i32_231 = arith.constant 7 : i32
    %448 = arith.subi %c7_i32_231, %c3_i32 : i32
    %449 = arith.addi %24, %448 : i32
    %450 = arith.index_cast %448 : i32 to index
    %c0_232 = arith.constant 0 : index
    %c0_233 = arith.constant 0 : index
    %451 = vector.load %arg17[%450, %c0_232, %c0_233] : memref<8x8x128xf32, #tpu.memory_space<vmem>>, vector<1x8x128xf32>
    %452 = vector.shape_cast %451 : vector<1x8x128xf32> to vector<8x128xf32>
    %c0_234 = arith.constant 0 : index
    %c0_235 = arith.constant 0 : index
    %453 = vector.load %arg14[%c0_234, %c0_235] : memref<8x32xf32, #tpu.memory_space<vmem>>, vector<8x32xf32>
    %c0_236 = arith.constant 0 : index
    %c0_237 = arith.constant 0 : index
    %454 = vector.load %arg7[%c0_236, %c0_237] : memref<32x128xf32, #tpu.memory_space<vmem>>, vector<32x128xf32>
    %cst_238 = arith.constant dense<0.000000e+00> : vector<8x128xf32>
    %455 = tpu.matmul %453, %454, %cst_238 {dimension_numbers = #tpu.dot_dimension_numbers<[1], [0], [0], [1], [0, 0, 1, 1], [], []>} : vector<8x32xf32>, vector<32x128xf32>, vector<8x128xf32> -> vector<8x128xf32>
    %456 = arith.addf %452, %455 : vector<8x128xf32>
    %457 = vector.extract_strided_slice %456 {offsets = [0, 0], sizes = [8, 32], strides = [1, 1]} : vector<8x128xf32> to vector<8x32xf32>
    %cst_239 = arith.constant 5.000000e-01 : f32
    %458 = vector.broadcast %cst_239 : f32 to vector<8x32xf32>
    %459 = arith.mulf %458, %457 : vector<8x32xf32>
    %460 = math.tanh %459 : vector<8x32xf32>
    %cst_240 = arith.constant 5.000000e-01 : f32
    %461 = vector.broadcast %cst_240 : f32 to vector<8x32xf32>
    %462 = arith.mulf %461, %460 : vector<8x32xf32>
    %cst_241 = arith.constant 5.000000e-01 : f32
    %463 = vector.broadcast %cst_241 : f32 to vector<8x32xf32>
    %464 = arith.addf %462, %463 : vector<8x32xf32>
    %465 = vector.extract_strided_slice %456 {offsets = [0, 32], sizes = [8, 32], strides = [1, 1]} : vector<8x128xf32> to vector<8x32xf32>
    %cst_242 = arith.constant 5.000000e-01 : f32
    %466 = vector.broadcast %cst_242 : f32 to vector<8x32xf32>
    %467 = arith.mulf %466, %465 : vector<8x32xf32>
    %468 = math.tanh %467 : vector<8x32xf32>
    %cst_243 = arith.constant 5.000000e-01 : f32
    %469 = vector.broadcast %cst_243 : f32 to vector<8x32xf32>
    %470 = arith.mulf %469, %468 : vector<8x32xf32>
    %cst_244 = arith.constant 5.000000e-01 : f32
    %471 = vector.broadcast %cst_244 : f32 to vector<8x32xf32>
    %472 = arith.addf %470, %471 : vector<8x32xf32>
    %473 = vector.extract_strided_slice %456 {offsets = [0, 64], sizes = [8, 32], strides = [1, 1]} : vector<8x128xf32> to vector<8x32xf32>
    %474 = math.tanh %473 : vector<8x32xf32>
    %475 = vector.extract_strided_slice %456 {offsets = [0, 96], sizes = [8, 32], strides = [1, 1]} : vector<8x128xf32> to vector<8x32xf32>
    %cst_245 = arith.constant 5.000000e-01 : f32
    %476 = vector.broadcast %cst_245 : f32 to vector<8x32xf32>
    %477 = arith.mulf %476, %475 : vector<8x32xf32>
    %478 = math.tanh %477 : vector<8x32xf32>
    %cst_246 = arith.constant 5.000000e-01 : f32
    %479 = vector.broadcast %cst_246 : f32 to vector<8x32xf32>
    %480 = arith.mulf %479, %478 : vector<8x32xf32>
    %cst_247 = arith.constant 5.000000e-01 : f32
    %481 = vector.broadcast %cst_247 : f32 to vector<8x32xf32>
    %482 = arith.addf %480, %481 : vector<8x32xf32>
    %c0_248 = arith.constant 0 : index
    %c0_249 = arith.constant 0 : index
    %483 = vector.load %arg15[%c0_248, %c0_249] : memref<8x32xf32, #tpu.memory_space<vmem>>, vector<8x32xf32>
    %484 = arith.mulf %472, %483 : vector<8x32xf32>
    %485 = arith.mulf %464, %474 : vector<8x32xf32>
    %486 = arith.addf %484, %485 : vector<8x32xf32>
    %487 = math.tanh %486 : vector<8x32xf32>
    %488 = arith.mulf %482, %487 : vector<8x32xf32>
    %489 = vector.broadcast %449 : i32 to vector<8x1xi32>
    %490 = arith.cmpi sgt, %21, %489 : vector<8x1xi32>
    %c0_250 = arith.constant 0 : index
    %c0_251 = arith.constant 0 : index
    %491 = vector.load %arg15[%c0_250, %c0_251] : memref<8x32xf32, #tpu.memory_space<vmem>>, vector<8x32xf32>
    %492 = vector.shape_cast %490 : vector<8x1xi1> to vector<8x1xi1>
    %493 = vector.broadcast %492 : vector<8x1xi1> to vector<8x32xi1>
    %494 = arith.select %493, %486, %491 : vector<8x32xi1>, vector<8x32xf32>
    %c0_252 = arith.constant 0 : index
    %c0_253 = arith.constant 0 : index
    %495 = vector.load %arg15[%c0_252, %c0_253] : memref<8x32xf32, #tpu.memory_space<vmem>>, vector<8x32xf32>
    tpu.vector_store %arg15[%c0_252, %c0_253], %494 {strides = array<i32>} : memref<8x32xf32, #tpu.memory_space<vmem>>, vector<8x32xf32>,
    %c0_254 = arith.constant 0 : index
    %c0_255 = arith.constant 0 : index
    %496 = vector.load %arg14[%c0_254, %c0_255] : memref<8x32xf32, #tpu.memory_space<vmem>>, vector<8x32xf32>
    %497 = vector.shape_cast %490 : vector<8x1xi1> to vector<8x1xi1>
    %498 = vector.broadcast %497 : vector<8x1xi1> to vector<8x32xi1>
    %499 = arith.select %498, %488, %496 : vector<8x32xi1>, vector<8x32xf32>
    %c0_256 = arith.constant 0 : index
    %c0_257 = arith.constant 0 : index
    %500 = vector.load %arg14[%c0_256, %c0_257] : memref<8x32xf32, #tpu.memory_space<vmem>>, vector<8x32xf32>
    tpu.vector_store %arg14[%c0_256, %c0_257], %499 {strides = array<i32>} : memref<8x32xf32, #tpu.memory_space<vmem>>, vector<8x32xf32>,
    %cst_258 = arith.constant 0.000000e+00 : f32
    %501 = vector.shape_cast %490 : vector<8x1xi1> to vector<8x1xi1>
    %502 = vector.broadcast %501 : vector<8x1xi1> to vector<8x32xi1>
    %503 = vector.broadcast %cst_258 : f32 to vector<8x32xf32>
    %504 = arith.select %502, %488, %503 : vector<8x32xi1>, vector<8x32xf32>
    %505 = arith.index_cast %448 : i32 to index
    %c0_259 = arith.constant 0 : index
    %c0_260 = arith.constant 0 : index
    %506 = vector.load %arg11[%505, %c0_259, %c0_260] : memref<8x8x32xf32, #tpu.memory_space<vmem>>, vector<1x8x32xf32>
    %507 = vector.shape_cast %506 : vector<1x8x32xf32> to vector<8x32xf32>
    %508 = vector.shape_cast %504 : vector<8x32xf32> to vector<1x8x32xf32>
    tpu.vector_store %arg11[%505, %c0_259, %c0_260], %508 {strides = array<i32>} : memref<8x8x32xf32, #tpu.memory_space<vmem>>, vector<1x8x32xf32>,
    %c4_i32 = arith.constant 4 : i32
    %509 = arith.addi %22, %c4_i32 : i32
    %510 = arith.index_cast %c4_i32 : i32 to index
    %c0_261 = arith.constant 0 : index
    %c0_262 = arith.constant 0 : index
    %511 = vector.load %arg16[%510, %c0_261, %c0_262] : memref<8x8x128xf32, #tpu.memory_space<vmem>>, vector<1x8x128xf32>
    %512 = vector.shape_cast %511 : vector<1x8x128xf32> to vector<8x128xf32>
    %c0_263 = arith.constant 0 : index
    %c0_264 = arith.constant 0 : index
    %513 = vector.load %arg12[%c0_263, %c0_264] : memref<8x32xf32, #tpu.memory_space<vmem>>, vector<8x32xf32>
    %c0_265 = arith.constant 0 : index
    %c0_266 = arith.constant 0 : index
    %514 = vector.load %arg6[%c0_265, %c0_266] : memref<32x128xf32, #tpu.memory_space<vmem>>, vector<32x128xf32>
    %cst_267 = arith.constant dense<0.000000e+00> : vector<8x128xf32>
    %515 = tpu.matmul %513, %514, %cst_267 {dimension_numbers = #tpu.dot_dimension_numbers<[1], [0], [0], [1], [0, 0, 1, 1], [], []>} : vector<8x32xf32>, vector<32x128xf32>, vector<8x128xf32> -> vector<8x128xf32>
    %516 = arith.addf %512, %515 : vector<8x128xf32>
    %517 = vector.extract_strided_slice %516 {offsets = [0, 0], sizes = [8, 32], strides = [1, 1]} : vector<8x128xf32> to vector<8x32xf32>
    %cst_268 = arith.constant 5.000000e-01 : f32
    %518 = vector.broadcast %cst_268 : f32 to vector<8x32xf32>
    %519 = arith.mulf %518, %517 : vector<8x32xf32>
    %520 = math.tanh %519 : vector<8x32xf32>
    %cst_269 = arith.constant 5.000000e-01 : f32
    %521 = vector.broadcast %cst_269 : f32 to vector<8x32xf32>
    %522 = arith.mulf %521, %520 : vector<8x32xf32>
    %cst_270 = arith.constant 5.000000e-01 : f32
    %523 = vector.broadcast %cst_270 : f32 to vector<8x32xf32>
    %524 = arith.addf %522, %523 : vector<8x32xf32>
    %525 = vector.extract_strided_slice %516 {offsets = [0, 32], sizes = [8, 32], strides = [1, 1]} : vector<8x128xf32> to vector<8x32xf32>
    %cst_271 = arith.constant 5.000000e-01 : f32
    %526 = vector.broadcast %cst_271 : f32 to vector<8x32xf32>
    %527 = arith.mulf %526, %525 : vector<8x32xf32>
    %528 = math.tanh %527 : vector<8x32xf32>
    %cst_272 = arith.constant 5.000000e-01 : f32
    %529 = vector.broadcast %cst_272 : f32 to vector<8x32xf32>
    %530 = arith.mulf %529, %528 : vector<8x32xf32>
    %cst_273 = arith.constant 5.000000e-01 : f32
    %531 = vector.broadcast %cst_273 : f32 to vector<8x32xf32>
    %532 = arith.addf %530, %531 : vector<8x32xf32>
    %533 = vector.extract_strided_slice %516 {offsets = [0, 64], sizes = [8, 32], strides = [1, 1]} : vector<8x128xf32> to vector<8x32xf32>
    %534 = math.tanh %533 : vector<8x32xf32>
    %535 = vector.extract_strided_slice %516 {offsets = [0, 96], sizes = [8, 32], strides = [1, 1]} : vector<8x128xf32> to vector<8x32xf32>
    %cst_274 = arith.constant 5.000000e-01 : f32
    %536 = vector.broadcast %cst_274 : f32 to vector<8x32xf32>
    %537 = arith.mulf %536, %535 : vector<8x32xf32>
    %538 = math.tanh %537 : vector<8x32xf32>
    %cst_275 = arith.constant 5.000000e-01 : f32
    %539 = vector.broadcast %cst_275 : f32 to vector<8x32xf32>
    %540 = arith.mulf %539, %538 : vector<8x32xf32>
    %cst_276 = arith.constant 5.000000e-01 : f32
    %541 = vector.broadcast %cst_276 : f32 to vector<8x32xf32>
    %542 = arith.addf %540, %541 : vector<8x32xf32>
    %c0_277 = arith.constant 0 : index
    %c0_278 = arith.constant 0 : index
    %543 = vector.load %arg13[%c0_277, %c0_278] : memref<8x32xf32, #tpu.memory_space<vmem>>, vector<8x32xf32>
    %544 = arith.mulf %532, %543 : vector<8x32xf32>
    %545 = arith.mulf %524, %534 : vector<8x32xf32>
    %546 = arith.addf %544, %545 : vector<8x32xf32>
    %547 = math.tanh %546 : vector<8x32xf32>
    %548 = arith.mulf %542, %547 : vector<8x32xf32>
    %549 = vector.broadcast %509 : i32 to vector<8x1xi32>
    %550 = arith.cmpi sgt, %21, %549 : vector<8x1xi32>
    %c0_279 = arith.constant 0 : index
    %c0_280 = arith.constant 0 : index
    %551 = vector.load %arg13[%c0_279, %c0_280] : memref<8x32xf32, #tpu.memory_space<vmem>>, vector<8x32xf32>
    %552 = vector.shape_cast %550 : vector<8x1xi1> to vector<8x1xi1>
    %553 = vector.broadcast %552 : vector<8x1xi1> to vector<8x32xi1>
    %554 = arith.select %553, %546, %551 : vector<8x32xi1>, vector<8x32xf32>
    %c0_281 = arith.constant 0 : index
    %c0_282 = arith.constant 0 : index
    %555 = vector.load %arg13[%c0_281, %c0_282] : memref<8x32xf32, #tpu.memory_space<vmem>>, vector<8x32xf32>
    tpu.vector_store %arg13[%c0_281, %c0_282], %554 {strides = array<i32>} : memref<8x32xf32, #tpu.memory_space<vmem>>, vector<8x32xf32>,
    %c0_283 = arith.constant 0 : index
    %c0_284 = arith.constant 0 : index
    %556 = vector.load %arg12[%c0_283, %c0_284] : memref<8x32xf32, #tpu.memory_space<vmem>>, vector<8x32xf32>
    %557 = vector.shape_cast %550 : vector<8x1xi1> to vector<8x1xi1>
    %558 = vector.broadcast %557 : vector<8x1xi1> to vector<8x32xi1>
    %559 = arith.select %558, %548, %556 : vector<8x32xi1>, vector<8x32xf32>
    %c0_285 = arith.constant 0 : index
    %c0_286 = arith.constant 0 : index
    %560 = vector.load %arg12[%c0_285, %c0_286] : memref<8x32xf32, #tpu.memory_space<vmem>>, vector<8x32xf32>
    tpu.vector_store %arg12[%c0_285, %c0_286], %559 {strides = array<i32>} : memref<8x32xf32, #tpu.memory_space<vmem>>, vector<8x32xf32>,
    %cst_287 = arith.constant 0.000000e+00 : f32
    %561 = vector.shape_cast %550 : vector<8x1xi1> to vector<8x1xi1>
    %562 = vector.broadcast %561 : vector<8x1xi1> to vector<8x32xi1>
    %563 = vector.broadcast %cst_287 : f32 to vector<8x32xf32>
    %564 = arith.select %562, %548, %563 : vector<8x32xi1>, vector<8x32xf32>
    %565 = arith.index_cast %c4_i32 : i32 to index
    %c0_288 = arith.constant 0 : index
    %c0_289 = arith.constant 0 : index
    %566 = vector.load %arg10[%565, %c0_288, %c0_289] : memref<8x8x32xf32, #tpu.memory_space<vmem>>, vector<1x8x32xf32>
    %567 = vector.shape_cast %566 : vector<1x8x32xf32> to vector<8x32xf32>
    %568 = vector.shape_cast %564 : vector<8x32xf32> to vector<1x8x32xf32>
    tpu.vector_store %arg10[%565, %c0_288, %c0_289], %568 {strides = array<i32>} : memref<8x8x32xf32, #tpu.memory_space<vmem>>, vector<1x8x32xf32>,
    %c7_i32_290 = arith.constant 7 : i32
    %569 = arith.subi %c7_i32_290, %c4_i32 : i32
    %570 = arith.addi %24, %569 : i32
    %571 = arith.index_cast %569 : i32 to index
    %c0_291 = arith.constant 0 : index
    %c0_292 = arith.constant 0 : index
    %572 = vector.load %arg17[%571, %c0_291, %c0_292] : memref<8x8x128xf32, #tpu.memory_space<vmem>>, vector<1x8x128xf32>
    %573 = vector.shape_cast %572 : vector<1x8x128xf32> to vector<8x128xf32>
    %c0_293 = arith.constant 0 : index
    %c0_294 = arith.constant 0 : index
    %574 = vector.load %arg14[%c0_293, %c0_294] : memref<8x32xf32, #tpu.memory_space<vmem>>, vector<8x32xf32>
    %c0_295 = arith.constant 0 : index
    %c0_296 = arith.constant 0 : index
    %575 = vector.load %arg7[%c0_295, %c0_296] : memref<32x128xf32, #tpu.memory_space<vmem>>, vector<32x128xf32>
    %cst_297 = arith.constant dense<0.000000e+00> : vector<8x128xf32>
    %576 = tpu.matmul %574, %575, %cst_297 {dimension_numbers = #tpu.dot_dimension_numbers<[1], [0], [0], [1], [0, 0, 1, 1], [], []>} : vector<8x32xf32>, vector<32x128xf32>, vector<8x128xf32> -> vector<8x128xf32>
    %577 = arith.addf %573, %576 : vector<8x128xf32>
    %578 = vector.extract_strided_slice %577 {offsets = [0, 0], sizes = [8, 32], strides = [1, 1]} : vector<8x128xf32> to vector<8x32xf32>
    %cst_298 = arith.constant 5.000000e-01 : f32
    %579 = vector.broadcast %cst_298 : f32 to vector<8x32xf32>
    %580 = arith.mulf %579, %578 : vector<8x32xf32>
    %581 = math.tanh %580 : vector<8x32xf32>
    %cst_299 = arith.constant 5.000000e-01 : f32
    %582 = vector.broadcast %cst_299 : f32 to vector<8x32xf32>
    %583 = arith.mulf %582, %581 : vector<8x32xf32>
    %cst_300 = arith.constant 5.000000e-01 : f32
    %584 = vector.broadcast %cst_300 : f32 to vector<8x32xf32>
    %585 = arith.addf %583, %584 : vector<8x32xf32>
    %586 = vector.extract_strided_slice %577 {offsets = [0, 32], sizes = [8, 32], strides = [1, 1]} : vector<8x128xf32> to vector<8x32xf32>
    %cst_301 = arith.constant 5.000000e-01 : f32
    %587 = vector.broadcast %cst_301 : f32 to vector<8x32xf32>
    %588 = arith.mulf %587, %586 : vector<8x32xf32>
    %589 = math.tanh %588 : vector<8x32xf32>
    %cst_302 = arith.constant 5.000000e-01 : f32
    %590 = vector.broadcast %cst_302 : f32 to vector<8x32xf32>
    %591 = arith.mulf %590, %589 : vector<8x32xf32>
    %cst_303 = arith.constant 5.000000e-01 : f32
    %592 = vector.broadcast %cst_303 : f32 to vector<8x32xf32>
    %593 = arith.addf %591, %592 : vector<8x32xf32>
    %594 = vector.extract_strided_slice %577 {offsets = [0, 64], sizes = [8, 32], strides = [1, 1]} : vector<8x128xf32> to vector<8x32xf32>
    %595 = math.tanh %594 : vector<8x32xf32>
    %596 = vector.extract_strided_slice %577 {offsets = [0, 96], sizes = [8, 32], strides = [1, 1]} : vector<8x128xf32> to vector<8x32xf32>
    %cst_304 = arith.constant 5.000000e-01 : f32
    %597 = vector.broadcast %cst_304 : f32 to vector<8x32xf32>
    %598 = arith.mulf %597, %596 : vector<8x32xf32>
    %599 = math.tanh %598 : vector<8x32xf32>
    %cst_305 = arith.constant 5.000000e-01 : f32
    %600 = vector.broadcast %cst_305 : f32 to vector<8x32xf32>
    %601 = arith.mulf %600, %599 : vector<8x32xf32>
    %cst_306 = arith.constant 5.000000e-01 : f32
    %602 = vector.broadcast %cst_306 : f32 to vector<8x32xf32>
    %603 = arith.addf %601, %602 : vector<8x32xf32>
    %c0_307 = arith.constant 0 : index
    %c0_308 = arith.constant 0 : index
    %604 = vector.load %arg15[%c0_307, %c0_308] : memref<8x32xf32, #tpu.memory_space<vmem>>, vector<8x32xf32>
    %605 = arith.mulf %593, %604 : vector<8x32xf32>
    %606 = arith.mulf %585, %595 : vector<8x32xf32>
    %607 = arith.addf %605, %606 : vector<8x32xf32>
    %608 = math.tanh %607 : vector<8x32xf32>
    %609 = arith.mulf %603, %608 : vector<8x32xf32>
    %610 = vector.broadcast %570 : i32 to vector<8x1xi32>
    %611 = arith.cmpi sgt, %21, %610 : vector<8x1xi32>
    %c0_309 = arith.constant 0 : index
    %c0_310 = arith.constant 0 : index
    %612 = vector.load %arg15[%c0_309, %c0_310] : memref<8x32xf32, #tpu.memory_space<vmem>>, vector<8x32xf32>
    %613 = vector.shape_cast %611 : vector<8x1xi1> to vector<8x1xi1>
    %614 = vector.broadcast %613 : vector<8x1xi1> to vector<8x32xi1>
    %615 = arith.select %614, %607, %612 : vector<8x32xi1>, vector<8x32xf32>
    %c0_311 = arith.constant 0 : index
    %c0_312 = arith.constant 0 : index
    %616 = vector.load %arg15[%c0_311, %c0_312] : memref<8x32xf32, #tpu.memory_space<vmem>>, vector<8x32xf32>
    tpu.vector_store %arg15[%c0_311, %c0_312], %615 {strides = array<i32>} : memref<8x32xf32, #tpu.memory_space<vmem>>, vector<8x32xf32>,
    %c0_313 = arith.constant 0 : index
    %c0_314 = arith.constant 0 : index
    %617 = vector.load %arg14[%c0_313, %c0_314] : memref<8x32xf32, #tpu.memory_space<vmem>>, vector<8x32xf32>
    %618 = vector.shape_cast %611 : vector<8x1xi1> to vector<8x1xi1>
    %619 = vector.broadcast %618 : vector<8x1xi1> to vector<8x32xi1>
    %620 = arith.select %619, %609, %617 : vector<8x32xi1>, vector<8x32xf32>
    %c0_315 = arith.constant 0 : index
    %c0_316 = arith.constant 0 : index
    %621 = vector.load %arg14[%c0_315, %c0_316] : memref<8x32xf32, #tpu.memory_space<vmem>>, vector<8x32xf32>
    tpu.vector_store %arg14[%c0_315, %c0_316], %620 {strides = array<i32>} : memref<8x32xf32, #tpu.memory_space<vmem>>, vector<8x32xf32>,
    %cst_317 = arith.constant 0.000000e+00 : f32
    %622 = vector.shape_cast %611 : vector<8x1xi1> to vector<8x1xi1>
    %623 = vector.broadcast %622 : vector<8x1xi1> to vector<8x32xi1>
    %624 = vector.broadcast %cst_317 : f32 to vector<8x32xf32>
    %625 = arith.select %623, %609, %624 : vector<8x32xi1>, vector<8x32xf32>
    %626 = arith.index_cast %569 : i32 to index
    %c0_318 = arith.constant 0 : index
    %c0_319 = arith.constant 0 : index
    %627 = vector.load %arg11[%626, %c0_318, %c0_319] : memref<8x8x32xf32, #tpu.memory_space<vmem>>, vector<1x8x32xf32>
    %628 = vector.shape_cast %627 : vector<1x8x32xf32> to vector<8x32xf32>
    %629 = vector.shape_cast %625 : vector<8x32xf32> to vector<1x8x32xf32>
    tpu.vector_store %arg11[%626, %c0_318, %c0_319], %629 {strides = array<i32>} : memref<8x8x32xf32, #tpu.memory_space<vmem>>, vector<1x8x32xf32>,
    %c5_i32 = arith.constant 5 : i32
    %630 = arith.addi %22, %c5_i32 : i32
    %631 = arith.index_cast %c5_i32 : i32 to index
    %c0_320 = arith.constant 0 : index
    %c0_321 = arith.constant 0 : index
    %632 = vector.load %arg16[%631, %c0_320, %c0_321] : memref<8x8x128xf32, #tpu.memory_space<vmem>>, vector<1x8x128xf32>
    %633 = vector.shape_cast %632 : vector<1x8x128xf32> to vector<8x128xf32>
    %c0_322 = arith.constant 0 : index
    %c0_323 = arith.constant 0 : index
    %634 = vector.load %arg12[%c0_322, %c0_323] : memref<8x32xf32, #tpu.memory_space<vmem>>, vector<8x32xf32>
    %c0_324 = arith.constant 0 : index
    %c0_325 = arith.constant 0 : index
    %635 = vector.load %arg6[%c0_324, %c0_325] : memref<32x128xf32, #tpu.memory_space<vmem>>, vector<32x128xf32>
    %cst_326 = arith.constant dense<0.000000e+00> : vector<8x128xf32>
    %636 = tpu.matmul %634, %635, %cst_326 {dimension_numbers = #tpu.dot_dimension_numbers<[1], [0], [0], [1], [0, 0, 1, 1], [], []>} : vector<8x32xf32>, vector<32x128xf32>, vector<8x128xf32> -> vector<8x128xf32>
    %637 = arith.addf %633, %636 : vector<8x128xf32>
    %638 = vector.extract_strided_slice %637 {offsets = [0, 0], sizes = [8, 32], strides = [1, 1]} : vector<8x128xf32> to vector<8x32xf32>
    %cst_327 = arith.constant 5.000000e-01 : f32
    %639 = vector.broadcast %cst_327 : f32 to vector<8x32xf32>
    %640 = arith.mulf %639, %638 : vector<8x32xf32>
    %641 = math.tanh %640 : vector<8x32xf32>
    %cst_328 = arith.constant 5.000000e-01 : f32
    %642 = vector.broadcast %cst_328 : f32 to vector<8x32xf32>
    %643 = arith.mulf %642, %641 : vector<8x32xf32>
    %cst_329 = arith.constant 5.000000e-01 : f32
    %644 = vector.broadcast %cst_329 : f32 to vector<8x32xf32>
    %645 = arith.addf %643, %644 : vector<8x32xf32>
    %646 = vector.extract_strided_slice %637 {offsets = [0, 32], sizes = [8, 32], strides = [1, 1]} : vector<8x128xf32> to vector<8x32xf32>
    %cst_330 = arith.constant 5.000000e-01 : f32
    %647 = vector.broadcast %cst_330 : f32 to vector<8x32xf32>
    %648 = arith.mulf %647, %646 : vector<8x32xf32>
    %649 = math.tanh %648 : vector<8x32xf32>
    %cst_331 = arith.constant 5.000000e-01 : f32
    %650 = vector.broadcast %cst_331 : f32 to vector<8x32xf32>
    %651 = arith.mulf %650, %649 : vector<8x32xf32>
    %cst_332 = arith.constant 5.000000e-01 : f32
    %652 = vector.broadcast %cst_332 : f32 to vector<8x32xf32>
    %653 = arith.addf %651, %652 : vector<8x32xf32>
    %654 = vector.extract_strided_slice %637 {offsets = [0, 64], sizes = [8, 32], strides = [1, 1]} : vector<8x128xf32> to vector<8x32xf32>
    %655 = math.tanh %654 : vector<8x32xf32>
    %656 = vector.extract_strided_slice %637 {offsets = [0, 96], sizes = [8, 32], strides = [1, 1]} : vector<8x128xf32> to vector<8x32xf32>
    %cst_333 = arith.constant 5.000000e-01 : f32
    %657 = vector.broadcast %cst_333 : f32 to vector<8x32xf32>
    %658 = arith.mulf %657, %656 : vector<8x32xf32>
    %659 = math.tanh %658 : vector<8x32xf32>
    %cst_334 = arith.constant 5.000000e-01 : f32
    %660 = vector.broadcast %cst_334 : f32 to vector<8x32xf32>
    %661 = arith.mulf %660, %659 : vector<8x32xf32>
    %cst_335 = arith.constant 5.000000e-01 : f32
    %662 = vector.broadcast %cst_335 : f32 to vector<8x32xf32>
    %663 = arith.addf %661, %662 : vector<8x32xf32>
    %c0_336 = arith.constant 0 : index
    %c0_337 = arith.constant 0 : index
    %664 = vector.load %arg13[%c0_336, %c0_337] : memref<8x32xf32, #tpu.memory_space<vmem>>, vector<8x32xf32>
    %665 = arith.mulf %653, %664 : vector<8x32xf32>
    %666 = arith.mulf %645, %655 : vector<8x32xf32>
    %667 = arith.addf %665, %666 : vector<8x32xf32>
    %668 = math.tanh %667 : vector<8x32xf32>
    %669 = arith.mulf %663, %668 : vector<8x32xf32>
    %670 = vector.broadcast %630 : i32 to vector<8x1xi32>
    %671 = arith.cmpi sgt, %21, %670 : vector<8x1xi32>
    %c0_338 = arith.constant 0 : index
    %c0_339 = arith.constant 0 : index
    %672 = vector.load %arg13[%c0_338, %c0_339] : memref<8x32xf32, #tpu.memory_space<vmem>>, vector<8x32xf32>
    %673 = vector.shape_cast %671 : vector<8x1xi1> to vector<8x1xi1>
    %674 = vector.broadcast %673 : vector<8x1xi1> to vector<8x32xi1>
    %675 = arith.select %674, %667, %672 : vector<8x32xi1>, vector<8x32xf32>
    %c0_340 = arith.constant 0 : index
    %c0_341 = arith.constant 0 : index
    %676 = vector.load %arg13[%c0_340, %c0_341] : memref<8x32xf32, #tpu.memory_space<vmem>>, vector<8x32xf32>
    tpu.vector_store %arg13[%c0_340, %c0_341], %675 {strides = array<i32>} : memref<8x32xf32, #tpu.memory_space<vmem>>, vector<8x32xf32>,
    %c0_342 = arith.constant 0 : index
    %c0_343 = arith.constant 0 : index
    %677 = vector.load %arg12[%c0_342, %c0_343] : memref<8x32xf32, #tpu.memory_space<vmem>>, vector<8x32xf32>
    %678 = vector.shape_cast %671 : vector<8x1xi1> to vector<8x1xi1>
    %679 = vector.broadcast %678 : vector<8x1xi1> to vector<8x32xi1>
    %680 = arith.select %679, %669, %677 : vector<8x32xi1>, vector<8x32xf32>
    %c0_344 = arith.constant 0 : index
    %c0_345 = arith.constant 0 : index
    %681 = vector.load %arg12[%c0_344, %c0_345] : memref<8x32xf32, #tpu.memory_space<vmem>>, vector<8x32xf32>
    tpu.vector_store %arg12[%c0_344, %c0_345], %680 {strides = array<i32>} : memref<8x32xf32, #tpu.memory_space<vmem>>, vector<8x32xf32>,
    %cst_346 = arith.constant 0.000000e+00 : f32
    %682 = vector.shape_cast %671 : vector<8x1xi1> to vector<8x1xi1>
    %683 = vector.broadcast %682 : vector<8x1xi1> to vector<8x32xi1>
    %684 = vector.broadcast %cst_346 : f32 to vector<8x32xf32>
    %685 = arith.select %683, %669, %684 : vector<8x32xi1>, vector<8x32xf32>
    %686 = arith.index_cast %c5_i32 : i32 to index
    %c0_347 = arith.constant 0 : index
    %c0_348 = arith.constant 0 : index
    %687 = vector.load %arg10[%686, %c0_347, %c0_348] : memref<8x8x32xf32, #tpu.memory_space<vmem>>, vector<1x8x32xf32>
    %688 = vector.shape_cast %687 : vector<1x8x32xf32> to vector<8x32xf32>
    %689 = vector.shape_cast %685 : vector<8x32xf32> to vector<1x8x32xf32>
    tpu.vector_store %arg10[%686, %c0_347, %c0_348], %689 {strides = array<i32>} : memref<8x8x32xf32, #tpu.memory_space<vmem>>, vector<1x8x32xf32>,
    %c7_i32_349 = arith.constant 7 : i32
    %690 = arith.subi %c7_i32_349, %c5_i32 : i32
    %691 = arith.addi %24, %690 : i32
    %692 = arith.index_cast %690 : i32 to index
    %c0_350 = arith.constant 0 : index
    %c0_351 = arith.constant 0 : index
    %693 = vector.load %arg17[%692, %c0_350, %c0_351] : memref<8x8x128xf32, #tpu.memory_space<vmem>>, vector<1x8x128xf32>
    %694 = vector.shape_cast %693 : vector<1x8x128xf32> to vector<8x128xf32>
    %c0_352 = arith.constant 0 : index
    %c0_353 = arith.constant 0 : index
    %695 = vector.load %arg14[%c0_352, %c0_353] : memref<8x32xf32, #tpu.memory_space<vmem>>, vector<8x32xf32>
    %c0_354 = arith.constant 0 : index
    %c0_355 = arith.constant 0 : index
    %696 = vector.load %arg7[%c0_354, %c0_355] : memref<32x128xf32, #tpu.memory_space<vmem>>, vector<32x128xf32>
    %cst_356 = arith.constant dense<0.000000e+00> : vector<8x128xf32>
    %697 = tpu.matmul %695, %696, %cst_356 {dimension_numbers = #tpu.dot_dimension_numbers<[1], [0], [0], [1], [0, 0, 1, 1], [], []>} : vector<8x32xf32>, vector<32x128xf32>, vector<8x128xf32> -> vector<8x128xf32>
    %698 = arith.addf %694, %697 : vector<8x128xf32>
    %699 = vector.extract_strided_slice %698 {offsets = [0, 0], sizes = [8, 32], strides = [1, 1]} : vector<8x128xf32> to vector<8x32xf32>
    %cst_357 = arith.constant 5.000000e-01 : f32
    %700 = vector.broadcast %cst_357 : f32 to vector<8x32xf32>
    %701 = arith.mulf %700, %699 : vector<8x32xf32>
    %702 = math.tanh %701 : vector<8x32xf32>
    %cst_358 = arith.constant 5.000000e-01 : f32
    %703 = vector.broadcast %cst_358 : f32 to vector<8x32xf32>
    %704 = arith.mulf %703, %702 : vector<8x32xf32>
    %cst_359 = arith.constant 5.000000e-01 : f32
    %705 = vector.broadcast %cst_359 : f32 to vector<8x32xf32>
    %706 = arith.addf %704, %705 : vector<8x32xf32>
    %707 = vector.extract_strided_slice %698 {offsets = [0, 32], sizes = [8, 32], strides = [1, 1]} : vector<8x128xf32> to vector<8x32xf32>
    %cst_360 = arith.constant 5.000000e-01 : f32
    %708 = vector.broadcast %cst_360 : f32 to vector<8x32xf32>
    %709 = arith.mulf %708, %707 : vector<8x32xf32>
    %710 = math.tanh %709 : vector<8x32xf32>
    %cst_361 = arith.constant 5.000000e-01 : f32
    %711 = vector.broadcast %cst_361 : f32 to vector<8x32xf32>
    %712 = arith.mulf %711, %710 : vector<8x32xf32>
    %cst_362 = arith.constant 5.000000e-01 : f32
    %713 = vector.broadcast %cst_362 : f32 to vector<8x32xf32>
    %714 = arith.addf %712, %713 : vector<8x32xf32>
    %715 = vector.extract_strided_slice %698 {offsets = [0, 64], sizes = [8, 32], strides = [1, 1]} : vector<8x128xf32> to vector<8x32xf32>
    %716 = math.tanh %715 : vector<8x32xf32>
    %717 = vector.extract_strided_slice %698 {offsets = [0, 96], sizes = [8, 32], strides = [1, 1]} : vector<8x128xf32> to vector<8x32xf32>
    %cst_363 = arith.constant 5.000000e-01 : f32
    %718 = vector.broadcast %cst_363 : f32 to vector<8x32xf32>
    %719 = arith.mulf %718, %717 : vector<8x32xf32>
    %720 = math.tanh %719 : vector<8x32xf32>
    %cst_364 = arith.constant 5.000000e-01 : f32
    %721 = vector.broadcast %cst_364 : f32 to vector<8x32xf32>
    %722 = arith.mulf %721, %720 : vector<8x32xf32>
    %cst_365 = arith.constant 5.000000e-01 : f32
    %723 = vector.broadcast %cst_365 : f32 to vector<8x32xf32>
    %724 = arith.addf %722, %723 : vector<8x32xf32>
    %c0_366 = arith.constant 0 : index
    %c0_367 = arith.constant 0 : index
    %725 = vector.load %arg15[%c0_366, %c0_367] : memref<8x32xf32, #tpu.memory_space<vmem>>, vector<8x32xf32>
    %726 = arith.mulf %714, %725 : vector<8x32xf32>
    %727 = arith.mulf %706, %716 : vector<8x32xf32>
    %728 = arith.addf %726, %727 : vector<8x32xf32>
    %729 = math.tanh %728 : vector<8x32xf32>
    %730 = arith.mulf %724, %729 : vector<8x32xf32>
    %731 = vector.broadcast %691 : i32 to vector<8x1xi32>
    %732 = arith.cmpi sgt, %21, %731 : vector<8x1xi32>
    %c0_368 = arith.constant 0 : index
    %c0_369 = arith.constant 0 : index
    %733 = vector.load %arg15[%c0_368, %c0_369] : memref<8x32xf32, #tpu.memory_space<vmem>>, vector<8x32xf32>
    %734 = vector.shape_cast %732 : vector<8x1xi1> to vector<8x1xi1>
    %735 = vector.broadcast %734 : vector<8x1xi1> to vector<8x32xi1>
    %736 = arith.select %735, %728, %733 : vector<8x32xi1>, vector<8x32xf32>
    %c0_370 = arith.constant 0 : index
    %c0_371 = arith.constant 0 : index
    %737 = vector.load %arg15[%c0_370, %c0_371] : memref<8x32xf32, #tpu.memory_space<vmem>>, vector<8x32xf32>
    tpu.vector_store %arg15[%c0_370, %c0_371], %736 {strides = array<i32>} : memref<8x32xf32, #tpu.memory_space<vmem>>, vector<8x32xf32>,
    %c0_372 = arith.constant 0 : index
    %c0_373 = arith.constant 0 : index
    %738 = vector.load %arg14[%c0_372, %c0_373] : memref<8x32xf32, #tpu.memory_space<vmem>>, vector<8x32xf32>
    %739 = vector.shape_cast %732 : vector<8x1xi1> to vector<8x1xi1>
    %740 = vector.broadcast %739 : vector<8x1xi1> to vector<8x32xi1>
    %741 = arith.select %740, %730, %738 : vector<8x32xi1>, vector<8x32xf32>
    %c0_374 = arith.constant 0 : index
    %c0_375 = arith.constant 0 : index
    %742 = vector.load %arg14[%c0_374, %c0_375] : memref<8x32xf32, #tpu.memory_space<vmem>>, vector<8x32xf32>
    tpu.vector_store %arg14[%c0_374, %c0_375], %741 {strides = array<i32>} : memref<8x32xf32, #tpu.memory_space<vmem>>, vector<8x32xf32>,
    %cst_376 = arith.constant 0.000000e+00 : f32
    %743 = vector.shape_cast %732 : vector<8x1xi1> to vector<8x1xi1>
    %744 = vector.broadcast %743 : vector<8x1xi1> to vector<8x32xi1>
    %745 = vector.broadcast %cst_376 : f32 to vector<8x32xf32>
    %746 = arith.select %744, %730, %745 : vector<8x32xi1>, vector<8x32xf32>
    %747 = arith.index_cast %690 : i32 to index
    %c0_377 = arith.constant 0 : index
    %c0_378 = arith.constant 0 : index
    %748 = vector.load %arg11[%747, %c0_377, %c0_378] : memref<8x8x32xf32, #tpu.memory_space<vmem>>, vector<1x8x32xf32>
    %749 = vector.shape_cast %748 : vector<1x8x32xf32> to vector<8x32xf32>
    %750 = vector.shape_cast %746 : vector<8x32xf32> to vector<1x8x32xf32>
    tpu.vector_store %arg11[%747, %c0_377, %c0_378], %750 {strides = array<i32>} : memref<8x8x32xf32, #tpu.memory_space<vmem>>, vector<1x8x32xf32>,
    %c6_i32 = arith.constant 6 : i32
    %751 = arith.addi %22, %c6_i32 : i32
    %752 = arith.index_cast %c6_i32 : i32 to index
    %c0_379 = arith.constant 0 : index
    %c0_380 = arith.constant 0 : index
    %753 = vector.load %arg16[%752, %c0_379, %c0_380] : memref<8x8x128xf32, #tpu.memory_space<vmem>>, vector<1x8x128xf32>
    %754 = vector.shape_cast %753 : vector<1x8x128xf32> to vector<8x128xf32>
    %c0_381 = arith.constant 0 : index
    %c0_382 = arith.constant 0 : index
    %755 = vector.load %arg12[%c0_381, %c0_382] : memref<8x32xf32, #tpu.memory_space<vmem>>, vector<8x32xf32>
    %c0_383 = arith.constant 0 : index
    %c0_384 = arith.constant 0 : index
    %756 = vector.load %arg6[%c0_383, %c0_384] : memref<32x128xf32, #tpu.memory_space<vmem>>, vector<32x128xf32>
    %cst_385 = arith.constant dense<0.000000e+00> : vector<8x128xf32>
    %757 = tpu.matmul %755, %756, %cst_385 {dimension_numbers = #tpu.dot_dimension_numbers<[1], [0], [0], [1], [0, 0, 1, 1], [], []>} : vector<8x32xf32>, vector<32x128xf32>, vector<8x128xf32> -> vector<8x128xf32>
    %758 = arith.addf %754, %757 : vector<8x128xf32>
    %759 = vector.extract_strided_slice %758 {offsets = [0, 0], sizes = [8, 32], strides = [1, 1]} : vector<8x128xf32> to vector<8x32xf32>
    %cst_386 = arith.constant 5.000000e-01 : f32
    %760 = vector.broadcast %cst_386 : f32 to vector<8x32xf32>
    %761 = arith.mulf %760, %759 : vector<8x32xf32>
    %762 = math.tanh %761 : vector<8x32xf32>
    %cst_387 = arith.constant 5.000000e-01 : f32
    %763 = vector.broadcast %cst_387 : f32 to vector<8x32xf32>
    %764 = arith.mulf %763, %762 : vector<8x32xf32>
    %cst_388 = arith.constant 5.000000e-01 : f32
    %765 = vector.broadcast %cst_388 : f32 to vector<8x32xf32>
    %766 = arith.addf %764, %765 : vector<8x32xf32>
    %767 = vector.extract_strided_slice %758 {offsets = [0, 32], sizes = [8, 32], strides = [1, 1]} : vector<8x128xf32> to vector<8x32xf32>
    %cst_389 = arith.constant 5.000000e-01 : f32
    %768 = vector.broadcast %cst_389 : f32 to vector<8x32xf32>
    %769 = arith.mulf %768, %767 : vector<8x32xf32>
    %770 = math.tanh %769 : vector<8x32xf32>
    %cst_390 = arith.constant 5.000000e-01 : f32
    %771 = vector.broadcast %cst_390 : f32 to vector<8x32xf32>
    %772 = arith.mulf %771, %770 : vector<8x32xf32>
    %cst_391 = arith.constant 5.000000e-01 : f32
    %773 = vector.broadcast %cst_391 : f32 to vector<8x32xf32>
    %774 = arith.addf %772, %773 : vector<8x32xf32>
    %775 = vector.extract_strided_slice %758 {offsets = [0, 64], sizes = [8, 32], strides = [1, 1]} : vector<8x128xf32> to vector<8x32xf32>
    %776 = math.tanh %775 : vector<8x32xf32>
    %777 = vector.extract_strided_slice %758 {offsets = [0, 96], sizes = [8, 32], strides = [1, 1]} : vector<8x128xf32> to vector<8x32xf32>
    %cst_392 = arith.constant 5.000000e-01 : f32
    %778 = vector.broadcast %cst_392 : f32 to vector<8x32xf32>
    %779 = arith.mulf %778, %777 : vector<8x32xf32>
    %780 = math.tanh %779 : vector<8x32xf32>
    %cst_393 = arith.constant 5.000000e-01 : f32
    %781 = vector.broadcast %cst_393 : f32 to vector<8x32xf32>
    %782 = arith.mulf %781, %780 : vector<8x32xf32>
    %cst_394 = arith.constant 5.000000e-01 : f32
    %783 = vector.broadcast %cst_394 : f32 to vector<8x32xf32>
    %784 = arith.addf %782, %783 : vector<8x32xf32>
    %c0_395 = arith.constant 0 : index
    %c0_396 = arith.constant 0 : index
    %785 = vector.load %arg13[%c0_395, %c0_396] : memref<8x32xf32, #tpu.memory_space<vmem>>, vector<8x32xf32>
    %786 = arith.mulf %774, %785 : vector<8x32xf32>
    %787 = arith.mulf %766, %776 : vector<8x32xf32>
    %788 = arith.addf %786, %787 : vector<8x32xf32>
    %789 = math.tanh %788 : vector<8x32xf32>
    %790 = arith.mulf %784, %789 : vector<8x32xf32>
    %791 = vector.broadcast %751 : i32 to vector<8x1xi32>
    %792 = arith.cmpi sgt, %21, %791 : vector<8x1xi32>
    %c0_397 = arith.constant 0 : index
    %c0_398 = arith.constant 0 : index
    %793 = vector.load %arg13[%c0_397, %c0_398] : memref<8x32xf32, #tpu.memory_space<vmem>>, vector<8x32xf32>
    %794 = vector.shape_cast %792 : vector<8x1xi1> to vector<8x1xi1>
    %795 = vector.broadcast %794 : vector<8x1xi1> to vector<8x32xi1>
    %796 = arith.select %795, %788, %793 : vector<8x32xi1>, vector<8x32xf32>
    %c0_399 = arith.constant 0 : index
    %c0_400 = arith.constant 0 : index
    %797 = vector.load %arg13[%c0_399, %c0_400] : memref<8x32xf32, #tpu.memory_space<vmem>>, vector<8x32xf32>
    tpu.vector_store %arg13[%c0_399, %c0_400], %796 {strides = array<i32>} : memref<8x32xf32, #tpu.memory_space<vmem>>, vector<8x32xf32>,
    %c0_401 = arith.constant 0 : index
    %c0_402 = arith.constant 0 : index
    %798 = vector.load %arg12[%c0_401, %c0_402] : memref<8x32xf32, #tpu.memory_space<vmem>>, vector<8x32xf32>
    %799 = vector.shape_cast %792 : vector<8x1xi1> to vector<8x1xi1>
    %800 = vector.broadcast %799 : vector<8x1xi1> to vector<8x32xi1>
    %801 = arith.select %800, %790, %798 : vector<8x32xi1>, vector<8x32xf32>
    %c0_403 = arith.constant 0 : index
    %c0_404 = arith.constant 0 : index
    %802 = vector.load %arg12[%c0_403, %c0_404] : memref<8x32xf32, #tpu.memory_space<vmem>>, vector<8x32xf32>
    tpu.vector_store %arg12[%c0_403, %c0_404], %801 {strides = array<i32>} : memref<8x32xf32, #tpu.memory_space<vmem>>, vector<8x32xf32>,
    %cst_405 = arith.constant 0.000000e+00 : f32
    %803 = vector.shape_cast %792 : vector<8x1xi1> to vector<8x1xi1>
    %804 = vector.broadcast %803 : vector<8x1xi1> to vector<8x32xi1>
    %805 = vector.broadcast %cst_405 : f32 to vector<8x32xf32>
    %806 = arith.select %804, %790, %805 : vector<8x32xi1>, vector<8x32xf32>
    %807 = arith.index_cast %c6_i32 : i32 to index
    %c0_406 = arith.constant 0 : index
    %c0_407 = arith.constant 0 : index
    %808 = vector.load %arg10[%807, %c0_406, %c0_407] : memref<8x8x32xf32, #tpu.memory_space<vmem>>, vector<1x8x32xf32>
    %809 = vector.shape_cast %808 : vector<1x8x32xf32> to vector<8x32xf32>
    %810 = vector.shape_cast %806 : vector<8x32xf32> to vector<1x8x32xf32>
    tpu.vector_store %arg10[%807, %c0_406, %c0_407], %810 {strides = array<i32>} : memref<8x8x32xf32, #tpu.memory_space<vmem>>, vector<1x8x32xf32>,
    %c7_i32_408 = arith.constant 7 : i32
    %811 = arith.subi %c7_i32_408, %c6_i32 : i32
    %812 = arith.addi %24, %811 : i32
    %813 = arith.index_cast %811 : i32 to index
    %c0_409 = arith.constant 0 : index
    %c0_410 = arith.constant 0 : index
    %814 = vector.load %arg17[%813, %c0_409, %c0_410] : memref<8x8x128xf32, #tpu.memory_space<vmem>>, vector<1x8x128xf32>
    %815 = vector.shape_cast %814 : vector<1x8x128xf32> to vector<8x128xf32>
    %c0_411 = arith.constant 0 : index
    %c0_412 = arith.constant 0 : index
    %816 = vector.load %arg14[%c0_411, %c0_412] : memref<8x32xf32, #tpu.memory_space<vmem>>, vector<8x32xf32>
    %c0_413 = arith.constant 0 : index
    %c0_414 = arith.constant 0 : index
    %817 = vector.load %arg7[%c0_413, %c0_414] : memref<32x128xf32, #tpu.memory_space<vmem>>, vector<32x128xf32>
    %cst_415 = arith.constant dense<0.000000e+00> : vector<8x128xf32>
    %818 = tpu.matmul %816, %817, %cst_415 {dimension_numbers = #tpu.dot_dimension_numbers<[1], [0], [0], [1], [0, 0, 1, 1], [], []>} : vector<8x32xf32>, vector<32x128xf32>, vector<8x128xf32> -> vector<8x128xf32>
    %819 = arith.addf %815, %818 : vector<8x128xf32>
    %820 = vector.extract_strided_slice %819 {offsets = [0, 0], sizes = [8, 32], strides = [1, 1]} : vector<8x128xf32> to vector<8x32xf32>
    %cst_416 = arith.constant 5.000000e-01 : f32
    %821 = vector.broadcast %cst_416 : f32 to vector<8x32xf32>
    %822 = arith.mulf %821, %820 : vector<8x32xf32>
    %823 = math.tanh %822 : vector<8x32xf32>
    %cst_417 = arith.constant 5.000000e-01 : f32
    %824 = vector.broadcast %cst_417 : f32 to vector<8x32xf32>
    %825 = arith.mulf %824, %823 : vector<8x32xf32>
    %cst_418 = arith.constant 5.000000e-01 : f32
    %826 = vector.broadcast %cst_418 : f32 to vector<8x32xf32>
    %827 = arith.addf %825, %826 : vector<8x32xf32>
    %828 = vector.extract_strided_slice %819 {offsets = [0, 32], sizes = [8, 32], strides = [1, 1]} : vector<8x128xf32> to vector<8x32xf32>
    %cst_419 = arith.constant 5.000000e-01 : f32
    %829 = vector.broadcast %cst_419 : f32 to vector<8x32xf32>
    %830 = arith.mulf %829, %828 : vector<8x32xf32>
    %831 = math.tanh %830 : vector<8x32xf32>
    %cst_420 = arith.constant 5.000000e-01 : f32
    %832 = vector.broadcast %cst_420 : f32 to vector<8x32xf32>
    %833 = arith.mulf %832, %831 : vector<8x32xf32>
    %cst_421 = arith.constant 5.000000e-01 : f32
    %834 = vector.broadcast %cst_421 : f32 to vector<8x32xf32>
    %835 = arith.addf %833, %834 : vector<8x32xf32>
    %836 = vector.extract_strided_slice %819 {offsets = [0, 64], sizes = [8, 32], strides = [1, 1]} : vector<8x128xf32> to vector<8x32xf32>
    %837 = math.tanh %836 : vector<8x32xf32>
    %838 = vector.extract_strided_slice %819 {offsets = [0, 96], sizes = [8, 32], strides = [1, 1]} : vector<8x128xf32> to vector<8x32xf32>
    %cst_422 = arith.constant 5.000000e-01 : f32
    %839 = vector.broadcast %cst_422 : f32 to vector<8x32xf32>
    %840 = arith.mulf %839, %838 : vector<8x32xf32>
    %841 = math.tanh %840 : vector<8x32xf32>
    %cst_423 = arith.constant 5.000000e-01 : f32
    %842 = vector.broadcast %cst_423 : f32 to vector<8x32xf32>
    %843 = arith.mulf %842, %841 : vector<8x32xf32>
    %cst_424 = arith.constant 5.000000e-01 : f32
    %844 = vector.broadcast %cst_424 : f32 to vector<8x32xf32>
    %845 = arith.addf %843, %844 : vector<8x32xf32>
    %c0_425 = arith.constant 0 : index
    %c0_426 = arith.constant 0 : index
    %846 = vector.load %arg15[%c0_425, %c0_426] : memref<8x32xf32, #tpu.memory_space<vmem>>, vector<8x32xf32>
    %847 = arith.mulf %835, %846 : vector<8x32xf32>
    %848 = arith.mulf %827, %837 : vector<8x32xf32>
    %849 = arith.addf %847, %848 : vector<8x32xf32>
    %850 = math.tanh %849 : vector<8x32xf32>
    %851 = arith.mulf %845, %850 : vector<8x32xf32>
    %852 = vector.broadcast %812 : i32 to vector<8x1xi32>
    %853 = arith.cmpi sgt, %21, %852 : vector<8x1xi32>
    %c0_427 = arith.constant 0 : index
    %c0_428 = arith.constant 0 : index
    %854 = vector.load %arg15[%c0_427, %c0_428] : memref<8x32xf32, #tpu.memory_space<vmem>>, vector<8x32xf32>
    %855 = vector.shape_cast %853 : vector<8x1xi1> to vector<8x1xi1>
    %856 = vector.broadcast %855 : vector<8x1xi1> to vector<8x32xi1>
    %857 = arith.select %856, %849, %854 : vector<8x32xi1>, vector<8x32xf32>
    %c0_429 = arith.constant 0 : index
    %c0_430 = arith.constant 0 : index
    %858 = vector.load %arg15[%c0_429, %c0_430] : memref<8x32xf32, #tpu.memory_space<vmem>>, vector<8x32xf32>
    tpu.vector_store %arg15[%c0_429, %c0_430], %857 {strides = array<i32>} : memref<8x32xf32, #tpu.memory_space<vmem>>, vector<8x32xf32>,
    %c0_431 = arith.constant 0 : index
    %c0_432 = arith.constant 0 : index
    %859 = vector.load %arg14[%c0_431, %c0_432] : memref<8x32xf32, #tpu.memory_space<vmem>>, vector<8x32xf32>
    %860 = vector.shape_cast %853 : vector<8x1xi1> to vector<8x1xi1>
    %861 = vector.broadcast %860 : vector<8x1xi1> to vector<8x32xi1>
    %862 = arith.select %861, %851, %859 : vector<8x32xi1>, vector<8x32xf32>
    %c0_433 = arith.constant 0 : index
    %c0_434 = arith.constant 0 : index
    %863 = vector.load %arg14[%c0_433, %c0_434] : memref<8x32xf32, #tpu.memory_space<vmem>>, vector<8x32xf32>
    tpu.vector_store %arg14[%c0_433, %c0_434], %862 {strides = array<i32>} : memref<8x32xf32, #tpu.memory_space<vmem>>, vector<8x32xf32>,
    %cst_435 = arith.constant 0.000000e+00 : f32
    %864 = vector.shape_cast %853 : vector<8x1xi1> to vector<8x1xi1>
    %865 = vector.broadcast %864 : vector<8x1xi1> to vector<8x32xi1>
    %866 = vector.broadcast %cst_435 : f32 to vector<8x32xf32>
    %867 = arith.select %865, %851, %866 : vector<8x32xi1>, vector<8x32xf32>
    %868 = arith.index_cast %811 : i32 to index
    %c0_436 = arith.constant 0 : index
    %c0_437 = arith.constant 0 : index
    %869 = vector.load %arg11[%868, %c0_436, %c0_437] : memref<8x8x32xf32, #tpu.memory_space<vmem>>, vector<1x8x32xf32>
    %870 = vector.shape_cast %869 : vector<1x8x32xf32> to vector<8x32xf32>
    %871 = vector.shape_cast %867 : vector<8x32xf32> to vector<1x8x32xf32>
    tpu.vector_store %arg11[%868, %c0_436, %c0_437], %871 {strides = array<i32>} : memref<8x8x32xf32, #tpu.memory_space<vmem>>, vector<1x8x32xf32>,
    %c7_i32_438 = arith.constant 7 : i32
    %872 = arith.addi %22, %c7_i32_438 : i32
    %873 = arith.index_cast %c7_i32_438 : i32 to index
    %c0_439 = arith.constant 0 : index
    %c0_440 = arith.constant 0 : index
    %874 = vector.load %arg16[%873, %c0_439, %c0_440] : memref<8x8x128xf32, #tpu.memory_space<vmem>>, vector<1x8x128xf32>
    %875 = vector.shape_cast %874 : vector<1x8x128xf32> to vector<8x128xf32>
    %c0_441 = arith.constant 0 : index
    %c0_442 = arith.constant 0 : index
    %876 = vector.load %arg12[%c0_441, %c0_442] : memref<8x32xf32, #tpu.memory_space<vmem>>, vector<8x32xf32>
    %c0_443 = arith.constant 0 : index
    %c0_444 = arith.constant 0 : index
    %877 = vector.load %arg6[%c0_443, %c0_444] : memref<32x128xf32, #tpu.memory_space<vmem>>, vector<32x128xf32>
    %cst_445 = arith.constant dense<0.000000e+00> : vector<8x128xf32>
    %878 = tpu.matmul %876, %877, %cst_445 {dimension_numbers = #tpu.dot_dimension_numbers<[1], [0], [0], [1], [0, 0, 1, 1], [], []>} : vector<8x32xf32>, vector<32x128xf32>, vector<8x128xf32> -> vector<8x128xf32>
    %879 = arith.addf %875, %878 : vector<8x128xf32>
    %880 = vector.extract_strided_slice %879 {offsets = [0, 0], sizes = [8, 32], strides = [1, 1]} : vector<8x128xf32> to vector<8x32xf32>
    %cst_446 = arith.constant 5.000000e-01 : f32
    %881 = vector.broadcast %cst_446 : f32 to vector<8x32xf32>
    %882 = arith.mulf %881, %880 : vector<8x32xf32>
    %883 = math.tanh %882 : vector<8x32xf32>
    %cst_447 = arith.constant 5.000000e-01 : f32
    %884 = vector.broadcast %cst_447 : f32 to vector<8x32xf32>
    %885 = arith.mulf %884, %883 : vector<8x32xf32>
    %cst_448 = arith.constant 5.000000e-01 : f32
    %886 = vector.broadcast %cst_448 : f32 to vector<8x32xf32>
    %887 = arith.addf %885, %886 : vector<8x32xf32>
    %888 = vector.extract_strided_slice %879 {offsets = [0, 32], sizes = [8, 32], strides = [1, 1]} : vector<8x128xf32> to vector<8x32xf32>
    %cst_449 = arith.constant 5.000000e-01 : f32
    %889 = vector.broadcast %cst_449 : f32 to vector<8x32xf32>
    %890 = arith.mulf %889, %888 : vector<8x32xf32>
    %891 = math.tanh %890 : vector<8x32xf32>
    %cst_450 = arith.constant 5.000000e-01 : f32
    %892 = vector.broadcast %cst_450 : f32 to vector<8x32xf32>
    %893 = arith.mulf %892, %891 : vector<8x32xf32>
    %cst_451 = arith.constant 5.000000e-01 : f32
    %894 = vector.broadcast %cst_451 : f32 to vector<8x32xf32>
    %895 = arith.addf %893, %894 : vector<8x32xf32>
    %896 = vector.extract_strided_slice %879 {offsets = [0, 64], sizes = [8, 32], strides = [1, 1]} : vector<8x128xf32> to vector<8x32xf32>
    %897 = math.tanh %896 : vector<8x32xf32>
    %898 = vector.extract_strided_slice %879 {offsets = [0, 96], sizes = [8, 32], strides = [1, 1]} : vector<8x128xf32> to vector<8x32xf32>
    %cst_452 = arith.constant 5.000000e-01 : f32
    %899 = vector.broadcast %cst_452 : f32 to vector<8x32xf32>
    %900 = arith.mulf %899, %898 : vector<8x32xf32>
    %901 = math.tanh %900 : vector<8x32xf32>
    %cst_453 = arith.constant 5.000000e-01 : f32
    %902 = vector.broadcast %cst_453 : f32 to vector<8x32xf32>
    %903 = arith.mulf %902, %901 : vector<8x32xf32>
    %cst_454 = arith.constant 5.000000e-01 : f32
    %904 = vector.broadcast %cst_454 : f32 to vector<8x32xf32>
    %905 = arith.addf %903, %904 : vector<8x32xf32>
    %c0_455 = arith.constant 0 : index
    %c0_456 = arith.constant 0 : index
    %906 = vector.load %arg13[%c0_455, %c0_456] : memref<8x32xf32, #tpu.memory_space<vmem>>, vector<8x32xf32>
    %907 = arith.mulf %895, %906 : vector<8x32xf32>
    %908 = arith.mulf %887, %897 : vector<8x32xf32>
    %909 = arith.addf %907, %908 : vector<8x32xf32>
    %910 = math.tanh %909 : vector<8x32xf32>
    %911 = arith.mulf %905, %910 : vector<8x32xf32>
    %912 = vector.broadcast %872 : i32 to vector<8x1xi32>
    %913 = arith.cmpi sgt, %21, %912 : vector<8x1xi32>
    %c0_457 = arith.constant 0 : index
    %c0_458 = arith.constant 0 : index
    %914 = vector.load %arg13[%c0_457, %c0_458] : memref<8x32xf32, #tpu.memory_space<vmem>>, vector<8x32xf32>
    %915 = vector.shape_cast %913 : vector<8x1xi1> to vector<8x1xi1>
    %916 = vector.broadcast %915 : vector<8x1xi1> to vector<8x32xi1>
    %917 = arith.select %916, %909, %914 : vector<8x32xi1>, vector<8x32xf32>
    %c0_459 = arith.constant 0 : index
    %c0_460 = arith.constant 0 : index
    %918 = vector.load %arg13[%c0_459, %c0_460] : memref<8x32xf32, #tpu.memory_space<vmem>>, vector<8x32xf32>
    tpu.vector_store %arg13[%c0_459, %c0_460], %917 {strides = array<i32>} : memref<8x32xf32, #tpu.memory_space<vmem>>, vector<8x32xf32>,
    %c0_461 = arith.constant 0 : index
    %c0_462 = arith.constant 0 : index
    %919 = vector.load %arg12[%c0_461, %c0_462] : memref<8x32xf32, #tpu.memory_space<vmem>>, vector<8x32xf32>
    %920 = vector.shape_cast %913 : vector<8x1xi1> to vector<8x1xi1>
    %921 = vector.broadcast %920 : vector<8x1xi1> to vector<8x32xi1>
    %922 = arith.select %921, %911, %919 : vector<8x32xi1>, vector<8x32xf32>
    %c0_463 = arith.constant 0 : index
    %c0_464 = arith.constant 0 : index
    %923 = vector.load %arg12[%c0_463, %c0_464] : memref<8x32xf32, #tpu.memory_space<vmem>>, vector<8x32xf32>
    tpu.vector_store %arg12[%c0_463, %c0_464], %922 {strides = array<i32>} : memref<8x32xf32, #tpu.memory_space<vmem>>, vector<8x32xf32>,
    %cst_465 = arith.constant 0.000000e+00 : f32
    %924 = vector.shape_cast %913 : vector<8x1xi1> to vector<8x1xi1>
    %925 = vector.broadcast %924 : vector<8x1xi1> to vector<8x32xi1>
    %926 = vector.broadcast %cst_465 : f32 to vector<8x32xf32>
    %927 = arith.select %925, %911, %926 : vector<8x32xi1>, vector<8x32xf32>
    %928 = arith.index_cast %c7_i32_438 : i32 to index
    %c0_466 = arith.constant 0 : index
    %c0_467 = arith.constant 0 : index
    %929 = vector.load %arg10[%928, %c0_466, %c0_467] : memref<8x8x32xf32, #tpu.memory_space<vmem>>, vector<1x8x32xf32>
    %930 = vector.shape_cast %929 : vector<1x8x32xf32> to vector<8x32xf32>
    %931 = vector.shape_cast %927 : vector<8x32xf32> to vector<1x8x32xf32>
    tpu.vector_store %arg10[%928, %c0_466, %c0_467], %931 {strides = array<i32>} : memref<8x8x32xf32, #tpu.memory_space<vmem>>, vector<1x8x32xf32>,
    %c7_i32_468 = arith.constant 7 : i32
    %932 = arith.subi %c7_i32_468, %c7_i32_438 : i32
    %933 = arith.addi %24, %932 : i32
    %934 = arith.index_cast %932 : i32 to index
    %c0_469 = arith.constant 0 : index
    %c0_470 = arith.constant 0 : index
    %935 = vector.load %arg17[%934, %c0_469, %c0_470] : memref<8x8x128xf32, #tpu.memory_space<vmem>>, vector<1x8x128xf32>
    %936 = vector.shape_cast %935 : vector<1x8x128xf32> to vector<8x128xf32>
    %c0_471 = arith.constant 0 : index
    %c0_472 = arith.constant 0 : index
    %937 = vector.load %arg14[%c0_471, %c0_472] : memref<8x32xf32, #tpu.memory_space<vmem>>, vector<8x32xf32>
    %c0_473 = arith.constant 0 : index
    %c0_474 = arith.constant 0 : index
    %938 = vector.load %arg7[%c0_473, %c0_474] : memref<32x128xf32, #tpu.memory_space<vmem>>, vector<32x128xf32>
    %cst_475 = arith.constant dense<0.000000e+00> : vector<8x128xf32>
    %939 = tpu.matmul %937, %938, %cst_475 {dimension_numbers = #tpu.dot_dimension_numbers<[1], [0], [0], [1], [0, 0, 1, 1], [], []>} : vector<8x32xf32>, vector<32x128xf32>, vector<8x128xf32> -> vector<8x128xf32>
    %940 = arith.addf %936, %939 : vector<8x128xf32>
    %941 = vector.extract_strided_slice %940 {offsets = [0, 0], sizes = [8, 32], strides = [1, 1]} : vector<8x128xf32> to vector<8x32xf32>
    %cst_476 = arith.constant 5.000000e-01 : f32
    %942 = vector.broadcast %cst_476 : f32 to vector<8x32xf32>
    %943 = arith.mulf %942, %941 : vector<8x32xf32>
    %944 = math.tanh %943 : vector<8x32xf32>
    %cst_477 = arith.constant 5.000000e-01 : f32
    %945 = vector.broadcast %cst_477 : f32 to vector<8x32xf32>
    %946 = arith.mulf %945, %944 : vector<8x32xf32>
    %cst_478 = arith.constant 5.000000e-01 : f32
    %947 = vector.broadcast %cst_478 : f32 to vector<8x32xf32>
    %948 = arith.addf %946, %947 : vector<8x32xf32>
    %949 = vector.extract_strided_slice %940 {offsets = [0, 32], sizes = [8, 32], strides = [1, 1]} : vector<8x128xf32> to vector<8x32xf32>
    %cst_479 = arith.constant 5.000000e-01 : f32
    %950 = vector.broadcast %cst_479 : f32 to vector<8x32xf32>
    %951 = arith.mulf %950, %949 : vector<8x32xf32>
    %952 = math.tanh %951 : vector<8x32xf32>
    %cst_480 = arith.constant 5.000000e-01 : f32
    %953 = vector.broadcast %cst_480 : f32 to vector<8x32xf32>
    %954 = arith.mulf %953, %952 : vector<8x32xf32>
    %cst_481 = arith.constant 5.000000e-01 : f32
    %955 = vector.broadcast %cst_481 : f32 to vector<8x32xf32>
    %956 = arith.addf %954, %955 : vector<8x32xf32>
    %957 = vector.extract_strided_slice %940 {offsets = [0, 64], sizes = [8, 32], strides = [1, 1]} : vector<8x128xf32> to vector<8x32xf32>
    %958 = math.tanh %957 : vector<8x32xf32>
    %959 = vector.extract_strided_slice %940 {offsets = [0, 96], sizes = [8, 32], strides = [1, 1]} : vector<8x128xf32> to vector<8x32xf32>
    %cst_482 = arith.constant 5.000000e-01 : f32
    %960 = vector.broadcast %cst_482 : f32 to vector<8x32xf32>
    %961 = arith.mulf %960, %959 : vector<8x32xf32>
    %962 = math.tanh %961 : vector<8x32xf32>
    %cst_483 = arith.constant 5.000000e-01 : f32
    %963 = vector.broadcast %cst_483 : f32 to vector<8x32xf32>
    %964 = arith.mulf %963, %962 : vector<8x32xf32>
    %cst_484 = arith.constant 5.000000e-01 : f32
    %965 = vector.broadcast %cst_484 : f32 to vector<8x32xf32>
    %966 = arith.addf %964, %965 : vector<8x32xf32>
    %c0_485 = arith.constant 0 : index
    %c0_486 = arith.constant 0 : index
    %967 = vector.load %arg15[%c0_485, %c0_486] : memref<8x32xf32, #tpu.memory_space<vmem>>, vector<8x32xf32>
    %968 = arith.mulf %956, %967 : vector<8x32xf32>
    %969 = arith.mulf %948, %958 : vector<8x32xf32>
    %970 = arith.addf %968, %969 : vector<8x32xf32>
    %971 = math.tanh %970 : vector<8x32xf32>
    %972 = arith.mulf %966, %971 : vector<8x32xf32>
    %973 = vector.broadcast %933 : i32 to vector<8x1xi32>
    %974 = arith.cmpi sgt, %21, %973 : vector<8x1xi32>
    %c0_487 = arith.constant 0 : index
    %c0_488 = arith.constant 0 : index
    %975 = vector.load %arg15[%c0_487, %c0_488] : memref<8x32xf32, #tpu.memory_space<vmem>>, vector<8x32xf32>
    %976 = vector.shape_cast %974 : vector<8x1xi1> to vector<8x1xi1>
    %977 = vector.broadcast %976 : vector<8x1xi1> to vector<8x32xi1>
    %978 = arith.select %977, %970, %975 : vector<8x32xi1>, vector<8x32xf32>
    %c0_489 = arith.constant 0 : index
    %c0_490 = arith.constant 0 : index
    %979 = vector.load %arg15[%c0_489, %c0_490] : memref<8x32xf32, #tpu.memory_space<vmem>>, vector<8x32xf32>
    tpu.vector_store %arg15[%c0_489, %c0_490], %978 {strides = array<i32>} : memref<8x32xf32, #tpu.memory_space<vmem>>, vector<8x32xf32>,
    %c0_491 = arith.constant 0 : index
    %c0_492 = arith.constant 0 : index
    %980 = vector.load %arg14[%c0_491, %c0_492] : memref<8x32xf32, #tpu.memory_space<vmem>>, vector<8x32xf32>
    %981 = vector.shape_cast %974 : vector<8x1xi1> to vector<8x1xi1>
    %982 = vector.broadcast %981 : vector<8x1xi1> to vector<8x32xi1>
    %983 = arith.select %982, %972, %980 : vector<8x32xi1>, vector<8x32xf32>
    %c0_493 = arith.constant 0 : index
    %c0_494 = arith.constant 0 : index
    %984 = vector.load %arg14[%c0_493, %c0_494] : memref<8x32xf32, #tpu.memory_space<vmem>>, vector<8x32xf32>
    tpu.vector_store %arg14[%c0_493, %c0_494], %983 {strides = array<i32>} : memref<8x32xf32, #tpu.memory_space<vmem>>, vector<8x32xf32>,
    %cst_495 = arith.constant 0.000000e+00 : f32
    %985 = vector.shape_cast %974 : vector<8x1xi1> to vector<8x1xi1>
    %986 = vector.broadcast %985 : vector<8x1xi1> to vector<8x32xi1>
    %987 = vector.broadcast %cst_495 : f32 to vector<8x32xf32>
    %988 = arith.select %986, %972, %987 : vector<8x32xi1>, vector<8x32xf32>
    %989 = arith.index_cast %932 : i32 to index
    %c0_496 = arith.constant 0 : index
    %c0_497 = arith.constant 0 : index
    %990 = vector.load %arg11[%989, %c0_496, %c0_497] : memref<8x8x32xf32, #tpu.memory_space<vmem>>, vector<1x8x32xf32>
    %991 = vector.shape_cast %990 : vector<1x8x32xf32> to vector<8x32xf32>
    %992 = vector.shape_cast %988 : vector<8x32xf32> to vector<1x8x32xf32>
    tpu.vector_store %arg11[%989, %c0_496, %c0_497], %992 {strides = array<i32>} : memref<8x8x32xf32, #tpu.memory_space<vmem>>, vector<1x8x32xf32>,
    %c8_i32_498 = arith.constant 8 : i32
    return
  }
  func.func @transform_0(%arg0: i32) -> (i32, i32) {
    %c0_i32 = arith.constant 0 : i32
    %c0_i32_0 = arith.constant 0 : i32
    %c0_i32_1 = arith.constant 0 : i32
    return %c0_i32, %c0_i32_0 : i32, i32
  }
  func.func @transform_1(%arg0: i32) -> (i32, i32, i32) {
    %c0_i32 = arith.constant 0 : i32
    %c0_i32_0 = arith.constant 0 : i32
    %c0_i32_1 = arith.constant 0 : i32
    return %arg0, %c0_i32, %c0_i32_0 : i32, i32, i32
  }
  func.func @transform_2(%arg0: i32) -> (i32, i32, i32) {
    %c0_i32 = arith.constant 0 : i32
    %0 = arith.subi %c0_i32, %arg0 : i32
    %c0_i32_0 = arith.constant 0 : i32
    %c0_i32_1 = arith.constant 0 : i32
    %c0_i32_2 = arith.constant 0 : i32
    return %0, %c0_i32_0, %c0_i32_1 : i32, i32, i32
  }
  func.func @transform_3(%arg0: i32) -> (i32, i32) {
    %c0_i32 = arith.constant 0 : i32
    %c0_i32_0 = arith.constant 0 : i32
    %c0_i32_1 = arith.constant 0 : i32
    return %c0_i32, %c0_i32_0 : i32, i32
  }
  func.func @transform_4(%arg0: i32) -> (i32, i32) {
    %c0_i32 = arith.constant 0 : i32
    %c0_i32_0 = arith.constant 0 : i32
    %c0_i32_1 = arith.constant 0 : i32
    return %c0_i32, %c0_i32_0 : i32, i32
  }
  func.func @transform_5(%arg0: i32) -> (i32, i32) {
    %c0_i32 = arith.constant 0 : i32
    %c0_i32_0 = arith.constant 0 : i32
    %c0_i32_1 = arith.constant 0 : i32
    return %c0_i32, %c0_i32_0 : i32, i32
  }
  func.func @transform_6(%arg0: i32) -> (i32, i32) {
    %c0_i32 = arith.constant 0 : i32
    %c0_i32_0 = arith.constant 0 : i32
    %c0_i32_1 = arith.constant 0 : i32
    return %c0_i32, %c0_i32_0 : i32, i32
  }
  func.func @transform_7(%arg0: i32) -> (i32, i32) {
    %c0_i32 = arith.constant 0 : i32
    %c0_i32_0 = arith.constant 0 : i32
    %c0_i32_1 = arith.constant 0 : i32
    return %c0_i32, %c0_i32_0 : i32, i32
  }
  func.func @transform_8(%arg0: i32) -> (i32, i32) {
    %c0_i32 = arith.constant 0 : i32
    %c0_i32_0 = arith.constant 0 : i32
    %c0_i32_1 = arith.constant 0 : i32
    return %c0_i32, %c0_i32_0 : i32, i32
  }
  func.func @transform_9(%arg0: i32) -> (i32, i32, i32) {
    %c0_i32 = arith.constant 0 : i32
    %c0_i32_0 = arith.constant 0 : i32
    %c0_i32_1 = arith.constant 0 : i32
    return %arg0, %c0_i32, %c0_i32_0 : i32, i32, i32
  }
  func.func @transform_10(%arg0: i32) -> (i32, i32, i32) {
    %c0_i32 = arith.constant 0 : i32
    %0 = arith.subi %c0_i32, %arg0 : i32
    %c0_i32_0 = arith.constant 0 : i32
    %c0_i32_1 = arith.constant 0 : i32
    %c0_i32_2 = arith.constant 0 : i32
    return %0, %c0_i32_0, %c0_i32_1 : i32, i32, i32
  }
}

module attributes {stable_mosaic.version = 11 : i64} {
  func.func @_bidir_chunk_kernel(%arg0: i32, %arg1: memref<8x1xi32, #tpu.memory_space<vmem>>, %arg2: memref<8x8x64xf32, #tpu.memory_space<vmem>>, %arg3: memref<8x8x64xf32, #tpu.memory_space<vmem>>, %arg4: memref<64x128xf32, #tpu.memory_space<vmem>>, %arg5: memref<64x128xf32, #tpu.memory_space<vmem>>, %arg6: memref<32x128xf32, #tpu.memory_space<vmem>>, %arg7: memref<32x128xf32, #tpu.memory_space<vmem>>, %arg8: memref<1x128xf32, #tpu.memory_space<vmem>>, %arg9: memref<1x128xf32, #tpu.memory_space<vmem>>, %arg10: memref<8x8x32xf32, #tpu.memory_space<vmem>>, %arg11: memref<8x8x32xf32, #tpu.memory_space<vmem>>, %arg12: memref<8x32xf32, #tpu.memory_space<vmem>>, %arg13: memref<8x32xf32, #tpu.memory_space<vmem>>, %arg14: memref<8x32xf32, #tpu.memory_space<vmem>>, %arg15: memref<8x32xf32, #tpu.memory_space<vmem>>, %arg16: memref<8x8x128xf32, #tpu.memory_space<vmem>>, %arg17: memref<8x8x128xf32, #tpu.memory_space<vmem>>) attributes {dimension_semantics = [#tpu.dimension_semantics<arbitrary>], iteration_bounds = array<i64: 1>, scalar_prefetch = 0 : i64, scratch_operands = 6 : i64, tpu.core_type = #tpu.core_type<tc>, window_params = [{pipeline_mode = #tpu.pipeline_mode<synchronous>, transform_indices = @transform_0, window_bounds = array<i64: 8, 1>}, {transform_indices = @transform_1, window_bounds = array<i64: 8, 8, 64>}, {transform_indices = @transform_2, window_bounds = array<i64: 8, 8, 64>}, {pipeline_mode = #tpu.pipeline_mode<synchronous>, transform_indices = @transform_3, window_bounds = array<i64: 64, 128>}, {pipeline_mode = #tpu.pipeline_mode<synchronous>, transform_indices = @transform_4, window_bounds = array<i64: 64, 128>}, {pipeline_mode = #tpu.pipeline_mode<synchronous>, transform_indices = @transform_5, window_bounds = array<i64: 32, 128>}, {pipeline_mode = #tpu.pipeline_mode<synchronous>, transform_indices = @transform_6, window_bounds = array<i64: 32, 128>}, {pipeline_mode = #tpu.pipeline_mode<synchronous>, transform_indices = @transform_7, window_bounds = array<i64: 1, 128>}, {pipeline_mode = #tpu.pipeline_mode<synchronous>, transform_indices = @transform_8, window_bounds = array<i64: 1, 128>}, {transform_indices = @transform_9, window_bounds = array<i64: 8, 8, 32>}, {transform_indices = @transform_10, window_bounds = array<i64: 8, 8, 32>}]} {
    %c0_i32 = arith.constant 0 : i32
    %0 = arith.cmpi eq, %arg0, %c0_i32 : i32
    %1 = arith.extui %0 : i1 to i32
    %c0_i32_0 = arith.constant 0 : i32
    %2 = arith.cmpi ne, %1, %c0_i32_0 : i32
    scf.if %2 {
      %cst_499 = arith.constant 0.000000e+00 : f32
      %993 = vector.broadcast %cst_499 : f32 to vector<8x32xf32>
      %c0_500 = arith.constant 0 : index
      %c0_501 = arith.constant 0 : index
      %994 = vector.load %arg12[%c0_500, %c0_501] : memref<8x32xf32, #tpu.memory_space<vmem>>, vector<8x32xf32>
      tpu.vector_store %arg12[%c0_500, %c0_501], %993 {strides = array<i32>} : memref<8x32xf32, #tpu.memory_space<vmem>>, vector<8x32xf32>,
      %cst_502 = arith.constant 0.000000e+00 : f32
      %995 = vector.broadcast %cst_502 : f32 to vector<8x32xf32>
      %c0_503 = arith.constant 0 : index
      %c0_504 = arith.constant 0 : index
      %996 = vector.load %arg13[%c0_503, %c0_504] : memref<8x32xf32, #tpu.memory_space<vmem>>, vector<8x32xf32>
      tpu.vector_store %arg13[%c0_503, %c0_504], %995 {strides = array<i32>} : memref<8x32xf32, #tpu.memory_space<vmem>>, vector<8x32xf32>,
      %cst_505 = arith.constant 0.000000e+00 : f32
      %997 = vector.broadcast %cst_505 : f32 to vector<8x32xf32>
      %c0_506 = arith.constant 0 : index
      %c0_507 = arith.constant 0 : index
      %998 = vector.load %arg14[%c0_506, %c0_507] : memref<8x32xf32, #tpu.memory_space<vmem>>, vector<8x32xf32>
      tpu.vector_store %arg14[%c0_506, %c0_507], %997 {strides = array<i32>} : memref<8x32xf32, #tpu.memory_space<vmem>>, vector<8x32xf32>,
      %cst_508 = arith.constant 0.000000e+00 : f32
      %999 = vector.broadcast %cst_508 : f32 to vector<8x32xf32>
      %c0_509 = arith.constant 0 : index
      %c0_510 = arith.constant 0 : index
      %1000 = vector.load %arg15[%c0_509, %c0_510] : memref<8x32xf32, #tpu.memory_space<vmem>>, vector<8x32xf32>
      tpu.vector_store %arg15[%c0_509, %c0_510], %999 {strides = array<i32>} : memref<8x32xf32, #tpu.memory_space<vmem>>, vector<8x32xf32>,
    } else {
    }
    %c0 = arith.constant 0 : index
    %c0_1 = arith.constant 0 : index
    %c0_2 = arith.constant 0 : index
    %3 = vector.load %arg2[%c0, %c0_1, %c0_2] : memref<8x8x64xf32, #tpu.memory_space<vmem>>, vector<8x8x64xf32>
    %4 = vector.shape_cast %3 : vector<8x8x64xf32> to vector<64x64xf32>
    %c0_3 = arith.constant 0 : index
    %c0_4 = arith.constant 0 : index
    %5 = vector.load %arg4[%c0_3, %c0_4] : memref<64x128xf32, #tpu.memory_space<vmem>>, vector<64x128xf32>
    %cst = arith.constant dense<0.000000e+00> : vector<64x128xf32>
    %6 = tpu.matmul %4, %5, %cst {dimension_numbers = #tpu.dot_dimension_numbers<[1], [0], [0], [1], [0, 0, 1, 1], [], []>} : vector<64x64xf32>, vector<64x128xf32>, vector<64x128xf32> -> vector<64x128xf32>
    %c0_5 = arith.constant 0 : index
    %c0_6 = arith.constant 0 : index
    %7 = vector.load %arg8[%c0_5, %c0_6] : memref<1x128xf32, #tpu.memory_space<vmem>>, vector<1x128xf32>
    %8 = vector.broadcast %7 : vector<1x128xf32> to vector<64x128xf32>
    %9 = arith.addf %6, %8 : vector<64x128xf32>
    %10 = vector.shape_cast %9 : vector<64x128xf32> to vector<8x8x128xf32>
    %c0_7 = arith.constant 0 : index
    %c0_8 = arith.constant 0 : index
    %c0_9 = arith.constant 0 : index
    %11 = vector.load %arg16[%c0_7, %c0_8, %c0_9] : memref<8x8x128xf32, #tpu.memory_space<vmem>>, vector<8x8x128xf32>
    tpu.vector_store %arg16[%c0_7, %c0_8, %c0_9], %10 {strides = array<i32>} : memref<8x8x128xf32, #tpu.memory_space<vmem>>, vector<8x8x128xf32>,
    %c0_10 = arith.constant 0 : index
    %c0_11 = arith.constant 0 : index
    %c0_12 = arith.constant 0 : index
    %12 = vector.load %arg3[%c0_10, %c0_11, %c0_12] : memref<8x8x64xf32, #tpu.memory_space<vmem>>, vector<8x8x64xf32>
    %13 = vector.shape_cast %12 : vector<8x8x64xf32> to vector<64x64xf32>
    %c0_13 = arith.constant 0 : index
    %c0_14 = arith.constant 0 : index
    %14 = vector.load %arg5[%c0_13, %c0_14] : memref<64x128xf32, #tpu.memory_space<vmem>>, vector<64x128xf32>
    %cst_15 = arith.constant dense<0.000000e+00> : vector<64x128xf32>
    %15 = tpu.matmul %13, %14, %cst_15 {dimension_numbers = #tpu.dot_dimension_numbers<[1], [0], [0], [1], [0, 0, 1, 1], [], []>} : vector<64x64xf32>, vector<64x128xf32>, vector<64x128xf32> -> vector<64x128xf32>
    %c0_16 = arith.constant 0 : index
    %c0_17 = arith.constant 0 : index
    %16 = vector.load %arg9[%c0_16, %c0_17] : memref<1x128xf32, #tpu.memory_space<vmem>>, vector<1x128xf32>
    %17 = vector.broadcast %16 : vector<1x128xf32> to vector<64x128xf32>
    %18 = arith.addf %15, %17 : vector<64x128xf32>
    %19 = vector.shape_cast %18 : vector<64x128xf32> to vector<8x8x128xf32>
    %c0_18 = arith.constant 0 : index
    %c0_19 = arith.constant 0 : index
    %c0_20 = arith.constant 0 : index
    %20 = vector.load %arg17[%c0_18, %c0_19, %c0_20] : memref<8x8x128xf32, #tpu.memory_space<vmem>>, vector<8x8x128xf32>
    tpu.vector_store %arg17[%c0_18, %c0_19, %c0_20], %19 {strides = array<i32>} : memref<8x8x128xf32, #tpu.memory_space<vmem>>, vector<8x8x128xf32>,
    %c0_21 = arith.constant 0 : index
    %c0_22 = arith.constant 0 : index
    %21 = vector.load %arg1[%c0_21, %c0_22] : memref<8x1xi32, #tpu.memory_space<vmem>>, vector<8x1xi32>
    %c8_i32 = arith.constant 8 : i32
    %22 = arith.muli %arg0, %c8_i32 : i32
    %c0_i32_23 = arith.constant 0 : i32
    %23 = arith.subi %c0_i32_23, %arg0 : i32
    %c8_i32_24 = arith.constant 8 : i32
    %24 = arith.muli %23, %c8_i32_24 : i32
    %c0_i32_25 = arith.constant 0 : i32
    %25 = arith.addi %22, %c0_i32_25 : i32
    %26 = arith.index_cast %c0_i32_25 : i32 to index
    %c0_26 = arith.constant 0 : index
    %c0_27 = arith.constant 0 : index
    %27 = vector.load %arg16[%26, %c0_26, %c0_27] : memref<8x8x128xf32, #tpu.memory_space<vmem>>, vector<1x8x128xf32>
    %28 = vector.shape_cast %27 : vector<1x8x128xf32> to vector<8x128xf32>
    %c0_28 = arith.constant 0 : index
    %c0_29 = arith.constant 0 : index
    %29 = vector.load %arg12[%c0_28, %c0_29] : memref<8x32xf32, #tpu.memory_space<vmem>>, vector<8x32xf32>
    %c0_30 = arith.constant 0 : index
    %c0_31 = arith.constant 0 : index
    %30 = vector.load %arg6[%c0_30, %c0_31] : memref<32x128xf32, #tpu.memory_space<vmem>>, vector<32x128xf32>
    %cst_32 = arith.constant dense<0.000000e+00> : vector<8x128xf32>
    %31 = tpu.matmul %29, %30, %cst_32 {dimension_numbers = #tpu.dot_dimension_numbers<[1], [0], [0], [1], [0, 0, 1, 1], [], []>} : vector<8x32xf32>, vector<32x128xf32>, vector<8x128xf32> -> vector<8x128xf32>
    %32 = arith.addf %28, %31 : vector<8x128xf32>
    %33 = vector.extract_strided_slice %32 {offsets = [0, 0], sizes = [8, 32], strides = [1, 1]} : vector<8x128xf32> to vector<8x32xf32>
    %cst_33 = arith.constant 5.000000e-01 : f32
    %34 = vector.broadcast %cst_33 : f32 to vector<8x32xf32>
    %35 = arith.mulf %34, %33 : vector<8x32xf32>
    %36 = math.tanh %35 : vector<8x32xf32>
    %cst_34 = arith.constant 5.000000e-01 : f32
    %37 = vector.broadcast %cst_34 : f32 to vector<8x32xf32>
    %38 = arith.mulf %37, %36 : vector<8x32xf32>
    %cst_35 = arith.constant 5.000000e-01 : f32
    %39 = vector.broadcast %cst_35 : f32 to vector<8x32xf32>
    %40 = arith.addf %38, %39 : vector<8x32xf32>
    %41 = vector.extract_strided_slice %32 {offsets = [0, 32], sizes = [8, 32], strides = [1, 1]} : vector<8x128xf32> to vector<8x32xf32>
    %cst_36 = arith.constant 5.000000e-01 : f32
    %42 = vector.broadcast %cst_36 : f32 to vector<8x32xf32>
    %43 = arith.mulf %42, %41 : vector<8x32xf32>
    %44 = math.tanh %43 : vector<8x32xf32>
    %cst_37 = arith.constant 5.000000e-01 : f32
    %45 = vector.broadcast %cst_37 : f32 to vector<8x32xf32>
    %46 = arith.mulf %45, %44 : vector<8x32xf32>
    %cst_38 = arith.constant 5.000000e-01 : f32
    %47 = vector.broadcast %cst_38 : f32 to vector<8x32xf32>
    %48 = arith.addf %46, %47 : vector<8x32xf32>
    %49 = vector.extract_strided_slice %32 {offsets = [0, 64], sizes = [8, 32], strides = [1, 1]} : vector<8x128xf32> to vector<8x32xf32>
    %50 = math.tanh %49 : vector<8x32xf32>
    %51 = vector.extract_strided_slice %32 {offsets = [0, 96], sizes = [8, 32], strides = [1, 1]} : vector<8x128xf32> to vector<8x32xf32>
    %cst_39 = arith.constant 5.000000e-01 : f32
    %52 = vector.broadcast %cst_39 : f32 to vector<8x32xf32>
    %53 = arith.mulf %52, %51 : vector<8x32xf32>
    %54 = math.tanh %53 : vector<8x32xf32>
    %cst_40 = arith.constant 5.000000e-01 : f32
    %55 = vector.broadcast %cst_40 : f32 to vector<8x32xf32>
    %56 = arith.mulf %55, %54 : vector<8x32xf32>
    %cst_41 = arith.constant 5.000000e-01 : f32
    %57 = vector.broadcast %cst_41 : f32 to vector<8x32xf32>
    %58 = arith.addf %56, %57 : vector<8x32xf32>
    %c0_42 = arith.constant 0 : index
    %c0_43 = arith.constant 0 : index
    %59 = vector.load %arg13[%c0_42, %c0_43] : memref<8x32xf32, #tpu.memory_space<vmem>>, vector<8x32xf32>
    %60 = arith.mulf %48, %59 : vector<8x32xf32>
    %61 = arith.mulf %40, %50 : vector<8x32xf32>
    %62 = arith.addf %60, %61 : vector<8x32xf32>
    %63 = math.tanh %62 : vector<8x32xf32>
    %64 = arith.mulf %58, %63 : vector<8x32xf32>
    %65 = vector.broadcast %25 : i32 to vector<8x1xi32>
    %66 = arith.cmpi sgt, %21, %65 : vector<8x1xi32>
    %c0_44 = arith.constant 0 : index
    %c0_45 = arith.constant 0 : index
    %67 = vector.load %arg13[%c0_44, %c0_45] : memref<8x32xf32, #tpu.memory_space<vmem>>, vector<8x32xf32>
    %68 = vector.shape_cast %66 : vector<8x1xi1> to vector<8x1xi1>
    %69 = vector.broadcast %68 : vector<8x1xi1> to vector<8x32xi1>
    %70 = arith.select %69, %62, %67 : vector<8x32xi1>, vector<8x32xf32>
    %c0_46 = arith.constant 0 : index
    %c0_47 = arith.constant 0 : index
    %71 = vector.load %arg13[%c0_46, %c0_47] : memref<8x32xf32, #tpu.memory_space<vmem>>, vector<8x32xf32>
    tpu.vector_store %arg13[%c0_46, %c0_47], %70 {strides = array<i32>} : memref<8x32xf32, #tpu.memory_space<vmem>>, vector<8x32xf32>,
    %c0_48 = arith.constant 0 : index
    %c0_49 = arith.constant 0 : index
    %72 = vector.load %arg12[%c0_48, %c0_49] : memref<8x32xf32, #tpu.memory_space<vmem>>, vector<8x32xf32>
    %73 = vector.shape_cast %66 : vector<8x1xi1> to vector<8x1xi1>
    %74 = vector.broadcast %73 : vector<8x1xi1> to vector<8x32xi1>
    %75 = arith.select %74, %64, %72 : vector<8x32xi1>, vector<8x32xf32>
    %c0_50 = arith.constant 0 : index
    %c0_51 = arith.constant 0 : index
    %76 = vector.load %arg12[%c0_50, %c0_51] : memref<8x32xf32, #tpu.memory_space<vmem>>, vector<8x32xf32>
    tpu.vector_store %arg12[%c0_50, %c0_51], %75 {strides = array<i32>} : memref<8x32xf32, #tpu.memory_space<vmem>>, vector<8x32xf32>,
    %cst_52 = arith.constant 0.000000e+00 : f32
    %77 = vector.shape_cast %66 : vector<8x1xi1> to vector<8x1xi1>
    %78 = vector.broadcast %77 : vector<8x1xi1> to vector<8x32xi1>
    %79 = vector.broadcast %cst_52 : f32 to vector<8x32xf32>
    %80 = arith.select %78, %64, %79 : vector<8x32xi1>, vector<8x32xf32>
    %81 = arith.index_cast %c0_i32_25 : i32 to index
    %c0_53 = arith.constant 0 : index
    %c0_54 = arith.constant 0 : index
    %82 = vector.load %arg10[%81, %c0_53, %c0_54] : memref<8x8x32xf32, #tpu.memory_space<vmem>>, vector<1x8x32xf32>
    %83 = vector.shape_cast %82 : vector<1x8x32xf32> to vector<8x32xf32>
    %84 = vector.shape_cast %80 : vector<8x32xf32> to vector<1x8x32xf32>
    tpu.vector_store %arg10[%81, %c0_53, %c0_54], %84 {strides = array<i32>} : memref<8x8x32xf32, #tpu.memory_space<vmem>>, vector<1x8x32xf32>,
    %c7_i32 = arith.constant 7 : i32
    %85 = arith.subi %c7_i32, %c0_i32_25 : i32
    %86 = arith.addi %24, %85 : i32
    %87 = arith.index_cast %85 : i32 to index
    %c0_55 = arith.constant 0 : index
    %c0_56 = arith.constant 0 : index
    %88 = vector.load %arg17[%87, %c0_55, %c0_56] : memref<8x8x128xf32, #tpu.memory_space<vmem>>, vector<1x8x128xf32>
    %89 = vector.shape_cast %88 : vector<1x8x128xf32> to vector<8x128xf32>
    %c0_57 = arith.constant 0 : index
    %c0_58 = arith.constant 0 : index
    %90 = vector.load %arg14[%c0_57, %c0_58] : memref<8x32xf32, #tpu.memory_space<vmem>>, vector<8x32xf32>
    %c0_59 = arith.constant 0 : index
    %c0_60 = arith.constant 0 : index
    %91 = vector.load %arg7[%c0_59, %c0_60] : memref<32x128xf32, #tpu.memory_space<vmem>>, vector<32x128xf32>
    %cst_61 = arith.constant dense<0.000000e+00> : vector<8x128xf32>
    %92 = tpu.matmul %90, %91, %cst_61 {dimension_numbers = #tpu.dot_dimension_numbers<[1], [0], [0], [1], [0, 0, 1, 1], [], []>} : vector<8x32xf32>, vector<32x128xf32>, vector<8x128xf32> -> vector<8x128xf32>
    %93 = arith.addf %89, %92 : vector<8x128xf32>
    %94 = vector.extract_strided_slice %93 {offsets = [0, 0], sizes = [8, 32], strides = [1, 1]} : vector<8x128xf32> to vector<8x32xf32>
    %cst_62 = arith.constant 5.000000e-01 : f32
    %95 = vector.broadcast %cst_62 : f32 to vector<8x32xf32>
    %96 = arith.mulf %95, %94 : vector<8x32xf32>
    %97 = math.tanh %96 : vector<8x32xf32>
    %cst_63 = arith.constant 5.000000e-01 : f32
    %98 = vector.broadcast %cst_63 : f32 to vector<8x32xf32>
    %99 = arith.mulf %98, %97 : vector<8x32xf32>
    %cst_64 = arith.constant 5.000000e-01 : f32
    %100 = vector.broadcast %cst_64 : f32 to vector<8x32xf32>
    %101 = arith.addf %99, %100 : vector<8x32xf32>
    %102 = vector.extract_strided_slice %93 {offsets = [0, 32], sizes = [8, 32], strides = [1, 1]} : vector<8x128xf32> to vector<8x32xf32>
    %cst_65 = arith.constant 5.000000e-01 : f32
    %103 = vector.broadcast %cst_65 : f32 to vector<8x32xf32>
    %104 = arith.mulf %103, %102 : vector<8x32xf32>
    %105 = math.tanh %104 : vector<8x32xf32>
    %cst_66 = arith.constant 5.000000e-01 : f32
    %106 = vector.broadcast %cst_66 : f32 to vector<8x32xf32>
    %107 = arith.mulf %106, %105 : vector<8x32xf32>
    %cst_67 = arith.constant 5.000000e-01 : f32
    %108 = vector.broadcast %cst_67 : f32 to vector<8x32xf32>
    %109 = arith.addf %107, %108 : vector<8x32xf32>
    %110 = vector.extract_strided_slice %93 {offsets = [0, 64], sizes = [8, 32], strides = [1, 1]} : vector<8x128xf32> to vector<8x32xf32>
    %111 = math.tanh %110 : vector<8x32xf32>
    %112 = vector.extract_strided_slice %93 {offsets = [0, 96], sizes = [8, 32], strides = [1, 1]} : vector<8x128xf32> to vector<8x32xf32>
    %cst_68 = arith.constant 5.000000e-01 : f32
    %113 = vector.broadcast %cst_68 : f32 to vector<8x32xf32>
    %114 = arith.mulf %113, %112 : vector<8x32xf32>
    %115 = math.tanh %114 : vector<8x32xf32>
    %cst_69 = arith.constant 5.000000e-01 : f32
    %116 = vector.broadcast %cst_69 : f32 to vector<8x32xf32>
    %117 = arith.mulf %116, %115 : vector<8x32xf32>
    %cst_70 = arith.constant 5.000000e-01 : f32
    %118 = vector.broadcast %cst_70 : f32 to vector<8x32xf32>
    %119 = arith.addf %117, %118 : vector<8x32xf32>
    %c0_71 = arith.constant 0 : index
    %c0_72 = arith.constant 0 : index
    %120 = vector.load %arg15[%c0_71, %c0_72] : memref<8x32xf32, #tpu.memory_space<vmem>>, vector<8x32xf32>
    %121 = arith.mulf %109, %120 : vector<8x32xf32>
    %122 = arith.mulf %101, %111 : vector<8x32xf32>
    %123 = arith.addf %121, %122 : vector<8x32xf32>
    %124 = math.tanh %123 : vector<8x32xf32>
    %125 = arith.mulf %119, %124 : vector<8x32xf32>
    %126 = vector.broadcast %86 : i32 to vector<8x1xi32>
    %127 = arith.cmpi sgt, %21, %126 : vector<8x1xi32>
    %c0_73 = arith.constant 0 : index
    %c0_74 = arith.constant 0 : index
    %128 = vector.load %arg15[%c0_73, %c0_74] : memref<8x32xf32, #tpu.memory_space<vmem>>, vector<8x32xf32>
    %129 = vector.shape_cast %127 : vector<8x1xi1> to vector<8x1xi1>
    %130 = vector.broadcast %129 : vector<8x1xi1> to vector<8x32xi1>
    %131 = arith.select %130, %123, %128 : vector<8x32xi1>, vector<8x32xf32>
    %c0_75 = arith.constant 0 : index
    %c0_76 = arith.constant 0 : index
    %132 = vector.load %arg15[%c0_75, %c0_76] : memref<8x32xf32, #tpu.memory_space<vmem>>, vector<8x32xf32>
    tpu.vector_store %arg15[%c0_75, %c0_76], %131 {strides = array<i32>} : memref<8x32xf32, #tpu.memory_space<vmem>>, vector<8x32xf32>,
    %c0_77 = arith.constant 0 : index
    %c0_78 = arith.constant 0 : index
    %133 = vector.load %arg14[%c0_77, %c0_78] : memref<8x32xf32, #tpu.memory_space<vmem>>, vector<8x32xf32>
    %134 = vector.shape_cast %127 : vector<8x1xi1> to vector<8x1xi1>
    %135 = vector.broadcast %134 : vector<8x1xi1> to vector<8x32xi1>
    %136 = arith.select %135, %125, %133 : vector<8x32xi1>, vector<8x32xf32>
    %c0_79 = arith.constant 0 : index
    %c0_80 = arith.constant 0 : index
    %137 = vector.load %arg14[%c0_79, %c0_80] : memref<8x32xf32, #tpu.memory_space<vmem>>, vector<8x32xf32>
    tpu.vector_store %arg14[%c0_79, %c0_80], %136 {strides = array<i32>} : memref<8x32xf32, #tpu.memory_space<vmem>>, vector<8x32xf32>,
    %cst_81 = arith.constant 0.000000e+00 : f32
    %138 = vector.shape_cast %127 : vector<8x1xi1> to vector<8x1xi1>
    %139 = vector.broadcast %138 : vector<8x1xi1> to vector<8x32xi1>
    %140 = vector.broadcast %cst_81 : f32 to vector<8x32xf32>
    %141 = arith.select %139, %125, %140 : vector<8x32xi1>, vector<8x32xf32>
    %142 = arith.index_cast %85 : i32 to index
    %c0_82 = arith.constant 0 : index
    %c0_83 = arith.constant 0 : index
    %143 = vector.load %arg11[%142, %c0_82, %c0_83] : memref<8x8x32xf32, #tpu.memory_space<vmem>>, vector<1x8x32xf32>
    %144 = vector.shape_cast %143 : vector<1x8x32xf32> to vector<8x32xf32>
    %145 = vector.shape_cast %141 : vector<8x32xf32> to vector<1x8x32xf32>
    tpu.vector_store %arg11[%142, %c0_82, %c0_83], %145 {strides = array<i32>} : memref<8x8x32xf32, #tpu.memory_space<vmem>>, vector<1x8x32xf32>,
    %c1_i32 = arith.constant 1 : i32
    %146 = arith.addi %22, %c1_i32 : i32
    %147 = arith.index_cast %c1_i32 : i32 to index
    %c0_84 = arith.constant 0 : index
    %c0_85 = arith.constant 0 : index
    %148 = vector.load %arg16[%147, %c0_84, %c0_85] : memref<8x8x128xf32, #tpu.memory_space<vmem>>, vector<1x8x128xf32>
    %149 = vector.shape_cast %148 : vector<1x8x128xf32> to vector<8x128xf32>
    %c0_86 = arith.constant 0 : index
    %c0_87 = arith.constant 0 : index
    %150 = vector.load %arg12[%c0_86, %c0_87] : memref<8x32xf32, #tpu.memory_space<vmem>>, vector<8x32xf32>
    %c0_88 = arith.constant 0 : index
    %c0_89 = arith.constant 0 : index
    %151 = vector.load %arg6[%c0_88, %c0_89] : memref<32x128xf32, #tpu.memory_space<vmem>>, vector<32x128xf32>
    %cst_90 = arith.constant dense<0.000000e+00> : vector<8x128xf32>
    %152 = tpu.matmul %150, %151, %cst_90 {dimension_numbers = #tpu.dot_dimension_numbers<[1], [0], [0], [1], [0, 0, 1, 1], [], []>} : vector<8x32xf32>, vector<32x128xf32>, vector<8x128xf32> -> vector<8x128xf32>
    %153 = arith.addf %149, %152 : vector<8x128xf32>
    %154 = vector.extract_strided_slice %153 {offsets = [0, 0], sizes = [8, 32], strides = [1, 1]} : vector<8x128xf32> to vector<8x32xf32>
    %cst_91 = arith.constant 5.000000e-01 : f32
    %155 = vector.broadcast %cst_91 : f32 to vector<8x32xf32>
    %156 = arith.mulf %155, %154 : vector<8x32xf32>
    %157 = math.tanh %156 : vector<8x32xf32>
    %cst_92 = arith.constant 5.000000e-01 : f32
    %158 = vector.broadcast %cst_92 : f32 to vector<8x32xf32>
    %159 = arith.mulf %158, %157 : vector<8x32xf32>
    %cst_93 = arith.constant 5.000000e-01 : f32
    %160 = vector.broadcast %cst_93 : f32 to vector<8x32xf32>
    %161 = arith.addf %159, %160 : vector<8x32xf32>
    %162 = vector.extract_strided_slice %153 {offsets = [0, 32], sizes = [8, 32], strides = [1, 1]} : vector<8x128xf32> to vector<8x32xf32>
    %cst_94 = arith.constant 5.000000e-01 : f32
    %163 = vector.broadcast %cst_94 : f32 to vector<8x32xf32>
    %164 = arith.mulf %163, %162 : vector<8x32xf32>
    %165 = math.tanh %164 : vector<8x32xf32>
    %cst_95 = arith.constant 5.000000e-01 : f32
    %166 = vector.broadcast %cst_95 : f32 to vector<8x32xf32>
    %167 = arith.mulf %166, %165 : vector<8x32xf32>
    %cst_96 = arith.constant 5.000000e-01 : f32
    %168 = vector.broadcast %cst_96 : f32 to vector<8x32xf32>
    %169 = arith.addf %167, %168 : vector<8x32xf32>
    %170 = vector.extract_strided_slice %153 {offsets = [0, 64], sizes = [8, 32], strides = [1, 1]} : vector<8x128xf32> to vector<8x32xf32>
    %171 = math.tanh %170 : vector<8x32xf32>
    %172 = vector.extract_strided_slice %153 {offsets = [0, 96], sizes = [8, 32], strides = [1, 1]} : vector<8x128xf32> to vector<8x32xf32>
    %cst_97 = arith.constant 5.000000e-01 : f32
    %173 = vector.broadcast %cst_97 : f32 to vector<8x32xf32>
    %174 = arith.mulf %173, %172 : vector<8x32xf32>
    %175 = math.tanh %174 : vector<8x32xf32>
    %cst_98 = arith.constant 5.000000e-01 : f32
    %176 = vector.broadcast %cst_98 : f32 to vector<8x32xf32>
    %177 = arith.mulf %176, %175 : vector<8x32xf32>
    %cst_99 = arith.constant 5.000000e-01 : f32
    %178 = vector.broadcast %cst_99 : f32 to vector<8x32xf32>
    %179 = arith.addf %177, %178 : vector<8x32xf32>
    %c0_100 = arith.constant 0 : index
    %c0_101 = arith.constant 0 : index
    %180 = vector.load %arg13[%c0_100, %c0_101] : memref<8x32xf32, #tpu.memory_space<vmem>>, vector<8x32xf32>
    %181 = arith.mulf %169, %180 : vector<8x32xf32>
    %182 = arith.mulf %161, %171 : vector<8x32xf32>
    %183 = arith.addf %181, %182 : vector<8x32xf32>
    %184 = math.tanh %183 : vector<8x32xf32>
    %185 = arith.mulf %179, %184 : vector<8x32xf32>
    %186 = vector.broadcast %146 : i32 to vector<8x1xi32>
    %187 = arith.cmpi sgt, %21, %186 : vector<8x1xi32>
    %c0_102 = arith.constant 0 : index
    %c0_103 = arith.constant 0 : index
    %188 = vector.load %arg13[%c0_102, %c0_103] : memref<8x32xf32, #tpu.memory_space<vmem>>, vector<8x32xf32>
    %189 = vector.shape_cast %187 : vector<8x1xi1> to vector<8x1xi1>
    %190 = vector.broadcast %189 : vector<8x1xi1> to vector<8x32xi1>
    %191 = arith.select %190, %183, %188 : vector<8x32xi1>, vector<8x32xf32>
    %c0_104 = arith.constant 0 : index
    %c0_105 = arith.constant 0 : index
    %192 = vector.load %arg13[%c0_104, %c0_105] : memref<8x32xf32, #tpu.memory_space<vmem>>, vector<8x32xf32>
    tpu.vector_store %arg13[%c0_104, %c0_105], %191 {strides = array<i32>} : memref<8x32xf32, #tpu.memory_space<vmem>>, vector<8x32xf32>,
    %c0_106 = arith.constant 0 : index
    %c0_107 = arith.constant 0 : index
    %193 = vector.load %arg12[%c0_106, %c0_107] : memref<8x32xf32, #tpu.memory_space<vmem>>, vector<8x32xf32>
    %194 = vector.shape_cast %187 : vector<8x1xi1> to vector<8x1xi1>
    %195 = vector.broadcast %194 : vector<8x1xi1> to vector<8x32xi1>
    %196 = arith.select %195, %185, %193 : vector<8x32xi1>, vector<8x32xf32>
    %c0_108 = arith.constant 0 : index
    %c0_109 = arith.constant 0 : index
    %197 = vector.load %arg12[%c0_108, %c0_109] : memref<8x32xf32, #tpu.memory_space<vmem>>, vector<8x32xf32>
    tpu.vector_store %arg12[%c0_108, %c0_109], %196 {strides = array<i32>} : memref<8x32xf32, #tpu.memory_space<vmem>>, vector<8x32xf32>,
    %cst_110 = arith.constant 0.000000e+00 : f32
    %198 = vector.shape_cast %187 : vector<8x1xi1> to vector<8x1xi1>
    %199 = vector.broadcast %198 : vector<8x1xi1> to vector<8x32xi1>
    %200 = vector.broadcast %cst_110 : f32 to vector<8x32xf32>
    %201 = arith.select %199, %185, %200 : vector<8x32xi1>, vector<8x32xf32>
    %202 = arith.index_cast %c1_i32 : i32 to index
    %c0_111 = arith.constant 0 : index
    %c0_112 = arith.constant 0 : index
    %203 = vector.load %arg10[%202, %c0_111, %c0_112] : memref<8x8x32xf32, #tpu.memory_space<vmem>>, vector<1x8x32xf32>
    %204 = vector.shape_cast %203 : vector<1x8x32xf32> to vector<8x32xf32>
    %205 = vector.shape_cast %201 : vector<8x32xf32> to vector<1x8x32xf32>
    tpu.vector_store %arg10[%202, %c0_111, %c0_112], %205 {strides = array<i32>} : memref<8x8x32xf32, #tpu.memory_space<vmem>>, vector<1x8x32xf32>,
    %c7_i32_113 = arith.constant 7 : i32
    %206 = arith.subi %c7_i32_113, %c1_i32 : i32
    %207 = arith.addi %24, %206 : i32
    %208 = arith.index_cast %206 : i32 to index
    %c0_114 = arith.constant 0 : index
    %c0_115 = arith.constant 0 : index
    %209 = vector.load %arg17[%208, %c0_114, %c0_115] : memref<8x8x128xf32, #tpu.memory_space<vmem>>, vector<1x8x128xf32>
    %210 = vector.shape_cast %209 : vector<1x8x128xf32> to vector<8x128xf32>
    %c0_116 = arith.constant 0 : index
    %c0_117 = arith.constant 0 : index
    %211 = vector.load %arg14[%c0_116, %c0_117] : memref<8x32xf32, #tpu.memory_space<vmem>>, vector<8x32xf32>
    %c0_118 = arith.constant 0 : index
    %c0_119 = arith.constant 0 : index
    %212 = vector.load %arg7[%c0_118, %c0_119] : memref<32x128xf32, #tpu.memory_space<vmem>>, vector<32x128xf32>
    %cst_120 = arith.constant dense<0.000000e+00> : vector<8x128xf32>
    %213 = tpu.matmul %211, %212, %cst_120 {dimension_numbers = #tpu.dot_dimension_numbers<[1], [0], [0], [1], [0, 0, 1, 1], [], []>} : vector<8x32xf32>, vector<32x128xf32>, vector<8x128xf32> -> vector<8x128xf32>
    %214 = arith.addf %210, %213 : vector<8x128xf32>
    %215 = vector.extract_strided_slice %214 {offsets = [0, 0], sizes = [8, 32], strides = [1, 1]} : vector<8x128xf32> to vector<8x32xf32>
    %cst_121 = arith.constant 5.000000e-01 : f32
    %216 = vector.broadcast %cst_121 : f32 to vector<8x32xf32>
    %217 = arith.mulf %216, %215 : vector<8x32xf32>
    %218 = math.tanh %217 : vector<8x32xf32>
    %cst_122 = arith.constant 5.000000e-01 : f32
    %219 = vector.broadcast %cst_122 : f32 to vector<8x32xf32>
    %220 = arith.mulf %219, %218 : vector<8x32xf32>
    %cst_123 = arith.constant 5.000000e-01 : f32
    %221 = vector.broadcast %cst_123 : f32 to vector<8x32xf32>
    %222 = arith.addf %220, %221 : vector<8x32xf32>
    %223 = vector.extract_strided_slice %214 {offsets = [0, 32], sizes = [8, 32], strides = [1, 1]} : vector<8x128xf32> to vector<8x32xf32>
    %cst_124 = arith.constant 5.000000e-01 : f32
    %224 = vector.broadcast %cst_124 : f32 to vector<8x32xf32>
    %225 = arith.mulf %224, %223 : vector<8x32xf32>
    %226 = math.tanh %225 : vector<8x32xf32>
    %cst_125 = arith.constant 5.000000e-01 : f32
    %227 = vector.broadcast %cst_125 : f32 to vector<8x32xf32>
    %228 = arith.mulf %227, %226 : vector<8x32xf32>
    %cst_126 = arith.constant 5.000000e-01 : f32
    %229 = vector.broadcast %cst_126 : f32 to vector<8x32xf32>
    %230 = arith.addf %228, %229 : vector<8x32xf32>
    %231 = vector.extract_strided_slice %214 {offsets = [0, 64], sizes = [8, 32], strides = [1, 1]} : vector<8x128xf32> to vector<8x32xf32>
    %232 = math.tanh %231 : vector<8x32xf32>
    %233 = vector.extract_strided_slice %214 {offsets = [0, 96], sizes = [8, 32], strides = [1, 1]} : vector<8x128xf32> to vector<8x32xf32>
    %cst_127 = arith.constant 5.000000e-01 : f32
    %234 = vector.broadcast %cst_127 : f32 to vector<8x32xf32>
    %235 = arith.mulf %234, %233 : vector<8x32xf32>
    %236 = math.tanh %235 : vector<8x32xf32>
    %cst_128 = arith.constant 5.000000e-01 : f32
    %237 = vector.broadcast %cst_128 : f32 to vector<8x32xf32>
    %238 = arith.mulf %237, %236 : vector<8x32xf32>
    %cst_129 = arith.constant 5.000000e-01 : f32
    %239 = vector.broadcast %cst_129 : f32 to vector<8x32xf32>
    %240 = arith.addf %238, %239 : vector<8x32xf32>
    %c0_130 = arith.constant 0 : index
    %c0_131 = arith.constant 0 : index
    %241 = vector.load %arg15[%c0_130, %c0_131] : memref<8x32xf32, #tpu.memory_space<vmem>>, vector<8x32xf32>
    %242 = arith.mulf %230, %241 : vector<8x32xf32>
    %243 = arith.mulf %222, %232 : vector<8x32xf32>
    %244 = arith.addf %242, %243 : vector<8x32xf32>
    %245 = math.tanh %244 : vector<8x32xf32>
    %246 = arith.mulf %240, %245 : vector<8x32xf32>
    %247 = vector.broadcast %207 : i32 to vector<8x1xi32>
    %248 = arith.cmpi sgt, %21, %247 : vector<8x1xi32>
    %c0_132 = arith.constant 0 : index
    %c0_133 = arith.constant 0 : index
    %249 = vector.load %arg15[%c0_132, %c0_133] : memref<8x32xf32, #tpu.memory_space<vmem>>, vector<8x32xf32>
    %250 = vector.shape_cast %248 : vector<8x1xi1> to vector<8x1xi1>
    %251 = vector.broadcast %250 : vector<8x1xi1> to vector<8x32xi1>
    %252 = arith.select %251, %244, %249 : vector<8x32xi1>, vector<8x32xf32>
    %c0_134 = arith.constant 0 : index
    %c0_135 = arith.constant 0 : index
    %253 = vector.load %arg15[%c0_134, %c0_135] : memref<8x32xf32, #tpu.memory_space<vmem>>, vector<8x32xf32>
    tpu.vector_store %arg15[%c0_134, %c0_135], %252 {strides = array<i32>} : memref<8x32xf32, #tpu.memory_space<vmem>>, vector<8x32xf32>,
    %c0_136 = arith.constant 0 : index
    %c0_137 = arith.constant 0 : index
    %254 = vector.load %arg14[%c0_136, %c0_137] : memref<8x32xf32, #tpu.memory_space<vmem>>, vector<8x32xf32>
    %255 = vector.shape_cast %248 : vector<8x1xi1> to vector<8x1xi1>
    %256 = vector.broadcast %255 : vector<8x1xi1> to vector<8x32xi1>
    %257 = arith.select %256, %246, %254 : vector<8x32xi1>, vector<8x32xf32>
    %c0_138 = arith.constant 0 : index
    %c0_139 = arith.constant 0 : index
    %258 = vector.load %arg14[%c0_138, %c0_139] : memref<8x32xf32, #tpu.memory_space<vmem>>, vector<8x32xf32>
    tpu.vector_store %arg14[%c0_138, %c0_139], %257 {strides = array<i32>} : memref<8x32xf32, #tpu.memory_space<vmem>>, vector<8x32xf32>,
    %cst_140 = arith.constant 0.000000e+00 : f32
    %259 = vector.shape_cast %248 : vector<8x1xi1> to vector<8x1xi1>
    %260 = vector.broadcast %259 : vector<8x1xi1> to vector<8x32xi1>
    %261 = vector.broadcast %cst_140 : f32 to vector<8x32xf32>
    %262 = arith.select %260, %246, %261 : vector<8x32xi1>, vector<8x32xf32>
    %263 = arith.index_cast %206 : i32 to index
    %c0_141 = arith.constant 0 : index
    %c0_142 = arith.constant 0 : index
    %264 = vector.load %arg11[%263, %c0_141, %c0_142] : memref<8x8x32xf32, #tpu.memory_space<vmem>>, vector<1x8x32xf32>
    %265 = vector.shape_cast %264 : vector<1x8x32xf32> to vector<8x32xf32>
    %266 = vector.shape_cast %262 : vector<8x32xf32> to vector<1x8x32xf32>
    tpu.vector_store %arg11[%263, %c0_141, %c0_142], %266 {strides = array<i32>} : memref<8x8x32xf32, #tpu.memory_space<vmem>>, vector<1x8x32xf32>,
    %c2_i32 = arith.constant 2 : i32
    %267 = arith.addi %22, %c2_i32 : i32
    %268 = arith.index_cast %c2_i32 : i32 to index
    %c0_143 = arith.constant 0 : index
    %c0_144 = arith.constant 0 : index
    %269 = vector.load %arg16[%268, %c0_143, %c0_144] : memref<8x8x128xf32, #tpu.memory_space<vmem>>, vector<1x8x128xf32>
    %270 = vector.shape_cast %269 : vector<1x8x128xf32> to vector<8x128xf32>
    %c0_145 = arith.constant 0 : index
    %c0_146 = arith.constant 0 : index
    %271 = vector.load %arg12[%c0_145, %c0_146] : memref<8x32xf32, #tpu.memory_space<vmem>>, vector<8x32xf32>
    %c0_147 = arith.constant 0 : index
    %c0_148 = arith.constant 0 : index
    %272 = vector.load %arg6[%c0_147, %c0_148] : memref<32x128xf32, #tpu.memory_space<vmem>>, vector<32x128xf32>
    %cst_149 = arith.constant dense<0.000000e+00> : vector<8x128xf32>
    %273 = tpu.matmul %271, %272, %cst_149 {dimension_numbers = #tpu.dot_dimension_numbers<[1], [0], [0], [1], [0, 0, 1, 1], [], []>} : vector<8x32xf32>, vector<32x128xf32>, vector<8x128xf32> -> vector<8x128xf32>
    %274 = arith.addf %270, %273 : vector<8x128xf32>
    %275 = vector.extract_strided_slice %274 {offsets = [0, 0], sizes = [8, 32], strides = [1, 1]} : vector<8x128xf32> to vector<8x32xf32>
    %cst_150 = arith.constant 5.000000e-01 : f32
    %276 = vector.broadcast %cst_150 : f32 to vector<8x32xf32>
    %277 = arith.mulf %276, %275 : vector<8x32xf32>
    %278 = math.tanh %277 : vector<8x32xf32>
    %cst_151 = arith.constant 5.000000e-01 : f32
    %279 = vector.broadcast %cst_151 : f32 to vector<8x32xf32>
    %280 = arith.mulf %279, %278 : vector<8x32xf32>
    %cst_152 = arith.constant 5.000000e-01 : f32
    %281 = vector.broadcast %cst_152 : f32 to vector<8x32xf32>
    %282 = arith.addf %280, %281 : vector<8x32xf32>
    %283 = vector.extract_strided_slice %274 {offsets = [0, 32], sizes = [8, 32], strides = [1, 1]} : vector<8x128xf32> to vector<8x32xf32>
    %cst_153 = arith.constant 5.000000e-01 : f32
    %284 = vector.broadcast %cst_153 : f32 to vector<8x32xf32>
    %285 = arith.mulf %284, %283 : vector<8x32xf32>
    %286 = math.tanh %285 : vector<8x32xf32>
    %cst_154 = arith.constant 5.000000e-01 : f32
    %287 = vector.broadcast %cst_154 : f32 to vector<8x32xf32>
    %288 = arith.mulf %287, %286 : vector<8x32xf32>
    %cst_155 = arith.constant 5.000000e-01 : f32
    %289 = vector.broadcast %cst_155 : f32 to vector<8x32xf32>
    %290 = arith.addf %288, %289 : vector<8x32xf32>
    %291 = vector.extract_strided_slice %274 {offsets = [0, 64], sizes = [8, 32], strides = [1, 1]} : vector<8x128xf32> to vector<8x32xf32>
    %292 = math.tanh %291 : vector<8x32xf32>
    %293 = vector.extract_strided_slice %274 {offsets = [0, 96], sizes = [8, 32], strides = [1, 1]} : vector<8x128xf32> to vector<8x32xf32>
    %cst_156 = arith.constant 5.000000e-01 : f32
    %294 = vector.broadcast %cst_156 : f32 to vector<8x32xf32>
    %295 = arith.mulf %294, %293 : vector<8x32xf32>
    %296 = math.tanh %295 : vector<8x32xf32>
    %cst_157 = arith.constant 5.000000e-01 : f32
    %297 = vector.broadcast %cst_157 : f32 to vector<8x32xf32>
    %298 = arith.mulf %297, %296 : vector<8x32xf32>
    %cst_158 = arith.constant 5.000000e-01 : f32
    %299 = vector.broadcast %cst_158 : f32 to vector<8x32xf32>
    %300 = arith.addf %298, %299 : vector<8x32xf32>
    %c0_159 = arith.constant 0 : index
    %c0_160 = arith.constant 0 : index
    %301 = vector.load %arg13[%c0_159, %c0_160] : memref<8x32xf32, #tpu.memory_space<vmem>>, vector<8x32xf32>
    %302 = arith.mulf %290, %301 : vector<8x32xf32>
    %303 = arith.mulf %282, %292 : vector<8x32xf32>
    %304 = arith.addf %302, %303 : vector<8x32xf32>
    %305 = math.tanh %304 : vector<8x32xf32>
    %306 = arith.mulf %300, %305 : vector<8x32xf32>
    %307 = vector.broadcast %267 : i32 to vector<8x1xi32>
    %308 = arith.cmpi sgt, %21, %307 : vector<8x1xi32>
    %c0_161 = arith.constant 0 : index
    %c0_162 = arith.constant 0 : index
    %309 = vector.load %arg13[%c0_161, %c0_162] : memref<8x32xf32, #tpu.memory_space<vmem>>, vector<8x32xf32>
    %310 = vector.shape_cast %308 : vector<8x1xi1> to vector<8x1xi1>
    %311 = vector.broadcast %310 : vector<8x1xi1> to vector<8x32xi1>
    %312 = arith.select %311, %304, %309 : vector<8x32xi1>, vector<8x32xf32>
    %c0_163 = arith.constant 0 : index
    %c0_164 = arith.constant 0 : index
    %313 = vector.load %arg13[%c0_163, %c0_164] : memref<8x32xf32, #tpu.memory_space<vmem>>, vector<8x32xf32>
    tpu.vector_store %arg13[%c0_163, %c0_164], %312 {strides = array<i32>} : memref<8x32xf32, #tpu.memory_space<vmem>>, vector<8x32xf32>,
    %c0_165 = arith.constant 0 : index
    %c0_166 = arith.constant 0 : index
    %314 = vector.load %arg12[%c0_165, %c0_166] : memref<8x32xf32, #tpu.memory_space<vmem>>, vector<8x32xf32>
    %315 = vector.shape_cast %308 : vector<8x1xi1> to vector<8x1xi1>
    %316 = vector.broadcast %315 : vector<8x1xi1> to vector<8x32xi1>
    %317 = arith.select %316, %306, %314 : vector<8x32xi1>, vector<8x32xf32>
    %c0_167 = arith.constant 0 : index
    %c0_168 = arith.constant 0 : index
    %318 = vector.load %arg12[%c0_167, %c0_168] : memref<8x32xf32, #tpu.memory_space<vmem>>, vector<8x32xf32>
    tpu.vector_store %arg12[%c0_167, %c0_168], %317 {strides = array<i32>} : memref<8x32xf32, #tpu.memory_space<vmem>>, vector<8x32xf32>,
    %cst_169 = arith.constant 0.000000e+00 : f32
    %319 = vector.shape_cast %308 : vector<8x1xi1> to vector<8x1xi1>
    %320 = vector.broadcast %319 : vector<8x1xi1> to vector<8x32xi1>
    %321 = vector.broadcast %cst_169 : f32 to vector<8x32xf32>
    %322 = arith.select %320, %306, %321 : vector<8x32xi1>, vector<8x32xf32>
    %323 = arith.index_cast %c2_i32 : i32 to index
    %c0_170 = arith.constant 0 : index
    %c0_171 = arith.constant 0 : index
    %324 = vector.load %arg10[%323, %c0_170, %c0_171] : memref<8x8x32xf32, #tpu.memory_space<vmem>>, vector<1x8x32xf32>
    %325 = vector.shape_cast %324 : vector<1x8x32xf32> to vector<8x32xf32>
    %326 = vector.shape_cast %322 : vector<8x32xf32> to vector<1x8x32xf32>
    tpu.vector_store %arg10[%323, %c0_170, %c0_171], %326 {strides = array<i32>} : memref<8x8x32xf32, #tpu.memory_space<vmem>>, vector<1x8x32xf32>,
    %c7_i32_172 = arith.constant 7 : i32
    %327 = arith.subi %c7_i32_172, %c2_i32 : i32
    %328 = arith.addi %24, %327 : i32
    %329 = arith.index_cast %327 : i32 to index
    %c0_173 = arith.constant 0 : index
    %c0_174 = arith.constant 0 : index
    %330 = vector.load %arg17[%329, %c0_173, %c0_174] : memref<8x8x128xf32, #tpu.memory_space<vmem>>, vector<1x8x128xf32>
    %331 = vector.shape_cast %330 : vector<1x8x128xf32> to vector<8x128xf32>
    %c0_175 = arith.constant 0 : index
    %c0_176 = arith.constant 0 : index
    %332 = vector.load %arg14[%c0_175, %c0_176] : memref<8x32xf32, #tpu.memory_space<vmem>>, vector<8x32xf32>
    %c0_177 = arith.constant 0 : index
    %c0_178 = arith.constant 0 : index
    %333 = vector.load %arg7[%c0_177, %c0_178] : memref<32x128xf32, #tpu.memory_space<vmem>>, vector<32x128xf32>
    %cst_179 = arith.constant dense<0.000000e+00> : vector<8x128xf32>
    %334 = tpu.matmul %332, %333, %cst_179 {dimension_numbers = #tpu.dot_dimension_numbers<[1], [0], [0], [1], [0, 0, 1, 1], [], []>} : vector<8x32xf32>, vector<32x128xf32>, vector<8x128xf32> -> vector<8x128xf32>
    %335 = arith.addf %331, %334 : vector<8x128xf32>
    %336 = vector.extract_strided_slice %335 {offsets = [0, 0], sizes = [8, 32], strides = [1, 1]} : vector<8x128xf32> to vector<8x32xf32>
    %cst_180 = arith.constant 5.000000e-01 : f32
    %337 = vector.broadcast %cst_180 : f32 to vector<8x32xf32>
    %338 = arith.mulf %337, %336 : vector<8x32xf32>
    %339 = math.tanh %338 : vector<8x32xf32>
    %cst_181 = arith.constant 5.000000e-01 : f32
    %340 = vector.broadcast %cst_181 : f32 to vector<8x32xf32>
    %341 = arith.mulf %340, %339 : vector<8x32xf32>
    %cst_182 = arith.constant 5.000000e-01 : f32
    %342 = vector.broadcast %cst_182 : f32 to vector<8x32xf32>
    %343 = arith.addf %341, %342 : vector<8x32xf32>
    %344 = vector.extract_strided_slice %335 {offsets = [0, 32], sizes = [8, 32], strides = [1, 1]} : vector<8x128xf32> to vector<8x32xf32>
    %cst_183 = arith.constant 5.000000e-01 : f32
    %345 = vector.broadcast %cst_183 : f32 to vector<8x32xf32>
    %346 = arith.mulf %345, %344 : vector<8x32xf32>
    %347 = math.tanh %346 : vector<8x32xf32>
    %cst_184 = arith.constant 5.000000e-01 : f32
    %348 = vector.broadcast %cst_184 : f32 to vector<8x32xf32>
    %349 = arith.mulf %348, %347 : vector<8x32xf32>
    %cst_185 = arith.constant 5.000000e-01 : f32
    %350 = vector.broadcast %cst_185 : f32 to vector<8x32xf32>
    %351 = arith.addf %349, %350 : vector<8x32xf32>
    %352 = vector.extract_strided_slice %335 {offsets = [0, 64], sizes = [8, 32], strides = [1, 1]} : vector<8x128xf32> to vector<8x32xf32>
    %353 = math.tanh %352 : vector<8x32xf32>
    %354 = vector.extract_strided_slice %335 {offsets = [0, 96], sizes = [8, 32], strides = [1, 1]} : vector<8x128xf32> to vector<8x32xf32>
    %cst_186 = arith.constant 5.000000e-01 : f32
    %355 = vector.broadcast %cst_186 : f32 to vector<8x32xf32>
    %356 = arith.mulf %355, %354 : vector<8x32xf32>
    %357 = math.tanh %356 : vector<8x32xf32>
    %cst_187 = arith.constant 5.000000e-01 : f32
    %358 = vector.broadcast %cst_187 : f32 to vector<8x32xf32>
    %359 = arith.mulf %358, %357 : vector<8x32xf32>
    %cst_188 = arith.constant 5.000000e-01 : f32
    %360 = vector.broadcast %cst_188 : f32 to vector<8x32xf32>
    %361 = arith.addf %359, %360 : vector<8x32xf32>
    %c0_189 = arith.constant 0 : index
    %c0_190 = arith.constant 0 : index
    %362 = vector.load %arg15[%c0_189, %c0_190] : memref<8x32xf32, #tpu.memory_space<vmem>>, vector<8x32xf32>
    %363 = arith.mulf %351, %362 : vector<8x32xf32>
    %364 = arith.mulf %343, %353 : vector<8x32xf32>
    %365 = arith.addf %363, %364 : vector<8x32xf32>
    %366 = math.tanh %365 : vector<8x32xf32>
    %367 = arith.mulf %361, %366 : vector<8x32xf32>
    %368 = vector.broadcast %328 : i32 to vector<8x1xi32>
    %369 = arith.cmpi sgt, %21, %368 : vector<8x1xi32>
    %c0_191 = arith.constant 0 : index
    %c0_192 = arith.constant 0 : index
    %370 = vector.load %arg15[%c0_191, %c0_192] : memref<8x32xf32, #tpu.memory_space<vmem>>, vector<8x32xf32>
    %371 = vector.shape_cast %369 : vector<8x1xi1> to vector<8x1xi1>
    %372 = vector.broadcast %371 : vector<8x1xi1> to vector<8x32xi1>
    %373 = arith.select %372, %365, %370 : vector<8x32xi1>, vector<8x32xf32>
    %c0_193 = arith.constant 0 : index
    %c0_194 = arith.constant 0 : index
    %374 = vector.load %arg15[%c0_193, %c0_194] : memref<8x32xf32, #tpu.memory_space<vmem>>, vector<8x32xf32>
    tpu.vector_store %arg15[%c0_193, %c0_194], %373 {strides = array<i32>} : memref<8x32xf32, #tpu.memory_space<vmem>>, vector<8x32xf32>,
    %c0_195 = arith.constant 0 : index
    %c0_196 = arith.constant 0 : index
    %375 = vector.load %arg14[%c0_195, %c0_196] : memref<8x32xf32, #tpu.memory_space<vmem>>, vector<8x32xf32>
    %376 = vector.shape_cast %369 : vector<8x1xi1> to vector<8x1xi1>
    %377 = vector.broadcast %376 : vector<8x1xi1> to vector<8x32xi1>
    %378 = arith.select %377, %367, %375 : vector<8x32xi1>, vector<8x32xf32>
    %c0_197 = arith.constant 0 : index
    %c0_198 = arith.constant 0 : index
    %379 = vector.load %arg14[%c0_197, %c0_198] : memref<8x32xf32, #tpu.memory_space<vmem>>, vector<8x32xf32>
    tpu.vector_store %arg14[%c0_197, %c0_198], %378 {strides = array<i32>} : memref<8x32xf32, #tpu.memory_space<vmem>>, vector<8x32xf32>,
    %cst_199 = arith.constant 0.000000e+00 : f32
    %380 = vector.shape_cast %369 : vector<8x1xi1> to vector<8x1xi1>
    %381 = vector.broadcast %380 : vector<8x1xi1> to vector<8x32xi1>
    %382 = vector.broadcast %cst_199 : f32 to vector<8x32xf32>
    %383 = arith.select %381, %367, %382 : vector<8x32xi1>, vector<8x32xf32>
    %384 = arith.index_cast %327 : i32 to index
    %c0_200 = arith.constant 0 : index
    %c0_201 = arith.constant 0 : index
    %385 = vector.load %arg11[%384, %c0_200, %c0_201] : memref<8x8x32xf32, #tpu.memory_space<vmem>>, vector<1x8x32xf32>
    %386 = vector.shape_cast %385 : vector<1x8x32xf32> to vector<8x32xf32>
    %387 = vector.shape_cast %383 : vector<8x32xf32> to vector<1x8x32xf32>
    tpu.vector_store %arg11[%384, %c0_200, %c0_201], %387 {strides = array<i32>} : memref<8x8x32xf32, #tpu.memory_space<vmem>>, vector<1x8x32xf32>,
    %c3_i32 = arith.constant 3 : i32
    %388 = arith.addi %22, %c3_i32 : i32
    %389 = arith.index_cast %c3_i32 : i32 to index
    %c0_202 = arith.constant 0 : index
    %c0_203 = arith.constant 0 : index
    %390 = vector.load %arg16[%389, %c0_202, %c0_203] : memref<8x8x128xf32, #tpu.memory_space<vmem>>, vector<1x8x128xf32>
    %391 = vector.shape_cast %390 : vector<1x8x128xf32> to vector<8x128xf32>
    %c0_204 = arith.constant 0 : index
    %c0_205 = arith.constant 0 : index
    %392 = vector.load %arg12[%c0_204, %c0_205] : memref<8x32xf32, #tpu.memory_space<vmem>>, vector<8x32xf32>
    %c0_206 = arith.constant 0 : index
    %c0_207 = arith.constant 0 : index
    %393 = vector.load %arg6[%c0_206, %c0_207] : memref<32x128xf32, #tpu.memory_space<vmem>>, vector<32x128xf32>
    %cst_208 = arith.constant dense<0.000000e+00> : vector<8x128xf32>
    %394 = tpu.matmul %392, %393, %cst_208 {dimension_numbers = #tpu.dot_dimension_numbers<[1], [0], [0], [1], [0, 0, 1, 1], [], []>} : vector<8x32xf32>, vector<32x128xf32>, vector<8x128xf32> -> vector<8x128xf32>
    %395 = arith.addf %391, %394 : vector<8x128xf32>
    %396 = vector.extract_strided_slice %395 {offsets = [0, 0], sizes = [8, 32], strides = [1, 1]} : vector<8x128xf32> to vector<8x32xf32>
    %cst_209 = arith.constant 5.000000e-01 : f32
    %397 = vector.broadcast %cst_209 : f32 to vector<8x32xf32>
    %398 = arith.mulf %397, %396 : vector<8x32xf32>
    %399 = math.tanh %398 : vector<8x32xf32>
    %cst_210 = arith.constant 5.000000e-01 : f32
    %400 = vector.broadcast %cst_210 : f32 to vector<8x32xf32>
    %401 = arith.mulf %400, %399 : vector<8x32xf32>
    %cst_211 = arith.constant 5.000000e-01 : f32
    %402 = vector.broadcast %cst_211 : f32 to vector<8x32xf32>
    %403 = arith.addf %401, %402 : vector<8x32xf32>
    %404 = vector.extract_strided_slice %395 {offsets = [0, 32], sizes = [8, 32], strides = [1, 1]} : vector<8x128xf32> to vector<8x32xf32>
    %cst_212 = arith.constant 5.000000e-01 : f32
    %405 = vector.broadcast %cst_212 : f32 to vector<8x32xf32>
    %406 = arith.mulf %405, %404 : vector<8x32xf32>
    %407 = math.tanh %406 : vector<8x32xf32>
    %cst_213 = arith.constant 5.000000e-01 : f32
    %408 = vector.broadcast %cst_213 : f32 to vector<8x32xf32>
    %409 = arith.mulf %408, %407 : vector<8x32xf32>
    %cst_214 = arith.constant 5.000000e-01 : f32
    %410 = vector.broadcast %cst_214 : f32 to vector<8x32xf32>
    %411 = arith.addf %409, %410 : vector<8x32xf32>
    %412 = vector.extract_strided_slice %395 {offsets = [0, 64], sizes = [8, 32], strides = [1, 1]} : vector<8x128xf32> to vector<8x32xf32>
    %413 = math.tanh %412 : vector<8x32xf32>
    %414 = vector.extract_strided_slice %395 {offsets = [0, 96], sizes = [8, 32], strides = [1, 1]} : vector<8x128xf32> to vector<8x32xf32>
    %cst_215 = arith.constant 5.000000e-01 : f32
    %415 = vector.broadcast %cst_215 : f32 to vector<8x32xf32>
    %416 = arith.mulf %415, %414 : vector<8x32xf32>
    %417 = math.tanh %416 : vector<8x32xf32>
    %cst_216 = arith.constant 5.000000e-01 : f32
    %418 = vector.broadcast %cst_216 : f32 to vector<8x32xf32>
    %419 = arith.mulf %418, %417 : vector<8x32xf32>
    %cst_217 = arith.constant 5.000000e-01 : f32
    %420 = vector.broadcast %cst_217 : f32 to vector<8x32xf32>
    %421 = arith.addf %419, %420 : vector<8x32xf32>
    %c0_218 = arith.constant 0 : index
    %c0_219 = arith.constant 0 : index
    %422 = vector.load %arg13[%c0_218, %c0_219] : memref<8x32xf32, #tpu.memory_space<vmem>>, vector<8x32xf32>
    %423 = arith.mulf %411, %422 : vector<8x32xf32>
    %424 = arith.mulf %403, %413 : vector<8x32xf32>
    %425 = arith.addf %423, %424 : vector<8x32xf32>
    %426 = math.tanh %425 : vector<8x32xf32>
    %427 = arith.mulf %421, %426 : vector<8x32xf32>
    %428 = vector.broadcast %388 : i32 to vector<8x1xi32>
    %429 = arith.cmpi sgt, %21, %428 : vector<8x1xi32>
    %c0_220 = arith.constant 0 : index
    %c0_221 = arith.constant 0 : index
    %430 = vector.load %arg13[%c0_220, %c0_221] : memref<8x32xf32, #tpu.memory_space<vmem>>, vector<8x32xf32>
    %431 = vector.shape_cast %429 : vector<8x1xi1> to vector<8x1xi1>
    %432 = vector.broadcast %431 : vector<8x1xi1> to vector<8x32xi1>
    %433 = arith.select %432, %425, %430 : vector<8x32xi1>, vector<8x32xf32>
    %c0_222 = arith.constant 0 : index
    %c0_223 = arith.constant 0 : index
    %434 = vector.load %arg13[%c0_222, %c0_223] : memref<8x32xf32, #tpu.memory_space<vmem>>, vector<8x32xf32>
    tpu.vector_store %arg13[%c0_222, %c0_223], %433 {strides = array<i32>} : memref<8x32xf32, #tpu.memory_space<vmem>>, vector<8x32xf32>,
    %c0_224 = arith.constant 0 : index
    %c0_225 = arith.constant 0 : index
    %435 = vector.load %arg12[%c0_224, %c0_225] : memref<8x32xf32, #tpu.memory_space<vmem>>, vector<8x32xf32>
    %436 = vector.shape_cast %429 : vector<8x1xi1> to vector<8x1xi1>
    %437 = vector.broadcast %436 : vector<8x1xi1> to vector<8x32xi1>
    %438 = arith.select %437, %427, %435 : vector<8x32xi1>, vector<8x32xf32>
    %c0_226 = arith.constant 0 : index
    %c0_227 = arith.constant 0 : index
    %439 = vector.load %arg12[%c0_226, %c0_227] : memref<8x32xf32, #tpu.memory_space<vmem>>, vector<8x32xf32>
    tpu.vector_store %arg12[%c0_226, %c0_227], %438 {strides = array<i32>} : memref<8x32xf32, #tpu.memory_space<vmem>>, vector<8x32xf32>,
    %cst_228 = arith.constant 0.000000e+00 : f32
    %440 = vector.shape_cast %429 : vector<8x1xi1> to vector<8x1xi1>
    %441 = vector.broadcast %440 : vector<8x1xi1> to vector<8x32xi1>
    %442 = vector.broadcast %cst_228 : f32 to vector<8x32xf32>
    %443 = arith.select %441, %427, %442 : vector<8x32xi1>, vector<8x32xf32>
    %444 = arith.index_cast %c3_i32 : i32 to index
    %c0_229 = arith.constant 0 : index
    %c0_230 = arith.constant 0 : index
    %445 = vector.load %arg10[%444, %c0_229, %c0_230] : memref<8x8x32xf32, #tpu.memory_space<vmem>>, vector<1x8x32xf32>
    %446 = vector.shape_cast %445 : vector<1x8x32xf32> to vector<8x32xf32>
    %447 = vector.shape_cast %443 : vector<8x32xf32> to vector<1x8x32xf32>
    tpu.vector_store %arg10[%444, %c0_229, %c0_230], %447 {strides = array<i32>} : memref<8x8x32xf32, #tpu.memory_space<vmem>>, vector<1x8x32xf32>,
    %c7_i32_231 = arith.constant 7 : i32
    %448 = arith.subi %c7_i32_231, %c3_i32 : i32
    %449 = arith.addi %24, %448 : i32
    %450 = arith.index_cast %448 : i32 to index
    %c0_232 = arith.constant 0 : index
    %c0_233 = arith.constant 0 : index
    %451 = vector.load %arg17[%450, %c0_232, %c0_233] : memref<8x8x128xf32, #tpu.memory_space<vmem>>, vector<1x8x128xf32>
    %452 = vector.shape_cast %451 : vector<1x8x128xf32> to vector<8x128xf32>
    %c0_234 = arith.constant 0 : index
    %c0_235 = arith.constant 0 : index
    %453 = vector.load %arg14[%c0_234, %c0_235] : memref<8x32xf32, #tpu.memory_space<vmem>>, vector<8x32xf32>
    %c0_236 = arith.constant 0 : index
    %c0_237 = arith.constant 0 : index
    %454 = vector.load %arg7[%c0_236, %c0_237] : memref<32x128xf32, #tpu.memory_space<vmem>>, vector<32x128xf32>
    %cst_238 = arith.constant dense<0.000000e+00> : vector<8x128xf32>
    %455 = tpu.matmul %453, %454, %cst_238 {dimension_numbers = #tpu.dot_dimension_numbers<[1], [0], [0], [1], [0, 0, 1, 1], [], []>} : vector<8x32xf32>, vector<32x128xf32>, vector<8x128xf32> -> vector<8x128xf32>
    %456 = arith.addf %452, %455 : vector<8x128xf32>
    %457 = vector.extract_strided_slice %456 {offsets = [0, 0], sizes = [8, 32], strides = [1, 1]} : vector<8x128xf32> to vector<8x32xf32>
    %cst_239 = arith.constant 5.000000e-01 : f32
    %458 = vector.broadcast %cst_239 : f32 to vector<8x32xf32>
    %459 = arith.mulf %458, %457 : vector<8x32xf32>
    %460 = math.tanh %459 : vector<8x32xf32>
    %cst_240 = arith.constant 5.000000e-01 : f32
    %461 = vector.broadcast %cst_240 : f32 to vector<8x32xf32>
    %462 = arith.mulf %461, %460 : vector<8x32xf32>
    %cst_241 = arith.constant 5.000000e-01 : f32
    %463 = vector.broadcast %cst_241 : f32 to vector<8x32xf32>
    %464 = arith.addf %462, %463 : vector<8x32xf32>
    %465 = vector.extract_strided_slice %456 {offsets = [0, 32], sizes = [8, 32], strides = [1, 1]} : vector<8x128xf32> to vector<8x32xf32>
    %cst_242 = arith.constant 5.000000e-01 : f32
    %466 = vector.broadcast %cst_242 : f32 to vector<8x32xf32>
    %467 = arith.mulf %466, %465 : vector<8x32xf32>
    %468 = math.tanh %467 : vector<8x32xf32>
    %cst_243 = arith.constant 5.000000e-01 : f32
    %469 = vector.broadcast %cst_243 : f32 to vector<8x32xf32>
    %470 = arith.mulf %469, %468 : vector<8x32xf32>
    %cst_244 = arith.constant 5.000000e-01 : f32
    %471 = vector.broadcast %cst_244 : f32 to vector<8x32xf32>
    %472 = arith.addf %470, %471 : vector<8x32xf32>
    %473 = vector.extract_strided_slice %456 {offsets = [0, 64], sizes = [8, 32], strides = [1, 1]} : vector<8x128xf32> to vector<8x32xf32>
    %474 = math.tanh %473 : vector<8x32xf32>
    %475 = vector.extract_strided_slice %456 {offsets = [0, 96], sizes = [8, 32], strides = [1, 1]} : vector<8x128xf32> to vector<8x32xf32>
    %cst_245 = arith.constant 5.000000e-01 : f32
    %476 = vector.broadcast %cst_245 : f32 to vector<8x32xf32>
    %477 = arith.mulf %476, %475 : vector<8x32xf32>
    %478 = math.tanh %477 : vector<8x32xf32>
    %cst_246 = arith.constant 5.000000e-01 : f32
    %479 = vector.broadcast %cst_246 : f32 to vector<8x32xf32>
    %480 = arith.mulf %479, %478 : vector<8x32xf32>
    %cst_247 = arith.constant 5.000000e-01 : f32
    %481 = vector.broadcast %cst_247 : f32 to vector<8x32xf32>
    %482 = arith.addf %480, %481 : vector<8x32xf32>
    %c0_248 = arith.constant 0 : index
    %c0_249 = arith.constant 0 : index
    %483 = vector.load %arg15[%c0_248, %c0_249] : memref<8x32xf32, #tpu.memory_space<vmem>>, vector<8x32xf32>
    %484 = arith.mulf %472, %483 : vector<8x32xf32>
    %485 = arith.mulf %464, %474 : vector<8x32xf32>
    %486 = arith.addf %484, %485 : vector<8x32xf32>
    %487 = math.tanh %486 : vector<8x32xf32>
    %488 = arith.mulf %482, %487 : vector<8x32xf32>
    %489 = vector.broadcast %449 : i32 to vector<8x1xi32>
    %490 = arith.cmpi sgt, %21, %489 : vector<8x1xi32>
    %c0_250 = arith.constant 0 : index
    %c0_251 = arith.constant 0 : index
    %491 = vector.load %arg15[%c0_250, %c0_251] : memref<8x32xf32, #tpu.memory_space<vmem>>, vector<8x32xf32>
    %492 = vector.shape_cast %490 : vector<8x1xi1> to vector<8x1xi1>
    %493 = vector.broadcast %492 : vector<8x1xi1> to vector<8x32xi1>
    %494 = arith.select %493, %486, %491 : vector<8x32xi1>, vector<8x32xf32>
    %c0_252 = arith.constant 0 : index
    %c0_253 = arith.constant 0 : index
    %495 = vector.load %arg15[%c0_252, %c0_253] : memref<8x32xf32, #tpu.memory_space<vmem>>, vector<8x32xf32>
    tpu.vector_store %arg15[%c0_252, %c0_253], %494 {strides = array<i32>} : memref<8x32xf32, #tpu.memory_space<vmem>>, vector<8x32xf32>,
    %c0_254 = arith.constant 0 : index
    %c0_255 = arith.constant 0 : index
    %496 = vector.load %arg14[%c0_254, %c0_255] : memref<8x32xf32, #tpu.memory_space<vmem>>, vector<8x32xf32>
    %497 = vector.shape_cast %490 : vector<8x1xi1> to vector<8x1xi1>
    %498 = vector.broadcast %497 : vector<8x1xi1> to vector<8x32xi1>
    %499 = arith.select %498, %488, %496 : vector<8x32xi1>, vector<8x32xf32>
    %c0_256 = arith.constant 0 : index
    %c0_257 = arith.constant 0 : index
    %500 = vector.load %arg14[%c0_256, %c0_257] : memref<8x32xf32, #tpu.memory_space<vmem>>, vector<8x32xf32>
    tpu.vector_store %arg14[%c0_256, %c0_257], %499 {strides = array<i32>} : memref<8x32xf32, #tpu.memory_space<vmem>>, vector<8x32xf32>,
    %cst_258 = arith.constant 0.000000e+00 : f32
    %501 = vector.shape_cast %490 : vector<8x1xi1> to vector<8x1xi1>
    %502 = vector.broadcast %501 : vector<8x1xi1> to vector<8x32xi1>
    %503 = vector.broadcast %cst_258 : f32 to vector<8x32xf32>
    %504 = arith.select %502, %488, %503 : vector<8x32xi1>, vector<8x32xf32>
    %505 = arith.index_cast %448 : i32 to index
    %c0_259 = arith.constant 0 : index
    %c0_260 = arith.constant 0 : index
    %506 = vector.load %arg11[%505, %c0_259, %c0_260] : memref<8x8x32xf32, #tpu.memory_space<vmem>>, vector<1x8x32xf32>
    %507 = vector.shape_cast %506 : vector<1x8x32xf32> to vector<8x32xf32>
    %508 = vector.shape_cast %504 : vector<8x32xf32> to vector<1x8x32xf32>
    tpu.vector_store %arg11[%505, %c0_259, %c0_260], %508 {strides = array<i32>} : memref<8x8x32xf32, #tpu.memory_space<vmem>>, vector<1x8x32xf32>,
    %c4_i32 = arith.constant 4 : i32
    %509 = arith.addi %22, %c4_i32 : i32
    %510 = arith.index_cast %c4_i32 : i32 to index
    %c0_261 = arith.constant 0 : index
    %c0_262 = arith.constant 0 : index
    %511 = vector.load %arg16[%510, %c0_261, %c0_262] : memref<8x8x128xf32, #tpu.memory_space<vmem>>, vector<1x8x128xf32>
    %512 = vector.shape_cast %511 : vector<1x8x128xf32> to vector<8x128xf32>
    %c0_263 = arith.constant 0 : index
    %c0_264 = arith.constant 0 : index
    %513 = vector.load %arg12[%c0_263, %c0_264] : memref<8x32xf32, #tpu.memory_space<vmem>>, vector<8x32xf32>
    %c0_265 = arith.constant 0 : index
    %c0_266 = arith.constant 0 : index
    %514 = vector.load %arg6[%c0_265, %c0_266] : memref<32x128xf32, #tpu.memory_space<vmem>>, vector<32x128xf32>
    %cst_267 = arith.constant dense<0.000000e+00> : vector<8x128xf32>
    %515 = tpu.matmul %513, %514, %cst_267 {dimension_numbers = #tpu.dot_dimension_numbers<[1], [0], [0], [1], [0, 0, 1, 1], [], []>} : vector<8x32xf32>, vector<32x128xf32>, vector<8x128xf32> -> vector<8x128xf32>
    %516 = arith.addf %512, %515 : vector<8x128xf32>
    %517 = vector.extract_strided_slice %516 {offsets = [0, 0], sizes = [8, 32], strides = [1, 1]} : vector<8x128xf32> to vector<8x32xf32>
    %cst_268 = arith.constant 5.000000e-01 : f32
    %518 = vector.broadcast %cst_268 : f32 to vector<8x32xf32>
    %519 = arith.mulf %518, %517 : vector<8x32xf32>
    %520 = math.tanh %519 : vector<8x32xf32>
    %cst_269 = arith.constant 5.000000e-01 : f32
    %521 = vector.broadcast %cst_269 : f32 to vector<8x32xf32>
    %522 = arith.mulf %521, %520 : vector<8x32xf32>
    %cst_270 = arith.constant 5.000000e-01 : f32
    %523 = vector.broadcast %cst_270 : f32 to vector<8x32xf32>
    %524 = arith.addf %522, %523 : vector<8x32xf32>
    %525 = vector.extract_strided_slice %516 {offsets = [0, 32], sizes = [8, 32], strides = [1, 1]} : vector<8x128xf32> to vector<8x32xf32>
    %cst_271 = arith.constant 5.000000e-01 : f32
    %526 = vector.broadcast %cst_271 : f32 to vector<8x32xf32>
    %527 = arith.mulf %526, %525 : vector<8x32xf32>
    %528 = math.tanh %527 : vector<8x32xf32>
    %cst_272 = arith.constant 5.000000e-01 : f32
    %529 = vector.broadcast %cst_272 : f32 to vector<8x32xf32>
    %530 = arith.mulf %529, %528 : vector<8x32xf32>
    %cst_273 = arith.constant 5.000000e-01 : f32
    %531 = vector.broadcast %cst_273 : f32 to vector<8x32xf32>
    %532 = arith.addf %530, %531 : vector<8x32xf32>
    %533 = vector.extract_strided_slice %516 {offsets = [0, 64], sizes = [8, 32], strides = [1, 1]} : vector<8x128xf32> to vector<8x32xf32>
    %534 = math.tanh %533 : vector<8x32xf32>
    %535 = vector.extract_strided_slice %516 {offsets = [0, 96], sizes = [8, 32], strides = [1, 1]} : vector<8x128xf32> to vector<8x32xf32>
    %cst_274 = arith.constant 5.000000e-01 : f32
    %536 = vector.broadcast %cst_274 : f32 to vector<8x32xf32>
    %537 = arith.mulf %536, %535 : vector<8x32xf32>
    %538 = math.tanh %537 : vector<8x32xf32>
    %cst_275 = arith.constant 5.000000e-01 : f32
    %539 = vector.broadcast %cst_275 : f32 to vector<8x32xf32>
    %540 = arith.mulf %539, %538 : vector<8x32xf32>
    %cst_276 = arith.constant 5.000000e-01 : f32
    %541 = vector.broadcast %cst_276 : f32 to vector<8x32xf32>
    %542 = arith.addf %540, %541 : vector<8x32xf32>
    %c0_277 = arith.constant 0 : index
    %c0_278 = arith.constant 0 : index
    %543 = vector.load %arg13[%c0_277, %c0_278] : memref<8x32xf32, #tpu.memory_space<vmem>>, vector<8x32xf32>
    %544 = arith.mulf %532, %543 : vector<8x32xf32>
    %545 = arith.mulf %524, %534 : vector<8x32xf32>
    %546 = arith.addf %544, %545 : vector<8x32xf32>
    %547 = math.tanh %546 : vector<8x32xf32>
    %548 = arith.mulf %542, %547 : vector<8x32xf32>
    %549 = vector.broadcast %509 : i32 to vector<8x1xi32>
    %550 = arith.cmpi sgt, %21, %549 : vector<8x1xi32>
    %c0_279 = arith.constant 0 : index
    %c0_280 = arith.constant 0 : index
    %551 = vector.load %arg13[%c0_279, %c0_280] : memref<8x32xf32, #tpu.memory_space<vmem>>, vector<8x32xf32>
    %552 = vector.shape_cast %550 : vector<8x1xi1> to vector<8x1xi1>
    %553 = vector.broadcast %552 : vector<8x1xi1> to vector<8x32xi1>
    %554 = arith.select %553, %546, %551 : vector<8x32xi1>, vector<8x32xf32>
    %c0_281 = arith.constant 0 : index
    %c0_282 = arith.constant 0 : index
    %555 = vector.load %arg13[%c0_281, %c0_282] : memref<8x32xf32, #tpu.memory_space<vmem>>, vector<8x32xf32>
    tpu.vector_store %arg13[%c0_281, %c0_282], %554 {strides = array<i32>} : memref<8x32xf32, #tpu.memory_space<vmem>>, vector<8x32xf32>,
    %c0_283 = arith.constant 0 : index
    %c0_284 = arith.constant 0 : index
    %556 = vector.load %arg12[%c0_283, %c0_284] : memref<8x32xf32, #tpu.memory_space<vmem>>, vector<8x32xf32>
    %557 = vector.shape_cast %550 : vector<8x1xi1> to vector<8x1xi1>
    %558 = vector.broadcast %557 : vector<8x1xi1> to vector<8x32xi1>
    %559 = arith.select %558, %548, %556 : vector<8x32xi1>, vector<8x32xf32>
    %c0_285 = arith.constant 0 : index
    %c0_286 = arith.constant 0 : index
    %560 = vector.load %arg12[%c0_285, %c0_286] : memref<8x32xf32, #tpu.memory_space<vmem>>, vector<8x32xf32>
    tpu.vector_store %arg12[%c0_285, %c0_286], %559 {strides = array<i32>} : memref<8x32xf32, #tpu.memory_space<vmem>>, vector<8x32xf32>,
    %cst_287 = arith.constant 0.000000e+00 : f32
    %561 = vector.shape_cast %550 : vector<8x1xi1> to vector<8x1xi1>
    %562 = vector.broadcast %561 : vector<8x1xi1> to vector<8x32xi1>
    %563 = vector.broadcast %cst_287 : f32 to vector<8x32xf32>
    %564 = arith.select %562, %548, %563 : vector<8x32xi1>, vector<8x32xf32>
    %565 = arith.index_cast %c4_i32 : i32 to index
    %c0_288 = arith.constant 0 : index
    %c0_289 = arith.constant 0 : index
    %566 = vector.load %arg10[%565, %c0_288, %c0_289] : memref<8x8x32xf32, #tpu.memory_space<vmem>>, vector<1x8x32xf32>
    %567 = vector.shape_cast %566 : vector<1x8x32xf32> to vector<8x32xf32>
    %568 = vector.shape_cast %564 : vector<8x32xf32> to vector<1x8x32xf32>
    tpu.vector_store %arg10[%565, %c0_288, %c0_289], %568 {strides = array<i32>} : memref<8x8x32xf32, #tpu.memory_space<vmem>>, vector<1x8x32xf32>,
    %c7_i32_290 = arith.constant 7 : i32
    %569 = arith.subi %c7_i32_290, %c4_i32 : i32
    %570 = arith.addi %24, %569 : i32
    %571 = arith.index_cast %569 : i32 to index
    %c0_291 = arith.constant 0 : index
    %c0_292 = arith.constant 0 : index
    %572 = vector.load %arg17[%571, %c0_291, %c0_292] : memref<8x8x128xf32, #tpu.memory_space<vmem>>, vector<1x8x128xf32>
    %573 = vector.shape_cast %572 : vector<1x8x128xf32> to vector<8x128xf32>
    %c0_293 = arith.constant 0 : index
    %c0_294 = arith.constant 0 : index
    %574 = vector.load %arg14[%c0_293, %c0_294] : memref<8x32xf32, #tpu.memory_space<vmem>>, vector<8x32xf32>
    %c0_295 = arith.constant 0 : index
    %c0_296 = arith.constant 0 : index
    %575 = vector.load %arg7[%c0_295, %c0_296] : memref<32x128xf32, #tpu.memory_space<vmem>>, vector<32x128xf32>
    %cst_297 = arith.constant dense<0.000000e+00> : vector<8x128xf32>
    %576 = tpu.matmul %574, %575, %cst_297 {dimension_numbers = #tpu.dot_dimension_numbers<[1], [0], [0], [1], [0, 0, 1, 1], [], []>} : vector<8x32xf32>, vector<32x128xf32>, vector<8x128xf32> -> vector<8x128xf32>
    %577 = arith.addf %573, %576 : vector<8x128xf32>
    %578 = vector.extract_strided_slice %577 {offsets = [0, 0], sizes = [8, 32], strides = [1, 1]} : vector<8x128xf32> to vector<8x32xf32>
    %cst_298 = arith.constant 5.000000e-01 : f32
    %579 = vector.broadcast %cst_298 : f32 to vector<8x32xf32>
    %580 = arith.mulf %579, %578 : vector<8x32xf32>
    %581 = math.tanh %580 : vector<8x32xf32>
    %cst_299 = arith.constant 5.000000e-01 : f32
    %582 = vector.broadcast %cst_299 : f32 to vector<8x32xf32>
    %583 = arith.mulf %582, %581 : vector<8x32xf32>
    %cst_300 = arith.constant 5.000000e-01 : f32
    %584 = vector.broadcast %cst_300 : f32 to vector<8x32xf32>
    %585 = arith.addf %583, %584 : vector<8x32xf32>
    %586 = vector.extract_strided_slice %577 {offsets = [0, 32], sizes = [8, 32], strides = [1, 1]} : vector<8x128xf32> to vector<8x32xf32>
    %cst_301 = arith.constant 5.000000e-01 : f32
    %587 = vector.broadcast %cst_301 : f32 to vector<8x32xf32>
    %588 = arith.mulf %587, %586 : vector<8x32xf32>
    %589 = math.tanh %588 : vector<8x32xf32>
    %cst_302 = arith.constant 5.000000e-01 : f32
    %590 = vector.broadcast %cst_302 : f32 to vector<8x32xf32>
    %591 = arith.mulf %590, %589 : vector<8x32xf32>
    %cst_303 = arith.constant 5.000000e-01 : f32
    %592 = vector.broadcast %cst_303 : f32 to vector<8x32xf32>
    %593 = arith.addf %591, %592 : vector<8x32xf32>
    %594 = vector.extract_strided_slice %577 {offsets = [0, 64], sizes = [8, 32], strides = [1, 1]} : vector<8x128xf32> to vector<8x32xf32>
    %595 = math.tanh %594 : vector<8x32xf32>
    %596 = vector.extract_strided_slice %577 {offsets = [0, 96], sizes = [8, 32], strides = [1, 1]} : vector<8x128xf32> to vector<8x32xf32>
    %cst_304 = arith.constant 5.000000e-01 : f32
    %597 = vector.broadcast %cst_304 : f32 to vector<8x32xf32>
    %598 = arith.mulf %597, %596 : vector<8x32xf32>
    %599 = math.tanh %598 : vector<8x32xf32>
    %cst_305 = arith.constant 5.000000e-01 : f32
    %600 = vector.broadcast %cst_305 : f32 to vector<8x32xf32>
    %601 = arith.mulf %600, %599 : vector<8x32xf32>
    %cst_306 = arith.constant 5.000000e-01 : f32
    %602 = vector.broadcast %cst_306 : f32 to vector<8x32xf32>
    %603 = arith.addf %601, %602 : vector<8x32xf32>
    %c0_307 = arith.constant 0 : index
    %c0_308 = arith.constant 0 : index
    %604 = vector.load %arg15[%c0_307, %c0_308] : memref<8x32xf32, #tpu.memory_space<vmem>>, vector<8x32xf32>
    %605 = arith.mulf %593, %604 : vector<8x32xf32>
    %606 = arith.mulf %585, %595 : vector<8x32xf32>
    %607 = arith.addf %605, %606 : vector<8x32xf32>
    %608 = math.tanh %607 : vector<8x32xf32>
    %609 = arith.mulf %603, %608 : vector<8x32xf32>
    %610 = vector.broadcast %570 : i32 to vector<8x1xi32>
    %611 = arith.cmpi sgt, %21, %610 : vector<8x1xi32>
    %c0_309 = arith.constant 0 : index
    %c0_310 = arith.constant 0 : index
    %612 = vector.load %arg15[%c0_309, %c0_310] : memref<8x32xf32, #tpu.memory_space<vmem>>, vector<8x32xf32>
    %613 = vector.shape_cast %611 : vector<8x1xi1> to vector<8x1xi1>
    %614 = vector.broadcast %613 : vector<8x1xi1> to vector<8x32xi1>
    %615 = arith.select %614, %607, %612 : vector<8x32xi1>, vector<8x32xf32>
    %c0_311 = arith.constant 0 : index
    %c0_312 = arith.constant 0 : index
    %616 = vector.load %arg15[%c0_311, %c0_312] : memref<8x32xf32, #tpu.memory_space<vmem>>, vector<8x32xf32>
    tpu.vector_store %arg15[%c0_311, %c0_312], %615 {strides = array<i32>} : memref<8x32xf32, #tpu.memory_space<vmem>>, vector<8x32xf32>,
    %c0_313 = arith.constant 0 : index
    %c0_314 = arith.constant 0 : index
    %617 = vector.load %arg14[%c0_313, %c0_314] : memref<8x32xf32, #tpu.memory_space<vmem>>, vector<8x32xf32>
    %618 = vector.shape_cast %611 : vector<8x1xi1> to vector<8x1xi1>
    %619 = vector.broadcast %618 : vector<8x1xi1> to vector<8x32xi1>
    %620 = arith.select %619, %609, %617 : vector<8x32xi1>, vector<8x32xf32>
    %c0_315 = arith.constant 0 : index
    %c0_316 = arith.constant 0 : index
    %621 = vector.load %arg14[%c0_315, %c0_316] : memref<8x32xf32, #tpu.memory_space<vmem>>, vector<8x32xf32>
    tpu.vector_store %arg14[%c0_315, %c0_316], %620 {strides = array<i32>} : memref<8x32xf32, #tpu.memory_space<vmem>>, vector<8x32xf32>,
    %cst_317 = arith.constant 0.000000e+00 : f32
    %622 = vector.shape_cast %611 : vector<8x1xi1> to vector<8x1xi1>
    %623 = vector.broadcast %622 : vector<8x1xi1> to vector<8x32xi1>
    %624 = vector.broadcast %cst_317 : f32 to vector<8x32xf32>
    %625 = arith.select %623, %609, %624 : vector<8x32xi1>, vector<8x32xf32>
    %626 = arith.index_cast %569 : i32 to index
    %c0_318 = arith.constant 0 : index
    %c0_319 = arith.constant 0 : index
    %627 = vector.load %arg11[%626, %c0_318, %c0_319] : memref<8x8x32xf32, #tpu.memory_space<vmem>>, vector<1x8x32xf32>
    %628 = vector.shape_cast %627 : vector<1x8x32xf32> to vector<8x32xf32>
    %629 = vector.shape_cast %625 : vector<8x32xf32> to vector<1x8x32xf32>
    tpu.vector_store %arg11[%626, %c0_318, %c0_319], %629 {strides = array<i32>} : memref<8x8x32xf32, #tpu.memory_space<vmem>>, vector<1x8x32xf32>,
    %c5_i32 = arith.constant 5 : i32
    %630 = arith.addi %22, %c5_i32 : i32
    %631 = arith.index_cast %c5_i32 : i32 to index
    %c0_320 = arith.constant 0 : index
    %c0_321 = arith.constant 0 : index
    %632 = vector.load %arg16[%631, %c0_320, %c0_321] : memref<8x8x128xf32, #tpu.memory_space<vmem>>, vector<1x8x128xf32>
    %633 = vector.shape_cast %632 : vector<1x8x128xf32> to vector<8x128xf32>
    %c0_322 = arith.constant 0 : index
    %c0_323 = arith.constant 0 : index
    %634 = vector.load %arg12[%c0_322, %c0_323] : memref<8x32xf32, #tpu.memory_space<vmem>>, vector<8x32xf32>
    %c0_324 = arith.constant 0 : index
    %c0_325 = arith.constant 0 : index
    %635 = vector.load %arg6[%c0_324, %c0_325] : memref<32x128xf32, #tpu.memory_space<vmem>>, vector<32x128xf32>
    %cst_326 = arith.constant dense<0.000000e+00> : vector<8x128xf32>
    %636 = tpu.matmul %634, %635, %cst_326 {dimension_numbers = #tpu.dot_dimension_numbers<[1], [0], [0], [1], [0, 0, 1, 1], [], []>} : vector<8x32xf32>, vector<32x128xf32>, vector<8x128xf32> -> vector<8x128xf32>
    %637 = arith.addf %633, %636 : vector<8x128xf32>
    %638 = vector.extract_strided_slice %637 {offsets = [0, 0], sizes = [8, 32], strides = [1, 1]} : vector<8x128xf32> to vector<8x32xf32>
    %cst_327 = arith.constant 5.000000e-01 : f32
    %639 = vector.broadcast %cst_327 : f32 to vector<8x32xf32>
    %640 = arith.mulf %639, %638 : vector<8x32xf32>
    %641 = math.tanh %640 : vector<8x32xf32>
    %cst_328 = arith.constant 5.000000e-01 : f32
    %642 = vector.broadcast %cst_328 : f32 to vector<8x32xf32>
    %643 = arith.mulf %642, %641 : vector<8x32xf32>
    %cst_329 = arith.constant 5.000000e-01 : f32
    %644 = vector.broadcast %cst_329 : f32 to vector<8x32xf32>
    %645 = arith.addf %643, %644 : vector<8x32xf32>
    %646 = vector.extract_strided_slice %637 {offsets = [0, 32], sizes = [8, 32], strides = [1, 1]} : vector<8x128xf32> to vector<8x32xf32>
    %cst_330 = arith.constant 5.000000e-01 : f32
    %647 = vector.broadcast %cst_330 : f32 to vector<8x32xf32>
    %648 = arith.mulf %647, %646 : vector<8x32xf32>
    %649 = math.tanh %648 : vector<8x32xf32>
    %cst_331 = arith.constant 5.000000e-01 : f32
    %650 = vector.broadcast %cst_331 : f32 to vector<8x32xf32>
    %651 = arith.mulf %650, %649 : vector<8x32xf32>
    %cst_332 = arith.constant 5.000000e-01 : f32
    %652 = vector.broadcast %cst_332 : f32 to vector<8x32xf32>
    %653 = arith.addf %651, %652 : vector<8x32xf32>
    %654 = vector.extract_strided_slice %637 {offsets = [0, 64], sizes = [8, 32], strides = [1, 1]} : vector<8x128xf32> to vector<8x32xf32>
    %655 = math.tanh %654 : vector<8x32xf32>
    %656 = vector.extract_strided_slice %637 {offsets = [0, 96], sizes = [8, 32], strides = [1, 1]} : vector<8x128xf32> to vector<8x32xf32>
    %cst_333 = arith.constant 5.000000e-01 : f32
    %657 = vector.broadcast %cst_333 : f32 to vector<8x32xf32>
    %658 = arith.mulf %657, %656 : vector<8x32xf32>
    %659 = math.tanh %658 : vector<8x32xf32>
    %cst_334 = arith.constant 5.000000e-01 : f32
    %660 = vector.broadcast %cst_334 : f32 to vector<8x32xf32>
    %661 = arith.mulf %660, %659 : vector<8x32xf32>
    %cst_335 = arith.constant 5.000000e-01 : f32
    %662 = vector.broadcast %cst_335 : f32 to vector<8x32xf32>
    %663 = arith.addf %661, %662 : vector<8x32xf32>
    %c0_336 = arith.constant 0 : index
    %c0_337 = arith.constant 0 : index
    %664 = vector.load %arg13[%c0_336, %c0_337] : memref<8x32xf32, #tpu.memory_space<vmem>>, vector<8x32xf32>
    %665 = arith.mulf %653, %664 : vector<8x32xf32>
    %666 = arith.mulf %645, %655 : vector<8x32xf32>
    %667 = arith.addf %665, %666 : vector<8x32xf32>
    %668 = math.tanh %667 : vector<8x32xf32>
    %669 = arith.mulf %663, %668 : vector<8x32xf32>
    %670 = vector.broadcast %630 : i32 to vector<8x1xi32>
    %671 = arith.cmpi sgt, %21, %670 : vector<8x1xi32>
    %c0_338 = arith.constant 0 : index
    %c0_339 = arith.constant 0 : index
    %672 = vector.load %arg13[%c0_338, %c0_339] : memref<8x32xf32, #tpu.memory_space<vmem>>, vector<8x32xf32>
    %673 = vector.shape_cast %671 : vector<8x1xi1> to vector<8x1xi1>
    %674 = vector.broadcast %673 : vector<8x1xi1> to vector<8x32xi1>
    %675 = arith.select %674, %667, %672 : vector<8x32xi1>, vector<8x32xf32>
    %c0_340 = arith.constant 0 : index
    %c0_341 = arith.constant 0 : index
    %676 = vector.load %arg13[%c0_340, %c0_341] : memref<8x32xf32, #tpu.memory_space<vmem>>, vector<8x32xf32>
    tpu.vector_store %arg13[%c0_340, %c0_341], %675 {strides = array<i32>} : memref<8x32xf32, #tpu.memory_space<vmem>>, vector<8x32xf32>,
    %c0_342 = arith.constant 0 : index
    %c0_343 = arith.constant 0 : index
    %677 = vector.load %arg12[%c0_342, %c0_343] : memref<8x32xf32, #tpu.memory_space<vmem>>, vector<8x32xf32>
    %678 = vector.shape_cast %671 : vector<8x1xi1> to vector<8x1xi1>
    %679 = vector.broadcast %678 : vector<8x1xi1> to vector<8x32xi1>
    %680 = arith.select %679, %669, %677 : vector<8x32xi1>, vector<8x32xf32>
    %c0_344 = arith.constant 0 : index
    %c0_345 = arith.constant 0 : index
    %681 = vector.load %arg12[%c0_344, %c0_345] : memref<8x32xf32, #tpu.memory_space<vmem>>, vector<8x32xf32>
    tpu.vector_store %arg12[%c0_344, %c0_345], %680 {strides = array<i32>} : memref<8x32xf32, #tpu.memory_space<vmem>>, vector<8x32xf32>,
    %cst_346 = arith.constant 0.000000e+00 : f32
    %682 = vector.shape_cast %671 : vector<8x1xi1> to vector<8x1xi1>
    %683 = vector.broadcast %682 : vector<8x1xi1> to vector<8x32xi1>
    %684 = vector.broadcast %cst_346 : f32 to vector<8x32xf32>
    %685 = arith.select %683, %669, %684 : vector<8x32xi1>, vector<8x32xf32>
    %686 = arith.index_cast %c5_i32 : i32 to index
    %c0_347 = arith.constant 0 : index
    %c0_348 = arith.constant 0 : index
    %687 = vector.load %arg10[%686, %c0_347, %c0_348] : memref<8x8x32xf32, #tpu.memory_space<vmem>>, vector<1x8x32xf32>
    %688 = vector.shape_cast %687 : vector<1x8x32xf32> to vector<8x32xf32>
    %689 = vector.shape_cast %685 : vector<8x32xf32> to vector<1x8x32xf32>
    tpu.vector_store %arg10[%686, %c0_347, %c0_348], %689 {strides = array<i32>} : memref<8x8x32xf32, #tpu.memory_space<vmem>>, vector<1x8x32xf32>,
    %c7_i32_349 = arith.constant 7 : i32
    %690 = arith.subi %c7_i32_349, %c5_i32 : i32
    %691 = arith.addi %24, %690 : i32
    %692 = arith.index_cast %690 : i32 to index
    %c0_350 = arith.constant 0 : index
    %c0_351 = arith.constant 0 : index
    %693 = vector.load %arg17[%692, %c0_350, %c0_351] : memref<8x8x128xf32, #tpu.memory_space<vmem>>, vector<1x8x128xf32>
    %694 = vector.shape_cast %693 : vector<1x8x128xf32> to vector<8x128xf32>
    %c0_352 = arith.constant 0 : index
    %c0_353 = arith.constant 0 : index
    %695 = vector.load %arg14[%c0_352, %c0_353] : memref<8x32xf32, #tpu.memory_space<vmem>>, vector<8x32xf32>
    %c0_354 = arith.constant 0 : index
    %c0_355 = arith.constant 0 : index
    %696 = vector.load %arg7[%c0_354, %c0_355] : memref<32x128xf32, #tpu.memory_space<vmem>>, vector<32x128xf32>
    %cst_356 = arith.constant dense<0.000000e+00> : vector<8x128xf32>
    %697 = tpu.matmul %695, %696, %cst_356 {dimension_numbers = #tpu.dot_dimension_numbers<[1], [0], [0], [1], [0, 0, 1, 1], [], []>} : vector<8x32xf32>, vector<32x128xf32>, vector<8x128xf32> -> vector<8x128xf32>
    %698 = arith.addf %694, %697 : vector<8x128xf32>
    %699 = vector.extract_strided_slice %698 {offsets = [0, 0], sizes = [8, 32], strides = [1, 1]} : vector<8x128xf32> to vector<8x32xf32>
    %cst_357 = arith.constant 5.000000e-01 : f32
    %700 = vector.broadcast %cst_357 : f32 to vector<8x32xf32>
    %701 = arith.mulf %700, %699 : vector<8x32xf32>
    %702 = math.tanh %701 : vector<8x32xf32>
    %cst_358 = arith.constant 5.000000e-01 : f32
    %703 = vector.broadcast %cst_358 : f32 to vector<8x32xf32>
    %704 = arith.mulf %703, %702 : vector<8x32xf32>
    %cst_359 = arith.constant 5.000000e-01 : f32
    %705 = vector.broadcast %cst_359 : f32 to vector<8x32xf32>
    %706 = arith.addf %704, %705 : vector<8x32xf32>
    %707 = vector.extract_strided_slice %698 {offsets = [0, 32], sizes = [8, 32], strides = [1, 1]} : vector<8x128xf32> to vector<8x32xf32>
    %cst_360 = arith.constant 5.000000e-01 : f32
    %708 = vector.broadcast %cst_360 : f32 to vector<8x32xf32>
    %709 = arith.mulf %708, %707 : vector<8x32xf32>
    %710 = math.tanh %709 : vector<8x32xf32>
    %cst_361 = arith.constant 5.000000e-01 : f32
    %711 = vector.broadcast %cst_361 : f32 to vector<8x32xf32>
    %712 = arith.mulf %711, %710 : vector<8x32xf32>
    %cst_362 = arith.constant 5.000000e-01 : f32
    %713 = vector.broadcast %cst_362 : f32 to vector<8x32xf32>
    %714 = arith.addf %712, %713 : vector<8x32xf32>
    %715 = vector.extract_strided_slice %698 {offsets = [0, 64], sizes = [8, 32], strides = [1, 1]} : vector<8x128xf32> to vector<8x32xf32>
    %716 = math.tanh %715 : vector<8x32xf32>
    %717 = vector.extract_strided_slice %698 {offsets = [0, 96], sizes = [8, 32], strides = [1, 1]} : vector<8x128xf32> to vector<8x32xf32>
    %cst_363 = arith.constant 5.000000e-01 : f32
    %718 = vector.broadcast %cst_363 : f32 to vector<8x32xf32>
    %719 = arith.mulf %718, %717 : vector<8x32xf32>
    %720 = math.tanh %719 : vector<8x32xf32>
    %cst_364 = arith.constant 5.000000e-01 : f32
    %721 = vector.broadcast %cst_364 : f32 to vector<8x32xf32>
    %722 = arith.mulf %721, %720 : vector<8x32xf32>
    %cst_365 = arith.constant 5.000000e-01 : f32
    %723 = vector.broadcast %cst_365 : f32 to vector<8x32xf32>
    %724 = arith.addf %722, %723 : vector<8x32xf32>
    %c0_366 = arith.constant 0 : index
    %c0_367 = arith.constant 0 : index
    %725 = vector.load %arg15[%c0_366, %c0_367] : memref<8x32xf32, #tpu.memory_space<vmem>>, vector<8x32xf32>
    %726 = arith.mulf %714, %725 : vector<8x32xf32>
    %727 = arith.mulf %706, %716 : vector<8x32xf32>
    %728 = arith.addf %726, %727 : vector<8x32xf32>
    %729 = math.tanh %728 : vector<8x32xf32>
    %730 = arith.mulf %724, %729 : vector<8x32xf32>
    %731 = vector.broadcast %691 : i32 to vector<8x1xi32>
    %732 = arith.cmpi sgt, %21, %731 : vector<8x1xi32>
    %c0_368 = arith.constant 0 : index
    %c0_369 = arith.constant 0 : index
    %733 = vector.load %arg15[%c0_368, %c0_369] : memref<8x32xf32, #tpu.memory_space<vmem>>, vector<8x32xf32>
    %734 = vector.shape_cast %732 : vector<8x1xi1> to vector<8x1xi1>
    %735 = vector.broadcast %734 : vector<8x1xi1> to vector<8x32xi1>
    %736 = arith.select %735, %728, %733 : vector<8x32xi1>, vector<8x32xf32>
    %c0_370 = arith.constant 0 : index
    %c0_371 = arith.constant 0 : index
    %737 = vector.load %arg15[%c0_370, %c0_371] : memref<8x32xf32, #tpu.memory_space<vmem>>, vector<8x32xf32>
    tpu.vector_store %arg15[%c0_370, %c0_371], %736 {strides = array<i32>} : memref<8x32xf32, #tpu.memory_space<vmem>>, vector<8x32xf32>,
    %c0_372 = arith.constant 0 : index
    %c0_373 = arith.constant 0 : index
    %738 = vector.load %arg14[%c0_372, %c0_373] : memref<8x32xf32, #tpu.memory_space<vmem>>, vector<8x32xf32>
    %739 = vector.shape_cast %732 : vector<8x1xi1> to vector<8x1xi1>
    %740 = vector.broadcast %739 : vector<8x1xi1> to vector<8x32xi1>
    %741 = arith.select %740, %730, %738 : vector<8x32xi1>, vector<8x32xf32>
    %c0_374 = arith.constant 0 : index
    %c0_375 = arith.constant 0 : index
    %742 = vector.load %arg14[%c0_374, %c0_375] : memref<8x32xf32, #tpu.memory_space<vmem>>, vector<8x32xf32>
    tpu.vector_store %arg14[%c0_374, %c0_375], %741 {strides = array<i32>} : memref<8x32xf32, #tpu.memory_space<vmem>>, vector<8x32xf32>,
    %cst_376 = arith.constant 0.000000e+00 : f32
    %743 = vector.shape_cast %732 : vector<8x1xi1> to vector<8x1xi1>
    %744 = vector.broadcast %743 : vector<8x1xi1> to vector<8x32xi1>
    %745 = vector.broadcast %cst_376 : f32 to vector<8x32xf32>
    %746 = arith.select %744, %730, %745 : vector<8x32xi1>, vector<8x32xf32>
    %747 = arith.index_cast %690 : i32 to index
    %c0_377 = arith.constant 0 : index
    %c0_378 = arith.constant 0 : index
    %748 = vector.load %arg11[%747, %c0_377, %c0_378] : memref<8x8x32xf32, #tpu.memory_space<vmem>>, vector<1x8x32xf32>
    %749 = vector.shape_cast %748 : vector<1x8x32xf32> to vector<8x32xf32>
    %750 = vector.shape_cast %746 : vector<8x32xf32> to vector<1x8x32xf32>
    tpu.vector_store %arg11[%747, %c0_377, %c0_378], %750 {strides = array<i32>} : memref<8x8x32xf32, #tpu.memory_space<vmem>>, vector<1x8x32xf32>,
    %c6_i32 = arith.constant 6 : i32
    %751 = arith.addi %22, %c6_i32 : i32
    %752 = arith.index_cast %c6_i32 : i32 to index
    %c0_379 = arith.constant 0 : index
    %c0_380 = arith.constant 0 : index
    %753 = vector.load %arg16[%752, %c0_379, %c0_380] : memref<8x8x128xf32, #tpu.memory_space<vmem>>, vector<1x8x128xf32>
    %754 = vector.shape_cast %753 : vector<1x8x128xf32> to vector<8x128xf32>
    %c0_381 = arith.constant 0 : index
    %c0_382 = arith.constant 0 : index
    %755 = vector.load %arg12[%c0_381, %c0_382] : memref<8x32xf32, #tpu.memory_space<vmem>>, vector<8x32xf32>
    %c0_383 = arith.constant 0 : index
    %c0_384 = arith.constant 0 : index
    %756 = vector.load %arg6[%c0_383, %c0_384] : memref<32x128xf32, #tpu.memory_space<vmem>>, vector<32x128xf32>
    %cst_385 = arith.constant dense<0.000000e+00> : vector<8x128xf32>
    %757 = tpu.matmul %755, %756, %cst_385 {dimension_numbers = #tpu.dot_dimension_numbers<[1], [0], [0], [1], [0, 0, 1, 1], [], []>} : vector<8x32xf32>, vector<32x128xf32>, vector<8x128xf32> -> vector<8x128xf32>
    %758 = arith.addf %754, %757 : vector<8x128xf32>
    %759 = vector.extract_strided_slice %758 {offsets = [0, 0], sizes = [8, 32], strides = [1, 1]} : vector<8x128xf32> to vector<8x32xf32>
    %cst_386 = arith.constant 5.000000e-01 : f32
    %760 = vector.broadcast %cst_386 : f32 to vector<8x32xf32>
    %761 = arith.mulf %760, %759 : vector<8x32xf32>
    %762 = math.tanh %761 : vector<8x32xf32>
    %cst_387 = arith.constant 5.000000e-01 : f32
    %763 = vector.broadcast %cst_387 : f32 to vector<8x32xf32>
    %764 = arith.mulf %763, %762 : vector<8x32xf32>
    %cst_388 = arith.constant 5.000000e-01 : f32
    %765 = vector.broadcast %cst_388 : f32 to vector<8x32xf32>
    %766 = arith.addf %764, %765 : vector<8x32xf32>
    %767 = vector.extract_strided_slice %758 {offsets = [0, 32], sizes = [8, 32], strides = [1, 1]} : vector<8x128xf32> to vector<8x32xf32>
    %cst_389 = arith.constant 5.000000e-01 : f32
    %768 = vector.broadcast %cst_389 : f32 to vector<8x32xf32>
    %769 = arith.mulf %768, %767 : vector<8x32xf32>
    %770 = math.tanh %769 : vector<8x32xf32>
    %cst_390 = arith.constant 5.000000e-01 : f32
    %771 = vector.broadcast %cst_390 : f32 to vector<8x32xf32>
    %772 = arith.mulf %771, %770 : vector<8x32xf32>
    %cst_391 = arith.constant 5.000000e-01 : f32
    %773 = vector.broadcast %cst_391 : f32 to vector<8x32xf32>
    %774 = arith.addf %772, %773 : vector<8x32xf32>
    %775 = vector.extract_strided_slice %758 {offsets = [0, 64], sizes = [8, 32], strides = [1, 1]} : vector<8x128xf32> to vector<8x32xf32>
    %776 = math.tanh %775 : vector<8x32xf32>
    %777 = vector.extract_strided_slice %758 {offsets = [0, 96], sizes = [8, 32], strides = [1, 1]} : vector<8x128xf32> to vector<8x32xf32>
    %cst_392 = arith.constant 5.000000e-01 : f32
    %778 = vector.broadcast %cst_392 : f32 to vector<8x32xf32>
    %779 = arith.mulf %778, %777 : vector<8x32xf32>
    %780 = math.tanh %779 : vector<8x32xf32>
    %cst_393 = arith.constant 5.000000e-01 : f32
    %781 = vector.broadcast %cst_393 : f32 to vector<8x32xf32>
    %782 = arith.mulf %781, %780 : vector<8x32xf32>
    %cst_394 = arith.constant 5.000000e-01 : f32
    %783 = vector.broadcast %cst_394 : f32 to vector<8x32xf32>
    %784 = arith.addf %782, %783 : vector<8x32xf32>
    %c0_395 = arith.constant 0 : index
    %c0_396 = arith.constant 0 : index
    %785 = vector.load %arg13[%c0_395, %c0_396] : memref<8x32xf32, #tpu.memory_space<vmem>>, vector<8x32xf32>
    %786 = arith.mulf %774, %785 : vector<8x32xf32>
    %787 = arith.mulf %766, %776 : vector<8x32xf32>
    %788 = arith.addf %786, %787 : vector<8x32xf32>
    %789 = math.tanh %788 : vector<8x32xf32>
    %790 = arith.mulf %784, %789 : vector<8x32xf32>
    %791 = vector.broadcast %751 : i32 to vector<8x1xi32>
    %792 = arith.cmpi sgt, %21, %791 : vector<8x1xi32>
    %c0_397 = arith.constant 0 : index
    %c0_398 = arith.constant 0 : index
    %793 = vector.load %arg13[%c0_397, %c0_398] : memref<8x32xf32, #tpu.memory_space<vmem>>, vector<8x32xf32>
    %794 = vector.shape_cast %792 : vector<8x1xi1> to vector<8x1xi1>
    %795 = vector.broadcast %794 : vector<8x1xi1> to vector<8x32xi1>
    %796 = arith.select %795, %788, %793 : vector<8x32xi1>, vector<8x32xf32>
    %c0_399 = arith.constant 0 : index
    %c0_400 = arith.constant 0 : index
    %797 = vector.load %arg13[%c0_399, %c0_400] : memref<8x32xf32, #tpu.memory_space<vmem>>, vector<8x32xf32>
    tpu.vector_store %arg13[%c0_399, %c0_400], %796 {strides = array<i32>} : memref<8x32xf32, #tpu.memory_space<vmem>>, vector<8x32xf32>,
    %c0_401 = arith.constant 0 : index
    %c0_402 = arith.constant 0 : index
    %798 = vector.load %arg12[%c0_401, %c0_402] : memref<8x32xf32, #tpu.memory_space<vmem>>, vector<8x32xf32>
    %799 = vector.shape_cast %792 : vector<8x1xi1> to vector<8x1xi1>
    %800 = vector.broadcast %799 : vector<8x1xi1> to vector<8x32xi1>
    %801 = arith.select %800, %790, %798 : vector<8x32xi1>, vector<8x32xf32>
    %c0_403 = arith.constant 0 : index
    %c0_404 = arith.constant 0 : index
    %802 = vector.load %arg12[%c0_403, %c0_404] : memref<8x32xf32, #tpu.memory_space<vmem>>, vector<8x32xf32>
    tpu.vector_store %arg12[%c0_403, %c0_404], %801 {strides = array<i32>} : memref<8x32xf32, #tpu.memory_space<vmem>>, vector<8x32xf32>,
    %cst_405 = arith.constant 0.000000e+00 : f32
    %803 = vector.shape_cast %792 : vector<8x1xi1> to vector<8x1xi1>
    %804 = vector.broadcast %803 : vector<8x1xi1> to vector<8x32xi1>
    %805 = vector.broadcast %cst_405 : f32 to vector<8x32xf32>
    %806 = arith.select %804, %790, %805 : vector<8x32xi1>, vector<8x32xf32>
    %807 = arith.index_cast %c6_i32 : i32 to index
    %c0_406 = arith.constant 0 : index
    %c0_407 = arith.constant 0 : index
    %808 = vector.load %arg10[%807, %c0_406, %c0_407] : memref<8x8x32xf32, #tpu.memory_space<vmem>>, vector<1x8x32xf32>
    %809 = vector.shape_cast %808 : vector<1x8x32xf32> to vector<8x32xf32>
    %810 = vector.shape_cast %806 : vector<8x32xf32> to vector<1x8x32xf32>
    tpu.vector_store %arg10[%807, %c0_406, %c0_407], %810 {strides = array<i32>} : memref<8x8x32xf32, #tpu.memory_space<vmem>>, vector<1x8x32xf32>,
    %c7_i32_408 = arith.constant 7 : i32
    %811 = arith.subi %c7_i32_408, %c6_i32 : i32
    %812 = arith.addi %24, %811 : i32
    %813 = arith.index_cast %811 : i32 to index
    %c0_409 = arith.constant 0 : index
    %c0_410 = arith.constant 0 : index
    %814 = vector.load %arg17[%813, %c0_409, %c0_410] : memref<8x8x128xf32, #tpu.memory_space<vmem>>, vector<1x8x128xf32>
    %815 = vector.shape_cast %814 : vector<1x8x128xf32> to vector<8x128xf32>
    %c0_411 = arith.constant 0 : index
    %c0_412 = arith.constant 0 : index
    %816 = vector.load %arg14[%c0_411, %c0_412] : memref<8x32xf32, #tpu.memory_space<vmem>>, vector<8x32xf32>
    %c0_413 = arith.constant 0 : index
    %c0_414 = arith.constant 0 : index
    %817 = vector.load %arg7[%c0_413, %c0_414] : memref<32x128xf32, #tpu.memory_space<vmem>>, vector<32x128xf32>
    %cst_415 = arith.constant dense<0.000000e+00> : vector<8x128xf32>
    %818 = tpu.matmul %816, %817, %cst_415 {dimension_numbers = #tpu.dot_dimension_numbers<[1], [0], [0], [1], [0, 0, 1, 1], [], []>} : vector<8x32xf32>, vector<32x128xf32>, vector<8x128xf32> -> vector<8x128xf32>
    %819 = arith.addf %815, %818 : vector<8x128xf32>
    %820 = vector.extract_strided_slice %819 {offsets = [0, 0], sizes = [8, 32], strides = [1, 1]} : vector<8x128xf32> to vector<8x32xf32>
    %cst_416 = arith.constant 5.000000e-01 : f32
    %821 = vector.broadcast %cst_416 : f32 to vector<8x32xf32>
    %822 = arith.mulf %821, %820 : vector<8x32xf32>
    %823 = math.tanh %822 : vector<8x32xf32>
    %cst_417 = arith.constant 5.000000e-01 : f32
    %824 = vector.broadcast %cst_417 : f32 to vector<8x32xf32>
    %825 = arith.mulf %824, %823 : vector<8x32xf32>
    %cst_418 = arith.constant 5.000000e-01 : f32
    %826 = vector.broadcast %cst_418 : f32 to vector<8x32xf32>
    %827 = arith.addf %825, %826 : vector<8x32xf32>
    %828 = vector.extract_strided_slice %819 {offsets = [0, 32], sizes = [8, 32], strides = [1, 1]} : vector<8x128xf32> to vector<8x32xf32>
    %cst_419 = arith.constant 5.000000e-01 : f32
    %829 = vector.broadcast %cst_419 : f32 to vector<8x32xf32>
    %830 = arith.mulf %829, %828 : vector<8x32xf32>
    %831 = math.tanh %830 : vector<8x32xf32>
    %cst_420 = arith.constant 5.000000e-01 : f32
    %832 = vector.broadcast %cst_420 : f32 to vector<8x32xf32>
    %833 = arith.mulf %832, %831 : vector<8x32xf32>
    %cst_421 = arith.constant 5.000000e-01 : f32
    %834 = vector.broadcast %cst_421 : f32 to vector<8x32xf32>
    %835 = arith.addf %833, %834 : vector<8x32xf32>
    %836 = vector.extract_strided_slice %819 {offsets = [0, 64], sizes = [8, 32], strides = [1, 1]} : vector<8x128xf32> to vector<8x32xf32>
    %837 = math.tanh %836 : vector<8x32xf32>
    %838 = vector.extract_strided_slice %819 {offsets = [0, 96], sizes = [8, 32], strides = [1, 1]} : vector<8x128xf32> to vector<8x32xf32>
    %cst_422 = arith.constant 5.000000e-01 : f32
    %839 = vector.broadcast %cst_422 : f32 to vector<8x32xf32>
    %840 = arith.mulf %839, %838 : vector<8x32xf32>
    %841 = math.tanh %840 : vector<8x32xf32>
    %cst_423 = arith.constant 5.000000e-01 : f32
    %842 = vector.broadcast %cst_423 : f32 to vector<8x32xf32>
    %843 = arith.mulf %842, %841 : vector<8x32xf32>
    %cst_424 = arith.constant 5.000000e-01 : f32
    %844 = vector.broadcast %cst_424 : f32 to vector<8x32xf32>
    %845 = arith.addf %843, %844 : vector<8x32xf32>
    %c0_425 = arith.constant 0 : index
    %c0_426 = arith.constant 0 : index
    %846 = vector.load %arg15[%c0_425, %c0_426] : memref<8x32xf32, #tpu.memory_space<vmem>>, vector<8x32xf32>
    %847 = arith.mulf %835, %846 : vector<8x32xf32>
    %848 = arith.mulf %827, %837 : vector<8x32xf32>
    %849 = arith.addf %847, %848 : vector<8x32xf32>
    %850 = math.tanh %849 : vector<8x32xf32>
    %851 = arith.mulf %845, %850 : vector<8x32xf32>
    %852 = vector.broadcast %812 : i32 to vector<8x1xi32>
    %853 = arith.cmpi sgt, %21, %852 : vector<8x1xi32>
    %c0_427 = arith.constant 0 : index
    %c0_428 = arith.constant 0 : index
    %854 = vector.load %arg15[%c0_427, %c0_428] : memref<8x32xf32, #tpu.memory_space<vmem>>, vector<8x32xf32>
    %855 = vector.shape_cast %853 : vector<8x1xi1> to vector<8x1xi1>
    %856 = vector.broadcast %855 : vector<8x1xi1> to vector<8x32xi1>
    %857 = arith.select %856, %849, %854 : vector<8x32xi1>, vector<8x32xf32>
    %c0_429 = arith.constant 0 : index
    %c0_430 = arith.constant 0 : index
    %858 = vector.load %arg15[%c0_429, %c0_430] : memref<8x32xf32, #tpu.memory_space<vmem>>, vector<8x32xf32>
    tpu.vector_store %arg15[%c0_429, %c0_430], %857 {strides = array<i32>} : memref<8x32xf32, #tpu.memory_space<vmem>>, vector<8x32xf32>,
    %c0_431 = arith.constant 0 : index
    %c0_432 = arith.constant 0 : index
    %859 = vector.load %arg14[%c0_431, %c0_432] : memref<8x32xf32, #tpu.memory_space<vmem>>, vector<8x32xf32>
    %860 = vector.shape_cast %853 : vector<8x1xi1> to vector<8x1xi1>
    %861 = vector.broadcast %860 : vector<8x1xi1> to vector<8x32xi1>
    %862 = arith.select %861, %851, %859 : vector<8x32xi1>, vector<8x32xf32>
    %c0_433 = arith.constant 0 : index
    %c0_434 = arith.constant 0 : index
    %863 = vector.load %arg14[%c0_433, %c0_434] : memref<8x32xf32, #tpu.memory_space<vmem>>, vector<8x32xf32>
    tpu.vector_store %arg14[%c0_433, %c0_434], %862 {strides = array<i32>} : memref<8x32xf32, #tpu.memory_space<vmem>>, vector<8x32xf32>,
    %cst_435 = arith.constant 0.000000e+00 : f32
    %864 = vector.shape_cast %853 : vector<8x1xi1> to vector<8x1xi1>
    %865 = vector.broadcast %864 : vector<8x1xi1> to vector<8x32xi1>
    %866 = vector.broadcast %cst_435 : f32 to vector<8x32xf32>
    %867 = arith.select %865, %851, %866 : vector<8x32xi1>, vector<8x32xf32>
    %868 = arith.index_cast %811 : i32 to index
    %c0_436 = arith.constant 0 : index
    %c0_437 = arith.constant 0 : index
    %869 = vector.load %arg11[%868, %c0_436, %c0_437] : memref<8x8x32xf32, #tpu.memory_space<vmem>>, vector<1x8x32xf32>
    %870 = vector.shape_cast %869 : vector<1x8x32xf32> to vector<8x32xf32>
    %871 = vector.shape_cast %867 : vector<8x32xf32> to vector<1x8x32xf32>
    tpu.vector_store %arg11[%868, %c0_436, %c0_437], %871 {strides = array<i32>} : memref<8x8x32xf32, #tpu.memory_space<vmem>>, vector<1x8x32xf32>,
    %c7_i32_438 = arith.constant 7 : i32
    %872 = arith.addi %22, %c7_i32_438 : i32
    %873 = arith.index_cast %c7_i32_438 : i32 to index
    %c0_439 = arith.constant 0 : index
    %c0_440 = arith.constant 0 : index
    %874 = vector.load %arg16[%873, %c0_439, %c0_440] : memref<8x8x128xf32, #tpu.memory_space<vmem>>, vector<1x8x128xf32>
    %875 = vector.shape_cast %874 : vector<1x8x128xf32> to vector<8x128xf32>
    %c0_441 = arith.constant 0 : index
    %c0_442 = arith.constant 0 : index
    %876 = vector.load %arg12[%c0_441, %c0_442] : memref<8x32xf32, #tpu.memory_space<vmem>>, vector<8x32xf32>
    %c0_443 = arith.constant 0 : index
    %c0_444 = arith.constant 0 : index
    %877 = vector.load %arg6[%c0_443, %c0_444] : memref<32x128xf32, #tpu.memory_space<vmem>>, vector<32x128xf32>
    %cst_445 = arith.constant dense<0.000000e+00> : vector<8x128xf32>
    %878 = tpu.matmul %876, %877, %cst_445 {dimension_numbers = #tpu.dot_dimension_numbers<[1], [0], [0], [1], [0, 0, 1, 1], [], []>} : vector<8x32xf32>, vector<32x128xf32>, vector<8x128xf32> -> vector<8x128xf32>
    %879 = arith.addf %875, %878 : vector<8x128xf32>
    %880 = vector.extract_strided_slice %879 {offsets = [0, 0], sizes = [8, 32], strides = [1, 1]} : vector<8x128xf32> to vector<8x32xf32>
    %cst_446 = arith.constant 5.000000e-01 : f32
    %881 = vector.broadcast %cst_446 : f32 to vector<8x32xf32>
    %882 = arith.mulf %881, %880 : vector<8x32xf32>
    %883 = math.tanh %882 : vector<8x32xf32>
    %cst_447 = arith.constant 5.000000e-01 : f32
    %884 = vector.broadcast %cst_447 : f32 to vector<8x32xf32>
    %885 = arith.mulf %884, %883 : vector<8x32xf32>
    %cst_448 = arith.constant 5.000000e-01 : f32
    %886 = vector.broadcast %cst_448 : f32 to vector<8x32xf32>
    %887 = arith.addf %885, %886 : vector<8x32xf32>
    %888 = vector.extract_strided_slice %879 {offsets = [0, 32], sizes = [8, 32], strides = [1, 1]} : vector<8x128xf32> to vector<8x32xf32>
    %cst_449 = arith.constant 5.000000e-01 : f32
    %889 = vector.broadcast %cst_449 : f32 to vector<8x32xf32>
    %890 = arith.mulf %889, %888 : vector<8x32xf32>
    %891 = math.tanh %890 : vector<8x32xf32>
    %cst_450 = arith.constant 5.000000e-01 : f32
    %892 = vector.broadcast %cst_450 : f32 to vector<8x32xf32>
    %893 = arith.mulf %892, %891 : vector<8x32xf32>
    %cst_451 = arith.constant 5.000000e-01 : f32
    %894 = vector.broadcast %cst_451 : f32 to vector<8x32xf32>
    %895 = arith.addf %893, %894 : vector<8x32xf32>
    %896 = vector.extract_strided_slice %879 {offsets = [0, 64], sizes = [8, 32], strides = [1, 1]} : vector<8x128xf32> to vector<8x32xf32>
    %897 = math.tanh %896 : vector<8x32xf32>
    %898 = vector.extract_strided_slice %879 {offsets = [0, 96], sizes = [8, 32], strides = [1, 1]} : vector<8x128xf32> to vector<8x32xf32>
    %cst_452 = arith.constant 5.000000e-01 : f32
    %899 = vector.broadcast %cst_452 : f32 to vector<8x32xf32>
    %900 = arith.mulf %899, %898 : vector<8x32xf32>
    %901 = math.tanh %900 : vector<8x32xf32>
    %cst_453 = arith.constant 5.000000e-01 : f32
    %902 = vector.broadcast %cst_453 : f32 to vector<8x32xf32>
    %903 = arith.mulf %902, %901 : vector<8x32xf32>
    %cst_454 = arith.constant 5.000000e-01 : f32
    %904 = vector.broadcast %cst_454 : f32 to vector<8x32xf32>
    %905 = arith.addf %903, %904 : vector<8x32xf32>
    %c0_455 = arith.constant 0 : index
    %c0_456 = arith.constant 0 : index
    %906 = vector.load %arg13[%c0_455, %c0_456] : memref<8x32xf32, #tpu.memory_space<vmem>>, vector<8x32xf32>
    %907 = arith.mulf %895, %906 : vector<8x32xf32>
    %908 = arith.mulf %887, %897 : vector<8x32xf32>
    %909 = arith.addf %907, %908 : vector<8x32xf32>
    %910 = math.tanh %909 : vector<8x32xf32>
    %911 = arith.mulf %905, %910 : vector<8x32xf32>
    %912 = vector.broadcast %872 : i32 to vector<8x1xi32>
    %913 = arith.cmpi sgt, %21, %912 : vector<8x1xi32>
    %c0_457 = arith.constant 0 : index
    %c0_458 = arith.constant 0 : index
    %914 = vector.load %arg13[%c0_457, %c0_458] : memref<8x32xf32, #tpu.memory_space<vmem>>, vector<8x32xf32>
    %915 = vector.shape_cast %913 : vector<8x1xi1> to vector<8x1xi1>
    %916 = vector.broadcast %915 : vector<8x1xi1> to vector<8x32xi1>
    %917 = arith.select %916, %909, %914 : vector<8x32xi1>, vector<8x32xf32>
    %c0_459 = arith.constant 0 : index
    %c0_460 = arith.constant 0 : index
    %918 = vector.load %arg13[%c0_459, %c0_460] : memref<8x32xf32, #tpu.memory_space<vmem>>, vector<8x32xf32>
    tpu.vector_store %arg13[%c0_459, %c0_460], %917 {strides = array<i32>} : memref<8x32xf32, #tpu.memory_space<vmem>>, vector<8x32xf32>,
    %c0_461 = arith.constant 0 : index
    %c0_462 = arith.constant 0 : index
    %919 = vector.load %arg12[%c0_461, %c0_462] : memref<8x32xf32, #tpu.memory_space<vmem>>, vector<8x32xf32>
    %920 = vector.shape_cast %913 : vector<8x1xi1> to vector<8x1xi1>
    %921 = vector.broadcast %920 : vector<8x1xi1> to vector<8x32xi1>
    %922 = arith.select %921, %911, %919 : vector<8x32xi1>, vector<8x32xf32>
    %c0_463 = arith.constant 0 : index
    %c0_464 = arith.constant 0 : index
    %923 = vector.load %arg12[%c0_463, %c0_464] : memref<8x32xf32, #tpu.memory_space<vmem>>, vector<8x32xf32>
    tpu.vector_store %arg12[%c0_463, %c0_464], %922 {strides = array<i32>} : memref<8x32xf32, #tpu.memory_space<vmem>>, vector<8x32xf32>,
    %cst_465 = arith.constant 0.000000e+00 : f32
    %924 = vector.shape_cast %913 : vector<8x1xi1> to vector<8x1xi1>
    %925 = vector.broadcast %924 : vector<8x1xi1> to vector<8x32xi1>
    %926 = vector.broadcast %cst_465 : f32 to vector<8x32xf32>
    %927 = arith.select %925, %911, %926 : vector<8x32xi1>, vector<8x32xf32>
    %928 = arith.index_cast %c7_i32_438 : i32 to index
    %c0_466 = arith.constant 0 : index
    %c0_467 = arith.constant 0 : index
    %929 = vector.load %arg10[%928, %c0_466, %c0_467] : memref<8x8x32xf32, #tpu.memory_space<vmem>>, vector<1x8x32xf32>
    %930 = vector.shape_cast %929 : vector<1x8x32xf32> to vector<8x32xf32>
    %931 = vector.shape_cast %927 : vector<8x32xf32> to vector<1x8x32xf32>
    tpu.vector_store %arg10[%928, %c0_466, %c0_467], %931 {strides = array<i32>} : memref<8x8x32xf32, #tpu.memory_space<vmem>>, vector<1x8x32xf32>,
    %c7_i32_468 = arith.constant 7 : i32
    %932 = arith.subi %c7_i32_468, %c7_i32_438 : i32
    %933 = arith.addi %24, %932 : i32
    %934 = arith.index_cast %932 : i32 to index
    %c0_469 = arith.constant 0 : index
    %c0_470 = arith.constant 0 : index
    %935 = vector.load %arg17[%934, %c0_469, %c0_470] : memref<8x8x128xf32, #tpu.memory_space<vmem>>, vector<1x8x128xf32>
    %936 = vector.shape_cast %935 : vector<1x8x128xf32> to vector<8x128xf32>
    %c0_471 = arith.constant 0 : index
    %c0_472 = arith.constant 0 : index
    %937 = vector.load %arg14[%c0_471, %c0_472] : memref<8x32xf32, #tpu.memory_space<vmem>>, vector<8x32xf32>
    %c0_473 = arith.constant 0 : index
    %c0_474 = arith.constant 0 : index
    %938 = vector.load %arg7[%c0_473, %c0_474] : memref<32x128xf32, #tpu.memory_space<vmem>>, vector<32x128xf32>
    %cst_475 = arith.constant dense<0.000000e+00> : vector<8x128xf32>
    %939 = tpu.matmul %937, %938, %cst_475 {dimension_numbers = #tpu.dot_dimension_numbers<[1], [0], [0], [1], [0, 0, 1, 1], [], []>} : vector<8x32xf32>, vector<32x128xf32>, vector<8x128xf32> -> vector<8x128xf32>
    %940 = arith.addf %936, %939 : vector<8x128xf32>
    %941 = vector.extract_strided_slice %940 {offsets = [0, 0], sizes = [8, 32], strides = [1, 1]} : vector<8x128xf32> to vector<8x32xf32>
    %cst_476 = arith.constant 5.000000e-01 : f32
    %942 = vector.broadcast %cst_476 : f32 to vector<8x32xf32>
    %943 = arith.mulf %942, %941 : vector<8x32xf32>
    %944 = math.tanh %943 : vector<8x32xf32>
    %cst_477 = arith.constant 5.000000e-01 : f32
    %945 = vector.broadcast %cst_477 : f32 to vector<8x32xf32>
    %946 = arith.mulf %945, %944 : vector<8x32xf32>
    %cst_478 = arith.constant 5.000000e-01 : f32
    %947 = vector.broadcast %cst_478 : f32 to vector<8x32xf32>
    %948 = arith.addf %946, %947 : vector<8x32xf32>
    %949 = vector.extract_strided_slice %940 {offsets = [0, 32], sizes = [8, 32], strides = [1, 1]} : vector<8x128xf32> to vector<8x32xf32>
    %cst_479 = arith.constant 5.000000e-01 : f32
    %950 = vector.broadcast %cst_479 : f32 to vector<8x32xf32>
    %951 = arith.mulf %950, %949 : vector<8x32xf32>
    %952 = math.tanh %951 : vector<8x32xf32>
    %cst_480 = arith.constant 5.000000e-01 : f32
    %953 = vector.broadcast %cst_480 : f32 to vector<8x32xf32>
    %954 = arith.mulf %953, %952 : vector<8x32xf32>
    %cst_481 = arith.constant 5.000000e-01 : f32
    %955 = vector.broadcast %cst_481 : f32 to vector<8x32xf32>
    %956 = arith.addf %954, %955 : vector<8x32xf32>
    %957 = vector.extract_strided_slice %940 {offsets = [0, 64], sizes = [8, 32], strides = [1, 1]} : vector<8x128xf32> to vector<8x32xf32>
    %958 = math.tanh %957 : vector<8x32xf32>
    %959 = vector.extract_strided_slice %940 {offsets = [0, 96], sizes = [8, 32], strides = [1, 1]} : vector<8x128xf32> to vector<8x32xf32>
    %cst_482 = arith.constant 5.000000e-01 : f32
    %960 = vector.broadcast %cst_482 : f32 to vector<8x32xf32>
    %961 = arith.mulf %960, %959 : vector<8x32xf32>
    %962 = math.tanh %961 : vector<8x32xf32>
    %cst_483 = arith.constant 5.000000e-01 : f32
    %963 = vector.broadcast %cst_483 : f32 to vector<8x32xf32>
    %964 = arith.mulf %963, %962 : vector<8x32xf32>
    %cst_484 = arith.constant 5.000000e-01 : f32
    %965 = vector.broadcast %cst_484 : f32 to vector<8x32xf32>
    %966 = arith.addf %964, %965 : vector<8x32xf32>
    %c0_485 = arith.constant 0 : index
    %c0_486 = arith.constant 0 : index
    %967 = vector.load %arg15[%c0_485, %c0_486] : memref<8x32xf32, #tpu.memory_space<vmem>>, vector<8x32xf32>
    %968 = arith.mulf %956, %967 : vector<8x32xf32>
    %969 = arith.mulf %948, %958 : vector<8x32xf32>
    %970 = arith.addf %968, %969 : vector<8x32xf32>
    %971 = math.tanh %970 : vector<8x32xf32>
    %972 = arith.mulf %966, %971 : vector<8x32xf32>
    %973 = vector.broadcast %933 : i32 to vector<8x1xi32>
    %974 = arith.cmpi sgt, %21, %973 : vector<8x1xi32>
    %c0_487 = arith.constant 0 : index
    %c0_488 = arith.constant 0 : index
    %975 = vector.load %arg15[%c0_487, %c0_488] : memref<8x32xf32, #tpu.memory_space<vmem>>, vector<8x32xf32>
    %976 = vector.shape_cast %974 : vector<8x1xi1> to vector<8x1xi1>
    %977 = vector.broadcast %976 : vector<8x1xi1> to vector<8x32xi1>
    %978 = arith.select %977, %970, %975 : vector<8x32xi1>, vector<8x32xf32>
    %c0_489 = arith.constant 0 : index
    %c0_490 = arith.constant 0 : index
    %979 = vector.load %arg15[%c0_489, %c0_490] : memref<8x32xf32, #tpu.memory_space<vmem>>, vector<8x32xf32>
    tpu.vector_store %arg15[%c0_489, %c0_490], %978 {strides = array<i32>} : memref<8x32xf32, #tpu.memory_space<vmem>>, vector<8x32xf32>,
    %c0_491 = arith.constant 0 : index
    %c0_492 = arith.constant 0 : index
    %980 = vector.load %arg14[%c0_491, %c0_492] : memref<8x32xf32, #tpu.memory_space<vmem>>, vector<8x32xf32>
    %981 = vector.shape_cast %974 : vector<8x1xi1> to vector<8x1xi1>
    %982 = vector.broadcast %981 : vector<8x1xi1> to vector<8x32xi1>
    %983 = arith.select %982, %972, %980 : vector<8x32xi1>, vector<8x32xf32>
    %c0_493 = arith.constant 0 : index
    %c0_494 = arith.constant 0 : index
    %984 = vector.load %arg14[%c0_493, %c0_494] : memref<8x32xf32, #tpu.memory_space<vmem>>, vector<8x32xf32>
    tpu.vector_store %arg14[%c0_493, %c0_494], %983 {strides = array<i32>} : memref<8x32xf32, #tpu.memory_space<vmem>>, vector<8x32xf32>,
    %cst_495 = arith.constant 0.000000e+00 : f32
    %985 = vector.shape_cast %974 : vector<8x1xi1> to vector<8x1xi1>
    %986 = vector.broadcast %985 : vector<8x1xi1> to vector<8x32xi1>
    %987 = vector.broadcast %cst_495 : f32 to vector<8x32xf32>
    %988 = arith.select %986, %972, %987 : vector<8x32xi1>, vector<8x32xf32>
    %989 = arith.index_cast %932 : i32 to index
    %c0_496 = arith.constant 0 : index
    %c0_497 = arith.constant 0 : index
    %990 = vector.load %arg11[%989, %c0_496, %c0_497] : memref<8x8x32xf32, #tpu.memory_space<vmem>>, vector<1x8x32xf32>
    %991 = vector.shape_cast %990 : vector<1x8x32xf32> to vector<8x32xf32>
    %992 = vector.shape_cast %988 : vector<8x32xf32> to vector<1x8x32xf32>
    tpu.vector_store %arg11[%989, %c0_496, %c0_497], %992 {strides = array<i32>} : memref<8x8x32xf32, #tpu.memory_space<vmem>>, vector<1x8x32xf32>,
    %c8_i32_498 = arith.constant 8 : i32
    return
  }
  func.func @transform_0(%arg0: i32) -> (i32, i32) {
    %c0_i32 = arith.constant 0 : i32
    %c0_i32_0 = arith.constant 0 : i32
    %c0_i32_1 = arith.constant 0 : i32
    return %c0_i32, %c0_i32_0 : i32, i32
  }
  func.func @transform_1(%arg0: i32) -> (i32, i32, i32) {
    %c0_i32 = arith.constant 0 : i32
    %c0_i32_0 = arith.constant 0 : i32
    %c0_i32_1 = arith.constant 0 : i32
    return %arg0, %c0_i32, %c0_i32_0 : i32, i32, i32
  }
  func.func @transform_2(%arg0: i32) -> (i32, i32, i32) {
    %c0_i32 = arith.constant 0 : i32
    %0 = arith.subi %c0_i32, %arg0 : i32
    %c0_i32_0 = arith.constant 0 : i32
    %c0_i32_1 = arith.constant 0 : i32
    %c0_i32_2 = arith.constant 0 : i32
    return %0, %c0_i32_0, %c0_i32_1 : i32, i32, i32
  }
  func.func @transform_3(%arg0: i32) -> (i32, i32) {
    %c0_i32 = arith.constant 0 : i32
    %c0_i32_0 = arith.constant 0 : i32
    %c0_i32_1 = arith.constant 0 : i32
    return %c0_i32, %c0_i32_0 : i32, i32
  }
  func.func @transform_4(%arg0: i32) -> (i32, i32) {
    %c0_i32 = arith.constant 0 : i32
    %c0_i32_0 = arith.constant 0 : i32
    %c0_i32_1 = arith.constant 0 : i32
    return %c0_i32, %c0_i32_0 : i32, i32
  }
  func.func @transform_5(%arg0: i32) -> (i32, i32) {
    %c0_i32 = arith.constant 0 : i32
    %c0_i32_0 = arith.constant 0 : i32
    %c0_i32_1 = arith.constant 0 : i32
    return %c0_i32, %c0_i32_0 : i32, i32
  }
  func.func @transform_6(%arg0: i32) -> (i32, i32) {
    %c0_i32 = arith.constant 0 : i32
    %c0_i32_0 = arith.constant 0 : i32
    %c0_i32_1 = arith.constant 0 : i32
    return %c0_i32, %c0_i32_0 : i32, i32
  }
  func.func @transform_7(%arg0: i32) -> (i32, i32) {
    %c0_i32 = arith.constant 0 : i32
    %c0_i32_0 = arith.constant 0 : i32
    %c0_i32_1 = arith.constant 0 : i32
    return %c0_i32, %c0_i32_0 : i32, i32
  }
  func.func @transform_8(%arg0: i32) -> (i32, i32) {
    %c0_i32 = arith.constant 0 : i32
    %c0_i32_0 = arith.constant 0 : i32
    %c0_i32_1 = arith.constant 0 : i32
    return %c0_i32, %c0_i32_0 : i32, i32
  }
  func.func @transform_9(%arg0: i32) -> (i32, i32, i32) {
    %c0_i32 = arith.constant 0 : i32
    %c0_i32_0 = arith.constant 0 : i32
    %c0_i32_1 = arith.constant 0 : i32
    return %arg0, %c0_i32, %c0_i32_0 : i32, i32, i32
  }
  func.func @transform_10(%arg0: i32) -> (i32, i32, i32) {
    %c0_i32 = arith.constant 0 : i32
    %0 = arith.subi %c0_i32, %arg0 : i32
    %c0_i32_0 = arith.constant 0 : i32
    %c0_i32_1 = arith.constant 0 : i32
    %c0_i32_2 = arith.constant 0 : i32
    return %0, %c0_i32_0, %c0_i32_1 : i32, i32, i32
  }
}

</mosaic_0001>

<bundles_post_ra>
// kernel: rnn_forward.3
= control target key start
LH: loop header
LB: loop body
LE: loop exit
PB: predicated region body
PF: predicated region fallthrough
CT: control target
= control target key end

     0   :  { %vm74_vm0 = vcmask 261120   ;;  %v3300_v7 = vmov 0.0   ;;  %vm102_vm1 = vcmask 523264   ;;  %s3301_s15 = smov 32   ;;  %v3302_v35 = vmov 0.0|0.0   ;;  %s4203_s3 = inlined_call_operand.vmem [shape: f32[64,128], index: 3, kind: input, shape index: {}]   ;;  %s4204_s4 = inlined_call_operand.vmem [shape: f32[64,128], index: 4, kind: input, shape index: {}]   ;;  %s4205_s1 = inlined_call_operand.vmem [shape: f32[8,8,64], index: 1, kind: input, shape index: {}, may-alias: {1,2}]   ;;  %s4206_s2 = inlined_call_operand.vmem [shape: f32[8,8,64], index: 2, kind: input, shape index: {}, may-alias: {1,2}]   ;;  %s4207_s5 = inlined_call_operand.vmem [shape: f32[32,128], index: 5, kind: input, shape index: {}]   ;;  %s4208_s6 = inlined_call_operand.vmem [shape: f32[32,128], index: 6, kind: input, shape index: {}]   ;;  %s4209_s7 = inlined_call_operand.vmem [shape: f32[1,128], index: 7, kind: input, shape index: {}]   ;;  %s4210_s8 = inlined_call_operand.vmem [shape: f32[1,128], index: 8, kind: input, shape index: {}]   ;;  %s4211_s0 = inlined_call_operand.vmem [shape: s32[8,1], index: 0, kind: input, shape index: {}]   ;;  %s4212_s9 = inlined_call_operand.vmem [shape: f32[8,8,32], index: 9, kind: output, shape index: {0}]   ;;  %s4213_s10 = inlined_call_operand.vmem [shape: f32[8,8,32], index: 10, kind: output, shape index: {1}]  }
   0x1   :  { %v87_v0 = vld [vmem:[%s4203_s3] sm:$0xff]  ;;  %v88_v1 = vld [vmem:[%s4203_s3 + $0x8] sm:$0xff]  ;;  %v89_v5 = vld [vmem:[%s4203_s3 + $0x10] sm:$0xff]  ;;  %75 = vst.msk [vmem:[#allocation2] sm:$0xff] %vm74_vm0, %v3300_v7  ;;  %vm3303_vm2 = vmmov 0  }
   0x2   :  { %v248_v2 = vld [vmem:[%s4204_s4] sm:$0xff]  ;;  %v3067_v3 = vpack.c.bf16 %v88_v1, %v87_v0  ;;  %v249_v4 = vld [vmem:[%s4204_s4 + $0x8] sm:$0xff]  ;;  %v90_v6 = vld [vmem:[%s4203_s3 + $0x18] sm:$0xff]  ;;  %76 = vst.msk [vmem:[#allocation3] sm:$0xff] %vm74_vm0, %v3300_v7 }
   0x3   :  { %77 = vst.msk [vmem:[#allocation4] sm:$0xff] %vm74_vm0, %v3300_v7  ;;  %78 = vst.msk [vmem:[#allocation5] sm:$0xff] %vm74_vm0, %v3300_v7  ;;  %v3083_v8 = vpack.c.bf16 %v249_v4, %v248_v2  ;;  %v3071_v9 = vpack.c.bf16 %v90_v6, %v89_v5  ;;  %v250_v10 = vld [vmem:[%s4204_s4 + $0x10] sm:$0xff]  ;;  %v251_v11 = vld [vmem:[%s4204_s4 + $0x18] sm:$0xff] }
   0x4   :  { %v91_v12 = vld [vmem:[%s4203_s3 + $0x20] sm:$0xff]  ;;  %3068 = vmatprep.subr.bf16.mxu0 %v3067_v3  ;;  %v3087_v13 = vpack.c.bf16 %v251_v11, %v250_v10  ;;  %v92_v14 = vld [vmem:[%s4203_s3 + $0x28] sm:$0xff]  ;;  %v93_v20 = vld [vmem:[%s4203_s3 + $0x30] sm:$0xff] }
   0x5   :  { %v252_v15 = vld [vmem:[%s4204_s4 + $0x20] sm:$0xff]  ;;  %v253_v16 = vld [vmem:[%s4204_s4 + $0x28] sm:$0xff]  ;;  %3070 = vmatpush3.bf16.msra.mxu0 %v3067_v3  ;;  %3084 = vmatprep.subr.bf16.mxu1 %v3083_v8  ;;  %v3075_v18 = vpack.c.bf16 %v92_v14, %v91_v12  ;;  %v94_v21 = vld [vmem:[%s4203_s3 + $0x38] sm:$0xff] }
   0x6   :  { %v79_v17 = vld [vmem:[%s4205_s1] sm:$0xff]  ;;  %3072 = vmatprep.subr.bf16.mxu0 %v3071_v9  ;;  %3086 = vmatpush3.bf16.msra.mxu1 %v3083_v8  ;;  %v3091_v19 = vpack.c.bf16 %v253_v16, %v252_v15  ;;  %v254_v23 = vld [vmem:[%s4204_s4 + $0x30] sm:$0xff]  ;;  %v255_v24 = vld [vmem:[%s4204_s4 + $0x38] sm:$0xff]  ;;  %v3079_v25 = vpack.c.bf16 %v94_v21, %v93_v20 }
   0x7   :  { %3088 = vmatprep.subr.bf16.mxu1 %v3087_v13  ;;  %2851 = vmatprep.mubr.msk.f32.mxu0 %vm102_vm1, %v79_v17  ;;  %v240_v22 = vld [vmem:[%s4206_s2] sm:$0xff]  ;;  %v3095_v26 = vpack.c.bf16 %v255_v24, %v254_v23  ;;  %v407_v28 = vld [vmem:[%s4207_s5 + $0x8] sm:$0xff]  ;;  %v81_v36 = vld [vmem:[%s4205_s1 + $0x10] sm:$0xff] }
   0x8   :  { %2879 = vmatprep.mubr.msk.f32.mxu1 %vm102_vm1, %v240_v22  ;;  %v406_v27 = vld [vmem:[%s4207_s5] sm:$0xff]  ;;  %v547_v31 = vld [vmem:[%s4208_s6 + $0x8] sm:$0xff]  ;;  %v408_v37 = vld [vmem:[%s4207_s5 + $0x10] sm:$0xff] }
   0x9   :  { %3074 = vmatpush3.bf16.msra.mxu0 %v3071_v9  ;;  %v490_v29 = vld [vmem:[#allocation3] sm:$0xff]  ;;  %v546_v30 = vld [vmem:[%s4208_s6] sm:$0xff]  ;;  %v3442_v33 = vpack.c.bf16 %v407_v28, %v406_v27  ;;  %v409_v38 = vld [vmem:[%s4207_s5 + $0x18] sm:$0xff] }
   0xa   :  { %3076 = vmatprep.subr.bf16.mxu0 %v3075_v18  ;;  %3090 = vmatpush3.bf16.msra.mxu1 %v3087_v13  ;;  %v80_v32 = vld [vmem:[%s4205_s1 + $0x8] sm:$0xff]  ;;  %v629_v34 = vld [vmem:[#allocation5] sm:$0xff]  ;;  %v3458_v40 = vpack.c.bf16 %v547_v31, %v546_v30  ;;  %v242_v41 = vld [vmem:[%s4206_s2 + $0x10] sm:$0xff]  ;;  %v3476_v45 = vpack.c.bf16 %v409_v38, %v408_v37  ;;  %v3304_v37 = vmov 0  }
   0xb   :  { %3092 = vmatprep.subr.bf16.mxu1 %v3091_v19  ;;  %492 = vrot.lane.b32.xlu1 %v490_v29, %s3301_s15  ;;  %v241_v39 = vld [vmem:[%s4206_s2 + $0x8] sm:$0xff]  ;;  %v548_v42 = vld [vmem:[%s4208_s6 + $0x10] sm:$0xff]  ;;  %v549_v43 = vld [vmem:[%s4208_s6 + $0x18] sm:$0xff] }
   0xc   :  { %v82_v44 = vld [vmem:[%s4205_s1 + $0x18] sm:$0xff]  ;;  %v83_v46 = vld [vmem:[%s4205_s1 + $0x20] sm:$0xff]  ;;  %v3488_v48 = vpack.c.bf16 %v549_v43, %v548_v42  ;;  %v84_v50 = vld [vmem:[%s4205_s1 + $0x28] sm:$0xff]  ;;  %3202 = vset.pattern.permute.xlu0 %v3304_v37  ;;  %3203 = vset.pattern.permute.xlu1 %v3304_v37 }
   0xd   :  { %3078 = vmatpush3.bf16.msra.mxu0 %v3075_v18  ;;  %v243_v47 = vld [vmem:[%s4206_s2 + $0x18] sm:$0xff]  ;;  %v244_v49 = vld [vmem:[%s4206_s2 + $0x20] sm:$0xff]  ;;  %v85_v51 = vld [vmem:[%s4205_s1 + $0x30] sm:$0xff] }
   0xe   :  { %3080 = vmatprep.subr.bf16.mxu0 %v3079_v25  ;;  %3094 = vmatpush3.bf16.msra.mxu1 %v3091_v19  ;;  %v245_v52 = vld [vmem:[%s4206_s2 + $0x28] sm:$0xff]  ;;  %v246_v53 = vld [vmem:[%s4206_s2 + $0x30] sm:$0xff]  ;;  %v86_v54 = vld [vmem:[%s4205_s1 + $0x38] sm:$0xff] }
   0xf   :  { %3096 = vmatprep.subr.bf16.mxu1 %v3095_v26  ;;  %631 = vrot.lane.b32.xlu1 %v629_v34, %s3301_s15  ;;  %v247_v55 = vld [vmem:[%s4206_s2 + $0x38] sm:$0xff]  ;;  %v3527_v56 = vld [vmem:[#allocation2] sm:$0xff]  ;;  %v3532_v57 = vld [vmem:[#allocation4] sm:$0xff] }
  0x10   :  { %v2675_v58 = vld [vmem:[%s4209_s7] ss:$0 sm:$0xff]  ;;  %s3305_s7 = smov 64  }
  0x11   :  { %3082 = vmatpush3.bf16.msra.mxu0 %v3079_v25  ;;  %v2684_v60 = vld [vmem:[%s4210_s8] ss:$0 sm:$0xff] }
  0x12   :  { %3098 = vmatpush3.bf16.msra.mxu1 %v3095_v26  ;;  %3099 = vmatprep.subr.bf16.mxu0 %v3302_v35 }
  0x13   :  { %3105 = vmatprep.subr.bf16.mxu1 %v3302_v35 }
  0x14   :  { %2852 = vmatmul.mubr.msk.f32.vlgmr.msra.gmra.mrb[0].mxu0 %vm102_vm1, %v80_v32 }
  0x15   :  { %3101 = vmatpush3.bf16.msra.mxu0 %v3442_v33  ;;  %2854 = vmatprep.mubr.msk.f32.mxu0 %vm102_vm1, %v81_v36 }
  0x16   :  { %2880 = vmatmul.mubr.msk.f32.vlgmr.msra.gmra.mrb[0].mxu1 %vm102_vm1, %v241_v39  ;;  %3102 = vmatprep.subr.bf16.mxu0 %v3302_v35 }
  0x17   :  { %3107 = vmatpush3.bf16.msra.mxu1 %v3458_v40  ;;  %2882 = vmatprep.mubr.msk.f32.mxu1 %vm102_vm1, %v242_v41 }
  0x18   :  { %2855 = vmatmul.mubr.msk.f32.gmra.mrb[2].mxu0 %vm102_vm1, %v82_v44  ;;  %3108 = vmatprep.subr.bf16.mxu1 %v3302_v35 }
  0x19   :  { %2857 = vmatprep.mubr.msk.f32.mxu0 %vm102_vm1, %v83_v46  ;;  %3104 = vmatpush3.bf16.msra.mxu0 %v3476_v45 }
  0x1a   :  { %2883 = vmatmul.mubr.msk.f32.gmra.mrb[2].mxu1 %vm102_vm1, %v243_v47  ;;  %3111 = vmatprep.subr.bf16.mxu0 %v3302_v35  ;;  %v3591_v47 = vld [vmem:[%s4211_s0] sm:$0xff]  ;;  %s3306_s0 = smov 96  }
  0x1b   :  { %2885 = vmatprep.mubr.msk.f32.mxu1 %vm102_vm1, %v244_v49  ;;  %3110 = vmatpush3.bf16.msra.mxu1 %v3488_v48  ;;  %vm513_vm3 = vcmp.gt.s32.totalorder %v3591_v47, 0  ;;  %vm652_vm4 = vcmp.gt.s32.totalorder %v3591_v47, 7  ;;  %vm792_vm7 = vcmp.gt.s32.totalorder %v3591_v47, 1  ;;  %vm932_vm8 = vcmp.gt.s32.totalorder %v3591_v47, 6 }
  0x1c   :  { %2858 = vmatmul.mubr.msk.f32.gmra.mrb[4].mxu0 %vm102_vm1, %v84_v50  ;;  %3117 = vmatprep.subr.bf16.mxu1 %v3302_v35  ;;  %vm1072_vm11 = vcmp.gt.s32.totalorder %v3591_v47, 2  ;;  %vm1212_vm12 = vcmp.gt.s32.totalorder %v3591_v47, 5  ;;  %vm1352_vm15 = vcmp.gt.s32.totalorder %v3591_v47, 3 }
  0x1d   :  { %2860 = vmatprep.mubr.msk.f32.mxu0 %vm102_vm1, %v85_v51 }
  0x1e   :  { %2886 = vmatmul.mubr.msk.f32.gmra.mrb[4].mxu1 %vm102_vm1, %v245_v52 }
  0x1f   :  { %2888 = vmatprep.mubr.msk.f32.mxu1 %vm102_vm1, %v246_v53 }
  0x20   :  { %2861 = vmatmul.mubr.msk.f32.gmra.mrb[6].mxu0 %vm102_vm1, %v86_v54 }
  0x21   :  { %2899 = vmatprep.mubr.msk.f32.mxu0 %vm3303_vm2, %v3300_v7 }
  0x22   :  { %2889 = vmatmul.mubr.msk.f32.gmra.mrb[6].mxu1 %vm102_vm1, %v247_v55  ;;  %v3596_v55 = vsel %vm513_vm3, 1, %v3304_v37  ;;  %vm1492_vm1 = vcmp.gt.s32.totalorder %v3591_v47, 4 }
  0x23   :  { %2910 = vmatprep.mubr.msk.f32.mxu1 %vm3303_vm2, %v3300_v7 }
  0x24   :  { %2900 = vmatmul.mubr.msk.f32.vlgmr.msra.gmra.mrb[8].mxu0 %vm74_vm0, %v3527_v56 }
  0x25   :  { %3113 = vmatpush3.bf16.msra.mxu0 %v3442_v33  ;;  %2921 = vmatprep.mubr.msk.f32.mxu0 %vm3303_vm2, %v3300_v7 }
  0x26   :  { %2911 = vmatmul.mubr.msk.f32.vlgmr.msra.gmra.mrb[8].mxu1 %vm74_vm0, %v3532_v57  ;;  %3114 = vmatprep.subr.bf16.mxu0 %v3302_v35 }
  0x27   :  { %3119 = vmatpush3.bf16.msra.mxu1 %v3458_v40  ;;  %2932 = vmatprep.mubr.msk.f32.mxu1 %vm3303_vm2, %v3300_v7 }
  0x28   :  { %3120 = vmatprep.subr.bf16.mxu1 %v3302_v35 }
  0x29   :  { %3116 = vmatpush3.bf16.msra.mxu0 %v3476_v45 }
  0x2a   :  { %3123 = vmatprep.subr.bf16.mxu0 %v3302_v35 }
  0x2b   :  { %3122 = vmatpush3.bf16.msra.mxu1 %v3488_v48 }
  0x2c   :  { %3129 = vmatprep.subr.bf16.mxu1 %v3302_v35 }
  0xe7   :  { %v2853_v59 = vpop.f32.mrb[0].mxu0 }
  0xe8   :  { %v3556_v61 = vadd.f32 %v2853_v59, %v2675_v58  ;;  %v193_v62 = vpop.f32.mrb[1].mxu0  ;;  %v3602_v59 = vsel %vm652_vm4, 1, %v3304_v37 }
  0xe9   :  { %v2881_v63 = vpop.f32.mrb[0].mxu1  ;;  %v194_v25 = vadd.f32 %v2675_v58, %v193_v62 }
  0xea   :  { %v3558_v0 = vadd.f32 %v2881_v63, %v2684_v60  ;;  %v353_v1 = vpop.f32.mrb[1].mxu1 }
  0xeb   :  { %v2856_v2 = vpop.f32.mrb[2].mxu0  ;;  %v3560_v3 = vadd.f32 %v2684_v60, %v353_v1 }
  0xec   :  { %v3562_v4 = vadd.f32 %v2856_v2, %v2675_v58  ;;  %v203_v5 = vpop.f32.mrb[3].mxu0 }
  0xed   :  { %v3564_v6 = vadd.f32 %v2675_v58, %v203_v5  ;;  %v2884_v8 = vpop.f32.mrb[2].mxu1 }
  0xee   :  { %v3566_v9 = vadd.f32 %v2884_v8, %v2684_v60  ;;  %v363_v10 = vpop.f32.mrb[3].mxu1 }
  0xef   :  { %v2859_v11 = vpop.f32.mrb[4].mxu0  ;;  %v3568_v12 = vadd.f32 %v2684_v60, %v363_v10 }
  0xf0   :  { %v3570_v13 = vadd.f32 %v2859_v11, %v2675_v58  ;;  %v213_v14 = vpop.f32.mrb[5].mxu0 }
  0xf1   :  { %v3572_v15 = vadd.f32 %v2675_v58, %v213_v14  ;;  %v2887_v16 = vpop.f32.mrb[4].mxu1 }
  0xf2   :  { %v3574_v17 = vadd.f32 %v2887_v16, %v2684_v60  ;;  %v373_v18 = vpop.f32.mrb[5].mxu1 }
  0xf3   :  { %v2862_v19 = vpop.f32.mrb[6].mxu0  ;;  %v3576_v20 = vadd.f32 %v2684_v60, %v373_v18 }
  0xf4   :  { %v3578_v21 = vadd.f32 %v2862_v19, %v2675_v58  ;;  %v223_v22 = vpop.f32.mrb[7].mxu0 }
  0xf5   :  { %v3580_v23 = vadd.f32 %v2675_v58, %v223_v22  ;;  %v2890_v24 = vpop.f32.mrb[6].mxu1 }
  0xf6   :  { %v389_v26 = vadd.f32 %v2890_v24, %v2684_v60  ;;  %v383_v27 = vpop.f32.mrb[7].mxu1 }
  0xf7   :  { %v480_v28 = vpop.f32.mrb[8].mxu0  ;;  %v3582_v29 = vadd.f32 %v2684_v60, %v383_v27  ;;  %v493_v60 = vpop.permute.xlu1 %492 }
  0xf8   :  { %v484_v30 = vadd.f32 %v480_v28, %v194_v25  ;;  %v2901_v31 = vpop.f32.mrb[9].mxu0 }
  0xf9   :  { %v619_v32 = vpop.f32.mrb[8].mxu1 }
  0xfa   :  { %3204 = vtanh.f32 %v484_v30  ;;  %v623_v34 = vadd.f32 %v619_v32, %v389_v26  ;;  %v2912_v36 = vpop.f32.mrb[9].mxu1  ;;  %v485_v41 = vmul.f32 0.5, %v484_v30 }
  0xfb   :  { %v632_v63 = vpop.permute.xlu1 %631 }
  0xfc   :  { %3206 = vtanh.f32 %v623_v34  ;;  %v624_v42 = vmul.f32 0.5, %v623_v34 }
  0xfd   :  { %3208 = vtanh.f32 %v485_v41 }
  0xfe   :  { %3210 = vtanh.f32 %v624_v42 }
 0x104   :  { %v3205_v38 = vpop.eup %3204 }
 0x105   :  { %497 = vrot.lane.b32.xlu0 %v3205_v38, %s3305_s7 }
 0x106   :  { %v3207_v39 = vpop.eup %3206 }
 0x107   :  { %v3209_v43 = vpop.eup %3208 }
 0x108   :  { %v487_v44 = vmul.f32 0.5, %v3209_v43  ;;  %v3211_v46 = vpop.eup %3210 }
 0x109   :  { %636 = vrot.lane.b32.xlu0 %v3207_v39, %s3305_s7  ;;  %v626_v50 = vmul.f32 0.5, %v3211_v46 }
 0x10a   :  { %v488_v49 = vadd.f32 0.5, %v487_v44 }
 0x10b   :  { %v627_v53 = vadd.f32 0.5, %v626_v50 }
 0x10c   :  { %v495_v62 = vmul.f32 %v493_v60, %v488_v49 }
 0x10d   :  { %v634_v5 = vmul.f32 %v632_v63, %v627_v53 }
 0x177   :  { %v498_v51 = vpop.permute.xlu0 %497 }
 0x178   :  { %v500_v52 = vmul.f32 %v498_v51, %v488_v49 }
 0x17a   :  { %502 = vrot.lane.b32.xlu0 %v500_v52, %s3301_s15 }
 0x17b   :  { %v637_v54 = vpop.permute.xlu0 %636 }
 0x17c   :  { %v639_v58 = vmul.f32 %v637_v54, %v627_v53 }
 0x17e   :  { %641 = vrot.lane.b32.xlu1 %v639_v58, %s3301_s15  ;;  %516 = vperm.xlu0 %3202, %v3596_v55  }
 0x182   :  { %655 = vperm.xlu1 %3203, %v3602_v59  }
 0x1ec   :  { %v503_v1 = vpop.permute.xlu0 %502 }
 0x1ed   :  { %v505_v2 = vadd.f32 %v503_v1, %v495_v62 }
 0x1ef   :  { %3212 = vtanh.f32 %v505_v2 }
 0x1f0   :  { %v642_v8 = vpop.permute.xlu1 %641 }
 0x1f1   :  { %v644_v10 = vadd.f32 %v642_v8, %v634_v5 }
 0x1f3   :  { %3214 = vtanh.f32 %v644_v10 }
 0x1f9   :  { %v3213_v11 = vpop.eup %3212 }
 0x1fa   :  { %508 = vrot.lane.b32.xlu1 %v3213_v11, %s3305_s7 }
 0x1fd   :  { %v3215_v14 = vpop.eup %3214  ;;  %v3613_v18 = vpop.permute.xlu0 %516 }
 0x1fe   :  { %527 = vrot.lane.b32.xlu1 %v3527_v56, %s3306_s0  ;;  %647 = vrot.lane.b32.xlu0 %v3215_v14, %s3305_s7  ;;  %vm518_vm5 = vcmp.eq.s32.totalorder %v3613_v18, 1  ;;  %v3671_v14 = vsel %vm932_vm8, 1, %v3304_v37 }
 0x1ff   :  { %v519_v27 = vsel %vm518_vm5, %v505_v2, %v493_v60 }
 0x201   :  { %v3611_v16 = vpop.permute.xlu1 %655 }
 0x202   :  { %666 = vrot.lane.b32.xlu0 %v3532_v57, %s3306_s0  ;;  %vm657_vm6 = vcmp.eq.s32.totalorder %v3611_v16, 1 }
 0x203   :  { %v658_v30 = vsel %vm657_vm6, %v644_v10, %v632_v63  ;;  %v3665_v10 = vsel %vm792_vm7, 1, %v3304_v37 }
 0x26c   :  { %v509_v19 = vpop.permute.xlu1 %508 }
 0x26d   :  { %v3615_v22 = vmul.f32 %v509_v19, %v488_v49 }
 0x270   :  { %v528_v24 = vpop.permute.xlu1 %527  ;;  %v648_v25 = vpop.permute.xlu0 %647 }
 0x271   :  { %v530_v56 = vsel %vm518_vm5, %v3615_v22, %v528_v24  ;;  %v3622_v26 = vmul.f32 %v648_v25, %v627_v53 }
 0x272   :  { %532 = vrot.lane.b32.xlu1 %v530_v56, %s3301_s15 }
 0x274   :  { %v667_v57 = vpop.permute.xlu0 %666 }
 0x275   :  { %v669_v28 = vsel %vm657_vm6, %v3622_v26, %v667_v57 }
 0x276   :  { %521 = vrot.lane.b32.xlu1 %v519_v27, %s3306_s0  ;;  %671 = vrot.lane.b32.xlu0 %v669_v28, %s3301_s15 }
 0x27a   :  { %660 = vrot.lane.b32.xlu0 %v658_v30, %s3306_s0 }
 0x2e4   :  { %v533_v31 = vpop.permute.xlu1 %532 }
 0x2e5   :  { %535 = vst.msk [vmem:[#allocation2] sm:$0xff] %vm74_vm0, %v533_v31 }
 0x2e8   :  { %v522_v32 = vpop.permute.xlu1 %521  ;;  %v672_v34 = vpop.permute.xlu0 %671 }
 0x2e9   :  { %524 = vst.msk [vmem:[#allocation3] sm:$0xff] %vm74_vm0, %v522_v32  ;;  %674 = vst.msk [vmem:[#allocation4] sm:$0xff] %vm74_vm0, %v672_v34 }
 0x2ec   :  { %v661_v36 = vpop.permute.xlu0 %660  ;;  %v3638_v38 = vld [vmem:[#allocation2] sm:$0xff] }
 0x2ed   :  { %663 = vst.msk [vmem:[#allocation5] sm:$0xff] %vm74_vm0, %v661_v36  ;;  %2922 = vmatmul.mubr.msk.f32.vlgmr.msra.gmra.mrb[10].mxu0 %vm74_vm0, %v3638_v38 }
 0x2ee   :  { %3125 = vmatpush3.bf16.msra.mxu0 %v3442_v33  ;;  %2943 = vmatprep.mubr.msk.f32.mxu0 %vm3303_vm2, %v3300_v7 }
 0x2ef   :  { %3126 = vmatprep.subr.bf16.mxu0 %v3302_v35 }
 0x2f0   :  { %v825_v39 = vld [vmem:[#allocation4] sm:$0xff]  ;;  %v769_v52 = vld [vmem:[#allocation3] sm:$0xff] }
 0x2f1   :  { %2933 = vmatmul.mubr.msk.f32.vlgmr.msra.gmra.mrb[10].mxu1 %vm74_vm0, %v825_v39 }
 0x2f2   :  { %3128 = vmatpush3.bf16.msra.mxu0 %v3476_v45  ;;  %3131 = vmatpush3.bf16.msra.mxu1 %v3458_v40 }
 0x2f3   :  { %3132 = vmatprep.subr.bf16.mxu1 %v3302_v35  ;;  %2954 = vmatprep.mubr.msk.f32.mxu1 %vm3303_vm2, %v3300_v7 }
 0x2f4   :  { %3135 = vmatprep.subr.bf16.mxu0 %v3302_v35  ;;  %v909_v53 = vld [vmem:[#allocation5] sm:$0xff] }
 0x2f6   :  { %3134 = vmatpush3.bf16.msra.mxu1 %v3488_v48 }
 0x2f7   :  { %3141 = vmatprep.subr.bf16.mxu1 %v3302_v35 }
 0x3c0   :  { %v759_v41 = vpop.f32.mrb[10].mxu0 }
 0x3c1   :  { %v763_v42 = vadd.f32 %v759_v41, %v3556_v61  ;;  %v2923_v43 = vpop.f32.mrb[11].mxu0 }
 0x3c3   :  { %3216 = vtanh.f32 %v763_v42  ;;  %v764_v61 = vmul.f32 0.5, %v763_v42 }
 0x3c4   :  { %v899_v44 = vpop.f32.mrb[10].mxu1 }
 0x3c5   :  { %v903_v46 = vadd.f32 %v899_v44, %v3582_v29  ;;  %v2934_v49 = vpop.f32.mrb[11].mxu1 }
 0x3c7   :  { %3218 = vtanh.f32 %v903_v46  ;;  %v904_v54 = vmul.f32 0.5, %v903_v46 }
 0x3c8   :  { %3220 = vtanh.f32 %v764_v61 }
 0x3c9   :  { %3222 = vtanh.f32 %v904_v54 }
 0x3cd   :  { %v3217_v50 = vpop.eup %3216 }
 0x3ce   :  { %776 = vrot.lane.b32.xlu1 %v3217_v50, %s3305_s7 }
 0x3d1   :  { %v3219_v51 = vpop.eup %3218 }
 0x3d2   :  { %771 = vrot.lane.b32.xlu1 %v769_v52, %s3301_s15  ;;  %916 = vrot.lane.b32.xlu0 %v3219_v51, %s3305_s7  ;;  %v3221_v58 = vpop.eup %3220 }
 0x3d3   :  { %v766_v29 = vmul.f32 0.5, %v3221_v58  ;;  %v3223_v60 = vpop.eup %3222 }
 0x3d4   :  { %v906_v62 = vmul.f32 0.5, %v3223_v60 }
 0x3d5   :  { %v767_v63 = vadd.f32 0.5, %v766_v29 }
 0x3d6   :  { %911 = vrot.lane.b32.xlu0 %v909_v53, %s3301_s15  ;;  %v907_v5 = vadd.f32 0.5, %v906_v62 }
 0x440   :  { %v777_v1 = vpop.permute.xlu1 %776 }
 0x441   :  { %v779_v2 = vmul.f32 %v777_v1, %v767_v63 }
 0x443   :  { %781 = vrot.lane.b32.xlu1 %v779_v2, %s3301_s15 }
 0x444   :  { %v917_v8 = vpop.permute.xlu0 %916  ;;  %v772_v19 = vpop.permute.xlu1 %771 }
 0x445   :  { %v919_v11 = vmul.f32 %v917_v8, %v907_v5  ;;  %v774_v24 = vmul.f32 %v772_v19, %v767_v63 }
 0x447   :  { %795 = vperm.xlu1 %3203, %v3665_v10   ;;  %921 = vrot.lane.b32.xlu0 %v919_v11, %s3301_s15 }
 0x448   :  { %v912_v25 = vpop.permute.xlu0 %911 }
 0x449   :  { %v914_v27 = vmul.f32 %v912_v25, %v907_v5 }
 0x44b   :  { %935 = vperm.xlu0 %3202, %v3671_v14  }
 0x4b5   :  { %v782_v56 = vpop.permute.xlu1 %781 }
 0x4b6   :  { %v784_v57 = vadd.f32 %v782_v56, %v774_v24 }
 0x4b8   :  { %3224 = vtanh.f32 %v784_v57 }
 0x4b9   :  { %v922_v28 = vpop.permute.xlu0 %921 }
 0x4ba   :  { %v924_v30 = vadd.f32 %v922_v28, %v914_v27 }
 0x4bc   :  { %3226 = vtanh.f32 %v924_v30 }
 0x4c2   :  { %v3225_v31 = vpop.eup %3224 }
 0x4c3   :  { %787 = vrot.lane.b32.xlu1 %v3225_v31, %s3305_s7 }
 0x4c6   :  { %v3227_v32 = vpop.eup %3226  ;;  %v3679_v34 = vpop.permute.xlu1 %795 }
 0x4c7   :  { %806 = vrot.lane.b32.xlu1 %v3638_v38, %s3306_s0  ;;  %927 = vrot.lane.b32.xlu0 %v3227_v32, %s3305_s7  ;;  %vm797_vm9 = vcmp.eq.s32.totalorder %v3679_v34, 1 }
 0x4c8   :  { %v798_v49 = vsel %vm797_vm9, %v784_v57, %v772_v19 }
 0x4ca   :  { %v3681_v36 = vpop.permute.xlu0 %935 }
 0x4cb   :  { %946 = vrot.lane.b32.xlu0 %v825_v39, %s3306_s0  ;;  %vm937_vm10 = vcmp.eq.s32.totalorder %v3681_v36, 1 }
 0x4cc   :  { %v938_v51 = vsel %vm937_vm10, %v924_v30, %v912_v25 }
 0x535   :  { %v788_v41 = vpop.permute.xlu1 %787 }
 0x536   :  { %v3683_v42 = vmul.f32 %v788_v41, %v767_v63 }
 0x539   :  { %v807_v43 = vpop.permute.xlu1 %806  ;;  %v928_v44 = vpop.permute.xlu0 %927 }
 0x53a   :  { %v809_v46 = vsel %vm797_vm9, %v3683_v42, %v807_v43  ;;  %v3690_v38 = vmul.f32 %v928_v44, %v907_v5  ;;  %v3733_v43 = vsel %vm1072_vm11, 1, %v3304_v37 }
 0x53b   :  { %811 = vrot.lane.b32.xlu1 %v809_v46, %s3301_s15  ;;  %v3739_v46 = vsel %vm1212_vm12, 1, %v3304_v37 }
 0x53d   :  { %v947_v39 = vpop.permute.xlu0 %946 }
 0x53e   :  { %v949_v50 = vsel %vm937_vm10, %v3690_v38, %v947_v39 }
 0x53f   :  { %800 = vrot.lane.b32.xlu1 %v798_v49, %s3306_s0  ;;  %951 = vrot.lane.b32.xlu0 %v949_v50, %s3301_s15 }
 0x543   :  { %940 = vrot.lane.b32.xlu0 %v938_v51, %s3306_s0 }
 0x5ad   :  { %v812_v52 = vpop.permute.xlu1 %811 }
 0x5ae   :  { %814 = vst.msk [vmem:[#allocation2] sm:$0xff] %vm74_vm0, %v812_v52 }
 0x5b1   :  { %v801_v53 = vpop.permute.xlu1 %800  ;;  %v952_v61 = vpop.permute.xlu0 %951 }
 0x5b2   :  { %803 = vst.msk [vmem:[#allocation3] sm:$0xff] %vm74_vm0, %v801_v53  ;;  %954 = vst.msk [vmem:[#allocation4] sm:$0xff] %vm74_vm0, %v952_v61 }
 0x5b5   :  { %v941_v54 = vpop.permute.xlu0 %940  ;;  %v3706_v58 = vld [vmem:[#allocation2] sm:$0xff] }
 0x5b6   :  { %943 = vst.msk [vmem:[#allocation5] sm:$0xff] %vm74_vm0, %v941_v54  ;;  %2944 = vmatmul.mubr.msk.f32.vlgmr.msra.gmra.mrb[12].mxu0 %vm74_vm0, %v3706_v58 }
 0x5b7   :  { %3137 = vmatpush3.bf16.msra.mxu0 %v3442_v33  ;;  %2965 = vmatprep.mubr.msk.f32.mxu0 %vm3303_vm2, %v3300_v7 }
 0x5b8   :  { %3138 = vmatprep.subr.bf16.mxu0 %v3302_v35 }
 0x5b9   :  { %v1105_v29 = vld [vmem:[#allocation4] sm:$0xff]  ;;  %v1049_v19 = vld [vmem:[#allocation3] sm:$0xff] }
 0x5ba   :  { %2955 = vmatmul.mubr.msk.f32.vlgmr.msra.gmra.mrb[12].mxu1 %vm74_vm0, %v1105_v29 }
 0x5bb   :  { %3140 = vmatpush3.bf16.msra.mxu0 %v3476_v45  ;;  %3143 = vmatpush3.bf16.msra.mxu1 %v3458_v40 }
 0x5bc   :  { %3144 = vmatprep.subr.bf16.mxu1 %v3302_v35  ;;  %2976 = vmatprep.mubr.msk.f32.mxu1 %vm3303_vm2, %v3300_v7 }
 0x5bd   :  { %3147 = vmatprep.subr.bf16.mxu0 %v3302_v35  ;;  %v1189_v24 = vld [vmem:[#allocation5] sm:$0xff] }
 0x5bf   :  { %3146 = vmatpush3.bf16.msra.mxu1 %v3488_v48 }
 0x5c0   :  { %3153 = vmatprep.subr.bf16.mxu1 %v3302_v35 }
 0x689   :  { %v1039_v60 = vpop.f32.mrb[12].mxu0 }
 0x68a   :  { %v1043_v62 = vadd.f32 %v1039_v60, %v3564_v6  ;;  %v2945_v63 = vpop.f32.mrb[13].mxu0 }
 0x68c   :  { %3228 = vtanh.f32 %v1043_v62  ;;  %v1044_v6 = vmul.f32 0.5, %v1043_v62 }
 0x68d   :  { %v1179_v1 = vpop.f32.mrb[12].mxu1 }
 0x68e   :  { %v1183_v2 = vadd.f32 %v1179_v1, %v3574_v17  ;;  %v2956_v5 = vpop.f32.mrb[13].mxu1 }
 0x690   :  { %3230 = vtanh.f32 %v1183_v2  ;;  %v1184_v25 = vmul.f32 0.5, %v1183_v2 }
 0x691   :  { %3232 = vtanh.f32 %v1044_v6 }
 0x692   :  { %3234 = vtanh.f32 %v1184_v25 }
 0x696   :  { %v3229_v8 = vpop.eup %3228 }
 0x697   :  { %1056 = vrot.lane.b32.xlu1 %v3229_v8, %s3305_s7 }
 0x69a   :  { %v3231_v11 = vpop.eup %3230 }
 0x69b   :  { %1051 = vrot.lane.b32.xlu1 %v1049_v19, %s3301_s15  ;;  %1196 = vrot.lane.b32.xlu0 %v3231_v11, %s3305_s7  ;;  %v3233_v56 = vpop.eup %3232 }
 0x69c   :  { %v1046_v17 = vmul.f32 0.5, %v3233_v56  ;;  %v3235_v57 = vpop.eup %3234 }
 0x69d   :  { %v1186_v27 = vmul.f32 0.5, %v3235_v57 }
 0x69e   :  { %v1047_v28 = vadd.f32 0.5, %v1046_v17 }
 0x69f   :  { %1191 = vrot.lane.b32.xlu0 %v1189_v24, %s3301_s15  ;;  %v1187_v32 = vadd.f32 0.5, %v1186_v27 }
 0x709   :  { %v1057_v30 = vpop.permute.xlu1 %1056 }
 0x70a   :  { %v1059_v31 = vmul.f32 %v1057_v30, %v1047_v28 }
 0x70c   :  { %1061 = vrot.lane.b32.xlu1 %v1059_v31, %s3301_s15 }
 0x70d   :  { %v1197_v41 = vpop.permute.xlu0 %1196  ;;  %v1052_v39 = vpop.permute.xlu1 %1051 }
 0x70e   :  { %v1199_v44 = vmul.f32 %v1197_v41, %v1187_v32  ;;  %v1054_v49 = vmul.f32 %v1052_v39, %v1047_v28 }
 0x710   :  { %1075 = vperm.xlu1 %3203, %v3733_v43   ;;  %1201 = vrot.lane.b32.xlu0 %v1199_v44, %s3301_s15 }
 0x711   :  { %v1192_v50 = vpop.permute.xlu0 %1191 }
 0x712   :  { %v1194_v53 = vmul.f32 %v1192_v50, %v1187_v32 }
 0x714   :  { %1215 = vperm.xlu0 %3202, %v3739_v46  }
 0x77e   :  { %v1062_v51 = vpop.permute.xlu1 %1061 }
 0x77f   :  { %v1064_v52 = vadd.f32 %v1062_v51, %v1054_v49 }
 0x781   :  { %3236 = vtanh.f32 %v1064_v52 }
 0x782   :  { %v1202_v61 = vpop.permute.xlu0 %1201 }
 0x783   :  { %v1204_v54 = vadd.f32 %v1202_v61, %v1194_v53 }
 0x785   :  { %3238 = vtanh.f32 %v1204_v54 }
 0x78b   :  { %v3237_v60 = vpop.eup %3236 }
 0x78c   :  { %1067 = vrot.lane.b32.xlu1 %v3237_v60, %s3305_s7 }
 0x78f   :  { %v3239_v62 = vpop.eup %3238  ;;  %v3747_v63 = vpop.permute.xlu1 %1075 }
 0x790   :  { %1086 = vrot.lane.b32.xlu1 %v3706_v58, %s3306_s0  ;;  %1207 = vrot.lane.b32.xlu0 %v3239_v62, %s3305_s7  ;;  %vm1077_vm13 = vcmp.eq.s32.totalorder %v3747_v63, 1 }
 0x791   :  { %v1078_v24 = vsel %vm1077_vm13, %v1064_v52, %v1052_v39 }
 0x793   :  { %v3749_v1 = vpop.permute.xlu0 %1215 }
 0x794   :  { %1226 = vrot.lane.b32.xlu0 %v1105_v29, %s3306_s0  ;;  %vm1217_vm14 = vcmp.eq.s32.totalorder %v3749_v1, 1 }
 0x795   :  { %v1218_v25 = vsel %vm1217_vm14, %v1204_v54, %v1192_v50 }
 0x7fe   :  { %v1068_v2 = vpop.permute.xlu1 %1067 }
 0x7ff   :  { %v3751_v5 = vmul.f32 %v1068_v2, %v1047_v28 }
 0x801   :  { %v1095_v18 = vsel %vm1077_vm13, %v3751_v5, 0.0 }
 0x802   :  { %v1087_v8 = vpop.permute.xlu1 %1086  ;;  %v1208_v11 = vpop.permute.xlu0 %1207 }
 0x803   :  { %v1089_v19 = vsel %vm1077_vm13, %v3751_v5, %v1087_v8  ;;  %v3758_v58 = vmul.f32 %v1208_v11, %v1187_v32  ;;  %v3801_v8 = vsel %vm1352_vm15, 1, %v3304_v37 }
 0x804   :  { %1091 = vrot.lane.b32.xlu1 %v1089_v19, %s3301_s15  ;;  %v3807_v19 = vsel %vm1492_vm1, 1, %v3304_v37 }
 0x806   :  { %v1227_v29 = vpop.permute.xlu0 %1226 }
 0x807   :  { %v1229_v6 = vsel %vm1217_vm14, %v3758_v58, %v1227_v29 }
 0x808   :  { %1080 = vrot.lane.b32.xlu1 %v1078_v24, %s3306_s0  ;;  %1231 = vrot.lane.b32.xlu0 %v1229_v6, %s3301_s15 }
 0x80c   :  { %1220 = vrot.lane.b32.xlu0 %v1218_v25, %s3306_s0 }
 0x876   :  { %v1092_v56 = vpop.permute.xlu1 %1091 }
 0x877   :  { %1094 = vst.msk [vmem:[#allocation2] sm:$0xff] %vm74_vm0, %v1092_v56 }
 0x87a   :  { %v1081_v17 = vpop.permute.xlu1 %1080  ;;  %v1232_v57 = vpop.permute.xlu0 %1231 }
 0x87b   :  { %1083 = vst.msk [vmem:[#allocation3] sm:$0xff] %vm74_vm0, %v1081_v17  ;;  %1234 = vst.msk [vmem:[#allocation4] sm:$0xff] %vm74_vm0, %v1232_v57 }
 0x87e   :  { %v1221_v27 = vpop.permute.xlu0 %1220  ;;  %v3774_v28 = vld [vmem:[#allocation2] sm:$0xff] }
 0x87f   :  { %1223 = vst.msk [vmem:[#allocation5] sm:$0xff] %vm74_vm0, %v1221_v27  ;;  %2966 = vmatmul.mubr.msk.f32.vlgmr.msra.gmra.mrb[14].mxu0 %vm74_vm0, %v3774_v28 }
 0x880   :  { %3149 = vmatpush3.bf16.msra.mxu0 %v3442_v33  ;;  %2987 = vmatprep.mubr.msk.f32.mxu0 %vm3303_vm2, %v3300_v7 }
 0x881   :  { %3150 = vmatprep.subr.bf16.mxu0 %v3302_v35 }
 0x882   :  { %v1385_v30 = vld [vmem:[#allocation4] sm:$0xff]  ;;  %v1329_v49 = vld [vmem:[#allocation3] sm:$0xff] }
 0x883   :  { %2977 = vmatmul.mubr.msk.f32.vlgmr.msra.gmra.mrb[14].mxu1 %vm74_vm0, %v1385_v30 }
 0x884   :  { %3152 = vmatpush3.bf16.msra.mxu0 %v3476_v45  ;;  %3155 = vmatpush3.bf16.msra.mxu1 %v3458_v40 }
 0x885   :  { %3156 = vmatprep.subr.bf16.mxu1 %v3302_v35  ;;  %2998 = vmatprep.mubr.msk.f32.mxu1 %vm3303_vm2, %v3300_v7 }
 0x886   :  { %3159 = vmatprep.subr.bf16.mxu0 %v3302_v35 }
 0x888   :  { %3158 = vmatpush3.bf16.msra.mxu1 %v3488_v48  ;;  %v1469_v48 = vld [vmem:[#allocation5] sm:$0xff] }
 0x889   :  { %3165 = vmatprep.subr.bf16.mxu1 %v3302_v35 }
 0x952   :  { %v1319_v33 = vpop.f32.mrb[14].mxu0 }
 0x953   :  { %v1323_v31 = vadd.f32 %v1319_v33, %v3562_v4  ;;  %v2967_v32 = vpop.f32.mrb[15].mxu0 }
 0x955   :  { %3240 = vtanh.f32 %v1323_v31  ;;  %v1324_v4 = vmul.f32 0.5, %v1323_v31 }
 0x956   :  { %v1459_v41 = vpop.f32.mrb[14].mxu1 }
 0x957   :  { %v1463_v45 = vadd.f32 %v1459_v41, %v3576_v20  ;;  %v2978_v40 = vpop.f32.mrb[15].mxu1 }
 0x959   :  { %3242 = vtanh.f32 %v1463_v45  ;;  %v1464_v50 = vmul.f32 0.5, %v1463_v45 }
 0x95a   :  { %3244 = vtanh.f32 %v1324_v4 }
 0x95b   :  { %3246 = vtanh.f32 %v1464_v50 }
 0x95f   :  { %v3241_v44 = vpop.eup %3240 }
 0x960   :  { %1336 = vrot.lane.b32.xlu1 %v3241_v44, %s3305_s7 }
 0x963   :  { %v3243_v39 = vpop.eup %3242 }
 0x964   :  { %1331 = vrot.lane.b32.xlu1 %v1329_v49, %s3301_s15  ;;  %1476 = vrot.lane.b32.xlu0 %v3243_v39, %s3305_s7  ;;  %v3245_v51 = vpop.eup %3244 }
 0x965   :  { %v1326_v20 = vmul.f32 0.5, %v3245_v51  ;;  %v3247_v52 = vpop.eup %3246 }
 0x966   :  { %v1466_v61 = vmul.f32 0.5, %v3247_v52 }
 0x967   :  { %v1327_v53 = vadd.f32 0.5, %v1326_v20 }
 0x968   :  { %1471 = vrot.lane.b32.xlu0 %v1469_v48, %s3301_s15  ;;  %v1467_v62 = vadd.f32 0.5, %v1466_v61 }
 0x9d2   :  { %v1337_v54 = vpop.permute.xlu1 %1336 }
 0x9d3   :  { %v1339_v60 = vmul.f32 %v1337_v54, %v1327_v53 }
 0x9d5   :  { %1341 = vrot.lane.b32.xlu1 %v1339_v60, %s3301_s15 }
 0x9d6   :  { %v1477_v2 = vpop.permute.xlu0 %1476  ;;  %v1332_v29 = vpop.permute.xlu1 %1331 }
 0x9d7   :  { %v1479_v11 = vmul.f32 %v1477_v2, %v1467_v62  ;;  %v1334_v24 = vmul.f32 %v1332_v29, %v1327_v53 }
 0x9d9   :  { %1355 = vperm.xlu1 %3203, %v3801_v8   ;;  %1481 = vrot.lane.b32.xlu0 %v1479_v11, %s3301_s15 }
 0x9da   :  { %v1472_v6 = vpop.permute.xlu0 %1471 }
 0x9db   :  { %v1474_v17 = vmul.f32 %v1472_v6, %v1467_v62 }
 0x9dd   :  { %1495 = vperm.xlu0 %3202, %v3807_v19  }
 0xa47   :  { %v1342_v25 = vpop.permute.xlu1 %1341 }
 0xa48   :  { %v1344_v56 = vadd.f32 %v1342_v25, %v1334_v24 }
 0xa4a   :  { %3248 = vtanh.f32 %v1344_v56 }
 0xa4b   :  { %v1482_v57 = vpop.permute.xlu0 %1481 }
 0xa4c   :  { %v1484_v27 = vadd.f32 %v1482_v57, %v1474_v17 }
 0xa4e   :  { %3250 = vtanh.f32 %v1484_v27 }
 0xa54   :  { %v3249_v47 = vpop.eup %3248 }
 0xa55   :  { %1347 = vrot.lane.b32.xlu1 %v3249_v47, %s3305_s7 }
 0xa58   :  { %v3251_v33 = vpop.eup %3250  ;;  %v3815_v37 = vpop.permute.xlu1 %1355 }
 0xa59   :  { %1366 = vrot.lane.b32.xlu1 %v3774_v28, %s3306_s0  ;;  %1487 = vrot.lane.b32.xlu0 %v3251_v33, %s3305_s7  ;;  %vm1357_vm3 = vcmp.eq.s32.totalorder %v3815_v37, 1 }
 0xa5a   :  { %v1358_v39 = vsel %vm1357_vm3, %v1344_v56, %v1332_v29 }
 0xa5c   :  { %v3817_v31 = vpop.permute.xlu0 %1495 }
 0xa5d   :  { %1506 = vrot.lane.b32.xlu0 %v1385_v30, %s3306_s0  ;;  %vm1497_vm4 = vcmp.eq.s32.totalorder %v3817_v31, 1 }
 0xa5e   :  { %v1498_v48 = vsel %vm1497_vm4, %v1484_v27, %v1472_v6 }
 0xac7   :  { %v1348_v32 = vpop.permute.xlu1 %1347 }
 0xac8   :  { %v3819_v41 = vmul.f32 %v1348_v32, %v1327_v53 }
 0xaca   :  { %v1375_v16 = vsel %vm1357_vm3, %v3819_v41, 0.0 }
 0xacb   :  { %v1367_v45 = vpop.permute.xlu1 %1366  ;;  %v1488_v40 = vpop.permute.xlu0 %1487 }
 0xacc   :  { %v1369_v44 = vsel %vm1357_vm3, %v3819_v41, %v1367_v45  ;;  %v3826_v28 = vmul.f32 %v1488_v40, %v1467_v62 }
 0xacd   :  { %1371 = vrot.lane.b32.xlu1 %v1369_v44, %s3301_s15 }
 0xace   :  { %v1515_v34 = vsel %vm1497_vm4, %v3826_v28, 0.0 }
 0xacf   :  { %v1507_v30 = vpop.permute.xlu0 %1506 }
 0xad0   :  { %v1509_v49 = vsel %vm1497_vm4, %v3826_v28, %v1507_v30 }
 0xad1   :  { %1360 = vrot.lane.b32.xlu1 %v1358_v39, %s3306_s0  ;;  %1511 = vrot.lane.b32.xlu0 %v1509_v49, %s3301_s15 }
 0xad5   :  { %1500 = vrot.lane.b32.xlu0 %v1498_v48, %s3306_s0 }
 0xb3f   :  { %v1372_v4 = vpop.permute.xlu1 %1371 }
 0xb40   :  { %1374 = vst.msk [vmem:[#allocation2] sm:$0xff] %vm74_vm0, %v1372_v4 }
 0xb43   :  { %v1361_v50 = vpop.permute.xlu1 %1360  ;;  %v1512_v51 = vpop.permute.xlu0 %1511 }
 0xb44   :  { %1363 = vst.msk [vmem:[#allocation3] sm:$0xff] %vm74_vm0, %v1361_v50  ;;  %1514 = vst.msk [vmem:[#allocation4] sm:$0xff] %vm74_vm0, %v1512_v51 }
 0xb47   :  { %v1501_v20 = vpop.permute.xlu0 %1500  ;;  %v1525_v52 = vld [vmem:[#allocation2] sm:$0xff] }
 0xb48   :  { %1503 = vst.msk [vmem:[#allocation5] sm:$0xff] %vm74_vm0, %v1501_v20  ;;  %2988 = vmatmul.mubr.msk.f32.vlgmr.msra.gmra.mrb[16].mxu0 %vm74_vm0, %v1525_v52 }
 0xb49   :  { %3009 = vmatprep.mubr.msk.f32.mxu0 %vm3303_vm2, %v3300_v7 }
 0xb4b   :  { %v1665_v53 = vld [vmem:[#allocation4] sm:$0xff]  ;;  %v1609_v6 = vld [vmem:[#allocation3] sm:$0xff] }
 0xb4c   :  { %2999 = vmatmul.mubr.msk.f32.vlgmr.msra.gmra.mrb[16].mxu1 %vm74_vm0, %v1665_v53 }
 0xb4d   :  { %3020 = vmatprep.mubr.msk.f32.mxu1 %vm3303_vm2, %v3300_v7 }
 0xb4f   :  { %v1749_v25 = vld [vmem:[#allocation5] sm:$0xff] }
 0xc1b   :  { %v1599_v61 = vpop.f32.mrb[16].mxu0 }
 0xc1c   :  { %v1603_v54 = vadd.f32 %v1599_v61, %v3572_v15  ;;  %v2989_v60 = vpop.f32.mrb[17].mxu0 }
 0xc1e   :  { %3252 = vtanh.f32 %v1603_v54  ;;  %v1604_v15 = vmul.f32 0.5, %v1603_v54 }
 0xc1f   :  { %v1739_v62 = vpop.f32.mrb[16].mxu1 }
 0xc20   :  { %v1743_v2 = vadd.f32 %v1739_v62, %v3566_v9  ;;  %v3000_v11 = vpop.f32.mrb[17].mxu1 }
 0xc22   :  { %3254 = vtanh.f32 %v1743_v2  ;;  %v1744_v56 = vmul.f32 0.5, %v1743_v2  ;;  %v1946_v2 = vld [vmem:[%s4208_s6] sm:$0xff] }
 0xc23   :  { %3256 = vtanh.f32 %v1604_v15  ;;  %v1948_v15 = vld [vmem:[%s4208_s6 + $0x10] sm:$0xff] }
 0xc24   :  { %3258 = vtanh.f32 %v1744_v56  ;;  %v1949_v56 = vld [vmem:[%s4208_s6 + $0x18] sm:$0xff] }
 0xc28   :  { %v3253_v29 = vpop.eup %3252 }
 0xc29   :  { %1616 = vrot.lane.b32.xlu1 %v3253_v29, %s3305_s7  ;;  %v1947_v29 = vld [vmem:[%s4208_s6 + $0x8] sm:$0xff] }
 0xc2c   :  { %v3255_v24 = vpop.eup %3254 }
 0xc2d   :  { %1611 = vrot.lane.b32.xlu1 %v1609_v6, %s3301_s15  ;;  %1756 = vrot.lane.b32.xlu0 %v3255_v24, %s3305_s7  ;;  %v3257_v17 = vpop.eup %3256  ;;  %v3889_v24 = vpack.c.bf16 %v1947_v29, %v1946_v2 }
 0xc2e   :  { %v1606_v9 = vmul.f32 0.5, %v3257_v17  ;;  %v3259_v57 = vpop.eup %3258  ;;  %v3903_v17 = vpack.c.bf16 %v1949_v56, %v1948_v15 }
 0xc2f   :  { %v1746_v47 = vmul.f32 0.5, %v3259_v57  ;;  %3167 = vmatpush3.bf16.msra.mxu1 %v3889_v24 }
 0xc30   :  { %v1607_v27 = vadd.f32 0.5, %v1606_v9  ;;  %3168 = vmatprep.subr.bf16.mxu1 %v3302_v35 }
 0xc31   :  { %1751 = vrot.lane.b32.xlu0 %v1749_v25, %s3301_s15  ;;  %v1747_v45 = vadd.f32 0.5, %v1746_v47 }
 0xc33   :  { %3170 = vmatpush3.bf16.msra.mxu1 %v3903_v17 }
 0xc34   :  { %3177 = vmatprep.subr.bf16.mxu1 %v3302_v35 }
 0xc9b   :  { %v1617_v33 = vpop.permute.xlu1 %1616 }
 0xc9c   :  { %v1619_v32 = vmul.f32 %v1617_v33, %v1607_v27 }
 0xc9e   :  { %1621 = vrot.lane.b32.xlu1 %v1619_v32, %s3301_s15 }
 0xc9f   :  { %v1757_v40 = vpop.permute.xlu0 %1756  ;;  %v1612_v30 = vpop.permute.xlu1 %1611 }
 0xca0   :  { %v1759_v44 = vmul.f32 %v1757_v40, %v1747_v45  ;;  %v1614_v39 = vmul.f32 %v1612_v30, %v1607_v27 }
 0xca2   :  { %1635 = vperm.xlu1 %3203, %v3807_v19   ;;  %1761 = vrot.lane.b32.xlu0 %v1759_v44, %s3301_s15  ;;  %v1807_v19 = vld [vmem:[%s4207_s5 + $0x8] sm:$0xff] }
 0xca3   :  { %v1752_v49 = vpop.permute.xlu0 %1751 }
 0xca4   :  { %v1754_v50 = vmul.f32 %v1752_v49, %v1747_v45 }
 0xca6   :  { %1775 = vperm.xlu0 %3202, %v3801_v8   ;;  %v1806_v8 = vld [vmem:[%s4207_s5] sm:$0xff] }
 0xca7   :  { %v3869_v60 = vpack.c.bf16 %v1807_v19, %v1806_v8 }
 0xca9   :  { %3161 = vmatpush3.bf16.msra.mxu0 %v3869_v60 }
 0xcaa   :  { %3162 = vmatprep.subr.bf16.mxu0 %v3302_v35 }
 0xd10   :  { %v1622_v48 = vpop.permute.xlu1 %1621 }
 0xd11   :  { %v1624_v4 = vadd.f32 %v1622_v48, %v1614_v39 }
 0xd13   :  { %3260 = vtanh.f32 %v1624_v4 }
 0xd14   :  { %v1762_v51 = vpop.permute.xlu0 %1761 }
 0xd15   :  { %v1764_v20 = vadd.f32 %v1762_v51, %v1754_v50 }
 0xd17   :  { %3262 = vtanh.f32 %v1764_v20 }
 0xd1d   :  { %v3261_v61 = vpop.eup %3260 }
 0xd1e   :  { %1627 = vrot.lane.b32.xlu1 %v3261_v61, %s3305_s7 }
 0xd21   :  { %v3263_v54 = vpop.eup %3262  ;;  %v3872_v62 = vpop.permute.xlu1 %1635 }
 0xd22   :  { %1646 = vrot.lane.b32.xlu1 %v1525_v52, %s3306_s0  ;;  %1767 = vrot.lane.b32.xlu0 %v3263_v54, %s3305_s7  ;;  %v1808_v52 = vld [vmem:[%s4207_s5 + $0x10] sm:$0xff]  ;;  %vm1637_vm7 = vcmp.eq.s32.totalorder %v3872_v62, 1 }
 0xd23   :  { %v1638_v40 = vsel %vm1637_vm7, %v1624_v4, %v1612_v30 }
 0xd25   :  { %v3892_v6 = vpop.permute.xlu0 %1775 }
 0xd26   :  { %1786 = vrot.lane.b32.xlu0 %v1665_v53, %s3306_s0  ;;  %v1809_v53 = vld [vmem:[%s4207_s5 + $0x18] sm:$0xff]  ;;  %vm1777_vm8 = vcmp.eq.s32.totalorder %v3892_v6, 1 }
 0xd27   :  { %v3884_v11 = vpack.c.bf16 %v1809_v53, %v1808_v52  ;;  %v1778_v39 = vsel %vm1777_vm8, %v1764_v20, %v1752_v49 }
 0xd29   :  { %3164 = vmatpush3.bf16.msra.mxu0 %v3884_v11 }
 0xd2a   :  { %3171 = vmatprep.subr.bf16.mxu0 %v3302_v35 }
 0xd90   :  { %v1628_v25 = vpop.permute.xlu1 %1627 }
 0xd91   :  { %v3905_v9 = vmul.f32 %v1628_v25, %v1607_v27 }
 0xd93   :  { %v1655_v36 = vsel %vm1637_vm7, %v3905_v9, 0.0 }
 0xd94   :  { %v1647_v57 = vpop.permute.xlu1 %1646  ;;  %v1768_v47 = vpop.permute.xlu0 %1767 }
 0xd95   :  { %v1649_v33 = vsel %vm1637_vm7, %v3905_v9, %v1647_v57  ;;  %v3914_v32 = vmul.f32 %v1768_v47, %v1747_v45 }
 0xd96   :  { %1651 = vrot.lane.b32.xlu1 %v1649_v33, %s3301_s15 }
 0xd98   :  { %v1787_v27 = vpop.permute.xlu0 %1786 }
 0xd99   :  { %v1789_v44 = vsel %vm1777_vm8, %v3914_v32, %v1787_v27 }
 0xd9a   :  { %1640 = vrot.lane.b32.xlu1 %v1638_v40, %s3306_s0  ;;  %1791 = vrot.lane.b32.xlu0 %v1789_v44, %s3301_s15 }
 0xd9e   :  { %1780 = vrot.lane.b32.xlu0 %v1778_v39, %s3306_s0 }
 0xe08   :  { %v1652_v45 = vpop.permute.xlu1 %1651 }
 0xe09   :  { %1654 = vst.msk [vmem:[#allocation2] sm:$0xff] %vm74_vm0, %v1652_v45 }
 0xe0c   :  { %v1641_v48 = vpop.permute.xlu1 %1640  ;;  %v1792_v50 = vpop.permute.xlu0 %1791 }
 0xe0d   :  { %1643 = vst.msk [vmem:[#allocation3] sm:$0xff] %vm74_vm0, %v1641_v48  ;;  %1794 = vst.msk [vmem:[#allocation4] sm:$0xff] %vm74_vm0, %v1792_v50 }
 0xe10   :  { %v1781_v30 = vpop.permute.xlu0 %1780  ;;  %v1805_v4 = vld [vmem:[#allocation2] sm:$0xff] }
 0xe11   :  { %1783 = vst.msk [vmem:[#allocation5] sm:$0xff] %vm74_vm0, %v1781_v30  ;;  %3010 = vmatmul.mubr.msk.f32.vlgmr.msra.gmra.mrb[18].mxu0 %vm74_vm0, %v1805_v4 }
 0xe12   :  { %3173 = vmatpush3.bf16.msra.mxu0 %v3869_v60  ;;  %3031 = vmatprep.mubr.msk.f32.mxu0 %vm3303_vm2, %v3300_v7 }
 0xe13   :  { %3174 = vmatprep.subr.bf16.mxu0 %v3302_v35 }
 0xe14   :  { %v1945_v49 = vld [vmem:[#allocation4] sm:$0xff]  ;;  %v1889_v2 = vld [vmem:[#allocation3] sm:$0xff] }
 0xe15   :  { %3021 = vmatmul.mubr.msk.f32.vlgmr.msra.gmra.mrb[18].mxu1 %vm74_vm0, %v1945_v49 }
 0xe16   :  { %3176 = vmatpush3.bf16.msra.mxu0 %v3884_v11  ;;  %3179 = vmatpush3.bf16.msra.mxu1 %v3889_v24 }
 0xe17   :  { %3180 = vmatprep.subr.bf16.mxu1 %v3302_v35  ;;  %3042 = vmatprep.mubr.msk.f32.mxu1 %vm3303_vm2, %v3300_v7 }
 0xe18   :  { %3183 = vmatprep.subr.bf16.mxu0 %v3302_v35  ;;  %v2029_v29 = vld [vmem:[#allocation5] sm:$0xff] }
 0xe1a   :  { %3182 = vmatpush3.bf16.msra.mxu1 %v3903_v17 }
 0xe1b   :  { %3189 = vmatprep.subr.bf16.mxu1 %v3302_v35 }
 0xee4   :  { %v1879_v51 = vpop.f32.mrb[18].mxu0 }
 0xee5   :  { %v1883_v20 = vadd.f32 %v1879_v51, %v3570_v13  ;;  %v3011_v61 = vpop.f32.mrb[19].mxu0 }
 0xee7   :  { %3264 = vtanh.f32 %v1883_v20  ;;  %v1884_v13 = vmul.f32 0.5, %v1883_v20 }
 0xee8   :  { %v2019_v54 = vpop.f32.mrb[18].mxu1 }
 0xee9   :  { %v2023_v8 = vadd.f32 %v2019_v54, %v3568_v12  ;;  %v3022_v19 = vpop.f32.mrb[19].mxu1 }
 0xeeb   :  { %3266 = vtanh.f32 %v2023_v8  ;;  %v2024_v25 = vmul.f32 0.5, %v2023_v8 }
 0xeec   :  { %3268 = vtanh.f32 %v1884_v13 }
 0xeed   :  { %3270 = vtanh.f32 %v2024_v25 }
 0xef1   :  { %v3265_v52 = vpop.eup %3264 }
 0xef2   :  { %1896 = vrot.lane.b32.xlu1 %v3265_v52, %s3305_s7 }
 0xef5   :  { %v3267_v53 = vpop.eup %3266 }
 0xef6   :  { %1891 = vrot.lane.b32.xlu1 %v1889_v2, %s3301_s15  ;;  %2036 = vrot.lane.b32.xlu0 %v3267_v53, %s3305_s7  ;;  %v3269_v15 = vpop.eup %3268 }
 0xef7   :  { %v1886_v12 = vmul.f32 0.5, %v3269_v15  ;;  %v3271_v56 = vpop.eup %3270 }
 0xef8   :  { %v2026_v47 = vmul.f32 0.5, %v3271_v56 }
 0xef9   :  { %v1887_v57 = vadd.f32 0.5, %v1886_v12 }
 0xefa   :  { %2031 = vrot.lane.b32.xlu0 %v2029_v29, %s3301_s15  ;;  %v2027_v40 = vadd.f32 0.5, %v2026_v47 }
 0xf64   :  { %v1897_v33 = vpop.permute.xlu1 %1896 }
 0xf65   :  { %v1899_v27 = vmul.f32 %v1897_v33, %v1887_v57 }
 0xf67   :  { %1901 = vrot.lane.b32.xlu1 %v1899_v27, %s3301_s15 }
 0xf68   :  { %v2037_v44 = vpop.permute.xlu0 %2036  ;;  %v1892_v45 = vpop.permute.xlu1 %1891 }
 0xf69   :  { %v2039_v39 = vmul.f32 %v2037_v44, %v2027_v40  ;;  %v1894_v48 = vmul.f32 %v1892_v45, %v1887_v57 }
 0xf6b   :  { %1915 = vperm.xlu1 %3203, %v3739_v46   ;;  %2041 = vrot.lane.b32.xlu0 %v2039_v39, %s3301_s15 }
 0xf6c   :  { %v2032_v50 = vpop.permute.xlu0 %2031 }
 0xf6d   :  { %v2034_v20 = vmul.f32 %v2032_v50, %v2027_v40 }
 0xf6f   :  { %2055 = vperm.xlu0 %3202, %v3733_v43  }
 0xfd9   :  { %v1902_v30 = vpop.permute.xlu1 %1901 }
 0xfda   :  { %v1904_v51 = vadd.f32 %v1902_v30, %v1894_v48 }
 0xfdc   :  { %3272 = vtanh.f32 %v1904_v51 }
 0xfdd   :  { %v2042_v61 = vpop.permute.xlu0 %2041 }
 0xfde   :  { %v2044_v54 = vadd.f32 %v2042_v61, %v2034_v20 }
 0xfe0   :  { %3274 = vtanh.f32 %v2044_v54 }
 0xfe6   :  { %v3273_v8 = vpop.eup %3272 }
 0xfe7   :  { %1907 = vrot.lane.b32.xlu1 %v3273_v8, %s3305_s7 }
 0xfea   :  { %v3275_v19 = vpop.eup %3274  ;;  %v3959_v43 = vpop.permute.xlu1 %1915 }
 0xfeb   :  { %1926 = vrot.lane.b32.xlu1 %v1805_v4, %s3306_s0  ;;  %2047 = vrot.lane.b32.xlu0 %v3275_v19, %s3305_s7  ;;  %vm1917_vm11 = vcmp.eq.s32.totalorder %v3959_v43, 1 }
 0xfec   :  { %v1918_v25 = vsel %vm1917_vm11, %v1904_v51, %v1892_v45 }
 0xfee   :  { %v3961_v46 = vpop.permute.xlu0 %2055 }
 0xfef   :  { %2066 = vrot.lane.b32.xlu0 %v1945_v49, %s3306_s0  ;;  %vm2057_vm12 = vcmp.eq.s32.totalorder %v3961_v46, 1 }
 0xff0   :  { %v2058_v12 = vsel %vm2057_vm12, %v2044_v54, %v2032_v50 }
0x1059   :  { %v1908_v52 = vpop.permute.xlu1 %1907 }
0x105a   :  { %v3963_v53 = vmul.f32 %v1908_v52, %v1887_v57 }
0x105d   :  { %v1927_v2 = vpop.permute.xlu1 %1926  ;;  %v2048_v29 = vpop.permute.xlu0 %2047 }
0x105e   :  { %v1929_v13 = vsel %vm1917_vm11, %v3963_v53, %v1927_v2  ;;  %v3970_v4 = vmul.f32 %v2048_v29, %v2027_v40 }
0x105f   :  { %1931 = vrot.lane.b32.xlu1 %v1929_v13, %s3301_s15 }
0x1060   :  { %v2075_v1 = vsel %vm2057_vm12, %v3970_v4, 0.0 }
0x1061   :  { %v2067_v49 = vpop.permute.xlu0 %2066 }
0x1062   :  { %v2069_v15 = vsel %vm2057_vm12, %v3970_v4, %v2067_v49 }
0x1063   :  { %1920 = vrot.lane.b32.xlu1 %v1918_v25, %s3306_s0  ;;  %2071 = vrot.lane.b32.xlu0 %v2069_v15, %s3301_s15 }
0x1067   :  { %2060 = vrot.lane.b32.xlu0 %v2058_v12, %s3306_s0 }
0x10d1   :  { %v1932_v56 = vpop.permute.xlu1 %1931 }
0x10d2   :  { %1934 = vst.msk [vmem:[#allocation2] sm:$0xff] %vm74_vm0, %v1932_v56 }
0x10d5   :  { %v1921_v57 = vpop.permute.xlu1 %1920  ;;  %v2072_v47 = vpop.permute.xlu0 %2071 }
0x10d6   :  { %1923 = vst.msk [vmem:[#allocation3] sm:$0xff] %vm74_vm0, %v1921_v57  ;;  %2074 = vst.msk [vmem:[#allocation4] sm:$0xff] %vm74_vm0, %v2072_v47 }
0x10d9   :  { %v2061_v33 = vpop.permute.xlu0 %2060  ;;  %v2085_v27 = vld [vmem:[#allocation2] sm:$0xff] }
0x10da   :  { %2063 = vst.msk [vmem:[#allocation5] sm:$0xff] %vm74_vm0, %v2061_v33  ;;  %3032 = vmatmul.mubr.msk.f32.vlgmr.msra.gmra.mrb[20].mxu0 %vm74_vm0, %v2085_v27 }
0x10db   :  { %3185 = vmatpush3.bf16.msra.mxu0 %v3869_v60  ;;  %3053 = vmatprep.mubr.msk.f32.mxu0 %vm3303_vm2, %v3300_v7 }
0x10dc   :  { %3186 = vmatprep.subr.bf16.mxu0 %v3302_v35 }
0x10dd   :  { %v2225_v40 = vld [vmem:[#allocation4] sm:$0xff] }
0x10de   :  { %3043 = vmatmul.mubr.msk.f32.vlgmr.msra.gmra.mrb[20].mxu1 %vm74_vm0, %v2225_v40 }
0x10df   :  { %3188 = vmatpush3.bf16.msra.mxu0 %v3884_v11  ;;  %3191 = vmatpush3.bf16.msra.mxu1 %v3889_v24 }
0x10e0   :  { %3192 = vmatprep.subr.bf16.mxu1 %v3302_v35  ;;  %3064 = vmatprep.mubr.msk.f32.mxu1 %vm3303_vm2, %v3300_v7  ;;  %v2169_v35 = vld [vmem:[#allocation3] sm:$0xff] }
0x10e1   :  { %v2309_v7 = vld [vmem:[#allocation5] sm:$0xff] }
0x10e3   :  { %3194 = vmatpush3.bf16.msra.mxu1 %v3903_v17 }
0x11ad   :  { %v2159_v60 = vpop.f32.mrb[20].mxu0 }
0x11ae   :  { %v2163_v44 = vadd.f32 %v2159_v60, %v3580_v23  ;;  %v3033_v39 = vpop.f32.mrb[21].mxu0 }
0x11b0   :  { %3276 = vtanh.f32 %v2163_v44  ;;  %v2164_v23 = vmul.f32 0.5, %v2163_v44 }
0x11b1   :  { %v2299_v45 = vpop.f32.mrb[20].mxu1 }
0x11b2   :  { %v2303_v48 = vadd.f32 %v2299_v45, %v3558_v0  ;;  %v3044_v50 = vpop.f32.mrb[21].mxu1 }
0x11b4   :  { %3278 = vtanh.f32 %v2303_v48  ;;  %v2304_v17 = vmul.f32 0.5, %v2303_v48 }
0x11b5   :  { %3280 = vtanh.f32 %v2164_v23 }
0x11b6   :  { %3282 = vtanh.f32 %v2304_v17 }
0x11ba   :  { %v3277_v11 = vpop.eup %3276 }
0x11bb   :  { %2176 = vrot.lane.b32.xlu1 %v3277_v11, %s3305_s7 }
0x11be   :  { %v3279_v24 = vpop.eup %3278 }
0x11bf   :  { %2171 = vrot.lane.b32.xlu1 %v2169_v35, %s3301_s15  ;;  %2316 = vrot.lane.b32.xlu0 %v3279_v24, %s3305_s7  ;;  %v3281_v30 = vpop.eup %3280 }
0x11c0   :  { %v2166_v0 = vmul.f32 0.5, %v3281_v30  ;;  %v3283_v51 = vpop.eup %3282 }
0x11c1   :  { %v2306_v61 = vmul.f32 0.5, %v3283_v51 }
0x11c2   :  { %v2167_v20 = vadd.f32 0.5, %v2166_v0 }
0x11c3   :  { %2311 = vrot.lane.b32.xlu0 %v2309_v7, %s3301_s15  ;;  %v2307_v19 = vadd.f32 0.5, %v2306_v61 }
0x122d   :  { %v2177_v54 = vpop.permute.xlu1 %2176 }
0x122e   :  { %v2179_v8 = vmul.f32 %v2177_v54, %v2167_v20 }
0x1230   :  { %2181 = vrot.lane.b32.xlu1 %v2179_v8, %s3301_s15 }
0x1231   :  { %v2317_v52 = vpop.permute.xlu0 %2316  ;;  %v2172_v29 = vpop.permute.xlu1 %2171 }
0x1232   :  { %v2319_v2 = vmul.f32 %v2317_v52, %v2307_v19  ;;  %v2174_v13 = vmul.f32 %v2172_v29, %v2167_v20 }
0x1234   :  { %2195 = vperm.xlu1 %3203, %v3671_v14   ;;  %2321 = vrot.lane.b32.xlu0 %v2319_v2, %s3301_s15 }
0x1235   :  { %v2312_v49 = vpop.permute.xlu0 %2311 }
0x1236   :  { %v2314_v12 = vmul.f32 %v2312_v49, %v2307_v19 }
0x1238   :  { %2335 = vperm.xlu0 %3202, %v3665_v10  }
0x12a2   :  { %v2182_v25 = vpop.permute.xlu1 %2181 }
0x12a3   :  { %v2184_v15 = vadd.f32 %v2182_v25, %v2174_v13 }
0x12a5   :  { %3284 = vtanh.f32 %v2184_v15 }
0x12a6   :  { %v2322_v56 = vpop.permute.xlu0 %2321 }
0x12a7   :  { %v2324_v57 = vadd.f32 %v2322_v56, %v2314_v12 }
0x12a9   :  { %3286 = vtanh.f32 %v2324_v57 }
0x12af   :  { %v3285_v47 = vpop.eup %3284 }
0x12b0   :  { %2187 = vrot.lane.b32.xlu1 %v3285_v47, %s3305_s7 }
0x12b3   :  { %v3287_v33 = vpop.eup %3286  ;;  %v4013_v10 = vpop.permute.xlu1 %2195 }
0x12b4   :  { %2206 = vrot.lane.b32.xlu1 %v2085_v27, %s3306_s0  ;;  %2327 = vrot.lane.b32.xlu0 %v3287_v33, %s3305_s7  ;;  %vm2197_vm2 = vcmp.eq.s32.totalorder %v4013_v10, 1 }
0x12b5   :  { %v2198_v50 = vsel %vm2197_vm2, %v2184_v15, %v2172_v29 }
0x12b7   :  { %v4015_v14 = vpop.permute.xlu0 %2335 }
0x12b8   :  { %2346 = vrot.lane.b32.xlu0 %v2225_v40, %s3306_s0  ;;  %vm2337_vm15 = vcmp.eq.s32.totalorder %v4015_v14, 1 }
0x12b9   :  { %v2338_v24 = vsel %vm2337_vm15, %v2324_v57, %v2312_v49 }
0x1322   :  { %v2188_v60 = vpop.permute.xlu1 %2187 }
0x1323   :  { %v4017_v44 = vmul.f32 %v2188_v60, %v2167_v20 }
0x1325   :  { %v2215_v5 = vsel %vm2197_vm2, %v4017_v44, 0.0 }
0x1326   :  { %v2207_v39 = vpop.permute.xlu1 %2206  ;;  %v2328_v45 = vpop.permute.xlu0 %2327 }
0x1327   :  { %v2209_v48 = vsel %vm2197_vm2, %v4017_v44, %v2207_v39  ;;  %v4024_v27 = vmul.f32 %v2328_v45, %v2307_v19 }
0x1328   :  { %2211 = vrot.lane.b32.xlu1 %v2209_v48, %s3301_s15 }
0x1329   :  { %v2355_v37 = vsel %vm2337_vm15, %v4024_v27, 0.0 }
0x132a   :  { %v2347_v40 = vpop.permute.xlu0 %2346 }
0x132b   :  { %v2349_v11 = vsel %vm2337_vm15, %v4024_v27, %v2347_v40 }
0x132c   :  { %2200 = vrot.lane.b32.xlu1 %v2198_v50, %s3306_s0  ;;  %2351 = vrot.lane.b32.xlu0 %v2349_v11, %s3301_s15 }
0x1330   :  { %2340 = vrot.lane.b32.xlu0 %v2338_v24, %s3306_s0 }
0x139a   :  { %v2212_v35 = vpop.permute.xlu1 %2211 }
0x139b   :  { %2214 = vst.msk [vmem:[#allocation2] sm:$0xff] %vm74_vm0, %v2212_v35 }
0x139e   :  { %v2201_v7 = vpop.permute.xlu1 %2200  ;;  %v2352_v23 = vpop.permute.xlu0 %2351 }
0x139f   :  { %2203 = vst.msk [vmem:[#allocation3] sm:$0xff] %vm74_vm0, %v2201_v7  ;;  %2354 = vst.msk [vmem:[#allocation4] sm:$0xff] %vm74_vm0, %v2352_v23 }
0x13a2   :  { %v2341_v17 = vpop.permute.xlu0 %2340  ;;  %v2365_v30 = vld [vmem:[#allocation2] sm:$0xff] }
0x13a3   :  { %2343 = vst.msk [vmem:[#allocation5] sm:$0xff] %vm74_vm0, %v2341_v17  ;;  %3054 = vmatmul.mubr.msk.f32.vlgmr.msra.gmra.mrb[22].mxu0 %vm74_vm0, %v2365_v30  ;;  %v815_v17 = vsel %vm797_vm9, %v3683_v42, 0.0  ;;  %v1795_v42 = vsel %vm1777_vm8, %v3914_v32, 0.0 }
0x13a6   :  { %v2503_v0 = vld [vmem:[#allocation4] sm:$0xff]  ;;  %v2449_v29 = vld [vmem:[#allocation3] sm:$0xff] }
0x13a7   :  { %3065 = vmatmul.mubr.msk.f32.vlgmr.msra.gmra.mrb[22].mxu1 %vm74_vm0, %v2503_v0 }
0x13aa   :  { %v2587_v13 = vld [vmem:[#allocation5] sm:$0xff] }
0x1476   :  { %v2439_v51 = vpop.f32.mrb[22].mxu0 }
0x1477   :  { %v2443_v20 = vadd.f32 %v2439_v51, %v3578_v21  ;;  %v3055_v61 = vpop.f32.mrb[23].mxu0  ;;  %v675_v51 = vsel %vm657_vm6, %v3622_v26, 0.0  ;;  %v1235_v26 = vsel %vm1217_vm14, %v3758_v58, 0.0 }
0x1479   :  { %3288 = vtanh.f32 %v2443_v20  ;;  %v2444_v21 = vmul.f32 0.5, %v2443_v20 }
0x147a   :  { %v2577_v54 = vpop.f32.mrb[22].mxu1 }
0x147b   :  { %v2581_v8 = vadd.f32 %v2577_v54, %v3560_v3  ;;  %v3066_v19 = vpop.f32.mrb[23].mxu1 }
0x147d   :  { %3290 = vtanh.f32 %v2581_v8  ;;  %v2582_v49 = vmul.f32 0.5, %v2581_v8 }
0x147e   :  { %3292 = vtanh.f32 %v2444_v21 }
0x147f   :  { %3294 = vtanh.f32 %v2582_v49 }
0x1483   :  { %v3289_v52 = vpop.eup %3288 }
0x1484   :  { %2456 = vrot.lane.b32.xlu1 %v3289_v52, %s3305_s7 }
0x1487   :  { %v3291_v2 = vpop.eup %3290 }
0x1488   :  { %2451 = vrot.lane.b32.xlu1 %v2449_v29, %s3301_s15  ;;  %2594 = vrot.lane.b32.xlu0 %v3291_v2, %s3305_s7  ;;  %v3293_v25 = vpop.eup %3292 }
0x1489   :  { %v2446_v3 = vmul.f32 0.5, %v3293_v25  ;;  %v3295_v15 = vpop.eup %3294 }
0x148a   :  { %v2584_v56 = vmul.f32 0.5, %v3295_v15 }
0x148b   :  { %v4049_v12 = vadd.f32 0.5, %v2446_v3 }
0x148c   :  { %2589 = vrot.lane.b32.xlu0 %v2587_v13, %s3301_s15  ;;  %v4053_v33 = vadd.f32 0.5, %v2584_v56 }
0x14f6   :  { %v2457_v57 = vpop.permute.xlu1 %2456 }
0x14f7   :  { %v2459_v47 = vmul.f32 %v2457_v57, %v4049_v12 }
0x14f9   :  { %2461 = vrot.lane.b32.xlu1 %v2459_v47, %s3301_s15 }
0x14fa   :  { %v2595_v60 = vpop.permute.xlu0 %2594  ;;  %v2452_v45 = vpop.permute.xlu1 %2451 }
0x14fb   :  { %v2597_v39 = vmul.f32 %v2595_v60, %v4053_v33  ;;  %v2454_v48 = vmul.f32 %v2452_v45, %v4049_v12 }
0x14fd   :  { %2475 = vperm.xlu1 %3203, %v3602_v59   ;;  %2599 = vrot.lane.b32.xlu0 %v2597_v39, %s3301_s15 }
0x14fe   :  { %v2590_v40 = vpop.permute.xlu0 %2589 }
0x14ff   :  { %v2592_v24 = vmul.f32 %v2590_v40, %v4053_v33 }
0x1501   :  { %2613 = vperm.xlu0 %3202, %v3596_v55   ;;  %v536_v55 = vsel %vm518_vm5, %v3615_v22, 0.0  ;;  %v955_v22 = vsel %vm937_vm10, %v3690_v38, 0.0  ;;  %v1935_v38 = vsel %vm1917_vm11, %v3963_v53, 0.0 }
0x156b   :  { %v2462_v50 = vpop.permute.xlu1 %2461 }
0x156c   :  { %v2464_v11 = vadd.f32 %v2462_v50, %v2454_v48 }
0x156e   :  { %3296 = vtanh.f32 %v2464_v11 }
0x156f   :  { %v2600_v35 = vpop.permute.xlu0 %2599 }
0x1570   :  { %v2602_v7 = vadd.f32 %v2600_v35, %v2592_v24 }
0x1572   :  { %3298 = vtanh.f32 %v2602_v7 }
0x1578   :  { %v3297_v23 = vpop.eup %3296 }
0x1579   :  { %2467 = vrot.lane.b32.xlu1 %v3297_v23, %s3305_s7 }
0x157c   :  { %v3299_v59 = vpop.eup %3298  ;;  %v2476_v63 = vpop.permute.xlu1 %2475 }
0x157d   :  { %2486 = vrot.lane.b32.xlu1 %v2365_v30, %s3306_s0  ;;  %2605 = vrot.lane.b32.xlu0 %v3299_v59, %s3305_s7  ;;  %vm2477_vm5 = vcmp.eq.s32.totalorder %v2476_v63, 1 }
0x157e   :  { %v2478_v31 = vsel %vm2477_vm5, %v2464_v11, %v2452_v45 }
0x1580   :  { %v2614_v58 = vpop.permute.xlu0 %2613 }
0x1581   :  { %538 = vrot.lane.b32.xlu1 %v536_v55, %s3301_s15  ;;  %2624 = vrot.lane.b32.xlu0 %v2503_v0, %s3306_s0  ;;  %vm2615_vm6 = vcmp.eq.s32.totalorder %v2614_v58, 1 }
0x1582   :  { %v2616_v41 = vsel %vm2615_vm6, %v2602_v7, %v2590_v40 }
0x1585   :  { %817 = vrot.lane.b32.xlu1 %v815_v17, %s3301_s15  ;;  %677 = vrot.lane.b32.xlu0 %v675_v51, %s3301_s15 }
0x1589   :  { %1097 = vrot.lane.b32.xlu1 %v1095_v18, %s3301_s15  ;;  %957 = vrot.lane.b32.xlu0 %v955_v22, %s3301_s15 }
0x158d   :  { %1377 = vrot.lane.b32.xlu1 %v1375_v16, %s3301_s15  ;;  %1237 = vrot.lane.b32.xlu0 %v1235_v26, %s3301_s15 }
0x1591   :  { %1657 = vrot.lane.b32.xlu1 %v1655_v36, %s3301_s15  ;;  %1517 = vrot.lane.b32.xlu0 %v1515_v34, %s3301_s15 }
0x1595   :  { %1937 = vrot.lane.b32.xlu1 %v1935_v38, %s3301_s15  ;;  %1797 = vrot.lane.b32.xlu0 %v1795_v42, %s3301_s15 }
0x1599   :  { %2217 = vrot.lane.b32.xlu1 %v2215_v5, %s3301_s15  ;;  %2077 = vrot.lane.b32.xlu0 %v2075_v1, %s3301_s15 }
0x159d   :  { %2480 = vrot.lane.b32.xlu1 %v2478_v31, %s3306_s0  ;;  %2357 = vrot.lane.b32.xlu0 %v2355_v37, %s3301_s15 }
0x15a1   :  { %2618 = vrot.lane.b32.xlu0 %v2616_v41, %s3306_s0 }
0x15eb   :  { %v2468_v28 = vpop.permute.xlu1 %2467 }
0x15ec   :  { %v2470_v62 = vmul.f32 %v2468_v28, %v4049_v12 }
0x15ee   :  { %v2495_v6 = vsel %vm2477_vm5, %v2470_v62, 0.0 }
0x15ef   :  { %2497 = vrot.lane.b32.xlu1 %v2495_v6, %s3301_s15  ;;  %v2487_v9 = vpop.permute.xlu1 %2486  ;;  %v2606_v32 = vpop.permute.xlu0 %2605 }
0x15f0   :  { %v2489_v43 = vsel %vm2477_vm5, %v2470_v62, %v2487_v9  ;;  %v2608_v46 = vmul.f32 %v2606_v32, %v4053_v33 }
0x15f1   :  { %2491 = vrot.lane.b32.xlu0 %v2489_v43, %s3301_s15 }
0x15f2   :  { %v2633_v10 = vsel %vm2615_vm6, %v2608_v46, 0.0 }
0x15f3   :  { %v539_v53 = vpop.permute.xlu1 %538  ;;  %v2625_v4 = vpop.permute.xlu0 %2624 }
0x15f4   :  { %541 = vst.msk [vmem:[%s4212_s9] sm:$0xff] %vm74_vm0, %v539_v53  ;;  %v2627_v14 = vsel %vm2615_vm6, %v2608_v46, %v2625_v4 }
0x15f5   :  { %2635 = vrot.lane.b32.xlu0 %v2633_v10, %s3301_s15  ;;  %2629 = vrot.lane.b32.xlu1 %v2627_v14, %s3301_s15 }
0x15f7   :  { %v818_v44 = vpop.permute.xlu1 %817  ;;  %v678_v27 = vpop.permute.xlu0 %677 }
0x15f8   :  { %2697 = vst.msk [vmem:[%s4212_s9 + $0x8] sm:$0xff] %vm74_vm0, %v818_v44  ;;  %2695 = vst.msk [vmem:[%s4213_s10 + $0x38] sm:$0xff] %vm74_vm0, %v678_v27 }
0x15fb   :  { %v1098_v30 = vpop.permute.xlu1 %1097  ;;  %v958_v0 = vpop.permute.xlu0 %957 }
0x15fc   :  { %2701 = vst.msk [vmem:[%s4212_s9 + $0x10] sm:$0xff] %vm74_vm0, %v1098_v30  ;;  %2699 = vst.msk [vmem:[%s4213_s10 + $0x30] sm:$0xff] %vm74_vm0, %v958_v0 }
0x15ff   :  { %v1378_v20 = vpop.permute.xlu1 %1377  ;;  %v1238_v61 = vpop.permute.xlu0 %1237 }
0x1600   :  { %2705 = vst.msk [vmem:[%s4212_s9 + $0x18] sm:$0xff] %vm74_vm0, %v1378_v20  ;;  %2703 = vst.msk [vmem:[%s4213_s10 + $0x28] sm:$0xff] %vm74_vm0, %v1238_v61 }
0x1603   :  { %v1658_v54 = vpop.permute.xlu1 %1657  ;;  %v1518_v8 = vpop.permute.xlu0 %1517 }
0x1604   :  { %2709 = vst.msk [vmem:[%s4212_s9 + $0x20] sm:$0xff] %vm74_vm0, %v1658_v54  ;;  %2707 = vst.msk [vmem:[%s4213_s10 + $0x20] sm:$0xff] %vm74_vm0, %v1518_v8 }
0x1607   :  { %v1938_v19 = vpop.permute.xlu1 %1937  ;;  %v1798_v52 = vpop.permute.xlu0 %1797 }
0x1608   :  { %2713 = vst.msk [vmem:[%s4212_s9 + $0x28] sm:$0xff] %vm74_vm0, %v1938_v19  ;;  %2711 = vst.msk [vmem:[%s4213_s10 + $0x18] sm:$0xff] %vm74_vm0, %v1798_v52 }
0x160b   :  { %v2218_v2 = vpop.permute.xlu1 %2217  ;;  %v2078_v29 = vpop.permute.xlu0 %2077 }
0x160c   :  { %2717 = vst.msk [vmem:[%s4212_s9 + $0x30] sm:$0xff] %vm74_vm0, %v2218_v2  ;;  %2715 = vst.msk [vmem:[%s4213_s10 + $0x10] sm:$0xff] %vm74_vm0, %v2078_v29 }
0x160f   :  { %v2481_v13 = vpop.permute.xlu1 %2480  ;;  %v2358_v21 = vpop.permute.xlu0 %2357 }
0x1610   :  { %2483 = vst.msk [vmem:[#allocation3] sm:$0xff] %vm74_vm0, %v2481_v13  ;;  %2719 = vst.msk [vmem:[%s4213_s10 + $0x8] sm:$0xff] %vm74_vm0, %v2358_v21 }
0x1613   :  { %v2619_v49 = vpop.permute.xlu0 %2618 }
0x1614   :  { %2621 = vst.msk [vmem:[#allocation5] sm:$0xff] %vm74_vm0, %v2619_v49 }
0x1661   :  { %v2498_v25 = vpop.permute.xlu1 %2497 }
0x1662   :  { %2721 = vst.msk [vmem:[%s4212_s9 + $0x38] sm:$0xff] %vm74_vm0, %v2498_v25 }
0x1663   :  { %v2492_v3 = vpop.permute.xlu0 %2491 }
0x1664   :  { %2494 = vst.msk [vmem:[#allocation2] sm:$0xff] %vm74_vm0, %v2492_v3 }
0x1667   :  { %v2630_v15 = vpop.permute.xlu1 %2629  ;;  %v2636_v12 = vpop.permute.xlu0 %2635 }
0x1668   :  { %2632 = vst.msk [vmem:[#allocation4] sm:$0xff] %vm74_vm0, %v2630_v15  ;;  %2638 = vst.msk [vmem:[%s4213_s10] sm:$0xff] %vm74_vm0, %v2636_v12 }

// kernel: rnn_forward.2
= control target key start
LH: loop header
LB: loop body
LE: loop exit
PB: predicated region body
PF: predicated region fallthrough
CT: control target
= control target key end

     0   :  { %vm74_vm0 = vcmask 261120   ;;  %v3251_v3 = vmov 0.0   ;;  %v3252_v21 = vmov 0.0|0.0   ;;  %s3253_s25 = smov 32   ;;  %vm3254_vm1 = vmmov 0   ;;  %s4130_s3 = inlined_call_operand.vmem [shape: f32[32,128], index: 3, kind: input, shape index: {}]   ;;  %s4131_s4 = inlined_call_operand.vmem [shape: f32[32,128], index: 4, kind: input, shape index: {}]   ;;  %s4132_s1 = inlined_call_operand.vmem [shape: f32[8,8,32], index: 1, kind: input, shape index: {}, may-alias: {1,2}]   ;;  %s4133_s2 = inlined_call_operand.vmem [shape: f32[8,8,32], index: 2, kind: input, shape index: {}, may-alias: {1,2}]   ;;  %s4134_s5 = inlined_call_operand.vmem [shape: f32[32,128], index: 5, kind: input, shape index: {}]   ;;  %s4135_s6 = inlined_call_operand.vmem [shape: f32[32,128], index: 6, kind: input, shape index: {}]   ;;  %s4136_s7 = inlined_call_operand.vmem [shape: f32[1,128], index: 7, kind: input, shape index: {}]   ;;  %s4137_s8 = inlined_call_operand.vmem [shape: f32[1,128], index: 8, kind: input, shape index: {}]   ;;  %s4138_s0 = inlined_call_operand.vmem [shape: s32[8,1], index: 0, kind: input, shape index: {}]   ;;  %s4139_s9 = inlined_call_operand.vmem [shape: f32[8,8,32], index: 9, kind: output, shape index: {0}]   ;;  %s4140_s10 = inlined_call_operand.vmem [shape: f32[8,8,32], index: 10, kind: output, shape index: {1}]  }
   0x1   :  { %v87_v0 = vld [vmem:[%s4130_s3] sm:$0xff]  ;;  %v88_v1 = vld [vmem:[%s4130_s3 + $0x8] sm:$0xff]  ;;  %75 = vst.msk [vmem:[#allocation2] sm:$0xff] %vm74_vm0, %v3251_v3  ;;  %76 = vst.msk [vmem:[#allocation3] sm:$0xff] %vm74_vm0, %v3251_v3 }
   0x2   :  { %v244_v2 = vld [vmem:[%s4131_s4] sm:$0xff]  ;;  %77 = vst.msk [vmem:[#allocation4] sm:$0xff] %vm74_vm0, %v3251_v3  ;;  %78 = vst.msk [vmem:[#allocation5] sm:$0xff] %vm74_vm0, %v3251_v3  ;;  %v3034_v4 = vpack.c.bf16 %v88_v1, %v87_v0  ;;  %v245_v5 = vld [vmem:[%s4131_s4 + $0x8] sm:$0xff] }
   0x3   :  { %v89_v6 = vld [vmem:[%s4130_s3 + $0x10] sm:$0xff]  ;;  %v90_v7 = vld [vmem:[%s4130_s3 + $0x18] sm:$0xff]  ;;  %v3042_v8 = vpack.c.bf16 %v245_v5, %v244_v2  ;;  %v79_v10 = vld [vmem:[%s4132_s1] sm:$0xff] }
   0x4   :  { %v3038_v9 = vpack.c.bf16 %v90_v7, %v89_v6  ;;  %v246_v11 = vld [vmem:[%s4131_s4 + $0x10] sm:$0xff]  ;;  %v247_v12 = vld [vmem:[%s4131_s4 + $0x18] sm:$0xff]  ;;  %3035 = vmatprep.subr.bf16.mxu0 %v3034_v4  ;;  %2826 = vmatprep.mubr.msk.f32.mxu0 %vm74_vm0, %v79_v10  ;;  %v236_v14 = vld [vmem:[%s4133_s2] sm:$0xff] }
   0x5   :  { %v3046_v13 = vpack.c.bf16 %v247_v12, %v246_v11  ;;  %3037 = vmatpush3.bf16.msra.mxu0 %v3034_v4  ;;  %3043 = vmatprep.subr.bf16.mxu1 %v3042_v8  ;;  %v398_v15 = vld [vmem:[%s4134_s5] sm:$0xff]  ;;  %v399_v16 = vld [vmem:[%s4134_s5 + $0x8] sm:$0xff]  ;;  %v81_v22 = vld [vmem:[%s4132_s1 + $0x10] sm:$0xff] }
   0x6   :  { %3039 = vmatprep.subr.bf16.mxu0 %v3038_v9  ;;  %3045 = vmatpush3.bf16.msra.mxu1 %v3042_v8  ;;  %v537_v17 = vld [vmem:[%s4135_s6] sm:$0xff]  ;;  %v538_v18 = vld [vmem:[%s4135_s6 + $0x8] sm:$0xff]  ;;  %v3368_v20 = vpack.c.bf16 %v399_v16, %v398_v15  ;;  %v400_v23 = vld [vmem:[%s4134_s5 + $0x10] sm:$0xff] }
   0x7   :  { %3047 = vmatprep.subr.bf16.mxu1 %v3046_v13  ;;  %2846 = vmatprep.mubr.msk.f32.mxu1 %vm74_vm0, %v236_v14  ;;  %v80_v19 = vld [vmem:[%s4132_s1 + $0x8] sm:$0xff]  ;;  %v401_v24 = vld [vmem:[%s4134_s5 + $0x18] sm:$0xff]  ;;  %v3384_v26 = vpack.c.bf16 %v538_v18, %v537_v17  ;;  %v238_v27 = vld [vmem:[%s4133_s2 + $0x10] sm:$0xff] }
   0x8   :  { %v237_v25 = vld [vmem:[%s4133_s2 + $0x8] sm:$0xff]  ;;  %v539_v28 = vld [vmem:[%s4135_s6 + $0x10] sm:$0xff]  ;;  %v540_v29 = vld [vmem:[%s4135_s6 + $0x18] sm:$0xff]  ;;  %v3401_v31 = vpack.c.bf16 %v401_v24, %v400_v23 }
   0x9   :  { %3041 = vmatpush3.bf16.msra.mxu0 %v3038_v9  ;;  %v82_v30 = vld [vmem:[%s4132_s1 + $0x18] sm:$0xff]  ;;  %v83_v32 = vld [vmem:[%s4132_s1 + $0x20] sm:$0xff]  ;;  %v3413_v34 = vpack.c.bf16 %v540_v29, %v539_v28  ;;  %v481_v35 = vld [vmem:[#allocation3] sm:$0xff] }
   0xa   :  { %3049 = vmatpush3.bf16.msra.mxu1 %v3046_v13  ;;  %3050 = vmatprep.subr.bf16.mxu0 %v3252_v21  ;;  %v239_v33 = vld [vmem:[%s4133_s2 + $0x18] sm:$0xff]  ;;  %v240_v36 = vld [vmem:[%s4133_s2 + $0x20] sm:$0xff]  ;;  %v84_v37 = vld [vmem:[%s4132_s1 + $0x28] sm:$0xff] }
   0xb   :  { %3056 = vmatprep.subr.bf16.mxu1 %v3252_v21  ;;  %v85_v38 = vld [vmem:[%s4132_s1 + $0x30] sm:$0xff]  ;;  %483 = vrot.lane.b32.xlu1 %v481_v35, %s3253_s25  ;;  %v241_v39 = vld [vmem:[%s4133_s2 + $0x28] sm:$0xff]  ;;  %v620_v40 = vld [vmem:[#allocation5] sm:$0xff] }
   0xc   :  { %2827 = vmatmul.mubr.msk.f32.vlgmr.msra.gmra.mrb[0].mxu0 %vm74_vm0, %v80_v19  ;;  %v242_v41 = vld [vmem:[%s4133_s2 + $0x30] sm:$0xff]  ;;  %v86_v42 = vld [vmem:[%s4132_s1 + $0x38] sm:$0xff]  ;;  %v3454_v44 = vld [vmem:[#allocation2] sm:$0xff] }
   0xd   :  { %3052 = vmatpush3.bf16.msra.mxu0 %v3368_v20  ;;  %2829 = vmatprep.mubr.msk.f32.mxu0 %vm74_vm0, %v81_v22  ;;  %v243_v43 = vld [vmem:[%s4133_s2 + $0x38] sm:$0xff]  ;;  %v3459_v45 = vld [vmem:[#allocation4] sm:$0xff]  ;;  %v2666_v46 = vld [vmem:[%s4136_s7] ss:$0 sm:$0xff]  ;;  %s3256_s7 = smov 64  }
   0xe   :  { %2847 = vmatmul.mubr.msk.f32.vlgmr.msra.gmra.mrb[0].mxu1 %vm74_vm0, %v237_v25  ;;  %3053 = vmatprep.subr.bf16.mxu0 %v3252_v21  ;;  %v2675_v48 = vld [vmem:[%s4137_s8] ss:$0 sm:$0xff]  ;;  %v3255_v25 = vmov 0  }
   0xf   :  { %3058 = vmatpush3.bf16.msra.mxu1 %v3384_v26  ;;  %2849 = vmatprep.mubr.msk.f32.mxu1 %vm74_vm0, %v238_v27 }
  0x10   :  { %2830 = vmatmul.mubr.msk.f32.gmra.mrb[2].mxu0 %vm74_vm0, %v82_v30  ;;  %3059 = vmatprep.subr.bf16.mxu1 %v3252_v21 }
  0x11   :  { %2832 = vmatprep.mubr.msk.f32.mxu0 %vm74_vm0, %v83_v32  ;;  %3055 = vmatpush3.bf16.msra.mxu0 %v3401_v31 }
  0x12   :  { %2850 = vmatmul.mubr.msk.f32.gmra.mrb[2].mxu1 %vm74_vm0, %v239_v33  ;;  %3062 = vmatprep.subr.bf16.mxu0 %v3252_v21 }
  0x13   :  { %2852 = vmatprep.mubr.msk.f32.mxu1 %vm74_vm0, %v240_v36  ;;  %3061 = vmatpush3.bf16.msra.mxu1 %v3413_v34  ;;  %v3518_v36 = vld [vmem:[%s4138_s0] sm:$0xff]  ;;  %s3257_s0 = smov 96  }
  0x14   :  { %2833 = vmatmul.mubr.msk.f32.gmra.mrb[4].mxu0 %vm74_vm0, %v84_v37  ;;  %3068 = vmatprep.subr.bf16.mxu1 %v3252_v21  ;;  %vm504_vm2 = vcmp.gt.s32.totalorder %v3518_v36, 0  ;;  %vm643_vm3 = vcmp.gt.s32.totalorder %v3518_v36, 7  ;;  %vm783_vm6 = vcmp.gt.s32.totalorder %v3518_v36, 1  ;;  %vm923_vm7 = vcmp.gt.s32.totalorder %v3518_v36, 6 }
  0x15   :  { %2835 = vmatprep.mubr.msk.f32.mxu0 %vm74_vm0, %v85_v38  ;;  %622 = vrot.lane.b32.xlu1 %v620_v40, %s3253_s25  ;;  %vm1063_vm10 = vcmp.gt.s32.totalorder %v3518_v36, 2  ;;  %vm1203_vm11 = vcmp.gt.s32.totalorder %v3518_v36, 5  ;;  %vm1343_vm14 = vcmp.gt.s32.totalorder %v3518_v36, 3  ;;  %vm1483_vm15 = vcmp.gt.s32.totalorder %v3518_v36, 4 }
  0x16   :  { %2853 = vmatmul.mubr.msk.f32.gmra.mrb[4].mxu1 %vm74_vm0, %v241_v39  ;;  %3153 = vset.pattern.permute.xlu0 %v3255_v25 }
  0x17   :  { %2855 = vmatprep.mubr.msk.f32.mxu1 %vm74_vm0, %v242_v41  ;;  %3154 = vset.pattern.permute.xlu1 %v3255_v25 }
  0x18   :  { %2836 = vmatmul.mubr.msk.f32.gmra.mrb[6].mxu0 %vm74_vm0, %v86_v42 }
  0x19   :  { %2866 = vmatprep.mubr.msk.f32.mxu0 %vm3254_vm1, %v3251_v3 }
  0x1a   :  { %2856 = vmatmul.mubr.msk.f32.gmra.mrb[6].mxu1 %vm74_vm0, %v243_v43  ;;  %v3523_v43 = vsel %vm504_vm2, 1, %v3255_v25 }
  0x1b   :  { %2877 = vmatprep.mubr.msk.f32.mxu1 %vm3254_vm1, %v3251_v3 }
  0x1c   :  { %2867 = vmatmul.mubr.msk.f32.vlgmr.msra.gmra.mrb[8].mxu0 %vm74_vm0, %v3454_v44 }
  0x1d   :  { %3064 = vmatpush3.bf16.msra.mxu0 %v3368_v20  ;;  %2888 = vmatprep.mubr.msk.f32.mxu0 %vm3254_vm1, %v3251_v3 }
  0x1e   :  { %2878 = vmatmul.mubr.msk.f32.vlgmr.msra.gmra.mrb[8].mxu1 %vm74_vm0, %v3459_v45  ;;  %3065 = vmatprep.subr.bf16.mxu0 %v3252_v21 }
  0x1f   :  { %3070 = vmatpush3.bf16.msra.mxu1 %v3384_v26  ;;  %2899 = vmatprep.mubr.msk.f32.mxu1 %vm3254_vm1, %v3251_v3 }
  0x20   :  { %3071 = vmatprep.subr.bf16.mxu1 %v3252_v21 }
  0x21   :  { %3067 = vmatpush3.bf16.msra.mxu0 %v3401_v31 }
  0x22   :  { %3074 = vmatprep.subr.bf16.mxu0 %v3252_v21 }
  0x23   :  { %3073 = vmatpush3.bf16.msra.mxu1 %v3413_v34 }
  0x24   :  { %3080 = vmatprep.subr.bf16.mxu1 %v3252_v21 }
  0xdf   :  { %v2828_v47 = vpop.f32.mrb[0].mxu0 }
  0xe0   :  { %v3483_v49 = vadd.f32 %v2828_v47, %v2666_v46  ;;  %v189_v50 = vpop.f32.mrb[1].mxu0  ;;  %v3529_v47 = vsel %vm643_vm3, 1, %v3255_v25 }
  0xe1   :  { %v2848_v51 = vpop.f32.mrb[0].mxu1  ;;  %v190_v13 = vadd.f32 %v2666_v46, %v189_v50 }
  0xe2   :  { %v3485_v52 = vadd.f32 %v2848_v51, %v2675_v48  ;;  %v345_v53 = vpop.f32.mrb[1].mxu1 }
  0xe3   :  { %v2831_v54 = vpop.f32.mrb[2].mxu0  ;;  %v3487_v55 = vadd.f32 %v2675_v48, %v345_v53 }
  0xe4   :  { %v3489_v56 = vadd.f32 %v2831_v54, %v2666_v46  ;;  %v199_v57 = vpop.f32.mrb[3].mxu0 }
  0xe5   :  { %v3491_v58 = vadd.f32 %v2666_v46, %v199_v57  ;;  %v2851_v59 = vpop.f32.mrb[2].mxu1 }
  0xe6   :  { %v3493_v60 = vadd.f32 %v2851_v59, %v2675_v48  ;;  %v355_v61 = vpop.f32.mrb[3].mxu1 }
  0xe7   :  { %v2834_v62 = vpop.f32.mrb[4].mxu0  ;;  %v3495_v63 = vadd.f32 %v2675_v48, %v355_v61 }
  0xe8   :  { %v3497_v0 = vadd.f32 %v2834_v62, %v2666_v46  ;;  %v209_v1 = vpop.f32.mrb[5].mxu0 }
  0xe9   :  { %v3499_v2 = vadd.f32 %v2666_v46, %v209_v1  ;;  %v2854_v4 = vpop.f32.mrb[4].mxu1 }
  0xea   :  { %v3501_v5 = vadd.f32 %v2854_v4, %v2675_v48  ;;  %v365_v6 = vpop.f32.mrb[5].mxu1 }
  0xeb   :  { %v2837_v7 = vpop.f32.mrb[6].mxu0  ;;  %v3503_v8 = vadd.f32 %v2675_v48, %v365_v6 }
  0xec   :  { %v3505_v9 = vadd.f32 %v2837_v7, %v2666_v46  ;;  %v219_v10 = vpop.f32.mrb[7].mxu0 }
  0xed   :  { %v3507_v11 = vadd.f32 %v2666_v46, %v219_v10  ;;  %v2857_v12 = vpop.f32.mrb[6].mxu1 }
  0xee   :  { %v381_v14 = vadd.f32 %v2857_v12, %v2675_v48  ;;  %v375_v15 = vpop.f32.mrb[7].mxu1 }
  0xef   :  { %v471_v16 = vpop.f32.mrb[8].mxu0  ;;  %v3509_v17 = vadd.f32 %v2675_v48, %v375_v15  ;;  %v484_v48 = vpop.permute.xlu1 %483 }
  0xf0   :  { %v475_v18 = vadd.f32 %v471_v16, %v190_v13  ;;  %v2868_v19 = vpop.f32.mrb[9].mxu0 }
  0xf1   :  { %v610_v22 = vpop.f32.mrb[8].mxu1 }
  0xf2   :  { %3155 = vtanh.f32 %v475_v18  ;;  %v614_v23 = vadd.f32 %v610_v22, %v381_v14  ;;  %v2879_v24 = vpop.f32.mrb[9].mxu1  ;;  %v476_v29 = vmul.f32 0.5, %v475_v18 }
  0xf3   :  { %v623_v51 = vpop.permute.xlu1 %622 }
  0xf4   :  { %3157 = vtanh.f32 %v614_v23  ;;  %v615_v30 = vmul.f32 0.5, %v614_v23 }
  0xf5   :  { %3159 = vtanh.f32 %v476_v29 }
  0xf6   :  { %3161 = vtanh.f32 %v615_v30 }
  0xfc   :  { %v3156_v27 = vpop.eup %3155 }
  0xfd   :  { %488 = vrot.lane.b32.xlu0 %v3156_v27, %s3256_s7 }
  0xfe   :  { %v3158_v28 = vpop.eup %3157 }
  0xff   :  { %v3160_v32 = vpop.eup %3159 }
 0x100   :  { %v478_v33 = vmul.f32 0.5, %v3160_v32  ;;  %v3162_v35 = vpop.eup %3161 }
 0x101   :  { %627 = vrot.lane.b32.xlu0 %v3158_v28, %s3256_s7  ;;  %v617_v38 = vmul.f32 0.5, %v3162_v35 }
 0x102   :  { %v479_v37 = vadd.f32 0.5, %v478_v33 }
 0x103   :  { %v618_v41 = vadd.f32 0.5, %v617_v38 }
 0x104   :  { %v486_v50 = vmul.f32 %v484_v48, %v479_v37 }
 0x105   :  { %v625_v57 = vmul.f32 %v623_v51, %v618_v41 }
 0x16f   :  { %v489_v39 = vpop.permute.xlu0 %488 }
 0x170   :  { %v491_v40 = vmul.f32 %v489_v39, %v479_v37 }
 0x172   :  { %493 = vrot.lane.b32.xlu0 %v491_v40, %s3253_s25 }
 0x173   :  { %v628_v42 = vpop.permute.xlu0 %627 }
 0x174   :  { %v630_v46 = vmul.f32 %v628_v42, %v618_v41 }
 0x176   :  { %632 = vrot.lane.b32.xlu1 %v630_v46, %s3253_s25  ;;  %507 = vperm.xlu0 %3153, %v3523_v43  }
 0x17a   :  { %646 = vperm.xlu1 %3154, %v3529_v47  }
 0x1e4   :  { %v494_v53 = vpop.permute.xlu0 %493 }
 0x1e5   :  { %v496_v54 = vadd.f32 %v494_v53, %v486_v50 }
 0x1e7   :  { %3163 = vtanh.f32 %v496_v54 }
 0x1e8   :  { %v633_v59 = vpop.permute.xlu1 %632 }
 0x1e9   :  { %v635_v61 = vadd.f32 %v633_v59, %v625_v57 }
 0x1eb   :  { %3165 = vtanh.f32 %v635_v61 }
 0x1f1   :  { %v3164_v62 = vpop.eup %3163 }
 0x1f2   :  { %499 = vrot.lane.b32.xlu1 %v3164_v62, %s3256_s7 }
 0x1f5   :  { %v3166_v1 = vpop.eup %3165  ;;  %v3540_v6 = vpop.permute.xlu0 %507 }
 0x1f6   :  { %518 = vrot.lane.b32.xlu1 %v3454_v44, %s3257_s0  ;;  %638 = vrot.lane.b32.xlu0 %v3166_v1, %s3256_s7  ;;  %vm509_vm4 = vcmp.eq.s32.totalorder %v3540_v6, 1  ;;  %v3598_v1 = vsel %vm923_vm7, 1, %v3255_v25 }
 0x1f7   :  { %v510_v15 = vsel %vm509_vm4, %v496_v54, %v484_v48 }
 0x1f9   :  { %v3538_v4 = vpop.permute.xlu1 %646 }
 0x1fa   :  { %657 = vrot.lane.b32.xlu0 %v3459_v45, %s3257_s0  ;;  %vm648_vm5 = vcmp.eq.s32.totalorder %v3538_v4, 1 }
 0x1fb   :  { %v649_v18 = vsel %vm648_vm5, %v635_v61, %v623_v51  ;;  %v3592_v61 = vsel %vm783_vm6, 1, %v3255_v25 }
 0x264   :  { %v500_v7 = vpop.permute.xlu1 %499 }
 0x265   :  { %v3542_v10 = vmul.f32 %v500_v7, %v479_v37 }
 0x268   :  { %v519_v12 = vpop.permute.xlu1 %518  ;;  %v639_v13 = vpop.permute.xlu0 %638 }
 0x269   :  { %v521_v44 = vsel %vm509_vm4, %v3542_v10, %v519_v12  ;;  %v3549_v14 = vmul.f32 %v639_v13, %v618_v41 }
 0x26a   :  { %523 = vrot.lane.b32.xlu1 %v521_v44, %s3253_s25 }
 0x26c   :  { %v658_v45 = vpop.permute.xlu0 %657 }
 0x26d   :  { %v660_v16 = vsel %vm648_vm5, %v3549_v14, %v658_v45 }
 0x26e   :  { %512 = vrot.lane.b32.xlu1 %v510_v15, %s3257_s0  ;;  %662 = vrot.lane.b32.xlu0 %v660_v16, %s3253_s25 }
 0x272   :  { %651 = vrot.lane.b32.xlu0 %v649_v18, %s3257_s0 }
 0x2dc   :  { %v524_v19 = vpop.permute.xlu1 %523 }
 0x2dd   :  { %526 = vst.msk [vmem:[#allocation2] sm:$0xff] %vm74_vm0, %v524_v19 }
 0x2e0   :  { %v513_v22 = vpop.permute.xlu1 %512  ;;  %v663_v23 = vpop.permute.xlu0 %662 }
 0x2e1   :  { %515 = vst.msk [vmem:[#allocation3] sm:$0xff] %vm74_vm0, %v513_v22  ;;  %665 = vst.msk [vmem:[#allocation4] sm:$0xff] %vm74_vm0, %v663_v23 }
 0x2e4   :  { %v652_v24 = vpop.permute.xlu0 %651  ;;  %v3565_v27 = vld [vmem:[#allocation2] sm:$0xff] }
 0x2e5   :  { %654 = vst.msk [vmem:[#allocation5] sm:$0xff] %vm74_vm0, %v652_v24  ;;  %2889 = vmatmul.mubr.msk.f32.vlgmr.msra.gmra.mrb[10].mxu0 %vm74_vm0, %v3565_v27 }
 0x2e6   :  { %3076 = vmatpush3.bf16.msra.mxu0 %v3368_v20  ;;  %2910 = vmatprep.mubr.msk.f32.mxu0 %vm3254_vm1, %v3251_v3 }
 0x2e7   :  { %3077 = vmatprep.subr.bf16.mxu0 %v3252_v21 }
 0x2e8   :  { %v816_v28 = vld [vmem:[#allocation4] sm:$0xff]  ;;  %v760_v40 = vld [vmem:[#allocation3] sm:$0xff] }
 0x2e9   :  { %2900 = vmatmul.mubr.msk.f32.vlgmr.msra.gmra.mrb[10].mxu1 %vm74_vm0, %v816_v28 }
 0x2ea   :  { %3079 = vmatpush3.bf16.msra.mxu0 %v3401_v31  ;;  %3082 = vmatpush3.bf16.msra.mxu1 %v3384_v26 }
 0x2eb   :  { %3083 = vmatprep.subr.bf16.mxu1 %v3252_v21  ;;  %2921 = vmatprep.mubr.msk.f32.mxu1 %vm3254_vm1, %v3251_v3 }
 0x2ec   :  { %3086 = vmatprep.subr.bf16.mxu0 %v3252_v21  ;;  %v900_v41 = vld [vmem:[#allocation5] sm:$0xff] }
 0x2ee   :  { %3085 = vmatpush3.bf16.msra.mxu1 %v3413_v34 }
 0x2ef   :  { %3092 = vmatprep.subr.bf16.mxu1 %v3252_v21 }
 0x3b8   :  { %v750_v29 = vpop.f32.mrb[10].mxu0 }
 0x3b9   :  { %v754_v30 = vadd.f32 %v750_v29, %v3483_v49  ;;  %v2890_v32 = vpop.f32.mrb[11].mxu0 }
 0x3bb   :  { %3167 = vtanh.f32 %v754_v30  ;;  %v755_v49 = vmul.f32 0.5, %v754_v30 }
 0x3bc   :  { %v890_v33 = vpop.f32.mrb[10].mxu1 }
 0x3bd   :  { %v894_v35 = vadd.f32 %v890_v33, %v3509_v17  ;;  %v2901_v37 = vpop.f32.mrb[11].mxu1 }
 0x3bf   :  { %3169 = vtanh.f32 %v894_v35  ;;  %v895_v42 = vmul.f32 0.5, %v894_v35 }
 0x3c0   :  { %3171 = vtanh.f32 %v755_v49 }
 0x3c1   :  { %3173 = vtanh.f32 %v895_v42 }
 0x3c5   :  { %v3168_v38 = vpop.eup %3167 }
 0x3c6   :  { %767 = vrot.lane.b32.xlu1 %v3168_v38, %s3256_s7 }
 0x3c9   :  { %v3170_v39 = vpop.eup %3169 }
 0x3ca   :  { %762 = vrot.lane.b32.xlu1 %v760_v40, %s3253_s25  ;;  %907 = vrot.lane.b32.xlu0 %v3170_v39, %s3256_s7  ;;  %v3172_v46 = vpop.eup %3171 }
 0x3cb   :  { %v757_v17 = vmul.f32 0.5, %v3172_v46  ;;  %v3174_v48 = vpop.eup %3173 }
 0x3cc   :  { %v897_v50 = vmul.f32 0.5, %v3174_v48 }
 0x3cd   :  { %v758_v51 = vadd.f32 0.5, %v757_v17 }
 0x3ce   :  { %902 = vrot.lane.b32.xlu0 %v900_v41, %s3253_s25  ;;  %v898_v57 = vadd.f32 0.5, %v897_v50 }
 0x438   :  { %v768_v53 = vpop.permute.xlu1 %767 }
 0x439   :  { %v770_v54 = vmul.f32 %v768_v53, %v758_v51 }
 0x43b   :  { %772 = vrot.lane.b32.xlu1 %v770_v54, %s3253_s25 }
 0x43c   :  { %v908_v59 = vpop.permute.xlu0 %907  ;;  %v763_v7 = vpop.permute.xlu1 %762 }
 0x43d   :  { %v910_v62 = vmul.f32 %v908_v59, %v898_v57  ;;  %v765_v12 = vmul.f32 %v763_v7, %v758_v51 }
 0x43f   :  { %786 = vperm.xlu1 %3154, %v3592_v61   ;;  %912 = vrot.lane.b32.xlu0 %v910_v62, %s3253_s25 }
 0x440   :  { %v903_v13 = vpop.permute.xlu0 %902 }
 0x441   :  { %v905_v15 = vmul.f32 %v903_v13, %v898_v57 }
 0x443   :  { %926 = vperm.xlu0 %3153, %v3598_v1  }
 0x4ad   :  { %v773_v44 = vpop.permute.xlu1 %772 }
 0x4ae   :  { %v775_v45 = vadd.f32 %v773_v44, %v765_v12 }
 0x4b0   :  { %3175 = vtanh.f32 %v775_v45 }
 0x4b1   :  { %v913_v16 = vpop.permute.xlu0 %912 }
 0x4b2   :  { %v915_v18 = vadd.f32 %v913_v16, %v905_v15 }
 0x4b4   :  { %3177 = vtanh.f32 %v915_v18 }
 0x4ba   :  { %v3176_v19 = vpop.eup %3175 }
 0x4bb   :  { %778 = vrot.lane.b32.xlu1 %v3176_v19, %s3256_s7 }
 0x4be   :  { %v3178_v22 = vpop.eup %3177  ;;  %v3606_v23 = vpop.permute.xlu1 %786 }
 0x4bf   :  { %797 = vrot.lane.b32.xlu1 %v3565_v27, %s3257_s0  ;;  %918 = vrot.lane.b32.xlu0 %v3178_v22, %s3256_s7  ;;  %vm788_vm8 = vcmp.eq.s32.totalorder %v3606_v23, 1 }
 0x4c0   :  { %v789_v37 = vsel %vm788_vm8, %v775_v45, %v763_v7 }
 0x4c2   :  { %v3608_v24 = vpop.permute.xlu0 %926 }
 0x4c3   :  { %937 = vrot.lane.b32.xlu0 %v816_v28, %s3257_s0  ;;  %vm928_vm9 = vcmp.eq.s32.totalorder %v3608_v24, 1 }
 0x4c4   :  { %v929_v39 = vsel %vm928_vm9, %v915_v18, %v903_v13 }
 0x52d   :  { %v779_v29 = vpop.permute.xlu1 %778 }
 0x52e   :  { %v3610_v30 = vmul.f32 %v779_v29, %v758_v51 }
 0x531   :  { %v798_v32 = vpop.permute.xlu1 %797  ;;  %v919_v33 = vpop.permute.xlu0 %918 }
 0x532   :  { %v800_v35 = vsel %vm788_vm8, %v3610_v30, %v798_v32  ;;  %v3617_v27 = vmul.f32 %v919_v33, %v898_v57  ;;  %v3660_v32 = vsel %vm1063_vm10, 1, %v3255_v25 }
 0x533   :  { %802 = vrot.lane.b32.xlu1 %v800_v35, %s3253_s25  ;;  %v3666_v35 = vsel %vm1203_vm11, 1, %v3255_v25 }
 0x535   :  { %v938_v28 = vpop.permute.xlu0 %937 }
 0x536   :  { %v940_v38 = vsel %vm928_vm9, %v3617_v27, %v938_v28 }
 0x537   :  { %791 = vrot.lane.b32.xlu1 %v789_v37, %s3257_s0  ;;  %942 = vrot.lane.b32.xlu0 %v940_v38, %s3253_s25 }
 0x53b   :  { %931 = vrot.lane.b32.xlu0 %v929_v39, %s3257_s0 }
 0x5a5   :  { %v803_v40 = vpop.permute.xlu1 %802 }
 0x5a6   :  { %805 = vst.msk [vmem:[#allocation2] sm:$0xff] %vm74_vm0, %v803_v40 }
 0x5a9   :  { %v792_v41 = vpop.permute.xlu1 %791  ;;  %v943_v49 = vpop.permute.xlu0 %942 }
 0x5aa   :  { %794 = vst.msk [vmem:[#allocation3] sm:$0xff] %vm74_vm0, %v792_v41  ;;  %945 = vst.msk [vmem:[#allocation4] sm:$0xff] %vm74_vm0, %v943_v49 }
 0x5ad   :  { %v932_v42 = vpop.permute.xlu0 %931  ;;  %v3633_v46 = vld [vmem:[#allocation2] sm:$0xff] }
 0x5ae   :  { %934 = vst.msk [vmem:[#allocation5] sm:$0xff] %vm74_vm0, %v932_v42  ;;  %2911 = vmatmul.mubr.msk.f32.vlgmr.msra.gmra.mrb[12].mxu0 %vm74_vm0, %v3633_v46 }
 0x5af   :  { %3088 = vmatpush3.bf16.msra.mxu0 %v3368_v20  ;;  %2932 = vmatprep.mubr.msk.f32.mxu0 %vm3254_vm1, %v3251_v3 }
 0x5b0   :  { %3089 = vmatprep.subr.bf16.mxu0 %v3252_v21 }
 0x5b1   :  { %v1096_v17 = vld [vmem:[#allocation4] sm:$0xff]  ;;  %v1040_v7 = vld [vmem:[#allocation3] sm:$0xff] }
 0x5b2   :  { %2922 = vmatmul.mubr.msk.f32.vlgmr.msra.gmra.mrb[12].mxu1 %vm74_vm0, %v1096_v17 }
 0x5b3   :  { %3091 = vmatpush3.bf16.msra.mxu0 %v3401_v31  ;;  %3094 = vmatpush3.bf16.msra.mxu1 %v3384_v26 }
 0x5b4   :  { %3095 = vmatprep.subr.bf16.mxu1 %v3252_v21  ;;  %2943 = vmatprep.mubr.msk.f32.mxu1 %vm3254_vm1, %v3251_v3 }
 0x5b5   :  { %3098 = vmatprep.subr.bf16.mxu0 %v3252_v21  ;;  %v1180_v12 = vld [vmem:[#allocation5] sm:$0xff] }
 0x5b7   :  { %3097 = vmatpush3.bf16.msra.mxu1 %v3413_v34 }
 0x5b8   :  { %3104 = vmatprep.subr.bf16.mxu1 %v3252_v21 }
 0x681   :  { %v1030_v48 = vpop.f32.mrb[12].mxu0 }
 0x682   :  { %v1034_v50 = vadd.f32 %v1030_v48, %v3491_v58  ;;  %v2912_v51 = vpop.f32.mrb[13].mxu0 }
 0x684   :  { %3179 = vtanh.f32 %v1034_v50  ;;  %v1035_v58 = vmul.f32 0.5, %v1034_v50 }
 0x685   :  { %v1170_v53 = vpop.f32.mrb[12].mxu1 }
 0x686   :  { %v1174_v54 = vadd.f32 %v1170_v53, %v3501_v5  ;;  %v2923_v57 = vpop.f32.mrb[13].mxu1 }
 0x688   :  { %3181 = vtanh.f32 %v1174_v54  ;;  %v1175_v13 = vmul.f32 0.5, %v1174_v54 }
 0x689   :  { %3183 = vtanh.f32 %v1035_v58 }
 0x68a   :  { %3185 = vtanh.f32 %v1175_v13 }
 0x68e   :  { %v3180_v59 = vpop.eup %3179 }
 0x68f   :  { %1047 = vrot.lane.b32.xlu1 %v3180_v59, %s3256_s7 }
 0x692   :  { %v3182_v62 = vpop.eup %3181 }
 0x693   :  { %1042 = vrot.lane.b32.xlu1 %v1040_v7, %s3253_s25  ;;  %1187 = vrot.lane.b32.xlu0 %v3182_v62, %s3256_s7  ;;  %v3184_v44 = vpop.eup %3183 }
 0x694   :  { %v1037_v5 = vmul.f32 0.5, %v3184_v44  ;;  %v3186_v45 = vpop.eup %3185 }
 0x695   :  { %v1177_v15 = vmul.f32 0.5, %v3186_v45 }
 0x696   :  { %v1038_v16 = vadd.f32 0.5, %v1037_v5 }
 0x697   :  { %1182 = vrot.lane.b32.xlu0 %v1180_v12, %s3253_s25  ;;  %v1178_v22 = vadd.f32 0.5, %v1177_v15 }
 0x701   :  { %v1048_v18 = vpop.permute.xlu1 %1047 }
 0x702   :  { %v1050_v19 = vmul.f32 %v1048_v18, %v1038_v16 }
 0x704   :  { %1052 = vrot.lane.b32.xlu1 %v1050_v19, %s3253_s25 }
 0x705   :  { %v1188_v29 = vpop.permute.xlu0 %1187  ;;  %v1043_v28 = vpop.permute.xlu1 %1042 }
 0x706   :  { %v1190_v33 = vmul.f32 %v1188_v29, %v1178_v22  ;;  %v1045_v37 = vmul.f32 %v1043_v28, %v1038_v16 }
 0x708   :  { %1066 = vperm.xlu1 %3154, %v3660_v32   ;;  %1192 = vrot.lane.b32.xlu0 %v1190_v33, %s3253_s25 }
 0x709   :  { %v1183_v38 = vpop.permute.xlu0 %1182 }
 0x70a   :  { %v1185_v41 = vmul.f32 %v1183_v38, %v1178_v22 }
 0x70c   :  { %1206 = vperm.xlu0 %3153, %v3666_v35  }
 0x776   :  { %v1053_v39 = vpop.permute.xlu1 %1052 }
 0x777   :  { %v1055_v40 = vadd.f32 %v1053_v39, %v1045_v37 }
 0x779   :  { %3187 = vtanh.f32 %v1055_v40 }
 0x77a   :  { %v1193_v49 = vpop.permute.xlu0 %1192 }
 0x77b   :  { %v1195_v42 = vadd.f32 %v1193_v49, %v1185_v41 }
 0x77d   :  { %3189 = vtanh.f32 %v1195_v42 }
 0x783   :  { %v3188_v48 = vpop.eup %3187 }
 0x784   :  { %1058 = vrot.lane.b32.xlu1 %v3188_v48, %s3256_s7 }
 0x787   :  { %v3190_v50 = vpop.eup %3189  ;;  %v3674_v51 = vpop.permute.xlu1 %1066 }
 0x788   :  { %1077 = vrot.lane.b32.xlu1 %v3633_v46, %s3257_s0  ;;  %1198 = vrot.lane.b32.xlu0 %v3190_v50, %s3256_s7  ;;  %vm1068_vm12 = vcmp.eq.s32.totalorder %v3674_v51, 1 }
 0x789   :  { %v1069_v12 = vsel %vm1068_vm12, %v1055_v40, %v1043_v28 }
 0x78b   :  { %v3676_v53 = vpop.permute.xlu0 %1206 }
 0x78c   :  { %1217 = vrot.lane.b32.xlu0 %v1096_v17, %s3257_s0  ;;  %vm1208_vm13 = vcmp.eq.s32.totalorder %v3676_v53, 1 }
 0x78d   :  { %v1209_v13 = vsel %vm1208_vm13, %v1195_v42, %v1183_v38 }
 0x7f6   :  { %v1059_v54 = vpop.permute.xlu1 %1058 }
 0x7f7   :  { %v3678_v57 = vmul.f32 %v1059_v54, %v1038_v16 }
 0x7f9   :  { %v1086_v6 = vsel %vm1068_vm12, %v3678_v57, 0.0 }
 0x7fa   :  { %v1078_v59 = vpop.permute.xlu1 %1077  ;;  %v1199_v62 = vpop.permute.xlu0 %1198 }
 0x7fb   :  { %v1080_v7 = vsel %vm1068_vm12, %v3678_v57, %v1078_v59  ;;  %v3685_v46 = vmul.f32 %v1199_v62, %v1178_v22  ;;  %v3728_v59 = vsel %vm1343_vm14, 1, %v3255_v25 }
 0x7fc   :  { %1082 = vrot.lane.b32.xlu1 %v1080_v7, %s3253_s25  ;;  %v3734_v7 = vsel %vm1483_vm15, 1, %v3255_v25 }
 0x7fe   :  { %v1218_v17 = vpop.permute.xlu0 %1217 }
 0x7ff   :  { %v1220_v58 = vsel %vm1208_vm13, %v3685_v46, %v1218_v17 }
 0x800   :  { %1071 = vrot.lane.b32.xlu1 %v1069_v12, %s3257_s0  ;;  %1222 = vrot.lane.b32.xlu0 %v1220_v58, %s3253_s25 }
 0x804   :  { %1211 = vrot.lane.b32.xlu0 %v1209_v13, %s3257_s0 }
 0x86e   :  { %v1083_v44 = vpop.permute.xlu1 %1082 }
 0x86f   :  { %1085 = vst.msk [vmem:[#allocation2] sm:$0xff] %vm74_vm0, %v1083_v44 }
 0x872   :  { %v1072_v5 = vpop.permute.xlu1 %1071  ;;  %v1223_v45 = vpop.permute.xlu0 %1222 }
 0x873   :  { %1074 = vst.msk [vmem:[#allocation3] sm:$0xff] %vm74_vm0, %v1072_v5  ;;  %1225 = vst.msk [vmem:[#allocation4] sm:$0xff] %vm74_vm0, %v1223_v45 }
 0x876   :  { %v1212_v15 = vpop.permute.xlu0 %1211  ;;  %v3701_v16 = vld [vmem:[#allocation2] sm:$0xff] }
 0x877   :  { %1214 = vst.msk [vmem:[#allocation5] sm:$0xff] %vm74_vm0, %v1212_v15  ;;  %2933 = vmatmul.mubr.msk.f32.vlgmr.msra.gmra.mrb[14].mxu0 %vm74_vm0, %v3701_v16 }
 0x878   :  { %3100 = vmatpush3.bf16.msra.mxu0 %v3368_v20  ;;  %2954 = vmatprep.mubr.msk.f32.mxu0 %vm3254_vm1, %v3251_v3 }
 0x879   :  { %3101 = vmatprep.subr.bf16.mxu0 %v3252_v21 }
 0x87a   :  { %v1376_v18 = vld [vmem:[#allocation4] sm:$0xff]  ;;  %v1320_v37 = vld [vmem:[#allocation3] sm:$0xff] }
 0x87b   :  { %2944 = vmatmul.mubr.msk.f32.vlgmr.msra.gmra.mrb[14].mxu1 %vm74_vm0, %v1376_v18 }
 0x87c   :  { %3103 = vmatpush3.bf16.msra.mxu0 %v3401_v31  ;;  %3106 = vmatpush3.bf16.msra.mxu1 %v3384_v26 }
 0x87d   :  { %3107 = vmatprep.subr.bf16.mxu1 %v3252_v21  ;;  %2965 = vmatprep.mubr.msk.f32.mxu1 %vm3254_vm1, %v3251_v3 }
 0x87e   :  { %3110 = vmatprep.subr.bf16.mxu0 %v3252_v21 }
 0x880   :  { %3109 = vmatpush3.bf16.msra.mxu1 %v3413_v34  ;;  %v1460_v34 = vld [vmem:[#allocation5] sm:$0xff] }
 0x881   :  { %3116 = vmatprep.subr.bf16.mxu1 %v3252_v21 }
 0x94a   :  { %v1310_v20 = vpop.f32.mrb[14].mxu0 }
 0x94b   :  { %v1314_v19 = vadd.f32 %v1310_v20, %v3489_v56  ;;  %v2934_v22 = vpop.f32.mrb[15].mxu0 }
 0x94d   :  { %3191 = vtanh.f32 %v1314_v19  ;;  %v1315_v56 = vmul.f32 0.5, %v1314_v19 }
 0x94e   :  { %v1450_v29 = vpop.f32.mrb[14].mxu1 }
 0x94f   :  { %v1454_v31 = vadd.f32 %v1450_v29, %v3503_v8  ;;  %v2945_v26 = vpop.f32.mrb[15].mxu1 }
 0x951   :  { %3193 = vtanh.f32 %v1454_v31  ;;  %v1455_v38 = vmul.f32 0.5, %v1454_v31 }
 0x952   :  { %3195 = vtanh.f32 %v1315_v56 }
 0x953   :  { %3197 = vtanh.f32 %v1455_v38 }
 0x957   :  { %v3192_v33 = vpop.eup %3191 }
 0x958   :  { %1327 = vrot.lane.b32.xlu1 %v3192_v33, %s3256_s7 }
 0x95b   :  { %v3194_v28 = vpop.eup %3193 }
 0x95c   :  { %1322 = vrot.lane.b32.xlu1 %v1320_v37, %s3253_s25  ;;  %1467 = vrot.lane.b32.xlu0 %v3194_v28, %s3256_s7  ;;  %v3196_v39 = vpop.eup %3195 }
 0x95d   :  { %v1317_v8 = vmul.f32 0.5, %v3196_v39  ;;  %v3198_v40 = vpop.eup %3197 }
 0x95e   :  { %v1457_v49 = vmul.f32 0.5, %v3198_v40 }
 0x95f   :  { %v1318_v41 = vadd.f32 0.5, %v1317_v8 }
 0x960   :  { %1462 = vrot.lane.b32.xlu0 %v1460_v34, %s3253_s25  ;;  %v1458_v50 = vadd.f32 0.5, %v1457_v49 }
 0x9ca   :  { %v1328_v42 = vpop.permute.xlu1 %1327 }
 0x9cb   :  { %v1330_v48 = vmul.f32 %v1328_v42, %v1318_v41 }
 0x9cd   :  { %1332 = vrot.lane.b32.xlu1 %v1330_v48, %s3253_s25 }
 0x9ce   :  { %v1468_v54 = vpop.permute.xlu0 %1467  ;;  %v1323_v17 = vpop.permute.xlu1 %1322 }
 0x9cf   :  { %v1470_v62 = vmul.f32 %v1468_v54, %v1458_v50  ;;  %v1325_v12 = vmul.f32 %v1323_v17, %v1318_v41 }
 0x9d1   :  { %1346 = vperm.xlu1 %3154, %v3728_v59   ;;  %1472 = vrot.lane.b32.xlu0 %v1470_v62, %s3253_s25 }
 0x9d2   :  { %v1463_v58 = vpop.permute.xlu0 %1462 }
 0x9d3   :  { %v1465_v5 = vmul.f32 %v1463_v58, %v1458_v50 }
 0x9d5   :  { %1486 = vperm.xlu0 %3153, %v3734_v7  }
 0xa3f   :  { %v1333_v13 = vpop.permute.xlu1 %1332 }
 0xa40   :  { %v1335_v44 = vadd.f32 %v1333_v13, %v1325_v12 }
 0xa42   :  { %3199 = vtanh.f32 %v1335_v44 }
 0xa43   :  { %v1473_v45 = vpop.permute.xlu0 %1472 }
 0xa44   :  { %v1475_v15 = vadd.f32 %v1473_v45, %v1465_v5 }
 0xa46   :  { %3201 = vtanh.f32 %v1475_v15 }
 0xa4c   :  { %v3200_v36 = vpop.eup %3199 }
 0xa4d   :  { %1338 = vrot.lane.b32.xlu1 %v3200_v36, %s3256_s7 }
 0xa50   :  { %v3202_v20 = vpop.eup %3201  ;;  %v3742_v25 = vpop.permute.xlu1 %1346 }
 0xa51   :  { %1357 = vrot.lane.b32.xlu1 %v3701_v16, %s3257_s0  ;;  %1478 = vrot.lane.b32.xlu0 %v3202_v20, %s3256_s7  ;;  %vm1348_vm2 = vcmp.eq.s32.totalorder %v3742_v25, 1 }
 0xa52   :  { %v1349_v28 = vsel %vm1348_vm2, %v1335_v44, %v1323_v17 }
 0xa54   :  { %v3744_v19 = vpop.permute.xlu0 %1486 }
 0xa55   :  { %1497 = vrot.lane.b32.xlu0 %v1376_v18, %s3257_s0  ;;  %vm1488_vm3 = vcmp.eq.s32.totalorder %v3744_v19, 1 }
 0xa56   :  { %v1489_v34 = vsel %vm1488_vm3, %v1475_v15, %v1463_v58 }
 0xabf   :  { %v1339_v22 = vpop.permute.xlu1 %1338 }
 0xac0   :  { %v3746_v29 = vmul.f32 %v1339_v22, %v1318_v41 }
 0xac2   :  { %v1366_v4 = vsel %vm1348_vm2, %v3746_v29, 0.0 }
 0xac3   :  { %v1358_v31 = vpop.permute.xlu1 %1357  ;;  %v1479_v26 = vpop.permute.xlu0 %1478 }
 0xac4   :  { %v1360_v33 = vsel %vm1348_vm2, %v3746_v29, %v1358_v31  ;;  %v3753_v16 = vmul.f32 %v1479_v26, %v1458_v50 }
 0xac5   :  { %1362 = vrot.lane.b32.xlu1 %v1360_v33, %s3253_s25 }
 0xac6   :  { %v1506_v23 = vsel %vm1488_vm3, %v3753_v16, 0.0 }
 0xac7   :  { %v1498_v18 = vpop.permute.xlu0 %1497 }
 0xac8   :  { %v1500_v37 = vsel %vm1488_vm3, %v3753_v16, %v1498_v18 }
 0xac9   :  { %1351 = vrot.lane.b32.xlu1 %v1349_v28, %s3257_s0  ;;  %1502 = vrot.lane.b32.xlu0 %v1500_v37, %s3253_s25 }
 0xacd   :  { %1491 = vrot.lane.b32.xlu0 %v1489_v34, %s3257_s0 }
 0xb37   :  { %v1363_v56 = vpop.permute.xlu1 %1362 }
 0xb38   :  { %1365 = vst.msk [vmem:[#allocation2] sm:$0xff] %vm74_vm0, %v1363_v56 }
 0xb3b   :  { %v1352_v38 = vpop.permute.xlu1 %1351  ;;  %v1503_v39 = vpop.permute.xlu0 %1502 }
 0xb3c   :  { %1354 = vst.msk [vmem:[#allocation3] sm:$0xff] %vm74_vm0, %v1352_v38  ;;  %1505 = vst.msk [vmem:[#allocation4] sm:$0xff] %vm74_vm0, %v1503_v39 }
 0xb3f   :  { %v1492_v8 = vpop.permute.xlu0 %1491  ;;  %v1516_v40 = vld [vmem:[#allocation2] sm:$0xff] }
 0xb40   :  { %1494 = vst.msk [vmem:[#allocation5] sm:$0xff] %vm74_vm0, %v1492_v8  ;;  %2955 = vmatmul.mubr.msk.f32.vlgmr.msra.gmra.mrb[16].mxu0 %vm74_vm0, %v1516_v40 }
 0xb41   :  { %2976 = vmatprep.mubr.msk.f32.mxu0 %vm3254_vm1, %v3251_v3 }
 0xb43   :  { %v1656_v41 = vld [vmem:[#allocation4] sm:$0xff]  ;;  %v1600_v58 = vld [vmem:[#allocation3] sm:$0xff] }
 0xb44   :  { %2966 = vmatmul.mubr.msk.f32.vlgmr.msra.gmra.mrb[16].mxu1 %vm74_vm0, %v1656_v41 }
 0xb45   :  { %2987 = vmatprep.mubr.msk.f32.mxu1 %vm3254_vm1, %v3251_v3 }
 0xb47   :  { %v1740_v13 = vld [vmem:[#allocation5] sm:$0xff] }
 0xc13   :  { %v1590_v49 = vpop.f32.mrb[16].mxu0 }
 0xc14   :  { %v1594_v42 = vadd.f32 %v1590_v49, %v3499_v2  ;;  %v2956_v48 = vpop.f32.mrb[17].mxu0 }
 0xc16   :  { %3203 = vtanh.f32 %v1594_v42  ;;  %v1595_v2 = vmul.f32 0.5, %v1594_v42 }
 0xc17   :  { %v1730_v50 = vpop.f32.mrb[16].mxu1 }
 0xc18   :  { %v1734_v54 = vadd.f32 %v1730_v50, %v3493_v60  ;;  %v2967_v62 = vpop.f32.mrb[17].mxu1 }
 0xc1a   :  { %3205 = vtanh.f32 %v1734_v54  ;;  %v1735_v44 = vmul.f32 0.5, %v1734_v54  ;;  %v1937_v54 = vld [vmem:[%s4135_s6] sm:$0xff] }
 0xc1b   :  { %3207 = vtanh.f32 %v1595_v2  ;;  %v1939_v2 = vld [vmem:[%s4135_s6 + $0x10] sm:$0xff] }
 0xc1c   :  { %3209 = vtanh.f32 %v1735_v44  ;;  %v1940_v44 = vld [vmem:[%s4135_s6 + $0x18] sm:$0xff] }
 0xc20   :  { %v3204_v17 = vpop.eup %3203 }
 0xc21   :  { %1607 = vrot.lane.b32.xlu1 %v3204_v17, %s3256_s7  ;;  %v1938_v17 = vld [vmem:[%s4135_s6 + $0x8] sm:$0xff] }
 0xc24   :  { %v3206_v12 = vpop.eup %3205 }
 0xc25   :  { %1602 = vrot.lane.b32.xlu1 %v1600_v58, %s3253_s25  ;;  %1747 = vrot.lane.b32.xlu0 %v3206_v12, %s3256_s7  ;;  %v3208_v5 = vpop.eup %3207  ;;  %v3816_v12 = vpack.c.bf16 %v1938_v17, %v1937_v54 }
 0xc26   :  { %v1597_v60 = vmul.f32 0.5, %v3208_v5  ;;  %v3210_v45 = vpop.eup %3209  ;;  %v3830_v5 = vpack.c.bf16 %v1940_v44, %v1939_v2 }
 0xc27   :  { %v1737_v36 = vmul.f32 0.5, %v3210_v45  ;;  %3118 = vmatpush3.bf16.msra.mxu1 %v3816_v12 }
 0xc28   :  { %v1598_v15 = vadd.f32 0.5, %v1597_v60  ;;  %3119 = vmatprep.subr.bf16.mxu1 %v3252_v21 }
 0xc29   :  { %1742 = vrot.lane.b32.xlu0 %v1740_v13, %s3253_s25  ;;  %v1738_v31 = vadd.f32 0.5, %v1737_v36 }
 0xc2b   :  { %3121 = vmatpush3.bf16.msra.mxu1 %v3830_v5 }
 0xc2c   :  { %3128 = vmatprep.subr.bf16.mxu1 %v3252_v21 }
 0xc93   :  { %v1608_v20 = vpop.permute.xlu1 %1607 }
 0xc94   :  { %v1610_v22 = vmul.f32 %v1608_v20, %v1598_v15 }
 0xc96   :  { %1612 = vrot.lane.b32.xlu1 %v1610_v22, %s3253_s25 }
 0xc97   :  { %v1748_v26 = vpop.permute.xlu0 %1747  ;;  %v1603_v18 = vpop.permute.xlu1 %1602 }
 0xc98   :  { %v1750_v33 = vmul.f32 %v1748_v26, %v1738_v31  ;;  %v1605_v28 = vmul.f32 %v1603_v18, %v1598_v15 }
 0xc9a   :  { %1626 = vperm.xlu1 %3154, %v3734_v7   ;;  %1752 = vrot.lane.b32.xlu0 %v1750_v33, %s3253_s25  ;;  %v1798_v7 = vld [vmem:[%s4134_s5 + $0x8] sm:$0xff] }
 0xc9b   :  { %v1743_v37 = vpop.permute.xlu0 %1742 }
 0xc9c   :  { %v1745_v38 = vmul.f32 %v1743_v37, %v1738_v31 }
 0xc9e   :  { %1766 = vperm.xlu0 %3153, %v3728_v59   ;;  %v1797_v59 = vld [vmem:[%s4134_s5] sm:$0xff] }
 0xc9f   :  { %v3796_v48 = vpack.c.bf16 %v1798_v7, %v1797_v59 }
 0xca1   :  { %3112 = vmatpush3.bf16.msra.mxu0 %v3796_v48 }
 0xca2   :  { %3113 = vmatprep.subr.bf16.mxu0 %v3252_v21 }
 0xd08   :  { %v1613_v34 = vpop.permute.xlu1 %1612 }
 0xd09   :  { %v1615_v56 = vadd.f32 %v1613_v34, %v1605_v28 }
 0xd0b   :  { %3211 = vtanh.f32 %v1615_v56 }
 0xd0c   :  { %v1753_v39 = vpop.permute.xlu0 %1752 }
 0xd0d   :  { %v1755_v8 = vadd.f32 %v1753_v39, %v1745_v38 }
 0xd0f   :  { %3213 = vtanh.f32 %v1755_v8 }
 0xd15   :  { %v3212_v49 = vpop.eup %3211 }
 0xd16   :  { %1618 = vrot.lane.b32.xlu1 %v3212_v49, %s3256_s7 }
 0xd19   :  { %v3214_v42 = vpop.eup %3213  ;;  %v3799_v50 = vpop.permute.xlu1 %1626 }
 0xd1a   :  { %1637 = vrot.lane.b32.xlu1 %v1516_v40, %s3257_s0  ;;  %1758 = vrot.lane.b32.xlu0 %v3214_v42, %s3256_s7  ;;  %v1799_v40 = vld [vmem:[%s4134_s5 + $0x10] sm:$0xff]  ;;  %vm1628_vm6 = vcmp.eq.s32.totalorder %v3799_v50, 1 }
 0xd1b   :  { %v1629_v26 = vsel %vm1628_vm6, %v1615_v56, %v1603_v18 }
 0xd1d   :  { %v3819_v58 = vpop.permute.xlu0 %1766 }
 0xd1e   :  { %1777 = vrot.lane.b32.xlu0 %v1656_v41, %s3257_s0  ;;  %v1800_v41 = vld [vmem:[%s4134_s5 + $0x18] sm:$0xff]  ;;  %vm1768_vm7 = vcmp.eq.s32.totalorder %v3819_v58, 1 }
 0xd1f   :  { %v3811_v62 = vpack.c.bf16 %v1800_v41, %v1799_v40  ;;  %v1769_v28 = vsel %vm1768_vm7, %v1755_v8, %v1743_v37 }
 0xd21   :  { %3115 = vmatpush3.bf16.msra.mxu0 %v3811_v62 }
 0xd22   :  { %3122 = vmatprep.subr.bf16.mxu0 %v3252_v21 }
 0xd88   :  { %v1619_v13 = vpop.permute.xlu1 %1618 }
 0xd89   :  { %v3832_v60 = vmul.f32 %v1619_v13, %v1598_v15 }
 0xd8b   :  { %v1646_v24 = vsel %vm1628_vm6, %v3832_v60, 0.0 }
 0xd8c   :  { %v1638_v45 = vpop.permute.xlu1 %1637  ;;  %v1759_v36 = vpop.permute.xlu0 %1758 }
 0xd8d   :  { %v1640_v20 = vsel %vm1628_vm6, %v3832_v60, %v1638_v45  ;;  %v3841_v22 = vmul.f32 %v1759_v36, %v1738_v31 }
 0xd8e   :  { %1642 = vrot.lane.b32.xlu1 %v1640_v20, %s3253_s25 }
 0xd90   :  { %v1778_v15 = vpop.permute.xlu0 %1777 }
 0xd91   :  { %v1780_v33 = vsel %vm1768_vm7, %v3841_v22, %v1778_v15 }
 0xd92   :  { %1631 = vrot.lane.b32.xlu1 %v1629_v26, %s3257_s0  ;;  %1782 = vrot.lane.b32.xlu0 %v1780_v33, %s3253_s25 }
 0xd96   :  { %1771 = vrot.lane.b32.xlu0 %v1769_v28, %s3257_s0 }
 0xe00   :  { %v1643_v31 = vpop.permute.xlu1 %1642 }
 0xe01   :  { %1645 = vst.msk [vmem:[#allocation2] sm:$0xff] %vm74_vm0, %v1643_v31 }
 0xe04   :  { %v1632_v34 = vpop.permute.xlu1 %1631  ;;  %v1783_v38 = vpop.permute.xlu0 %1782 }
 0xe05   :  { %1634 = vst.msk [vmem:[#allocation3] sm:$0xff] %vm74_vm0, %v1632_v34  ;;  %1785 = vst.msk [vmem:[#allocation4] sm:$0xff] %vm74_vm0, %v1783_v38 }
 0xe08   :  { %v1772_v18 = vpop.permute.xlu0 %1771  ;;  %v1796_v56 = vld [vmem:[#allocation2] sm:$0xff] }
 0xe09   :  { %1774 = vst.msk [vmem:[#allocation5] sm:$0xff] %vm74_vm0, %v1772_v18  ;;  %2977 = vmatmul.mubr.msk.f32.vlgmr.msra.gmra.mrb[18].mxu0 %vm74_vm0, %v1796_v56 }
 0xe0a   :  { %3124 = vmatpush3.bf16.msra.mxu0 %v3796_v48  ;;  %2998 = vmatprep.mubr.msk.f32.mxu0 %vm3254_vm1, %v3251_v3 }
 0xe0b   :  { %3125 = vmatprep.subr.bf16.mxu0 %v3252_v21 }
 0xe0c   :  { %v1936_v37 = vld [vmem:[#allocation4] sm:$0xff]  ;;  %v1880_v54 = vld [vmem:[#allocation3] sm:$0xff] }
 0xe0d   :  { %2988 = vmatmul.mubr.msk.f32.vlgmr.msra.gmra.mrb[18].mxu1 %vm74_vm0, %v1936_v37 }
 0xe0e   :  { %3127 = vmatpush3.bf16.msra.mxu0 %v3811_v62  ;;  %3130 = vmatpush3.bf16.msra.mxu1 %v3816_v12 }
 0xe0f   :  { %3131 = vmatprep.subr.bf16.mxu1 %v3252_v21  ;;  %3009 = vmatprep.mubr.msk.f32.mxu1 %vm3254_vm1, %v3251_v3 }
 0xe10   :  { %3134 = vmatprep.subr.bf16.mxu0 %v3252_v21  ;;  %v2020_v17 = vld [vmem:[#allocation5] sm:$0xff] }
 0xe12   :  { %3133 = vmatpush3.bf16.msra.mxu1 %v3830_v5 }
 0xe13   :  { %3140 = vmatprep.subr.bf16.mxu1 %v3252_v21 }
 0xedc   :  { %v1870_v39 = vpop.f32.mrb[18].mxu0 }
 0xedd   :  { %v1874_v8 = vadd.f32 %v1870_v39, %v3497_v0  ;;  %v2978_v49 = vpop.f32.mrb[19].mxu0 }
 0xedf   :  { %3215 = vtanh.f32 %v1874_v8  ;;  %v1875_v0 = vmul.f32 0.5, %v1874_v8 }
 0xee0   :  { %v2010_v42 = vpop.f32.mrb[18].mxu1 }
 0xee1   :  { %v2014_v59 = vadd.f32 %v2010_v42, %v3495_v63  ;;  %v2989_v7 = vpop.f32.mrb[19].mxu1 }
 0xee3   :  { %3217 = vtanh.f32 %v2014_v59  ;;  %v2015_v13 = vmul.f32 0.5, %v2014_v59 }
 0xee4   :  { %3219 = vtanh.f32 %v1875_v0 }
 0xee5   :  { %3221 = vtanh.f32 %v2015_v13 }
 0xee9   :  { %v3216_v40 = vpop.eup %3215 }
 0xeea   :  { %1887 = vrot.lane.b32.xlu1 %v3216_v40, %s3256_s7 }
 0xeed   :  { %v3218_v41 = vpop.eup %3217 }
 0xeee   :  { %1882 = vrot.lane.b32.xlu1 %v1880_v54, %s3253_s25  ;;  %2027 = vrot.lane.b32.xlu0 %v3218_v41, %s3256_s7  ;;  %v3220_v2 = vpop.eup %3219 }
 0xeef   :  { %v1877_v63 = vmul.f32 0.5, %v3220_v2  ;;  %v3222_v44 = vpop.eup %3221 }
 0xef0   :  { %v2017_v36 = vmul.f32 0.5, %v3222_v44 }
 0xef1   :  { %v1878_v45 = vadd.f32 0.5, %v1877_v63 }
 0xef2   :  { %2022 = vrot.lane.b32.xlu0 %v2020_v17, %s3253_s25  ;;  %v2018_v26 = vadd.f32 0.5, %v2017_v36 }
 0xf5c   :  { %v1888_v20 = vpop.permute.xlu1 %1887 }
 0xf5d   :  { %v1890_v15 = vmul.f32 %v1888_v20, %v1878_v45 }
 0xf5f   :  { %1892 = vrot.lane.b32.xlu1 %v1890_v15, %s3253_s25 }
 0xf60   :  { %v2028_v33 = vpop.permute.xlu0 %2027  ;;  %v1883_v31 = vpop.permute.xlu1 %1882 }
 0xf61   :  { %v2030_v28 = vmul.f32 %v2028_v33, %v2018_v26  ;;  %v1885_v34 = vmul.f32 %v1883_v31, %v1878_v45 }
 0xf63   :  { %1906 = vperm.xlu1 %3154, %v3666_v35   ;;  %2032 = vrot.lane.b32.xlu0 %v2030_v28, %s3253_s25 }
 0xf64   :  { %v2023_v38 = vpop.permute.xlu0 %2022 }
 0xf65   :  { %v2025_v8 = vmul.f32 %v2023_v38, %v2018_v26 }
 0xf67   :  { %2046 = vperm.xlu0 %3153, %v3660_v32  }
 0xfd1   :  { %v1893_v18 = vpop.permute.xlu1 %1892 }
 0xfd2   :  { %v1895_v39 = vadd.f32 %v1893_v18, %v1885_v34 }
 0xfd4   :  { %3223 = vtanh.f32 %v1895_v39 }
 0xfd5   :  { %v2033_v49 = vpop.permute.xlu0 %2032 }
 0xfd6   :  { %v2035_v42 = vadd.f32 %v2033_v49, %v2025_v8 }
 0xfd8   :  { %3225 = vtanh.f32 %v2035_v42 }
 0xfde   :  { %v3224_v59 = vpop.eup %3223 }
 0xfdf   :  { %1898 = vrot.lane.b32.xlu1 %v3224_v59, %s3256_s7 }
 0xfe2   :  { %v3226_v7 = vpop.eup %3225  ;;  %v3886_v32 = vpop.permute.xlu1 %1906 }
 0xfe3   :  { %1917 = vrot.lane.b32.xlu1 %v1796_v56, %s3257_s0  ;;  %2038 = vrot.lane.b32.xlu0 %v3226_v7, %s3256_s7  ;;  %vm1908_vm10 = vcmp.eq.s32.totalorder %v3886_v32, 1 }
 0xfe4   :  { %v1909_v13 = vsel %vm1908_vm10, %v1895_v39, %v1883_v31 }
 0xfe6   :  { %v3888_v35 = vpop.permute.xlu0 %2046 }
 0xfe7   :  { %2057 = vrot.lane.b32.xlu0 %v1936_v37, %s3257_s0  ;;  %vm2048_vm11 = vcmp.eq.s32.totalorder %v3888_v35, 1 }
 0xfe8   :  { %v2049_v63 = vsel %vm2048_vm11, %v2035_v42, %v2023_v38 }
0x1051   :  { %v1899_v40 = vpop.permute.xlu1 %1898 }
0x1052   :  { %v3890_v41 = vmul.f32 %v1899_v40, %v1878_v45 }
0x1055   :  { %v1918_v54 = vpop.permute.xlu1 %1917  ;;  %v2039_v17 = vpop.permute.xlu0 %2038 }
0x1056   :  { %v1920_v0 = vsel %vm1908_vm10, %v3890_v41, %v1918_v54  ;;  %v3897_v56 = vmul.f32 %v2039_v17, %v2018_v26 }
0x1057   :  { %1922 = vrot.lane.b32.xlu1 %v1920_v0, %s3253_s25 }
0x1058   :  { %v2066_v53 = vsel %vm2048_vm11, %v3897_v56, 0.0 }
0x1059   :  { %v2058_v37 = vpop.permute.xlu0 %2057 }
0x105a   :  { %v2060_v2 = vsel %vm2048_vm11, %v3897_v56, %v2058_v37 }
0x105b   :  { %1911 = vrot.lane.b32.xlu1 %v1909_v13, %s3257_s0  ;;  %2062 = vrot.lane.b32.xlu0 %v2060_v2, %s3253_s25 }
0x105f   :  { %2051 = vrot.lane.b32.xlu0 %v2049_v63, %s3257_s0 }
0x10c9   :  { %v1923_v44 = vpop.permute.xlu1 %1922 }
0x10ca   :  { %1925 = vst.msk [vmem:[#allocation2] sm:$0xff] %vm74_vm0, %v1923_v44 }
0x10cd   :  { %v1912_v45 = vpop.permute.xlu1 %1911  ;;  %v2063_v36 = vpop.permute.xlu0 %2062 }
0x10ce   :  { %1914 = vst.msk [vmem:[#allocation3] sm:$0xff] %vm74_vm0, %v1912_v45  ;;  %2065 = vst.msk [vmem:[#allocation4] sm:$0xff] %vm74_vm0, %v2063_v36 }
0x10d1   :  { %v2052_v20 = vpop.permute.xlu0 %2051  ;;  %v2076_v15 = vld [vmem:[#allocation2] sm:$0xff] }
0x10d2   :  { %2054 = vst.msk [vmem:[#allocation5] sm:$0xff] %vm74_vm0, %v2052_v20  ;;  %2999 = vmatmul.mubr.msk.f32.vlgmr.msra.gmra.mrb[20].mxu0 %vm74_vm0, %v2076_v15 }
0x10d3   :  { %3136 = vmatpush3.bf16.msra.mxu0 %v3796_v48  ;;  %3020 = vmatprep.mubr.msk.f32.mxu0 %vm3254_vm1, %v3251_v3 }
0x10d4   :  { %3137 = vmatprep.subr.bf16.mxu0 %v3252_v21 }
0x10d5   :  { %v2216_v26 = vld [vmem:[#allocation4] sm:$0xff] }
0x10d6   :  { %3010 = vmatmul.mubr.msk.f32.vlgmr.msra.gmra.mrb[20].mxu1 %vm74_vm0, %v2216_v26 }
0x10d7   :  { %3139 = vmatpush3.bf16.msra.mxu0 %v3811_v62  ;;  %3142 = vmatpush3.bf16.msra.mxu1 %v3816_v12 }
0x10d8   :  { %3143 = vmatprep.subr.bf16.mxu1 %v3252_v21  ;;  %3031 = vmatprep.mubr.msk.f32.mxu1 %vm3254_vm1, %v3251_v3  ;;  %v2160_v21 = vld [vmem:[#allocation3] sm:$0xff] }
0x10d9   :  { %v2300_v3 = vld [vmem:[#allocation5] sm:$0xff] }
0x10db   :  { %3145 = vmatpush3.bf16.msra.mxu1 %v3830_v5 }
0x11a5   :  { %v2150_v48 = vpop.f32.mrb[20].mxu0 }
0x11a6   :  { %v2154_v33 = vadd.f32 %v2150_v48, %v3507_v11  ;;  %v3000_v28 = vpop.f32.mrb[21].mxu0 }
0x11a8   :  { %3227 = vtanh.f32 %v2154_v33  ;;  %v2155_v11 = vmul.f32 0.5, %v2154_v33 }
0x11a9   :  { %v2290_v31 = vpop.f32.mrb[20].mxu1 }
0x11aa   :  { %v2294_v34 = vadd.f32 %v2290_v31, %v3485_v52  ;;  %v3011_v38 = vpop.f32.mrb[21].mxu1 }
0x11ac   :  { %3229 = vtanh.f32 %v2294_v34  ;;  %v2295_v5 = vmul.f32 0.5, %v2294_v34 }
0x11ad   :  { %3231 = vtanh.f32 %v2155_v11 }
0x11ae   :  { %3233 = vtanh.f32 %v2295_v5 }
0x11b2   :  { %v3228_v62 = vpop.eup %3227 }
0x11b3   :  { %2167 = vrot.lane.b32.xlu1 %v3228_v62, %s3256_s7 }
0x11b6   :  { %v3230_v12 = vpop.eup %3229 }
0x11b7   :  { %2162 = vrot.lane.b32.xlu1 %v2160_v21, %s3253_s25  ;;  %2307 = vrot.lane.b32.xlu0 %v3230_v12, %s3256_s7  ;;  %v3232_v18 = vpop.eup %3231 }
0x11b8   :  { %v2157_v52 = vmul.f32 0.5, %v3232_v18  ;;  %v3234_v39 = vpop.eup %3233 }
0x11b9   :  { %v2297_v49 = vmul.f32 0.5, %v3234_v39 }
0x11ba   :  { %v2158_v8 = vadd.f32 0.5, %v2157_v52 }
0x11bb   :  { %2302 = vrot.lane.b32.xlu0 %v2300_v3, %s3253_s25  ;;  %v2298_v7 = vadd.f32 0.5, %v2297_v49 }
0x1225   :  { %v2168_v42 = vpop.permute.xlu1 %2167 }
0x1226   :  { %v2170_v59 = vmul.f32 %v2168_v42, %v2158_v8 }
0x1228   :  { %2172 = vrot.lane.b32.xlu1 %v2170_v59, %s3253_s25 }
0x1229   :  { %v2308_v40 = vpop.permute.xlu0 %2307  ;;  %v2163_v17 = vpop.permute.xlu1 %2162 }
0x122a   :  { %v2310_v54 = vmul.f32 %v2308_v40, %v2298_v7  ;;  %v2165_v0 = vmul.f32 %v2163_v17, %v2158_v8 }
0x122c   :  { %2186 = vperm.xlu1 %3154, %v3598_v1   ;;  %2312 = vrot.lane.b32.xlu0 %v2310_v54, %s3253_s25 }
0x122d   :  { %v2303_v37 = vpop.permute.xlu0 %2302 }
0x122e   :  { %v2305_v63 = vmul.f32 %v2303_v37, %v2298_v7 }
0x1230   :  { %2326 = vperm.xlu0 %3153, %v3592_v61  }
0x129a   :  { %v2173_v13 = vpop.permute.xlu1 %2172 }
0x129b   :  { %v2175_v2 = vadd.f32 %v2173_v13, %v2165_v0 }
0x129d   :  { %3235 = vtanh.f32 %v2175_v2 }
0x129e   :  { %v2313_v44 = vpop.permute.xlu0 %2312 }
0x129f   :  { %v2315_v45 = vadd.f32 %v2313_v44, %v2305_v63 }
0x12a1   :  { %3237 = vtanh.f32 %v2315_v45 }
0x12a7   :  { %v3236_v36 = vpop.eup %3235 }
0x12a8   :  { %2178 = vrot.lane.b32.xlu1 %v3236_v36, %s3256_s7 }
0x12ab   :  { %v3238_v20 = vpop.eup %3237  ;;  %v3940_v61 = vpop.permute.xlu1 %2186 }
0x12ac   :  { %2197 = vrot.lane.b32.xlu1 %v2076_v15, %s3257_s0  ;;  %2318 = vrot.lane.b32.xlu0 %v3238_v20, %s3256_s7  ;;  %vm2188_vm1 = vcmp.eq.s32.totalorder %v3940_v61, 1 }
0x12ad   :  { %v2189_v38 = vsel %vm2188_vm1, %v2175_v2, %v2163_v17 }
0x12af   :  { %v3942_v1 = vpop.permute.xlu0 %2326 }
0x12b0   :  { %2337 = vrot.lane.b32.xlu0 %v2216_v26, %s3257_s0  ;;  %vm2328_vm14 = vcmp.eq.s32.totalorder %v3942_v1, 1 }
0x12b1   :  { %v2329_v12 = vsel %vm2328_vm14, %v2315_v45, %v2303_v37 }
0x131a   :  { %v2179_v48 = vpop.permute.xlu1 %2178 }
0x131b   :  { %v3944_v33 = vmul.f32 %v2179_v48, %v2158_v8 }
0x131d   :  { %v2206_v57 = vsel %vm2188_vm1, %v3944_v33, 0.0 }
0x131e   :  { %v2198_v28 = vpop.permute.xlu1 %2197  ;;  %v2319_v31 = vpop.permute.xlu0 %2318 }
0x131f   :  { %v2200_v34 = vsel %vm2188_vm1, %v3944_v33, %v2198_v28  ;;  %v3951_v15 = vmul.f32 %v2319_v31, %v2298_v7 }
0x1320   :  { %2202 = vrot.lane.b32.xlu1 %v2200_v34, %s3253_s25 }
0x1321   :  { %v2346_v25 = vsel %vm2328_vm14, %v3951_v15, 0.0 }
0x1322   :  { %v2338_v26 = vpop.permute.xlu0 %2337 }
0x1323   :  { %v2340_v62 = vsel %vm2328_vm14, %v3951_v15, %v2338_v26 }
0x1324   :  { %2191 = vrot.lane.b32.xlu1 %v2189_v38, %s3257_s0  ;;  %2342 = vrot.lane.b32.xlu0 %v2340_v62, %s3253_s25 }
0x1328   :  { %2331 = vrot.lane.b32.xlu0 %v2329_v12, %s3257_s0 }
0x1392   :  { %v2203_v21 = vpop.permute.xlu1 %2202 }
0x1393   :  { %2205 = vst.msk [vmem:[#allocation2] sm:$0xff] %vm74_vm0, %v2203_v21 }
0x1396   :  { %v2192_v3 = vpop.permute.xlu1 %2191  ;;  %v2343_v11 = vpop.permute.xlu0 %2342 }
0x1397   :  { %2194 = vst.msk [vmem:[#allocation3] sm:$0xff] %vm74_vm0, %v2192_v3  ;;  %2345 = vst.msk [vmem:[#allocation4] sm:$0xff] %vm74_vm0, %v2343_v11 }
0x139a   :  { %v2332_v5 = vpop.permute.xlu0 %2331  ;;  %v2356_v18 = vld [vmem:[#allocation2] sm:$0xff] }
0x139b   :  { %2334 = vst.msk [vmem:[#allocation5] sm:$0xff] %vm74_vm0, %v2332_v5  ;;  %3021 = vmatmul.mubr.msk.f32.vlgmr.msra.gmra.mrb[22].mxu0 %vm74_vm0, %v2356_v18  ;;  %v806_v5 = vsel %vm788_vm8, %v3610_v30, 0.0  ;;  %v1786_v30 = vsel %vm1768_vm7, %v3841_v22, 0.0 }
0x139e   :  { %v2494_v52 = vld [vmem:[#allocation4] sm:$0xff]  ;;  %v2440_v17 = vld [vmem:[#allocation3] sm:$0xff] }
0x139f   :  { %3032 = vmatmul.mubr.msk.f32.vlgmr.msra.gmra.mrb[22].mxu1 %vm74_vm0, %v2494_v52 }
0x13a2   :  { %v2578_v0 = vld [vmem:[#allocation5] sm:$0xff] }
0x146e   :  { %v2430_v39 = vpop.f32.mrb[22].mxu0 }
0x146f   :  { %v2434_v8 = vadd.f32 %v2430_v39, %v3505_v9  ;;  %v3022_v49 = vpop.f32.mrb[23].mxu0  ;;  %v666_v39 = vsel %vm648_vm5, %v3549_v14, 0.0  ;;  %v1226_v14 = vsel %vm1208_vm13, %v3685_v46, 0.0 }
0x1471   :  { %3239 = vtanh.f32 %v2434_v8  ;;  %v2435_v9 = vmul.f32 0.5, %v2434_v8 }
0x1472   :  { %v2568_v42 = vpop.f32.mrb[22].mxu1 }
0x1473   :  { %v2572_v59 = vadd.f32 %v2568_v42, %v3487_v55  ;;  %v3033_v7 = vpop.f32.mrb[23].mxu1 }
0x1475   :  { %3241 = vtanh.f32 %v2572_v59  ;;  %v2573_v37 = vmul.f32 0.5, %v2572_v59 }
0x1476   :  { %3243 = vtanh.f32 %v2435_v9 }
0x1477   :  { %3245 = vtanh.f32 %v2573_v37 }
0x147b   :  { %v3240_v40 = vpop.eup %3239 }
0x147c   :  { %2447 = vrot.lane.b32.xlu1 %v3240_v40, %s3256_s7 }
0x147f   :  { %v3242_v54 = vpop.eup %3241 }
0x1480   :  { %2442 = vrot.lane.b32.xlu1 %v2440_v17, %s3253_s25  ;;  %2585 = vrot.lane.b32.xlu0 %v3242_v54, %s3256_s7  ;;  %v3244_v13 = vpop.eup %3243 }
0x1481   :  { %v2437_v55 = vmul.f32 0.5, %v3244_v13  ;;  %v3246_v2 = vpop.eup %3245 }
0x1482   :  { %v2575_v44 = vmul.f32 0.5, %v3246_v2 }
0x1483   :  { %v3976_v63 = vadd.f32 0.5, %v2437_v55 }
0x1484   :  { %2580 = vrot.lane.b32.xlu0 %v2578_v0, %s3253_s25  ;;  %v3980_v20 = vadd.f32 0.5, %v2575_v44 }
0x14ee   :  { %v2448_v45 = vpop.permute.xlu1 %2447 }
0x14ef   :  { %v2450_v36 = vmul.f32 %v2448_v45, %v3976_v63 }
0x14f1   :  { %2452 = vrot.lane.b32.xlu1 %v2450_v36, %s3253_s25 }
0x14f2   :  { %v2586_v48 = vpop.permute.xlu0 %2585  ;;  %v2443_v31 = vpop.permute.xlu1 %2442 }
0x14f3   :  { %v2588_v28 = vmul.f32 %v2586_v48, %v3980_v20  ;;  %v2445_v34 = vmul.f32 %v2443_v31, %v3976_v63 }
0x14f5   :  { %2466 = vperm.xlu1 %3154, %v3529_v47   ;;  %2590 = vrot.lane.b32.xlu0 %v2588_v28, %s3253_s25 }
0x14f6   :  { %v2581_v26 = vpop.permute.xlu0 %2580 }
0x14f7   :  { %v2583_v12 = vmul.f32 %v2581_v26, %v3980_v20 }
0x14f9   :  { %2604 = vperm.xlu0 %3153, %v3523_v43   ;;  %v527_v43 = vsel %vm509_vm4, %v3542_v10, 0.0  ;;  %v946_v10 = vsel %vm928_vm9, %v3617_v27, 0.0  ;;  %v1926_v27 = vsel %vm1908_vm10, %v3890_v41, 0.0 }
0x1563   :  { %v2453_v38 = vpop.permute.xlu1 %2452 }
0x1564   :  { %v2455_v62 = vadd.f32 %v2453_v38, %v2445_v34 }
0x1566   :  { %3247 = vtanh.f32 %v2455_v62 }
0x1567   :  { %v2591_v21 = vpop.permute.xlu0 %2590 }
0x1568   :  { %v2593_v3 = vadd.f32 %v2591_v21, %v2583_v12 }
0x156a   :  { %3249 = vtanh.f32 %v2593_v3 }
0x1570   :  { %v3248_v11 = vpop.eup %3247 }
0x1571   :  { %2458 = vrot.lane.b32.xlu1 %v3248_v11, %s3256_s7 }
0x1574   :  { %v3250_v47 = vpop.eup %3249  ;;  %v2467_v51 = vpop.permute.xlu1 %2466 }
0x1575   :  { %2477 = vrot.lane.b32.xlu1 %v2356_v18, %s3257_s0  ;;  %2596 = vrot.lane.b32.xlu0 %v3250_v47, %s3256_s7  ;;  %vm2468_vm4 = vcmp.eq.s32.totalorder %v2467_v51, 1 }
0x1576   :  { %v2469_v19 = vsel %vm2468_vm4, %v2455_v62, %v2443_v31 }
0x1578   :  { %v2605_v46 = vpop.permute.xlu0 %2604 }
0x1579   :  { %529 = vrot.lane.b32.xlu1 %v527_v43, %s3253_s25  ;;  %2615 = vrot.lane.b32.xlu0 %v2494_v52, %s3257_s0  ;;  %vm2606_vm5 = vcmp.eq.s32.totalorder %v2605_v46, 1 }
0x157a   :  { %v2607_v29 = vsel %vm2606_vm5, %v2593_v3, %v2581_v26 }
0x157d   :  { %808 = vrot.lane.b32.xlu1 %v806_v5, %s3253_s25  ;;  %668 = vrot.lane.b32.xlu0 %v666_v39, %s3253_s25 }
0x1581   :  { %1088 = vrot.lane.b32.xlu1 %v1086_v6, %s3253_s25  ;;  %948 = vrot.lane.b32.xlu0 %v946_v10, %s3253_s25 }
0x1585   :  { %1368 = vrot.lane.b32.xlu1 %v1366_v4, %s3253_s25  ;;  %1228 = vrot.lane.b32.xlu0 %v1226_v14, %s3253_s25 }
0x1589   :  { %1648 = vrot.lane.b32.xlu1 %v1646_v24, %s3253_s25  ;;  %1508 = vrot.lane.b32.xlu0 %v1506_v23, %s3253_s25 }
0x158d   :  { %1928 = vrot.lane.b32.xlu1 %v1926_v27, %s3253_s25  ;;  %1788 = vrot.lane.b32.xlu0 %v1786_v30, %s3253_s25 }
0x1591   :  { %2208 = vrot.lane.b32.xlu1 %v2206_v57, %s3253_s25  ;;  %2068 = vrot.lane.b32.xlu0 %v2066_v53, %s3253_s25 }
0x1595   :  { %2471 = vrot.lane.b32.xlu1 %v2469_v19, %s3257_s0  ;;  %2348 = vrot.lane.b32.xlu0 %v2346_v25, %s3253_s25 }
0x1599   :  { %2609 = vrot.lane.b32.xlu0 %v2607_v29, %s3257_s0 }
0x15e3   :  { %v2459_v16 = vpop.permute.xlu1 %2458 }
0x15e4   :  { %v2461_v50 = vmul.f32 %v2459_v16, %v3976_v63 }
0x15e6   :  { %v2486_v58 = vsel %vm2468_vm4, %v2461_v50, 0.0 }
0x15e7   :  { %2488 = vrot.lane.b32.xlu1 %v2486_v58, %s3253_s25  ;;  %v2478_v60 = vpop.permute.xlu1 %2477  ;;  %v2597_v22 = vpop.permute.xlu0 %2596 }
0x15e8   :  { %v2480_v32 = vsel %vm2468_vm4, %v2461_v50, %v2478_v60  ;;  %v2599_v35 = vmul.f32 %v2597_v22, %v3980_v20 }
0x15e9   :  { %2482 = vrot.lane.b32.xlu0 %v2480_v32, %s3253_s25 }
0x15ea   :  { %v2624_v61 = vsel %vm2606_vm5, %v2599_v35, 0.0 }
0x15eb   :  { %v530_v41 = vpop.permute.xlu1 %529  ;;  %v2616_v56 = vpop.permute.xlu0 %2615 }
0x15ec   :  { %532 = vst.msk [vmem:[%s4139_s9] sm:$0xff] %vm74_vm0, %v530_v41  ;;  %v2618_v1 = vsel %vm2606_vm5, %v2599_v35, %v2616_v56 }
0x15ed   :  { %2626 = vrot.lane.b32.xlu0 %v2624_v61, %s3253_s25  ;;  %2620 = vrot.lane.b32.xlu1 %v2618_v1, %s3253_s25 }
0x15ef   :  { %v809_v33 = vpop.permute.xlu1 %808  ;;  %v669_v15 = vpop.permute.xlu0 %668 }
0x15f0   :  { %2688 = vst.msk [vmem:[%s4139_s9 + $0x8] sm:$0xff] %vm74_vm0, %v809_v33  ;;  %2686 = vst.msk [vmem:[%s4140_s10 + $0x38] sm:$0xff] %vm74_vm0, %v669_v15 }
0x15f3   :  { %v1089_v18 = vpop.permute.xlu1 %1088  ;;  %v949_v52 = vpop.permute.xlu0 %948 }
0x15f4   :  { %2692 = vst.msk [vmem:[%s4139_s9 + $0x10] sm:$0xff] %vm74_vm0, %v1089_v18  ;;  %2690 = vst.msk [vmem:[%s4140_s10 + $0x30] sm:$0xff] %vm74_vm0, %v949_v52 }
0x15f7   :  { %v1369_v8 = vpop.permute.xlu1 %1368  ;;  %v1229_v49 = vpop.permute.xlu0 %1228 }
0x15f8   :  { %2696 = vst.msk [vmem:[%s4139_s9 + $0x18] sm:$0xff] %vm74_vm0, %v1369_v8  ;;  %2694 = vst.msk [vmem:[%s4140_s10 + $0x28] sm:$0xff] %vm74_vm0, %v1229_v49 }
0x15fb   :  { %v1649_v42 = vpop.permute.xlu1 %1648  ;;  %v1509_v59 = vpop.permute.xlu0 %1508 }
0x15fc   :  { %2700 = vst.msk [vmem:[%s4139_s9 + $0x20] sm:$0xff] %vm74_vm0, %v1649_v42  ;;  %2698 = vst.msk [vmem:[%s4140_s10 + $0x20] sm:$0xff] %vm74_vm0, %v1509_v59 }
0x15ff   :  { %v1929_v7 = vpop.permute.xlu1 %1928  ;;  %v1789_v40 = vpop.permute.xlu0 %1788 }
0x1600   :  { %2704 = vst.msk [vmem:[%s4139_s9 + $0x28] sm:$0xff] %vm74_vm0, %v1929_v7  ;;  %2702 = vst.msk [vmem:[%s4140_s10 + $0x18] sm:$0xff] %vm74_vm0, %v1789_v40 }
0x1603   :  { %v2209_v54 = vpop.permute.xlu1 %2208  ;;  %v2069_v17 = vpop.permute.xlu0 %2068 }
0x1604   :  { %2708 = vst.msk [vmem:[%s4139_s9 + $0x30] sm:$0xff] %vm74_vm0, %v2209_v54  ;;  %2706 = vst.msk [vmem:[%s4140_s10 + $0x10] sm:$0xff] %vm74_vm0, %v2069_v17 }
0x1607   :  { %v2472_v0 = vpop.permute.xlu1 %2471  ;;  %v2349_v9 = vpop.permute.xlu0 %2348 }
0x1608   :  { %2474 = vst.msk [vmem:[#allocation3] sm:$0xff] %vm74_vm0, %v2472_v0  ;;  %2710 = vst.msk [vmem:[%s4140_s10 + $0x8] sm:$0xff] %vm74_vm0, %v2349_v9 }
0x160b   :  { %v2610_v37 = vpop.permute.xlu0 %2609 }
0x160c   :  { %2612 = vst.msk [vmem:[#allocation5] sm:$0xff] %vm74_vm0, %v2610_v37 }
0x1659   :  { %v2489_v13 = vpop.permute.xlu1 %2488 }
0x165a   :  { %2712 = vst.msk [vmem:[%s4139_s9 + $0x38] sm:$0xff] %vm74_vm0, %v2489_v13 }
0x165b   :  { %v2483_v55 = vpop.permute.xlu0 %2482 }
0x165c   :  { %2485 = vst.msk [vmem:[#allocation2] sm:$0xff] %vm74_vm0, %v2483_v55 }
0x165f   :  { %v2621_v2 = vpop.permute.xlu1 %2620  ;;  %v2627_v63 = vpop.permute.xlu0 %2626 }
0x1660   :  { %2623 = vst.msk [vmem:[#allocation4] sm:$0xff] %vm74_vm0, %v2621_v2  ;;  %2629 = vst.msk [vmem:[%s4140_s10] sm:$0xff] %vm74_vm0, %v2627_v63 }

</bundles_post_ra>
